<compile_context>
chip_gen: v5e
topology: v5e:2x2
jax: 0.10.0
libtpu: 0.0.40
codegen_flags: <defaults>
</compile_context>

<pallas_src>
import functools

import jax
import jax.numpy as jnp
from jax.experimental import pallas as pl
from jax.experimental.pallas import tpu as pltpu


# ----------------------------------------------------------------------------
# Fused bidirectional LSTM recurrence kernel.
# Grid: time chunks (forward chunks ascending, backward chunks descending via index_map).
# Inputs are PRE-PROJECTED gates (x @ W_ih + b), bf16, shape (T_p, B_p, 4*H_p), gate order
# [i, f, g, o] with each gate's H columns placed at 128-lane-aligned offsets.
# ----------------------------------------------------------------------------
def _bilstm_chunk_kernel(gf_ref, gb_ref, whh_f_ref, whh_b_ref,
                         of_ref, ob_ref,
                         hf_scr, cf_scr, hb_scr, cb_scr,
                         *, t_blk, n_chunks, seq_len, final_only, unroll):
    c = pl.program_id(0)

    @pl.when(c == 0)
    def _():
        hf_scr[...] = jnp.zeros_like(hf_scr)
        cf_scr[...] = jnp.zeros_like(cf_scr)
        hb_scr[...] = jnp.zeros_like(hb_scr)
        cb_scr[...] = jnp.zeros_like(cb_scr)

    H = whh_f_ref.shape[0]

    # Hoisted weight loads: one VMEM read per grid step per direction (not per cell()).
    # NOTE: keeping W_hh resident in the MXU weight registers across the chunk
    # (matmul_push_rhs / matmul_acc_lhs / matmul_pop) would shave the per-step weight
    # reload off the serial path, but needs multi-tile RHS staging for 4*H_p > 256;
    # deliberately not done here.
    whh_f = whh_f_ref[...]
    whh_b = whh_b_ref[...]

    def cell(gates_in, h_prev, c_prev, whh):
        # Only the recurrent h_prev @ W_hh matmul is on the serial path
        # (bf16 operands, f32 accumulation); gate math stays f32 (v5e-safe).
        gates = gates_in.astype(jnp.float32) + jnp.dot(
            h_prev.astype(whh.dtype), whh, preferred_element_type=jnp.float32)
        i = jax.nn.sigmoid(gates[:, 0 * H:1 * H])
        f = jax.nn.sigmoid(gates[:, 1 * H:2 * H])
        g = jnp.tanh(gates[:, 2 * H:3 * H])
        o = jax.nn.sigmoid(gates[:, 3 * H:4 * H])
        c_new = f * c_prev + i * g
        h_new = o * jnp.tanh(c_new)
        return h_new, c_new

    # Static landmarks (real, unpadded sequence) for the final-layer endpoint outputs.
    c_last = (seq_len - 1) // t_blk
    s_last = (seq_len - 1) % t_blk

    def maybe_store(ref, row, val, chunk_cond, step_cond):
        # step_cond is a Python bool in the unrolled path (skip dead writes at trace
        # time); a traced bool in the fori_loop path.
        if isinstance(step_cond, bool):
            if step_cond:
                @pl.when(chunk_cond)
                def _():
                    ref[row] = val.astype(ref.dtype)
        else:
            @pl.when(jnp.logical_and(chunk_cond, step_cond))
            def _():
                ref[row] = val.astype(ref.dtype)

    def step(s, carry):
        hf, cf, hb, cb = carry
        # Forward walks local time 0..t_blk-1; backward walks t_blk-1..0 of its chunk
        # (the backward chunk order is already reversed by the index_map).
        hf, cf = cell(gf_ref[s], hf, cf, whh_f)
        sb = t_blk - 1 - s
        hb, cb = cell(gb_ref[sb], hb, cb, whh_b)
        if final_only:
            # Only the two timesteps the decoder reads: t == 0 and t == seq_len-1.
            maybe_store(of_ref, 0, hf, c == 0, s == 0)
            maybe_store(of_ref, 1, hf, c == c_last, s == s_last)
            maybe_store(ob_ref, 0, hb, c == n_chunks - 1, sb == 0)
            maybe_store(ob_ref, 1, hb, c == n_chunks - 1 - c_last, sb == s_last)
        else:
            of_ref[s] = hf.astype(of_ref.dtype)
            ob_ref[sb] = hb.astype(ob_ref.dtype)
        return hf, cf, hb, cb

    carry = (hf_scr[...], cf_scr[...], hb_scr[...], cb_scr[...])
    if unroll:
        # Fully static unroll: all time indices are Python ints (aligned slices,
        # maximum LLO scheduling freedom).
        for s in range(t_blk):
            carry = step(s, carry)
    else:
        # Large-batch / large-hidden guard: partial unroll to cap vreg pressure.
        carry = jax.lax.fori_loop(0, t_blk, step, carry, unroll=4)

    hf, cf, hb, cb = carry
    hf_scr[...] = hf
    cf_scr[...] = cf
    hb_scr[...] = hb
    cb_scr[...] = cb


def _choose_time_block(T, B_p, H_p, buf_budget_bytes=24 << 20, cap=128):
    """Largest time chunk whose pipelined (double-buffered) bf16 gate + output blocks
    for both directions stay within buf_budget_bytes.  T is padded up to a multiple."""
    per_step = 2 * 2 * B_p * (4 * H_p + H_p) * 2   # 2 dirs x 2 buffers x bf16 bytes
    t_blk = int(max(1, min(cap, buf_budget_bytes // per_step, T)))
    n_chunks = -(-T // t_blk)                       # cdiv: no divisibility requirement
    return t_blk, n_chunks


def _vmem_limit_bytes(t_blk, B_p, H_p, final_only):
    """Conservative over-estimate of in-kernel VMEM; >= default 32 MiB, <= v7x's 64 MiB."""
    gate_buf = 2 * 2 * t_blk * B_p * 4 * H_p * 2            # bf16 gates, double-buffered
    out_rows = 2 if final_only else t_blk
    out_buf = 2 * 2 * out_rows * B_p * H_p * 2               # bf16 outputs
    w_buf = 2 * 2 * H_p * 4 * H_p * 2                        # bf16 W_hh (double-buffered)
    scr = 4 * B_p * H_p * 4                                  # f32 h/c scratch
    est = gate_buf + out_buf + w_buf + scr + (4 << 20)
    return int(min(64 << 20, max(32 << 20, 2 * est)))


def bilstm_layer(gates_fwd, gates_bwd, w_hh_fwd, w_hh_bwd, *, final_only=False):
    """One bidirectional LSTM layer over pre-projected gates.

    gates_fwd/gates_bwd: (T, B, 4*H_p) float32  (x @ W_ih + b_ih + b_hh, per direction)
    w_hh_fwd/w_hh_bwd:   (H_p, 4*H_p)  bfloat16
    returns:
      final_only=False: h_fwd, h_bwd each (T, B, H_p) bfloat16
      final_only=True : h_fwd, h_bwd each (2, B, H_p) bfloat16  (rows: t=0, t=T-1)
    """
    T, B, H4 = gates_fwd.shape
    H = w_hh_fwd.shape[0]
    assert H4 == 4 * H and H % 128 == 0

    B_p = ((B + 7) // 8) * 8
    t_blk, n_chunks = _choose_time_block(T, B_p, H)
    T_p = t_blk * n_chunks

    # Pad AFTER the bias add so padded timesteps / batch rows carry exactly zero gates
    # (provably inert: h/c stay 0 through them). Cast to bf16 to halve HBM/VMEM traffic.
    gf = jnp.pad(gates_fwd.astype(jnp.bfloat16),
                 ((0, T_p - T), (0, B_p - B), (0, 0)))
    gb = jnp.pad(gates_bwd.astype(jnp.bfloat16),
                 ((0, T_p - T), (0, B_p - B), (0, 0)))

    # Vreg-pressure guard: fully unroll only while the live state tiles stay small.
    unroll = (B_p // 8) * (H // 128) <= 16

    gate_spec_f = pl.BlockSpec((t_blk, B_p, 4 * H), lambda c: (c, 0, 0))
    gate_spec_b = pl.BlockSpec((t_blk, B_p, 4 * H), lambda c: (n_chunks - 1 - c, 0, 0))
    whh_spec = pl.BlockSpec((H, 4 * H), lambda c: (0, 0))

    if final_only:
        out_shape = jax.ShapeDtypeStruct((2, B_p, H), jnp.bfloat16)
        out_spec_f = pl.BlockSpec((2, B_p, H), lambda c: (0, 0, 0))   # grid-resident
        out_spec_b = pl.BlockSpec((2, B_p, H), lambda c: (0, 0, 0))
    else:
        out_shape = jax.ShapeDtypeStruct((T_p, B_p, H), jnp.bfloat16)
        out_spec_f = pl.BlockSpec((t_blk, B_p, H), lambda c: (c, 0, 0))
        out_spec_b = pl.BlockSpec((t_blk, B_p, H), lambda c: (n_chunks - 1 - c, 0, 0))

    kernel = functools.partial(
        _bilstm_chunk_kernel, t_blk=t_blk, n_chunks=n_chunks, seq_len=T,
        final_only=final_only, unroll=unroll)

    hf, hb = pl.pallas_call(
        kernel,
        out_shape=(out_shape, out_shape),
        grid=(n_chunks,),
        in_specs=[gate_spec_f, gate_spec_b, whh_spec, whh_spec],
        out_specs=(out_spec_f, out_spec_b),
        scratch_shapes=[pltpu.VMEM((B_p, H), jnp.float32) for _ in range(4)],
        compiler_params=pltpu.CompilerParams(
            dimension_semantics=("arbitrary",),  # recurrence across the time grid
            vmem_limit_bytes=_vmem_limit_bytes(t_blk, B_p, H, final_only),
        ),
        # NOTE(v7x): the two direction chains are independent; a leading core-parallel
        # grid axis over the two TensorCores would ~halve the serial wall time there.
    )(gf, gb, w_hh_fwd, w_hh_bwd)

    if final_only:
        return hf[:, :B, :], hb[:, :B, :]
    return hf[:T, :B, :], hb[:T, :B, :]


# ----------------------------------------------------------------------------
# Full BiRNN forward
# ----------------------------------------------------------------------------
@functools.partial(jax.jit, static_argnames=("num_hiddens",))
def birnn_forward(token_ids, params, num_hiddens):
    """token_ids: (batch, seq_len) int32  ->  logits (batch, num_classes)."""
    H = num_hiddens
    ids = token_ids.T                                  # permute(1, 0): (T, B)
    # Embedding gather stays in plain XLA.
    x = jnp.take(params["embedding"], ids, axis=0)     # (T, B, E) f32
    T, _B, _ = x.shape

    n_layers = len(params["lstm"])
    hf = hb = None
    for li, ((wih_f, whh_f, b_f), (wih_b, whh_b, b_b)) in enumerate(params["lstm"]):
        final = (li == n_layers - 1)
        # Hoisted input projection: one large (T*B, D) @ (D, 4H_p) matmul per direction,
        # bf16 operands with f32 accumulation (left to XLA / MXU).
        # TODO(synk): on v5e this projection could be fused into the recurrence kernel
        # per chunk to avoid streaming the full gate tensor through HBM.
        xb = x.astype(jnp.bfloat16)
        gf = jnp.einsum("tbd,dh->tbh", xb, wih_f,
                        preferred_element_type=jnp.float32) + b_f
        gb = jnp.einsum("tbd,dh->tbh", xb, wih_b,
                        preferred_element_type=jnp.float32) + b_b
        hf, hb = bilstm_layer(gf, gb, whh_f, whh_b, final_only=final)
        if not final:
            x = jnp.concatenate([hf, hb], axis=-1)     # (T, B, 2*H_p) bf16

    # Final layer returned only the endpoints: row 0 = t=0, row 1 = t=T-1.
    # encoding = cat(outputs[0], outputs[-1]) = [hf[0], hb[0], hf[T-1], hb[T-1]].
    enc = jnp.concatenate(
        [hf[0, :, :H], hb[0, :, :H], hf[1, :, :H], hb[1, :, :H]],
        axis=-1).astype(jnp.float32)                   # (B, 4H)
    # Decoder left to XLA: (B, 4H) @ (4H, C) is far below one MXU pass.
    return enc @ params["dec_w"] + params["dec_b"]


# ----------------------------------------------------------------------------
# Deterministic parameter construction (PyTorch-shaped) + TPU-friendly padding/cast
# ----------------------------------------------------------------------------
def init_params(key, vocab_size, embed_size, num_hiddens, num_layers, num_classes):
    keys = iter(jax.random.split(key, 4 + num_layers * 12))
    stdv = 1.0 / jnp.sqrt(jnp.float32(num_hiddens))

    def u(k, shape):
        return jax.random.uniform(k, shape, jnp.float32, -stdv, stdv)

    params = {
        "embedding": jax.random.normal(next(keys), (vocab_size, embed_size), jnp.float32)
    }
    lstm = []
    for layer in range(num_layers):
        d_in = embed_size if layer == 0 else 2 * num_hiddens
        dirs = []
        for _ in range(2):  # forward, backward
            w_ih = u(next(keys), (d_in, 4 * num_hiddens))
            w_hh = u(next(keys), (num_hiddens, 4 * num_hiddens))
            b_ih = u(next(keys), (1, 4 * num_hiddens))
            b_hh = u(next(keys), (1, 4 * num_hiddens))
            dirs.append((w_ih, w_hh, b_ih + b_hh))
        lstm.append(tuple(dirs))
    params["lstm"] = tuple(lstm)
    params["dec_w"] = u(next(keys), (4 * num_hiddens, num_classes))
    params["dec_b"] = u(next(keys), (1, num_classes))
    return params


def _pad_gate_cols(w, H, H_p):
    """(D, 4H) -> (D, 4H_p): each gate's H columns placed at 128-lane-aligned offsets."""
    D = w.shape[0]
    out = jnp.zeros((D, 4 * H_p), w.dtype)
    for g in range(4):
        out = out.at[:, g * H_p:g * H_p + H].set(w[:, g * H:(g + 1) * H])
    return out


def _pad_dir_rows(w, H, H_p, num_dirs):
    """(num_dirs*H, N) -> (num_dirs*H_p, N): per-direction row blocks at aligned offsets."""
    N = w.shape[1]
    out = jnp.zeros((num_dirs * H_p, N), w.dtype)
    for d in range(num_dirs):
        out = out.at[d * H_p:d * H_p + H, :].set(w[d * H:(d + 1) * H, :])
    return out


def prepare_params(params, num_hiddens):
    """Pad hidden dims to 128-lane multiples (gate-aligned) and cast weights to bf16.

    NOTE: for tiny H (e.g. 32) packing all four gates into one 128-lane group would avoid
    the 4x lane waste at the cost of lane-masked gate selects; not done here to keep a
    single generic layout.
    """
    H = num_hiddens
    H_p = ((H + 127) // 128) * 128
    lstm = []
    for layer_idx, layer in enumerate(params["lstm"]):
        dirs = []
        for (w_ih, w_hh, b) in layer:
            w_ih_p = _pad_gate_cols(w_ih, H, H_p)
            if layer_idx > 0:  # input is concat(h_fwd, h_bwd), each padded to H_p
                w_ih_p = _pad_dir_rows(w_ih_p, H, H_p, num_dirs=2)
            w_hh_p = _pad_dir_rows(_pad_gate_cols(w_hh, H, H_p), H, H_p, num_dirs=1)
            b_p = _pad_gate_cols(b, H, H_p)
            dirs.append((w_ih_p.astype(jnp.bfloat16),
                         w_hh_p.astype(jnp.bfloat16),
                         b_p))  # bias / gate math stays f32
        lstm.append(tuple(dirs))
    return {
        "embedding": params["embedding"],
        "lstm": tuple(lstm),
        "dec_w": params["dec_w"],
        "dec_b": params["dec_b"],
    }


if __name__ == "__main__":
    vocab_size = 50
    embed_size = 32
    num_hiddens = 32
    num_layers = 2
    num_classes = 2
    batch, seq_len = 2, 8

    key = jax.random.PRNGKey(0)
    k_params, k_ids = jax.random.split(key)
    raw_params = init_params(k_params, vocab_size, embed_size, num_hiddens,
                             num_layers, num_classes)
    params = prepare_params(raw_params, num_hiddens)
    token_ids = jax.random.randint(k_ids, (batch, seq_len), 0, vocab_size,
                                   dtype=jnp.int32)

    logits = birnn_forward(token_ids, params, num_hiddens)
    jax.block_until_ready(logits)
    assert logits.shape == (batch, num_classes)
    print("KERNEL_OK")
</pallas_src>

<mosaic_0001>
module attributes {stable_mosaic.version = 11 : i64} {
  func.func @_bilstm_chunk_kernel(%arg0: i32, %arg1: memref<8x8x512xbf16, #tpu.memory_space<vmem>>, %arg2: memref<8x8x512xbf16, #tpu.memory_space<vmem>>, %arg3: memref<128x512xbf16, #tpu.memory_space<vmem>>, %arg4: memref<128x512xbf16, #tpu.memory_space<vmem>>, %arg5: memref<8x8x128xbf16, #tpu.memory_space<vmem>>, %arg6: memref<8x8x128xbf16, #tpu.memory_space<vmem>>, %arg7: memref<8x128xf32, #tpu.memory_space<vmem>>, %arg8: memref<8x128xf32, #tpu.memory_space<vmem>>, %arg9: memref<8x128xf32, #tpu.memory_space<vmem>>, %arg10: memref<8x128xf32, #tpu.memory_space<vmem>>) attributes {dimension_semantics = [#tpu.dimension_semantics<arbitrary>], iteration_bounds = array<i64: 1>, scalar_prefetch = 0 : i64, scratch_operands = 4 : i64, tpu.core_type = #tpu.core_type<tc>, window_params = [{transform_indices = @transform_0, window_bounds = array<i64: 8, 8, 512>}, {transform_indices = @transform_1, window_bounds = array<i64: 8, 8, 512>}, {pipeline_mode = #tpu.pipeline_mode<synchronous>, transform_indices = @transform_2, window_bounds = array<i64: 128, 512>}, {pipeline_mode = #tpu.pipeline_mode<synchronous>, transform_indices = @transform_3, window_bounds = array<i64: 128, 512>}, {transform_indices = @transform_4, window_bounds = array<i64: 8, 8, 128>}, {transform_indices = @transform_5, window_bounds = array<i64: 8, 8, 128>}]} {
    %c0_i32 = arith.constant 0 : i32
    %0 = arith.cmpi eq, %arg0, %c0_i32 : i32
    %1 = arith.extui %0 : i1 to i32
    %c0_i32_0 = arith.constant 0 : i32
    %2 = arith.cmpi ne, %1, %c0_i32_0 : i32
    scf.if %2 {
      %cst_172 = arith.constant 0.000000e+00 : f32
      %573 = vector.broadcast %cst_172 : f32 to vector<8x128xf32>
      %c0_173 = arith.constant 0 : index
      %c0_174 = arith.constant 0 : index
      %574 = vector.load %arg7[%c0_173, %c0_174] : memref<8x128xf32, #tpu.memory_space<vmem>>, vector<8x128xf32>
      tpu.vector_store %arg7[%c0_173, %c0_174], %573 {strides = array<i32>} : memref<8x128xf32, #tpu.memory_space<vmem>>, vector<8x128xf32>,
      %cst_175 = arith.constant 0.000000e+00 : f32
      %575 = vector.broadcast %cst_175 : f32 to vector<8x128xf32>
      %c0_176 = arith.constant 0 : index
      %c0_177 = arith.constant 0 : index
      %576 = vector.load %arg8[%c0_176, %c0_177] : memref<8x128xf32, #tpu.memory_space<vmem>>, vector<8x128xf32>
      tpu.vector_store %arg8[%c0_176, %c0_177], %575 {strides = array<i32>} : memref<8x128xf32, #tpu.memory_space<vmem>>, vector<8x128xf32>,
      %cst_178 = arith.constant 0.000000e+00 : f32
      %577 = vector.broadcast %cst_178 : f32 to vector<8x128xf32>
      %c0_179 = arith.constant 0 : index
      %c0_180 = arith.constant 0 : index
      %578 = vector.load %arg9[%c0_179, %c0_180] : memref<8x128xf32, #tpu.memory_space<vmem>>, vector<8x128xf32>
      tpu.vector_store %arg9[%c0_179, %c0_180], %577 {strides = array<i32>} : memref<8x128xf32, #tpu.memory_space<vmem>>, vector<8x128xf32>,
      %cst_181 = arith.constant 0.000000e+00 : f32
      %579 = vector.broadcast %cst_181 : f32 to vector<8x128xf32>
      %c0_182 = arith.constant 0 : index
      %c0_183 = arith.constant 0 : index
      %580 = vector.load %arg10[%c0_182, %c0_183] : memref<8x128xf32, #tpu.memory_space<vmem>>, vector<8x128xf32>
      tpu.vector_store %arg10[%c0_182, %c0_183], %579 {strides = array<i32>} : memref<8x128xf32, #tpu.memory_space<vmem>>, vector<8x128xf32>,
    } else {
    }
    %c0 = arith.constant 0 : index
    %c0_1 = arith.constant 0 : index
    %3 = vector.load %arg3[%c0, %c0_1] : memref<128x512xbf16, #tpu.memory_space<vmem>>, vector<128x512xbf16>
    %c0_2 = arith.constant 0 : index
    %c0_3 = arith.constant 0 : index
    %4 = vector.load %arg4[%c0_2, %c0_3] : memref<128x512xbf16, #tpu.memory_space<vmem>>, vector<128x512xbf16>
    %c0_4 = arith.constant 0 : index
    %c0_5 = arith.constant 0 : index
    %5 = vector.load %arg7[%c0_4, %c0_5] : memref<8x128xf32, #tpu.memory_space<vmem>>, vector<8x128xf32>
    %c0_6 = arith.constant 0 : index
    %c0_7 = arith.constant 0 : index
    %6 = vector.load %arg8[%c0_6, %c0_7] : memref<8x128xf32, #tpu.memory_space<vmem>>, vector<8x128xf32>
    %c0_8 = arith.constant 0 : index
    %c0_9 = arith.constant 0 : index
    %7 = vector.load %arg9[%c0_8, %c0_9] : memref<8x128xf32, #tpu.memory_space<vmem>>, vector<8x128xf32>
    %c0_10 = arith.constant 0 : index
    %c0_11 = arith.constant 0 : index
    %8 = vector.load %arg10[%c0_10, %c0_11] : memref<8x128xf32, #tpu.memory_space<vmem>>, vector<8x128xf32>
    %c0_12 = arith.constant 0 : index
    %c0_13 = arith.constant 0 : index
    %c0_14 = arith.constant 0 : index
    %9 = vector.load %arg1[%c0_12, %c0_13, %c0_14] : memref<8x8x512xbf16, #tpu.memory_space<vmem>>, vector<1x8x512xbf16>
    %10 = vector.shape_cast %9 : vector<1x8x512xbf16> to vector<8x512xbf16>
    %11 = arith.extf %10 : vector<8x512xbf16> to vector<8x512xf32>
    %12 = arith.truncf %5 : vector<8x128xf32> to vector<8x128xbf16>
    %cst = arith.constant dense<0.000000e+00> : vector<8x512xf32>
    %13 = tpu.matmul %12, %3, %cst {dimension_numbers = #tpu.dot_dimension_numbers<[1], [0], [0], [1], [0, 0, 1, 1], [], []>} : vector<8x128xbf16>, vector<128x512xbf16>, vector<8x512xf32> -> vector<8x512xf32>
    %14 = arith.addf %11, %13 : vector<8x512xf32>
    %15 = vector.extract_strided_slice %14 {offsets = [0, 0], sizes = [8, 128], strides = [1, 1]} : vector<8x512xf32> to vector<8x128xf32>
    %16 = arith.negf %15 : vector<8x128xf32>
    %17 = math.exp %16 : vector<8x128xf32>
    %cst_15 = arith.constant 1.000000e+00 : f32
    %18 = vector.broadcast %cst_15 : f32 to vector<8x128xf32>
    %19 = arith.addf %18, %17 : vector<8x128xf32>
    %20 = arith.divf %18, %19 : vector<8x128xf32>
    %21 = vector.extract_strided_slice %14 {offsets = [0, 128], sizes = [8, 128], strides = [1, 1]} : vector<8x512xf32> to vector<8x128xf32>
    %22 = arith.negf %21 : vector<8x128xf32>
    %23 = math.exp %22 : vector<8x128xf32>
    %cst_16 = arith.constant 1.000000e+00 : f32
    %24 = vector.broadcast %cst_16 : f32 to vector<8x128xf32>
    %25 = arith.addf %24, %23 : vector<8x128xf32>
    %26 = arith.divf %24, %25 : vector<8x128xf32>
    %27 = vector.extract_strided_slice %14 {offsets = [0, 256], sizes = [8, 128], strides = [1, 1]} : vector<8x512xf32> to vector<8x128xf32>
    %28 = math.tanh %27 : vector<8x128xf32>
    %29 = vector.extract_strided_slice %14 {offsets = [0, 384], sizes = [8, 128], strides = [1, 1]} : vector<8x512xf32> to vector<8x128xf32>
    %30 = arith.negf %29 : vector<8x128xf32>
    %31 = math.exp %30 : vector<8x128xf32>
    %cst_17 = arith.constant 1.000000e+00 : f32
    %32 = vector.broadcast %cst_17 : f32 to vector<8x128xf32>
    %33 = arith.addf %32, %31 : vector<8x128xf32>
    %34 = arith.divf %32, %33 : vector<8x128xf32>
    %35 = arith.mulf %26, %6 : vector<8x128xf32>
    %36 = arith.mulf %20, %28 : vector<8x128xf32>
    %37 = arith.addf %35, %36 : vector<8x128xf32>
    %38 = math.tanh %37 : vector<8x128xf32>
    %39 = arith.mulf %34, %38 : vector<8x128xf32>
    %c7 = arith.constant 7 : index
    %c0_18 = arith.constant 0 : index
    %c0_19 = arith.constant 0 : index
    %40 = vector.load %arg2[%c7, %c0_18, %c0_19] : memref<8x8x512xbf16, #tpu.memory_space<vmem>>, vector<1x8x512xbf16>
    %41 = vector.shape_cast %40 : vector<1x8x512xbf16> to vector<8x512xbf16>
    %42 = arith.extf %41 : vector<8x512xbf16> to vector<8x512xf32>
    %43 = arith.truncf %7 : vector<8x128xf32> to vector<8x128xbf16>
    %cst_20 = arith.constant dense<0.000000e+00> : vector<8x512xf32>
    %44 = tpu.matmul %43, %4, %cst_20 {dimension_numbers = #tpu.dot_dimension_numbers<[1], [0], [0], [1], [0, 0, 1, 1], [], []>} : vector<8x128xbf16>, vector<128x512xbf16>, vector<8x512xf32> -> vector<8x512xf32>
    %45 = arith.addf %42, %44 : vector<8x512xf32>
    %46 = vector.extract_strided_slice %45 {offsets = [0, 0], sizes = [8, 128], strides = [1, 1]} : vector<8x512xf32> to vector<8x128xf32>
    %47 = arith.negf %46 : vector<8x128xf32>
    %48 = math.exp %47 : vector<8x128xf32>
    %cst_21 = arith.constant 1.000000e+00 : f32
    %49 = vector.broadcast %cst_21 : f32 to vector<8x128xf32>
    %50 = arith.addf %49, %48 : vector<8x128xf32>
    %51 = arith.divf %49, %50 : vector<8x128xf32>
    %52 = vector.extract_strided_slice %45 {offsets = [0, 128], sizes = [8, 128], strides = [1, 1]} : vector<8x512xf32> to vector<8x128xf32>
    %53 = arith.negf %52 : vector<8x128xf32>
    %54 = math.exp %53 : vector<8x128xf32>
    %cst_22 = arith.constant 1.000000e+00 : f32
    %55 = vector.broadcast %cst_22 : f32 to vector<8x128xf32>
    %56 = arith.addf %55, %54 : vector<8x128xf32>
    %57 = arith.divf %55, %56 : vector<8x128xf32>
    %58 = vector.extract_strided_slice %45 {offsets = [0, 256], sizes = [8, 128], strides = [1, 1]} : vector<8x512xf32> to vector<8x128xf32>
    %59 = math.tanh %58 : vector<8x128xf32>
    %60 = vector.extract_strided_slice %45 {offsets = [0, 384], sizes = [8, 128], strides = [1, 1]} : vector<8x512xf32> to vector<8x128xf32>
    %61 = arith.negf %60 : vector<8x128xf32>
    %62 = math.exp %61 : vector<8x128xf32>
    %cst_23 = arith.constant 1.000000e+00 : f32
    %63 = vector.broadcast %cst_23 : f32 to vector<8x128xf32>
    %64 = arith.addf %63, %62 : vector<8x128xf32>
    %65 = arith.divf %63, %64 : vector<8x128xf32>
    %66 = arith.mulf %57, %8 : vector<8x128xf32>
    %67 = arith.mulf %51, %59 : vector<8x128xf32>
    %68 = arith.addf %66, %67 : vector<8x128xf32>
    %69 = math.tanh %68 : vector<8x128xf32>
    %70 = arith.mulf %65, %69 : vector<8x128xf32>
    %71 = arith.truncf %39 : vector<8x128xf32> to vector<8x128xbf16>
    %c0_24 = arith.constant 0 : index
    %c0_25 = arith.constant 0 : index
    %c0_26 = arith.constant 0 : index
    %72 = vector.load %arg5[%c0_24, %c0_25, %c0_26] : memref<8x8x128xbf16, #tpu.memory_space<vmem>>, vector<1x8x128xbf16>
    %73 = vector.shape_cast %72 : vector<1x8x128xbf16> to vector<8x128xbf16>
    %74 = vector.shape_cast %71 : vector<8x128xbf16> to vector<1x8x128xbf16>
    tpu.vector_store %arg5[%c0_24, %c0_25, %c0_26], %74 {strides = array<i32>} : memref<8x8x128xbf16, #tpu.memory_space<vmem>>, vector<1x8x128xbf16>,
    %75 = arith.truncf %70 : vector<8x128xf32> to vector<8x128xbf16>
    %c7_27 = arith.constant 7 : index
    %c0_28 = arith.constant 0 : index
    %c0_29 = arith.constant 0 : index
    %76 = vector.load %arg6[%c7_27, %c0_28, %c0_29] : memref<8x8x128xbf16, #tpu.memory_space<vmem>>, vector<1x8x128xbf16>
    %77 = vector.shape_cast %76 : vector<1x8x128xbf16> to vector<8x128xbf16>
    %78 = vector.shape_cast %75 : vector<8x128xbf16> to vector<1x8x128xbf16>
    tpu.vector_store %arg6[%c7_27, %c0_28, %c0_29], %78 {strides = array<i32>} : memref<8x8x128xbf16, #tpu.memory_space<vmem>>, vector<1x8x128xbf16>,
    %c1 = arith.constant 1 : index
    %c0_30 = arith.constant 0 : index
    %c0_31 = arith.constant 0 : index
    %79 = vector.load %arg1[%c1, %c0_30, %c0_31] : memref<8x8x512xbf16, #tpu.memory_space<vmem>>, vector<1x8x512xbf16>
    %80 = vector.shape_cast %79 : vector<1x8x512xbf16> to vector<8x512xbf16>
    %81 = arith.extf %80 : vector<8x512xbf16> to vector<8x512xf32>
    %82 = arith.truncf %39 : vector<8x128xf32> to vector<8x128xbf16>
    %cst_32 = arith.constant dense<0.000000e+00> : vector<8x512xf32>
    %83 = tpu.matmul %82, %3, %cst_32 {dimension_numbers = #tpu.dot_dimension_numbers<[1], [0], [0], [1], [0, 0, 1, 1], [], []>} : vector<8x128xbf16>, vector<128x512xbf16>, vector<8x512xf32> -> vector<8x512xf32>
    %84 = arith.addf %81, %83 : vector<8x512xf32>
    %85 = vector.extract_strided_slice %84 {offsets = [0, 0], sizes = [8, 128], strides = [1, 1]} : vector<8x512xf32> to vector<8x128xf32>
    %86 = arith.negf %85 : vector<8x128xf32>
    %87 = math.exp %86 : vector<8x128xf32>
    %cst_33 = arith.constant 1.000000e+00 : f32
    %88 = vector.broadcast %cst_33 : f32 to vector<8x128xf32>
    %89 = arith.addf %88, %87 : vector<8x128xf32>
    %90 = arith.divf %88, %89 : vector<8x128xf32>
    %91 = vector.extract_strided_slice %84 {offsets = [0, 128], sizes = [8, 128], strides = [1, 1]} : vector<8x512xf32> to vector<8x128xf32>
    %92 = arith.negf %91 : vector<8x128xf32>
    %93 = math.exp %92 : vector<8x128xf32>
    %cst_34 = arith.constant 1.000000e+00 : f32
    %94 = vector.broadcast %cst_34 : f32 to vector<8x128xf32>
    %95 = arith.addf %94, %93 : vector<8x128xf32>
    %96 = arith.divf %94, %95 : vector<8x128xf32>
    %97 = vector.extract_strided_slice %84 {offsets = [0, 256], sizes = [8, 128], strides = [1, 1]} : vector<8x512xf32> to vector<8x128xf32>
    %98 = math.tanh %97 : vector<8x128xf32>
    %99 = vector.extract_strided_slice %84 {offsets = [0, 384], sizes = [8, 128], strides = [1, 1]} : vector<8x512xf32> to vector<8x128xf32>
    %100 = arith.negf %99 : vector<8x128xf32>
    %101 = math.exp %100 : vector<8x128xf32>
    %cst_35 = arith.constant 1.000000e+00 : f32
    %102 = vector.broadcast %cst_35 : f32 to vector<8x128xf32>
    %103 = arith.addf %102, %101 : vector<8x128xf32>
    %104 = arith.divf %102, %103 : vector<8x128xf32>
    %105 = arith.mulf %96, %37 : vector<8x128xf32>
    %106 = arith.mulf %90, %98 : vector<8x128xf32>
    %107 = arith.addf %105, %106 : vector<8x128xf32>
    %108 = math.tanh %107 : vector<8x128xf32>
    %109 = arith.mulf %104, %108 : vector<8x128xf32>
    %c6 = arith.constant 6 : index
    %c0_36 = arith.constant 0 : index
    %c0_37 = arith.constant 0 : index
    %110 = vector.load %arg2[%c6, %c0_36, %c0_37] : memref<8x8x512xbf16, #tpu.memory_space<vmem>>, vector<1x8x512xbf16>
    %111 = vector.shape_cast %110 : vector<1x8x512xbf16> to vector<8x512xbf16>
    %112 = arith.extf %111 : vector<8x512xbf16> to vector<8x512xf32>
    %113 = arith.truncf %70 : vector<8x128xf32> to vector<8x128xbf16>
    %cst_38 = arith.constant dense<0.000000e+00> : vector<8x512xf32>
    %114 = tpu.matmul %113, %4, %cst_38 {dimension_numbers = #tpu.dot_dimension_numbers<[1], [0], [0], [1], [0, 0, 1, 1], [], []>} : vector<8x128xbf16>, vector<128x512xbf16>, vector<8x512xf32> -> vector<8x512xf32>
    %115 = arith.addf %112, %114 : vector<8x512xf32>
    %116 = vector.extract_strided_slice %115 {offsets = [0, 0], sizes = [8, 128], strides = [1, 1]} : vector<8x512xf32> to vector<8x128xf32>
    %117 = arith.negf %116 : vector<8x128xf32>
    %118 = math.exp %117 : vector<8x128xf32>
    %cst_39 = arith.constant 1.000000e+00 : f32
    %119 = vector.broadcast %cst_39 : f32 to vector<8x128xf32>
    %120 = arith.addf %119, %118 : vector<8x128xf32>
    %121 = arith.divf %119, %120 : vector<8x128xf32>
    %122 = vector.extract_strided_slice %115 {offsets = [0, 128], sizes = [8, 128], strides = [1, 1]} : vector<8x512xf32> to vector<8x128xf32>
    %123 = arith.negf %122 : vector<8x128xf32>
    %124 = math.exp %123 : vector<8x128xf32>
    %cst_40 = arith.constant 1.000000e+00 : f32
    %125 = vector.broadcast %cst_40 : f32 to vector<8x128xf32>
    %126 = arith.addf %125, %124 : vector<8x128xf32>
    %127 = arith.divf %125, %126 : vector<8x128xf32>
    %128 = vector.extract_strided_slice %115 {offsets = [0, 256], sizes = [8, 128], strides = [1, 1]} : vector<8x512xf32> to vector<8x128xf32>
    %129 = math.tanh %128 : vector<8x128xf32>
    %130 = vector.extract_strided_slice %115 {offsets = [0, 384], sizes = [8, 128], strides = [1, 1]} : vector<8x512xf32> to vector<8x128xf32>
    %131 = arith.negf %130 : vector<8x128xf32>
    %132 = math.exp %131 : vector<8x128xf32>
    %cst_41 = arith.constant 1.000000e+00 : f32
    %133 = vector.broadcast %cst_41 : f32 to vector<8x128xf32>
    %134 = arith.addf %133, %132 : vector<8x128xf32>
    %135 = arith.divf %133, %134 : vector<8x128xf32>
    %136 = arith.mulf %127, %68 : vector<8x128xf32>
    %137 = arith.mulf %121, %129 : vector<8x128xf32>
    %138 = arith.addf %136, %137 : vector<8x128xf32>
    %139 = math.tanh %138 : vector<8x128xf32>
    %140 = arith.mulf %135, %139 : vector<8x128xf32>
    %141 = arith.truncf %109 : vector<8x128xf32> to vector<8x128xbf16>
    %c1_42 = arith.constant 1 : index
    %c0_43 = arith.constant 0 : index
    %c0_44 = arith.constant 0 : index
    %142 = vector.load %arg5[%c1_42, %c0_43, %c0_44] : memref<8x8x128xbf16, #tpu.memory_space<vmem>>, vector<1x8x128xbf16>
    %143 = vector.shape_cast %142 : vector<1x8x128xbf16> to vector<8x128xbf16>
    %144 = vector.shape_cast %141 : vector<8x128xbf16> to vector<1x8x128xbf16>
    tpu.vector_store %arg5[%c1_42, %c0_43, %c0_44], %144 {strides = array<i32>} : memref<8x8x128xbf16, #tpu.memory_space<vmem>>, vector<1x8x128xbf16>,
    %145 = arith.truncf %140 : vector<8x128xf32> to vector<8x128xbf16>
    %c6_45 = arith.constant 6 : index
    %c0_46 = arith.constant 0 : index
    %c0_47 = arith.constant 0 : index
    %146 = vector.load %arg6[%c6_45, %c0_46, %c0_47] : memref<8x8x128xbf16, #tpu.memory_space<vmem>>, vector<1x8x128xbf16>
    %147 = vector.shape_cast %146 : vector<1x8x128xbf16> to vector<8x128xbf16>
    %148 = vector.shape_cast %145 : vector<8x128xbf16> to vector<1x8x128xbf16>
    tpu.vector_store %arg6[%c6_45, %c0_46, %c0_47], %148 {strides = array<i32>} : memref<8x8x128xbf16, #tpu.memory_space<vmem>>, vector<1x8x128xbf16>,
    %c2 = arith.constant 2 : index
    %c0_48 = arith.constant 0 : index
    %c0_49 = arith.constant 0 : index
    %149 = vector.load %arg1[%c2, %c0_48, %c0_49] : memref<8x8x512xbf16, #tpu.memory_space<vmem>>, vector<1x8x512xbf16>
    %150 = vector.shape_cast %149 : vector<1x8x512xbf16> to vector<8x512xbf16>
    %151 = arith.extf %150 : vector<8x512xbf16> to vector<8x512xf32>
    %152 = arith.truncf %109 : vector<8x128xf32> to vector<8x128xbf16>
    %cst_50 = arith.constant dense<0.000000e+00> : vector<8x512xf32>
    %153 = tpu.matmul %152, %3, %cst_50 {dimension_numbers = #tpu.dot_dimension_numbers<[1], [0], [0], [1], [0, 0, 1, 1], [], []>} : vector<8x128xbf16>, vector<128x512xbf16>, vector<8x512xf32> -> vector<8x512xf32>
    %154 = arith.addf %151, %153 : vector<8x512xf32>
    %155 = vector.extract_strided_slice %154 {offsets = [0, 0], sizes = [8, 128], strides = [1, 1]} : vector<8x512xf32> to vector<8x128xf32>
    %156 = arith.negf %155 : vector<8x128xf32>
    %157 = math.exp %156 : vector<8x128xf32>
    %cst_51 = arith.constant 1.000000e+00 : f32
    %158 = vector.broadcast %cst_51 : f32 to vector<8x128xf32>
    %159 = arith.addf %158, %157 : vector<8x128xf32>
    %160 = arith.divf %158, %159 : vector<8x128xf32>
    %161 = vector.extract_strided_slice %154 {offsets = [0, 128], sizes = [8, 128], strides = [1, 1]} : vector<8x512xf32> to vector<8x128xf32>
    %162 = arith.negf %161 : vector<8x128xf32>
    %163 = math.exp %162 : vector<8x128xf32>
    %cst_52 = arith.constant 1.000000e+00 : f32
    %164 = vector.broadcast %cst_52 : f32 to vector<8x128xf32>
    %165 = arith.addf %164, %163 : vector<8x128xf32>
    %166 = arith.divf %164, %165 : vector<8x128xf32>
    %167 = vector.extract_strided_slice %154 {offsets = [0, 256], sizes = [8, 128], strides = [1, 1]} : vector<8x512xf32> to vector<8x128xf32>
    %168 = math.tanh %167 : vector<8x128xf32>
    %169 = vector.extract_strided_slice %154 {offsets = [0, 384], sizes = [8, 128], strides = [1, 1]} : vector<8x512xf32> to vector<8x128xf32>
    %170 = arith.negf %169 : vector<8x128xf32>
    %171 = math.exp %170 : vector<8x128xf32>
    %cst_53 = arith.constant 1.000000e+00 : f32
    %172 = vector.broadcast %cst_53 : f32 to vector<8x128xf32>
    %173 = arith.addf %172, %171 : vector<8x128xf32>
    %174 = arith.divf %172, %173 : vector<8x128xf32>
    %175 = arith.mulf %166, %107 : vector<8x128xf32>
    %176 = arith.mulf %160, %168 : vector<8x128xf32>
    %177 = arith.addf %175, %176 : vector<8x128xf32>
    %178 = math.tanh %177 : vector<8x128xf32>
    %179 = arith.mulf %174, %178 : vector<8x128xf32>
    %c5 = arith.constant 5 : index
    %c0_54 = arith.constant 0 : index
    %c0_55 = arith.constant 0 : index
    %180 = vector.load %arg2[%c5, %c0_54, %c0_55] : memref<8x8x512xbf16, #tpu.memory_space<vmem>>, vector<1x8x512xbf16>
    %181 = vector.shape_cast %180 : vector<1x8x512xbf16> to vector<8x512xbf16>
    %182 = arith.extf %181 : vector<8x512xbf16> to vector<8x512xf32>
    %183 = arith.truncf %140 : vector<8x128xf32> to vector<8x128xbf16>
    %cst_56 = arith.constant dense<0.000000e+00> : vector<8x512xf32>
    %184 = tpu.matmul %183, %4, %cst_56 {dimension_numbers = #tpu.dot_dimension_numbers<[1], [0], [0], [1], [0, 0, 1, 1], [], []>} : vector<8x128xbf16>, vector<128x512xbf16>, vector<8x512xf32> -> vector<8x512xf32>
    %185 = arith.addf %182, %184 : vector<8x512xf32>
    %186 = vector.extract_strided_slice %185 {offsets = [0, 0], sizes = [8, 128], strides = [1, 1]} : vector<8x512xf32> to vector<8x128xf32>
    %187 = arith.negf %186 : vector<8x128xf32>
    %188 = math.exp %187 : vector<8x128xf32>
    %cst_57 = arith.constant 1.000000e+00 : f32
    %189 = vector.broadcast %cst_57 : f32 to vector<8x128xf32>
    %190 = arith.addf %189, %188 : vector<8x128xf32>
    %191 = arith.divf %189, %190 : vector<8x128xf32>
    %192 = vector.extract_strided_slice %185 {offsets = [0, 128], sizes = [8, 128], strides = [1, 1]} : vector<8x512xf32> to vector<8x128xf32>
    %193 = arith.negf %192 : vector<8x128xf32>
    %194 = math.exp %193 : vector<8x128xf32>
    %cst_58 = arith.constant 1.000000e+00 : f32
    %195 = vector.broadcast %cst_58 : f32 to vector<8x128xf32>
    %196 = arith.addf %195, %194 : vector<8x128xf32>
    %197 = arith.divf %195, %196 : vector<8x128xf32>
    %198 = vector.extract_strided_slice %185 {offsets = [0, 256], sizes = [8, 128], strides = [1, 1]} : vector<8x512xf32> to vector<8x128xf32>
    %199 = math.tanh %198 : vector<8x128xf32>
    %200 = vector.extract_strided_slice %185 {offsets = [0, 384], sizes = [8, 128], strides = [1, 1]} : vector<8x512xf32> to vector<8x128xf32>
    %201 = arith.negf %200 : vector<8x128xf32>
    %202 = math.exp %201 : vector<8x128xf32>
    %cst_59 = arith.constant 1.000000e+00 : f32
    %203 = vector.broadcast %cst_59 : f32 to vector<8x128xf32>
    %204 = arith.addf %203, %202 : vector<8x128xf32>
    %205 = arith.divf %203, %204 : vector<8x128xf32>
    %206 = arith.mulf %197, %138 : vector<8x128xf32>
    %207 = arith.mulf %191, %199 : vector<8x128xf32>
    %208 = arith.addf %206, %207 : vector<8x128xf32>
    %209 = math.tanh %208 : vector<8x128xf32>
    %210 = arith.mulf %205, %209 : vector<8x128xf32>
    %211 = arith.truncf %179 : vector<8x128xf32> to vector<8x128xbf16>
    %c2_60 = arith.constant 2 : index
    %c0_61 = arith.constant 0 : index
    %c0_62 = arith.constant 0 : index
    %212 = vector.load %arg5[%c2_60, %c0_61, %c0_62] : memref<8x8x128xbf16, #tpu.memory_space<vmem>>, vector<1x8x128xbf16>
    %213 = vector.shape_cast %212 : vector<1x8x128xbf16> to vector<8x128xbf16>
    %214 = vector.shape_cast %211 : vector<8x128xbf16> to vector<1x8x128xbf16>
    tpu.vector_store %arg5[%c2_60, %c0_61, %c0_62], %214 {strides = array<i32>} : memref<8x8x128xbf16, #tpu.memory_space<vmem>>, vector<1x8x128xbf16>,
    %215 = arith.truncf %210 : vector<8x128xf32> to vector<8x128xbf16>
    %c5_63 = arith.constant 5 : index
    %c0_64 = arith.constant 0 : index
    %c0_65 = arith.constant 0 : index
    %216 = vector.load %arg6[%c5_63, %c0_64, %c0_65] : memref<8x8x128xbf16, #tpu.memory_space<vmem>>, vector<1x8x128xbf16>
    %217 = vector.shape_cast %216 : vector<1x8x128xbf16> to vector<8x128xbf16>
    %218 = vector.shape_cast %215 : vector<8x128xbf16> to vector<1x8x128xbf16>
    tpu.vector_store %arg6[%c5_63, %c0_64, %c0_65], %218 {strides = array<i32>} : memref<8x8x128xbf16, #tpu.memory_space<vmem>>, vector<1x8x128xbf16>,
    %c3 = arith.constant 3 : index
    %c0_66 = arith.constant 0 : index
    %c0_67 = arith.constant 0 : index
    %219 = vector.load %arg1[%c3, %c0_66, %c0_67] : memref<8x8x512xbf16, #tpu.memory_space<vmem>>, vector<1x8x512xbf16>
    %220 = vector.shape_cast %219 : vector<1x8x512xbf16> to vector<8x512xbf16>
    %221 = arith.extf %220 : vector<8x512xbf16> to vector<8x512xf32>
    %222 = arith.truncf %179 : vector<8x128xf32> to vector<8x128xbf16>
    %cst_68 = arith.constant dense<0.000000e+00> : vector<8x512xf32>
    %223 = tpu.matmul %222, %3, %cst_68 {dimension_numbers = #tpu.dot_dimension_numbers<[1], [0], [0], [1], [0, 0, 1, 1], [], []>} : vector<8x128xbf16>, vector<128x512xbf16>, vector<8x512xf32> -> vector<8x512xf32>
    %224 = arith.addf %221, %223 : vector<8x512xf32>
    %225 = vector.extract_strided_slice %224 {offsets = [0, 0], sizes = [8, 128], strides = [1, 1]} : vector<8x512xf32> to vector<8x128xf32>
    %226 = arith.negf %225 : vector<8x128xf32>
    %227 = math.exp %226 : vector<8x128xf32>
    %cst_69 = arith.constant 1.000000e+00 : f32
    %228 = vector.broadcast %cst_69 : f32 to vector<8x128xf32>
    %229 = arith.addf %228, %227 : vector<8x128xf32>
    %230 = arith.divf %228, %229 : vector<8x128xf32>
    %231 = vector.extract_strided_slice %224 {offsets = [0, 128], sizes = [8, 128], strides = [1, 1]} : vector<8x512xf32> to vector<8x128xf32>
    %232 = arith.negf %231 : vector<8x128xf32>
    %233 = math.exp %232 : vector<8x128xf32>
    %cst_70 = arith.constant 1.000000e+00 : f32
    %234 = vector.broadcast %cst_70 : f32 to vector<8x128xf32>
    %235 = arith.addf %234, %233 : vector<8x128xf32>
    %236 = arith.divf %234, %235 : vector<8x128xf32>
    %237 = vector.extract_strided_slice %224 {offsets = [0, 256], sizes = [8, 128], strides = [1, 1]} : vector<8x512xf32> to vector<8x128xf32>
    %238 = math.tanh %237 : vector<8x128xf32>
    %239 = vector.extract_strided_slice %224 {offsets = [0, 384], sizes = [8, 128], strides = [1, 1]} : vector<8x512xf32> to vector<8x128xf32>
    %240 = arith.negf %239 : vector<8x128xf32>
    %241 = math.exp %240 : vector<8x128xf32>
    %cst_71 = arith.constant 1.000000e+00 : f32
    %242 = vector.broadcast %cst_71 : f32 to vector<8x128xf32>
    %243 = arith.addf %242, %241 : vector<8x128xf32>
    %244 = arith.divf %242, %243 : vector<8x128xf32>
    %245 = arith.mulf %236, %177 : vector<8x128xf32>
    %246 = arith.mulf %230, %238 : vector<8x128xf32>
    %247 = arith.addf %245, %246 : vector<8x128xf32>
    %248 = math.tanh %247 : vector<8x128xf32>
    %249 = arith.mulf %244, %248 : vector<8x128xf32>
    %c4 = arith.constant 4 : index
    %c0_72 = arith.constant 0 : index
    %c0_73 = arith.constant 0 : index
    %250 = vector.load %arg2[%c4, %c0_72, %c0_73] : memref<8x8x512xbf16, #tpu.memory_space<vmem>>, vector<1x8x512xbf16>
    %251 = vector.shape_cast %250 : vector<1x8x512xbf16> to vector<8x512xbf16>
    %252 = arith.extf %251 : vector<8x512xbf16> to vector<8x512xf32>
    %253 = arith.truncf %210 : vector<8x128xf32> to vector<8x128xbf16>
    %cst_74 = arith.constant dense<0.000000e+00> : vector<8x512xf32>
    %254 = tpu.matmul %253, %4, %cst_74 {dimension_numbers = #tpu.dot_dimension_numbers<[1], [0], [0], [1], [0, 0, 1, 1], [], []>} : vector<8x128xbf16>, vector<128x512xbf16>, vector<8x512xf32> -> vector<8x512xf32>
    %255 = arith.addf %252, %254 : vector<8x512xf32>
    %256 = vector.extract_strided_slice %255 {offsets = [0, 0], sizes = [8, 128], strides = [1, 1]} : vector<8x512xf32> to vector<8x128xf32>
    %257 = arith.negf %256 : vector<8x128xf32>
    %258 = math.exp %257 : vector<8x128xf32>
    %cst_75 = arith.constant 1.000000e+00 : f32
    %259 = vector.broadcast %cst_75 : f32 to vector<8x128xf32>
    %260 = arith.addf %259, %258 : vector<8x128xf32>
    %261 = arith.divf %259, %260 : vector<8x128xf32>
    %262 = vector.extract_strided_slice %255 {offsets = [0, 128], sizes = [8, 128], strides = [1, 1]} : vector<8x512xf32> to vector<8x128xf32>
    %263 = arith.negf %262 : vector<8x128xf32>
    %264 = math.exp %263 : vector<8x128xf32>
    %cst_76 = arith.constant 1.000000e+00 : f32
    %265 = vector.broadcast %cst_76 : f32 to vector<8x128xf32>
    %266 = arith.addf %265, %264 : vector<8x128xf32>
    %267 = arith.divf %265, %266 : vector<8x128xf32>
    %268 = vector.extract_strided_slice %255 {offsets = [0, 256], sizes = [8, 128], strides = [1, 1]} : vector<8x512xf32> to vector<8x128xf32>
    %269 = math.tanh %268 : vector<8x128xf32>
    %270 = vector.extract_strided_slice %255 {offsets = [0, 384], sizes = [8, 128], strides = [1, 1]} : vector<8x512xf32> to vector<8x128xf32>
    %271 = arith.negf %270 : vector<8x128xf32>
    %272 = math.exp %271 : vector<8x128xf32>
    %cst_77 = arith.constant 1.000000e+00 : f32
    %273 = vector.broadcast %cst_77 : f32 to vector<8x128xf32>
    %274 = arith.addf %273, %272 : vector<8x128xf32>
    %275 = arith.divf %273, %274 : vector<8x128xf32>
    %276 = arith.mulf %267, %208 : vector<8x128xf32>
    %277 = arith.mulf %261, %269 : vector<8x128xf32>
    %278 = arith.addf %276, %277 : vector<8x128xf32>
    %279 = math.tanh %278 : vector<8x128xf32>
    %280 = arith.mulf %275, %279 : vector<8x128xf32>
    %281 = arith.truncf %249 : vector<8x128xf32> to vector<8x128xbf16>
    %c3_78 = arith.constant 3 : index
    %c0_79 = arith.constant 0 : index
    %c0_80 = arith.constant 0 : index
    %282 = vector.load %arg5[%c3_78, %c0_79, %c0_80] : memref<8x8x128xbf16, #tpu.memory_space<vmem>>, vector<1x8x128xbf16>
    %283 = vector.shape_cast %282 : vector<1x8x128xbf16> to vector<8x128xbf16>
    %284 = vector.shape_cast %281 : vector<8x128xbf16> to vector<1x8x128xbf16>
    tpu.vector_store %arg5[%c3_78, %c0_79, %c0_80], %284 {strides = array<i32>} : memref<8x8x128xbf16, #tpu.memory_space<vmem>>, vector<1x8x128xbf16>,
    %285 = arith.truncf %280 : vector<8x128xf32> to vector<8x128xbf16>
    %c4_81 = arith.constant 4 : index
    %c0_82 = arith.constant 0 : index
    %c0_83 = arith.constant 0 : index
    %286 = vector.load %arg6[%c4_81, %c0_82, %c0_83] : memref<8x8x128xbf16, #tpu.memory_space<vmem>>, vector<1x8x128xbf16>
    %287 = vector.shape_cast %286 : vector<1x8x128xbf16> to vector<8x128xbf16>
    %288 = vector.shape_cast %285 : vector<8x128xbf16> to vector<1x8x128xbf16>
    tpu.vector_store %arg6[%c4_81, %c0_82, %c0_83], %288 {strides = array<i32>} : memref<8x8x128xbf16, #tpu.memory_space<vmem>>, vector<1x8x128xbf16>,
    %c4_84 = arith.constant 4 : index
    %c0_85 = arith.constant 0 : index
    %c0_86 = arith.constant 0 : index
    %289 = vector.load %arg1[%c4_84, %c0_85, %c0_86] : memref<8x8x512xbf16, #tpu.memory_space<vmem>>, vector<1x8x512xbf16>
    %290 = vector.shape_cast %289 : vector<1x8x512xbf16> to vector<8x512xbf16>
    %291 = arith.extf %290 : vector<8x512xbf16> to vector<8x512xf32>
    %292 = arith.truncf %249 : vector<8x128xf32> to vector<8x128xbf16>
    %cst_87 = arith.constant dense<0.000000e+00> : vector<8x512xf32>
    %293 = tpu.matmul %292, %3, %cst_87 {dimension_numbers = #tpu.dot_dimension_numbers<[1], [0], [0], [1], [0, 0, 1, 1], [], []>} : vector<8x128xbf16>, vector<128x512xbf16>, vector<8x512xf32> -> vector<8x512xf32>
    %294 = arith.addf %291, %293 : vector<8x512xf32>
    %295 = vector.extract_strided_slice %294 {offsets = [0, 0], sizes = [8, 128], strides = [1, 1]} : vector<8x512xf32> to vector<8x128xf32>
    %296 = arith.negf %295 : vector<8x128xf32>
    %297 = math.exp %296 : vector<8x128xf32>
    %cst_88 = arith.constant 1.000000e+00 : f32
    %298 = vector.broadcast %cst_88 : f32 to vector<8x128xf32>
    %299 = arith.addf %298, %297 : vector<8x128xf32>
    %300 = arith.divf %298, %299 : vector<8x128xf32>
    %301 = vector.extract_strided_slice %294 {offsets = [0, 128], sizes = [8, 128], strides = [1, 1]} : vector<8x512xf32> to vector<8x128xf32>
    %302 = arith.negf %301 : vector<8x128xf32>
    %303 = math.exp %302 : vector<8x128xf32>
    %cst_89 = arith.constant 1.000000e+00 : f32
    %304 = vector.broadcast %cst_89 : f32 to vector<8x128xf32>
    %305 = arith.addf %304, %303 : vector<8x128xf32>
    %306 = arith.divf %304, %305 : vector<8x128xf32>
    %307 = vector.extract_strided_slice %294 {offsets = [0, 256], sizes = [8, 128], strides = [1, 1]} : vector<8x512xf32> to vector<8x128xf32>
    %308 = math.tanh %307 : vector<8x128xf32>
    %309 = vector.extract_strided_slice %294 {offsets = [0, 384], sizes = [8, 128], strides = [1, 1]} : vector<8x512xf32> to vector<8x128xf32>
    %310 = arith.negf %309 : vector<8x128xf32>
    %311 = math.exp %310 : vector<8x128xf32>
    %cst_90 = arith.constant 1.000000e+00 : f32
    %312 = vector.broadcast %cst_90 : f32 to vector<8x128xf32>
    %313 = arith.addf %312, %311 : vector<8x128xf32>
    %314 = arith.divf %312, %313 : vector<8x128xf32>
    %315 = arith.mulf %306, %247 : vector<8x128xf32>
    %316 = arith.mulf %300, %308 : vector<8x128xf32>
    %317 = arith.addf %315, %316 : vector<8x128xf32>
    %318 = math.tanh %317 : vector<8x128xf32>
    %319 = arith.mulf %314, %318 : vector<8x128xf32>
    %c3_91 = arith.constant 3 : index
    %c0_92 = arith.constant 0 : index
    %c0_93 = arith.constant 0 : index
    %320 = vector.load %arg2[%c3_91, %c0_92, %c0_93] : memref<8x8x512xbf16, #tpu.memory_space<vmem>>, vector<1x8x512xbf16>
    %321 = vector.shape_cast %320 : vector<1x8x512xbf16> to vector<8x512xbf16>
    %322 = arith.extf %321 : vector<8x512xbf16> to vector<8x512xf32>
    %323 = arith.truncf %280 : vector<8x128xf32> to vector<8x128xbf16>
    %cst_94 = arith.constant dense<0.000000e+00> : vector<8x512xf32>
    %324 = tpu.matmul %323, %4, %cst_94 {dimension_numbers = #tpu.dot_dimension_numbers<[1], [0], [0], [1], [0, 0, 1, 1], [], []>} : vector<8x128xbf16>, vector<128x512xbf16>, vector<8x512xf32> -> vector<8x512xf32>
    %325 = arith.addf %322, %324 : vector<8x512xf32>
    %326 = vector.extract_strided_slice %325 {offsets = [0, 0], sizes = [8, 128], strides = [1, 1]} : vector<8x512xf32> to vector<8x128xf32>
    %327 = arith.negf %326 : vector<8x128xf32>
    %328 = math.exp %327 : vector<8x128xf32>
    %cst_95 = arith.constant 1.000000e+00 : f32
    %329 = vector.broadcast %cst_95 : f32 to vector<8x128xf32>
    %330 = arith.addf %329, %328 : vector<8x128xf32>
    %331 = arith.divf %329, %330 : vector<8x128xf32>
    %332 = vector.extract_strided_slice %325 {offsets = [0, 128], sizes = [8, 128], strides = [1, 1]} : vector<8x512xf32> to vector<8x128xf32>
    %333 = arith.negf %332 : vector<8x128xf32>
    %334 = math.exp %333 : vector<8x128xf32>
    %cst_96 = arith.constant 1.000000e+00 : f32
    %335 = vector.broadcast %cst_96 : f32 to vector<8x128xf32>
    %336 = arith.addf %335, %334 : vector<8x128xf32>
    %337 = arith.divf %335, %336 : vector<8x128xf32>
    %338 = vector.extract_strided_slice %325 {offsets = [0, 256], sizes = [8, 128], strides = [1, 1]} : vector<8x512xf32> to vector<8x128xf32>
    %339 = math.tanh %338 : vector<8x128xf32>
    %340 = vector.extract_strided_slice %325 {offsets = [0, 384], sizes = [8, 128], strides = [1, 1]} : vector<8x512xf32> to vector<8x128xf32>
    %341 = arith.negf %340 : vector<8x128xf32>
    %342 = math.exp %341 : vector<8x128xf32>
    %cst_97 = arith.constant 1.000000e+00 : f32
    %343 = vector.broadcast %cst_97 : f32 to vector<8x128xf32>
    %344 = arith.addf %343, %342 : vector<8x128xf32>
    %345 = arith.divf %343, %344 : vector<8x128xf32>
    %346 = arith.mulf %337, %278 : vector<8x128xf32>
    %347 = arith.mulf %331, %339 : vector<8x128xf32>
    %348 = arith.addf %346, %347 : vector<8x128xf32>
    %349 = math.tanh %348 : vector<8x128xf32>
    %350 = arith.mulf %345, %349 : vector<8x128xf32>
    %351 = arith.truncf %319 : vector<8x128xf32> to vector<8x128xbf16>
    %c4_98 = arith.constant 4 : index
    %c0_99 = arith.constant 0 : index
    %c0_100 = arith.constant 0 : index
    %352 = vector.load %arg5[%c4_98, %c0_99, %c0_100] : memref<8x8x128xbf16, #tpu.memory_space<vmem>>, vector<1x8x128xbf16>
    %353 = vector.shape_cast %352 : vector<1x8x128xbf16> to vector<8x128xbf16>
    %354 = vector.shape_cast %351 : vector<8x128xbf16> to vector<1x8x128xbf16>
    tpu.vector_store %arg5[%c4_98, %c0_99, %c0_100], %354 {strides = array<i32>} : memref<8x8x128xbf16, #tpu.memory_space<vmem>>, vector<1x8x128xbf16>,
    %355 = arith.truncf %350 : vector<8x128xf32> to vector<8x128xbf16>
    %c3_101 = arith.constant 3 : index
    %c0_102 = arith.constant 0 : index
    %c0_103 = arith.constant 0 : index
    %356 = vector.load %arg6[%c3_101, %c0_102, %c0_103] : memref<8x8x128xbf16, #tpu.memory_space<vmem>>, vector<1x8x128xbf16>
    %357 = vector.shape_cast %356 : vector<1x8x128xbf16> to vector<8x128xbf16>
    %358 = vector.shape_cast %355 : vector<8x128xbf16> to vector<1x8x128xbf16>
    tpu.vector_store %arg6[%c3_101, %c0_102, %c0_103], %358 {strides = array<i32>} : memref<8x8x128xbf16, #tpu.memory_space<vmem>>, vector<1x8x128xbf16>,
    %c5_104 = arith.constant 5 : index
    %c0_105 = arith.constant 0 : index
    %c0_106 = arith.constant 0 : index
    %359 = vector.load %arg1[%c5_104, %c0_105, %c0_106] : memref<8x8x512xbf16, #tpu.memory_space<vmem>>, vector<1x8x512xbf16>
    %360 = vector.shape_cast %359 : vector<1x8x512xbf16> to vector<8x512xbf16>
    %361 = arith.extf %360 : vector<8x512xbf16> to vector<8x512xf32>
    %362 = arith.truncf %319 : vector<8x128xf32> to vector<8x128xbf16>
    %cst_107 = arith.constant dense<0.000000e+00> : vector<8x512xf32>
    %363 = tpu.matmul %362, %3, %cst_107 {dimension_numbers = #tpu.dot_dimension_numbers<[1], [0], [0], [1], [0, 0, 1, 1], [], []>} : vector<8x128xbf16>, vector<128x512xbf16>, vector<8x512xf32> -> vector<8x512xf32>
    %364 = arith.addf %361, %363 : vector<8x512xf32>
    %365 = vector.extract_strided_slice %364 {offsets = [0, 0], sizes = [8, 128], strides = [1, 1]} : vector<8x512xf32> to vector<8x128xf32>
    %366 = arith.negf %365 : vector<8x128xf32>
    %367 = math.exp %366 : vector<8x128xf32>
    %cst_108 = arith.constant 1.000000e+00 : f32
    %368 = vector.broadcast %cst_108 : f32 to vector<8x128xf32>
    %369 = arith.addf %368, %367 : vector<8x128xf32>
    %370 = arith.divf %368, %369 : vector<8x128xf32>
    %371 = vector.extract_strided_slice %364 {offsets = [0, 128], sizes = [8, 128], strides = [1, 1]} : vector<8x512xf32> to vector<8x128xf32>
    %372 = arith.negf %371 : vector<8x128xf32>
    %373 = math.exp %372 : vector<8x128xf32>
    %cst_109 = arith.constant 1.000000e+00 : f32
    %374 = vector.broadcast %cst_109 : f32 to vector<8x128xf32>
    %375 = arith.addf %374, %373 : vector<8x128xf32>
    %376 = arith.divf %374, %375 : vector<8x128xf32>
    %377 = vector.extract_strided_slice %364 {offsets = [0, 256], sizes = [8, 128], strides = [1, 1]} : vector<8x512xf32> to vector<8x128xf32>
    %378 = math.tanh %377 : vector<8x128xf32>
    %379 = vector.extract_strided_slice %364 {offsets = [0, 384], sizes = [8, 128], strides = [1, 1]} : vector<8x512xf32> to vector<8x128xf32>
    %380 = arith.negf %379 : vector<8x128xf32>
    %381 = math.exp %380 : vector<8x128xf32>
    %cst_110 = arith.constant 1.000000e+00 : f32
    %382 = vector.broadcast %cst_110 : f32 to vector<8x128xf32>
    %383 = arith.addf %382, %381 : vector<8x128xf32>
    %384 = arith.divf %382, %383 : vector<8x128xf32>
    %385 = arith.mulf %376, %317 : vector<8x128xf32>
    %386 = arith.mulf %370, %378 : vector<8x128xf32>
    %387 = arith.addf %385, %386 : vector<8x128xf32>
    %388 = math.tanh %387 : vector<8x128xf32>
    %389 = arith.mulf %384, %388 : vector<8x128xf32>
    %c2_111 = arith.constant 2 : index
    %c0_112 = arith.constant 0 : index
    %c0_113 = arith.constant 0 : index
    %390 = vector.load %arg2[%c2_111, %c0_112, %c0_113] : memref<8x8x512xbf16, #tpu.memory_space<vmem>>, vector<1x8x512xbf16>
    %391 = vector.shape_cast %390 : vector<1x8x512xbf16> to vector<8x512xbf16>
    %392 = arith.extf %391 : vector<8x512xbf16> to vector<8x512xf32>
    %393 = arith.truncf %350 : vector<8x128xf32> to vector<8x128xbf16>
    %cst_114 = arith.constant dense<0.000000e+00> : vector<8x512xf32>
    %394 = tpu.matmul %393, %4, %cst_114 {dimension_numbers = #tpu.dot_dimension_numbers<[1], [0], [0], [1], [0, 0, 1, 1], [], []>} : vector<8x128xbf16>, vector<128x512xbf16>, vector<8x512xf32> -> vector<8x512xf32>
    %395 = arith.addf %392, %394 : vector<8x512xf32>
    %396 = vector.extract_strided_slice %395 {offsets = [0, 0], sizes = [8, 128], strides = [1, 1]} : vector<8x512xf32> to vector<8x128xf32>
    %397 = arith.negf %396 : vector<8x128xf32>
    %398 = math.exp %397 : vector<8x128xf32>
    %cst_115 = arith.constant 1.000000e+00 : f32
    %399 = vector.broadcast %cst_115 : f32 to vector<8x128xf32>
    %400 = arith.addf %399, %398 : vector<8x128xf32>
    %401 = arith.divf %399, %400 : vector<8x128xf32>
    %402 = vector.extract_strided_slice %395 {offsets = [0, 128], sizes = [8, 128], strides = [1, 1]} : vector<8x512xf32> to vector<8x128xf32>
    %403 = arith.negf %402 : vector<8x128xf32>
    %404 = math.exp %403 : vector<8x128xf32>
    %cst_116 = arith.constant 1.000000e+00 : f32
    %405 = vector.broadcast %cst_116 : f32 to vector<8x128xf32>
    %406 = arith.addf %405, %404 : vector<8x128xf32>
    %407 = arith.divf %405, %406 : vector<8x128xf32>
    %408 = vector.extract_strided_slice %395 {offsets = [0, 256], sizes = [8, 128], strides = [1, 1]} : vector<8x512xf32> to vector<8x128xf32>
    %409 = math.tanh %408 : vector<8x128xf32>
    %410 = vector.extract_strided_slice %395 {offsets = [0, 384], sizes = [8, 128], strides = [1, 1]} : vector<8x512xf32> to vector<8x128xf32>
    %411 = arith.negf %410 : vector<8x128xf32>
    %412 = math.exp %411 : vector<8x128xf32>
    %cst_117 = arith.constant 1.000000e+00 : f32
    %413 = vector.broadcast %cst_117 : f32 to vector<8x128xf32>
    %414 = arith.addf %413, %412 : vector<8x128xf32>
    %415 = arith.divf %413, %414 : vector<8x128xf32>
    %416 = arith.mulf %407, %348 : vector<8x128xf32>
    %417 = arith.mulf %401, %409 : vector<8x128xf32>
    %418 = arith.addf %416, %417 : vector<8x128xf32>
    %419 = math.tanh %418 : vector<8x128xf32>
    %420 = arith.mulf %415, %419 : vector<8x128xf32>
    %421 = arith.truncf %389 : vector<8x128xf32> to vector<8x128xbf16>
    %c5_118 = arith.constant 5 : index
    %c0_119 = arith.constant 0 : index
    %c0_120 = arith.constant 0 : index
    %422 = vector.load %arg5[%c5_118, %c0_119, %c0_120] : memref<8x8x128xbf16, #tpu.memory_space<vmem>>, vector<1x8x128xbf16>
    %423 = vector.shape_cast %422 : vector<1x8x128xbf16> to vector<8x128xbf16>
    %424 = vector.shape_cast %421 : vector<8x128xbf16> to vector<1x8x128xbf16>
    tpu.vector_store %arg5[%c5_118, %c0_119, %c0_120], %424 {strides = array<i32>} : memref<8x8x128xbf16, #tpu.memory_space<vmem>>, vector<1x8x128xbf16>,
    %425 = arith.truncf %420 : vector<8x128xf32> to vector<8x128xbf16>
    %c2_121 = arith.constant 2 : index
    %c0_122 = arith.constant 0 : index
    %c0_123 = arith.constant 0 : index
    %426 = vector.load %arg6[%c2_121, %c0_122, %c0_123] : memref<8x8x128xbf16, #tpu.memory_space<vmem>>, vector<1x8x128xbf16>
    %427 = vector.shape_cast %426 : vector<1x8x128xbf16> to vector<8x128xbf16>
    %428 = vector.shape_cast %425 : vector<8x128xbf16> to vector<1x8x128xbf16>
    tpu.vector_store %arg6[%c2_121, %c0_122, %c0_123], %428 {strides = array<i32>} : memref<8x8x128xbf16, #tpu.memory_space<vmem>>, vector<1x8x128xbf16>,
    %c6_124 = arith.constant 6 : index
    %c0_125 = arith.constant 0 : index
    %c0_126 = arith.constant 0 : index
    %429 = vector.load %arg1[%c6_124, %c0_125, %c0_126] : memref<8x8x512xbf16, #tpu.memory_space<vmem>>, vector<1x8x512xbf16>
    %430 = vector.shape_cast %429 : vector<1x8x512xbf16> to vector<8x512xbf16>
    %431 = arith.extf %430 : vector<8x512xbf16> to vector<8x512xf32>
    %432 = arith.truncf %389 : vector<8x128xf32> to vector<8x128xbf16>
    %cst_127 = arith.constant dense<0.000000e+00> : vector<8x512xf32>
    %433 = tpu.matmul %432, %3, %cst_127 {dimension_numbers = #tpu.dot_dimension_numbers<[1], [0], [0], [1], [0, 0, 1, 1], [], []>} : vector<8x128xbf16>, vector<128x512xbf16>, vector<8x512xf32> -> vector<8x512xf32>
    %434 = arith.addf %431, %433 : vector<8x512xf32>
    %435 = vector.extract_strided_slice %434 {offsets = [0, 0], sizes = [8, 128], strides = [1, 1]} : vector<8x512xf32> to vector<8x128xf32>
    %436 = arith.negf %435 : vector<8x128xf32>
    %437 = math.exp %436 : vector<8x128xf32>
    %cst_128 = arith.constant 1.000000e+00 : f32
    %438 = vector.broadcast %cst_128 : f32 to vector<8x128xf32>
    %439 = arith.addf %438, %437 : vector<8x128xf32>
    %440 = arith.divf %438, %439 : vector<8x128xf32>
    %441 = vector.extract_strided_slice %434 {offsets = [0, 128], sizes = [8, 128], strides = [1, 1]} : vector<8x512xf32> to vector<8x128xf32>
    %442 = arith.negf %441 : vector<8x128xf32>
    %443 = math.exp %442 : vector<8x128xf32>
    %cst_129 = arith.constant 1.000000e+00 : f32
    %444 = vector.broadcast %cst_129 : f32 to vector<8x128xf32>
    %445 = arith.addf %444, %443 : vector<8x128xf32>
    %446 = arith.divf %444, %445 : vector<8x128xf32>
    %447 = vector.extract_strided_slice %434 {offsets = [0, 256], sizes = [8, 128], strides = [1, 1]} : vector<8x512xf32> to vector<8x128xf32>
    %448 = math.tanh %447 : vector<8x128xf32>
    %449 = vector.extract_strided_slice %434 {offsets = [0, 384], sizes = [8, 128], strides = [1, 1]} : vector<8x512xf32> to vector<8x128xf32>
    %450 = arith.negf %449 : vector<8x128xf32>
    %451 = math.exp %450 : vector<8x128xf32>
    %cst_130 = arith.constant 1.000000e+00 : f32
    %452 = vector.broadcast %cst_130 : f32 to vector<8x128xf32>
    %453 = arith.addf %452, %451 : vector<8x128xf32>
    %454 = arith.divf %452, %453 : vector<8x128xf32>
    %455 = arith.mulf %446, %387 : vector<8x128xf32>
    %456 = arith.mulf %440, %448 : vector<8x128xf32>
    %457 = arith.addf %455, %456 : vector<8x128xf32>
    %458 = math.tanh %457 : vector<8x128xf32>
    %459 = arith.mulf %454, %458 : vector<8x128xf32>
    %c1_131 = arith.constant 1 : index
    %c0_132 = arith.constant 0 : index
    %c0_133 = arith.constant 0 : index
    %460 = vector.load %arg2[%c1_131, %c0_132, %c0_133] : memref<8x8x512xbf16, #tpu.memory_space<vmem>>, vector<1x8x512xbf16>
    %461 = vector.shape_cast %460 : vector<1x8x512xbf16> to vector<8x512xbf16>
    %462 = arith.extf %461 : vector<8x512xbf16> to vector<8x512xf32>
    %463 = arith.truncf %420 : vector<8x128xf32> to vector<8x128xbf16>
    %cst_134 = arith.constant dense<0.000000e+00> : vector<8x512xf32>
    %464 = tpu.matmul %463, %4, %cst_134 {dimension_numbers = #tpu.dot_dimension_numbers<[1], [0], [0], [1], [0, 0, 1, 1], [], []>} : vector<8x128xbf16>, vector<128x512xbf16>, vector<8x512xf32> -> vector<8x512xf32>
    %465 = arith.addf %462, %464 : vector<8x512xf32>
    %466 = vector.extract_strided_slice %465 {offsets = [0, 0], sizes = [8, 128], strides = [1, 1]} : vector<8x512xf32> to vector<8x128xf32>
    %467 = arith.negf %466 : vector<8x128xf32>
    %468 = math.exp %467 : vector<8x128xf32>
    %cst_135 = arith.constant 1.000000e+00 : f32
    %469 = vector.broadcast %cst_135 : f32 to vector<8x128xf32>
    %470 = arith.addf %469, %468 : vector<8x128xf32>
    %471 = arith.divf %469, %470 : vector<8x128xf32>
    %472 = vector.extract_strided_slice %465 {offsets = [0, 128], sizes = [8, 128], strides = [1, 1]} : vector<8x512xf32> to vector<8x128xf32>
    %473 = arith.negf %472 : vector<8x128xf32>
    %474 = math.exp %473 : vector<8x128xf32>
    %cst_136 = arith.constant 1.000000e+00 : f32
    %475 = vector.broadcast %cst_136 : f32 to vector<8x128xf32>
    %476 = arith.addf %475, %474 : vector<8x128xf32>
    %477 = arith.divf %475, %476 : vector<8x128xf32>
    %478 = vector.extract_strided_slice %465 {offsets = [0, 256], sizes = [8, 128], strides = [1, 1]} : vector<8x512xf32> to vector<8x128xf32>
    %479 = math.tanh %478 : vector<8x128xf32>
    %480 = vector.extract_strided_slice %465 {offsets = [0, 384], sizes = [8, 128], strides = [1, 1]} : vector<8x512xf32> to vector<8x128xf32>
    %481 = arith.negf %480 : vector<8x128xf32>
    %482 = math.exp %481 : vector<8x128xf32>
    %cst_137 = arith.constant 1.000000e+00 : f32
    %483 = vector.broadcast %cst_137 : f32 to vector<8x128xf32>
    %484 = arith.addf %483, %482 : vector<8x128xf32>
    %485 = arith.divf %483, %484 : vector<8x128xf32>
    %486 = arith.mulf %477, %418 : vector<8x128xf32>
    %487 = arith.mulf %471, %479 : vector<8x128xf32>
    %488 = arith.addf %486, %487 : vector<8x128xf32>
    %489 = math.tanh %488 : vector<8x128xf32>
    %490 = arith.mulf %485, %489 : vector<8x128xf32>
    %491 = arith.truncf %459 : vector<8x128xf32> to vector<8x128xbf16>
    %c6_138 = arith.constant 6 : index
    %c0_139 = arith.constant 0 : index
    %c0_140 = arith.constant 0 : index
    %492 = vector.load %arg5[%c6_138, %c0_139, %c0_140] : memref<8x8x128xbf16, #tpu.memory_space<vmem>>, vector<1x8x128xbf16>
    %493 = vector.shape_cast %492 : vector<1x8x128xbf16> to vector<8x128xbf16>
    %494 = vector.shape_cast %491 : vector<8x128xbf16> to vector<1x8x128xbf16>
    tpu.vector_store %arg5[%c6_138, %c0_139, %c0_140], %494 {strides = array<i32>} : memref<8x8x128xbf16, #tpu.memory_space<vmem>>, vector<1x8x128xbf16>,
    %495 = arith.truncf %490 : vector<8x128xf32> to vector<8x128xbf16>
    %c1_141 = arith.constant 1 : index
    %c0_142 = arith.constant 0 : index
    %c0_143 = arith.constant 0 : index
    %496 = vector.load %arg6[%c1_141, %c0_142, %c0_143] : memref<8x8x128xbf16, #tpu.memory_space<vmem>>, vector<1x8x128xbf16>
    %497 = vector.shape_cast %496 : vector<1x8x128xbf16> to vector<8x128xbf16>
    %498 = vector.shape_cast %495 : vector<8x128xbf16> to vector<1x8x128xbf16>
    tpu.vector_store %arg6[%c1_141, %c0_142, %c0_143], %498 {strides = array<i32>} : memref<8x8x128xbf16, #tpu.memory_space<vmem>>, vector<1x8x128xbf16>,
    %c7_144 = arith.constant 7 : index
    %c0_145 = arith.constant 0 : index
    %c0_146 = arith.constant 0 : index
    %499 = vector.load %arg1[%c7_144, %c0_145, %c0_146] : memref<8x8x512xbf16, #tpu.memory_space<vmem>>, vector<1x8x512xbf16>
    %500 = vector.shape_cast %499 : vector<1x8x512xbf16> to vector<8x512xbf16>
    %501 = arith.extf %500 : vector<8x512xbf16> to vector<8x512xf32>
    %502 = arith.truncf %459 : vector<8x128xf32> to vector<8x128xbf16>
    %cst_147 = arith.constant dense<0.000000e+00> : vector<8x512xf32>
    %503 = tpu.matmul %502, %3, %cst_147 {dimension_numbers = #tpu.dot_dimension_numbers<[1], [0], [0], [1], [0, 0, 1, 1], [], []>} : vector<8x128xbf16>, vector<128x512xbf16>, vector<8x512xf32> -> vector<8x512xf32>
    %504 = arith.addf %501, %503 : vector<8x512xf32>
    %505 = vector.extract_strided_slice %504 {offsets = [0, 0], sizes = [8, 128], strides = [1, 1]} : vector<8x512xf32> to vector<8x128xf32>
    %506 = arith.negf %505 : vector<8x128xf32>
    %507 = math.exp %506 : vector<8x128xf32>
    %cst_148 = arith.constant 1.000000e+00 : f32
    %508 = vector.broadcast %cst_148 : f32 to vector<8x128xf32>
    %509 = arith.addf %508, %507 : vector<8x128xf32>
    %510 = arith.divf %508, %509 : vector<8x128xf32>
    %511 = vector.extract_strided_slice %504 {offsets = [0, 128], sizes = [8, 128], strides = [1, 1]} : vector<8x512xf32> to vector<8x128xf32>
    %512 = arith.negf %511 : vector<8x128xf32>
    %513 = math.exp %512 : vector<8x128xf32>
    %cst_149 = arith.constant 1.000000e+00 : f32
    %514 = vector.broadcast %cst_149 : f32 to vector<8x128xf32>
    %515 = arith.addf %514, %513 : vector<8x128xf32>
    %516 = arith.divf %514, %515 : vector<8x128xf32>
    %517 = vector.extract_strided_slice %504 {offsets = [0, 256], sizes = [8, 128], strides = [1, 1]} : vector<8x512xf32> to vector<8x128xf32>
    %518 = math.tanh %517 : vector<8x128xf32>
    %519 = vector.extract_strided_slice %504 {offsets = [0, 384], sizes = [8, 128], strides = [1, 1]} : vector<8x512xf32> to vector<8x128xf32>
    %520 = arith.negf %519 : vector<8x128xf32>
    %521 = math.exp %520 : vector<8x128xf32>
    %cst_150 = arith.constant 1.000000e+00 : f32
    %522 = vector.broadcast %cst_150 : f32 to vector<8x128xf32>
    %523 = arith.addf %522, %521 : vector<8x128xf32>
    %524 = arith.divf %522, %523 : vector<8x128xf32>
    %525 = arith.mulf %516, %457 : vector<8x128xf32>
    %526 = arith.mulf %510, %518 : vector<8x128xf32>
    %527 = arith.addf %525, %526 : vector<8x128xf32>
    %528 = math.tanh %527 : vector<8x128xf32>
    %529 = arith.mulf %524, %528 : vector<8x128xf32>
    %c0_151 = arith.constant 0 : index
    %c0_152 = arith.constant 0 : index
    %c0_153 = arith.constant 0 : index
    %530 = vector.load %arg2[%c0_151, %c0_152, %c0_153] : memref<8x8x512xbf16, #tpu.memory_space<vmem>>, vector<1x8x512xbf16>
    %531 = vector.shape_cast %530 : vector<1x8x512xbf16> to vector<8x512xbf16>
    %532 = arith.extf %531 : vector<8x512xbf16> to vector<8x512xf32>
    %533 = arith.truncf %490 : vector<8x128xf32> to vector<8x128xbf16>
    %cst_154 = arith.constant dense<0.000000e+00> : vector<8x512xf32>
    %534 = tpu.matmul %533, %4, %cst_154 {dimension_numbers = #tpu.dot_dimension_numbers<[1], [0], [0], [1], [0, 0, 1, 1], [], []>} : vector<8x128xbf16>, vector<128x512xbf16>, vector<8x512xf32> -> vector<8x512xf32>
    %535 = arith.addf %532, %534 : vector<8x512xf32>
    %536 = vector.extract_strided_slice %535 {offsets = [0, 0], sizes = [8, 128], strides = [1, 1]} : vector<8x512xf32> to vector<8x128xf32>
    %537 = arith.negf %536 : vector<8x128xf32>
    %538 = math.exp %537 : vector<8x128xf32>
    %cst_155 = arith.constant 1.000000e+00 : f32
    %539 = vector.broadcast %cst_155 : f32 to vector<8x128xf32>
    %540 = arith.addf %539, %538 : vector<8x128xf32>
    %541 = arith.divf %539, %540 : vector<8x128xf32>
    %542 = vector.extract_strided_slice %535 {offsets = [0, 128], sizes = [8, 128], strides = [1, 1]} : vector<8x512xf32> to vector<8x128xf32>
    %543 = arith.negf %542 : vector<8x128xf32>
    %544 = math.exp %543 : vector<8x128xf32>
    %cst_156 = arith.constant 1.000000e+00 : f32
    %545 = vector.broadcast %cst_156 : f32 to vector<8x128xf32>
    %546 = arith.addf %545, %544 : vector<8x128xf32>
    %547 = arith.divf %545, %546 : vector<8x128xf32>
    %548 = vector.extract_strided_slice %535 {offsets = [0, 256], sizes = [8, 128], strides = [1, 1]} : vector<8x512xf32> to vector<8x128xf32>
    %549 = math.tanh %548 : vector<8x128xf32>
    %550 = vector.extract_strided_slice %535 {offsets = [0, 384], sizes = [8, 128], strides = [1, 1]} : vector<8x512xf32> to vector<8x128xf32>
    %551 = arith.negf %550 : vector<8x128xf32>
    %552 = math.exp %551 : vector<8x128xf32>
    %cst_157 = arith.constant 1.000000e+00 : f32
    %553 = vector.broadcast %cst_157 : f32 to vector<8x128xf32>
    %554 = arith.addf %553, %552 : vector<8x128xf32>
    %555 = arith.divf %553, %554 : vector<8x128xf32>
    %556 = arith.mulf %547, %488 : vector<8x128xf32>
    %557 = arith.mulf %541, %549 : vector<8x128xf32>
    %558 = arith.addf %556, %557 : vector<8x128xf32>
    %559 = math.tanh %558 : vector<8x128xf32>
    %560 = arith.mulf %555, %559 : vector<8x128xf32>
    %561 = arith.truncf %529 : vector<8x128xf32> to vector<8x128xbf16>
    %c7_158 = arith.constant 7 : index
    %c0_159 = arith.constant 0 : index
    %c0_160 = arith.constant 0 : index
    %562 = vector.load %arg5[%c7_158, %c0_159, %c0_160] : memref<8x8x128xbf16, #tpu.memory_space<vmem>>, vector<1x8x128xbf16>
    %563 = vector.shape_cast %562 : vector<1x8x128xbf16> to vector<8x128xbf16>
    %564 = vector.shape_cast %561 : vector<8x128xbf16> to vector<1x8x128xbf16>
    tpu.vector_store %arg5[%c7_158, %c0_159, %c0_160], %564 {strides = array<i32>} : memref<8x8x128xbf16, #tpu.memory_space<vmem>>, vector<1x8x128xbf16>,
    %565 = arith.truncf %560 : vector<8x128xf32> to vector<8x128xbf16>
    %c0_161 = arith.constant 0 : index
    %c0_162 = arith.constant 0 : index
    %c0_163 = arith.constant 0 : index
    %566 = vector.load %arg6[%c0_161, %c0_162, %c0_163] : memref<8x8x128xbf16, #tpu.memory_space<vmem>>, vector<1x8x128xbf16>
    %567 = vector.shape_cast %566 : vector<1x8x128xbf16> to vector<8x128xbf16>
    %568 = vector.shape_cast %565 : vector<8x128xbf16> to vector<1x8x128xbf16>
    tpu.vector_store %arg6[%c0_161, %c0_162, %c0_163], %568 {strides = array<i32>} : memref<8x8x128xbf16, #tpu.memory_space<vmem>>, vector<1x8x128xbf16>,
    %c0_164 = arith.constant 0 : index
    %c0_165 = arith.constant 0 : index
    %569 = vector.load %arg7[%c0_164, %c0_165] : memref<8x128xf32, #tpu.memory_space<vmem>>, vector<8x128xf32>
    tpu.vector_store %arg7[%c0_164, %c0_165], %529 {strides = array<i32>} : memref<8x128xf32, #tpu.memory_space<vmem>>, vector<8x128xf32>,
    %c0_166 = arith.constant 0 : index
    %c0_167 = arith.constant 0 : index
    %570 = vector.load %arg8[%c0_166, %c0_167] : memref<8x128xf32, #tpu.memory_space<vmem>>, vector<8x128xf32>
    tpu.vector_store %arg8[%c0_166, %c0_167], %527 {strides = array<i32>} : memref<8x128xf32, #tpu.memory_space<vmem>>, vector<8x128xf32>,
    %c0_168 = arith.constant 0 : index
    %c0_169 = arith.constant 0 : index
    %571 = vector.load %arg9[%c0_168, %c0_169] : memref<8x128xf32, #tpu.memory_space<vmem>>, vector<8x128xf32>
    tpu.vector_store %arg9[%c0_168, %c0_169], %560 {strides = array<i32>} : memref<8x128xf32, #tpu.memory_space<vmem>>, vector<8x128xf32>,
    %c0_170 = arith.constant 0 : index
    %c0_171 = arith.constant 0 : index
    %572 = vector.load %arg10[%c0_170, %c0_171] : memref<8x128xf32, #tpu.memory_space<vmem>>, vector<8x128xf32>
    tpu.vector_store %arg10[%c0_170, %c0_171], %558 {strides = array<i32>} : memref<8x128xf32, #tpu.memory_space<vmem>>, vector<8x128xf32>,
    return
  }
  func.func @transform_0(%arg0: i32) -> (i32, i32, i32) {
    %c0_i32 = arith.constant 0 : i32
    %c0_i32_0 = arith.constant 0 : i32
    %c0_i32_1 = arith.constant 0 : i32
    return %arg0, %c0_i32, %c0_i32_0 : i32, i32, i32
  }
  func.func @transform_1(%arg0: i32) -> (i32, i32, i32) {
    %c0_i32 = arith.constant 0 : i32
    %0 = arith.subi %c0_i32, %arg0 : i32
    %c0_i32_0 = arith.constant 0 : i32
    %c0_i32_1 = arith.constant 0 : i32
    %c0_i32_2 = arith.constant 0 : i32
    return %0, %c0_i32_0, %c0_i32_1 : i32, i32, i32
  }
  func.func @transform_2(%arg0: i32) -> (i32, i32) {
    %c0_i32 = arith.constant 0 : i32
    %c0_i32_0 = arith.constant 0 : i32
    %c0_i32_1 = arith.constant 0 : i32
    return %c0_i32, %c0_i32_0 : i32, i32
  }
  func.func @transform_3(%arg0: i32) -> (i32, i32) {
    %c0_i32 = arith.constant 0 : i32
    %c0_i32_0 = arith.constant 0 : i32
    %c0_i32_1 = arith.constant 0 : i32
    return %c0_i32, %c0_i32_0 : i32, i32
  }
  func.func @transform_4(%arg0: i32) -> (i32, i32, i32) {
    %c0_i32 = arith.constant 0 : i32
    %c0_i32_0 = arith.constant 0 : i32
    %c0_i32_1 = arith.constant 0 : i32
    return %arg0, %c0_i32, %c0_i32_0 : i32, i32, i32
  }
  func.func @transform_5(%arg0: i32) -> (i32, i32, i32) {
    %c0_i32 = arith.constant 0 : i32
    %0 = arith.subi %c0_i32, %arg0 : i32
    %c0_i32_0 = arith.constant 0 : i32
    %c0_i32_1 = arith.constant 0 : i32
    %c0_i32_2 = arith.constant 0 : i32
    return %0, %c0_i32_0, %c0_i32_1 : i32, i32, i32
  }
}

module attributes {stable_mosaic.version = 11 : i64} {
  func.func @_bilstm_chunk_kernel(%arg0: i32, %arg1: memref<8x8x512xbf16, #tpu.memory_space<vmem>>, %arg2: memref<8x8x512xbf16, #tpu.memory_space<vmem>>, %arg3: memref<128x512xbf16, #tpu.memory_space<vmem>>, %arg4: memref<128x512xbf16, #tpu.memory_space<vmem>>, %arg5: memref<2x8x128xbf16, #tpu.memory_space<vmem>>, %arg6: memref<2x8x128xbf16, #tpu.memory_space<vmem>>, %arg7: memref<8x128xf32, #tpu.memory_space<vmem>>, %arg8: memref<8x128xf32, #tpu.memory_space<vmem>>, %arg9: memref<8x128xf32, #tpu.memory_space<vmem>>, %arg10: memref<8x128xf32, #tpu.memory_space<vmem>>) attributes {dimension_semantics = [#tpu.dimension_semantics<arbitrary>], iteration_bounds = array<i64: 1>, scalar_prefetch = 0 : i64, scratch_operands = 4 : i64, tpu.core_type = #tpu.core_type<tc>, window_params = [{transform_indices = @transform_0, window_bounds = array<i64: 8, 8, 512>}, {transform_indices = @transform_1, window_bounds = array<i64: 8, 8, 512>}, {pipeline_mode = #tpu.pipeline_mode<synchronous>, transform_indices = @transform_2, window_bounds = array<i64: 128, 512>}, {pipeline_mode = #tpu.pipeline_mode<synchronous>, transform_indices = @transform_3, window_bounds = array<i64: 128, 512>}, {pipeline_mode = #tpu.pipeline_mode<synchronous>, transform_indices = @transform_4, window_bounds = array<i64: 2, 8, 128>}, {pipeline_mode = #tpu.pipeline_mode<synchronous>, transform_indices = @transform_5, window_bounds = array<i64: 2, 8, 128>}]} {
    %c0_i32 = arith.constant 0 : i32
    %0 = arith.cmpi eq, %arg0, %c0_i32 : i32
    %1 = arith.extui %0 : i1 to i32
    %c0_i32_0 = arith.constant 0 : i32
    %2 = arith.cmpi ne, %1, %c0_i32_0 : i32
    scf.if %2 {
      %cst_132 = arith.constant 0.000000e+00 : f32
      %521 = vector.broadcast %cst_132 : f32 to vector<8x128xf32>
      %c0_133 = arith.constant 0 : index
      %c0_134 = arith.constant 0 : index
      %522 = vector.load %arg7[%c0_133, %c0_134] : memref<8x128xf32, #tpu.memory_space<vmem>>, vector<8x128xf32>
      tpu.vector_store %arg7[%c0_133, %c0_134], %521 {strides = array<i32>} : memref<8x128xf32, #tpu.memory_space<vmem>>, vector<8x128xf32>,
      %cst_135 = arith.constant 0.000000e+00 : f32
      %523 = vector.broadcast %cst_135 : f32 to vector<8x128xf32>
      %c0_136 = arith.constant 0 : index
      %c0_137 = arith.constant 0 : index
      %524 = vector.load %arg8[%c0_136, %c0_137] : memref<8x128xf32, #tpu.memory_space<vmem>>, vector<8x128xf32>
      tpu.vector_store %arg8[%c0_136, %c0_137], %523 {strides = array<i32>} : memref<8x128xf32, #tpu.memory_space<vmem>>, vector<8x128xf32>,
      %cst_138 = arith.constant 0.000000e+00 : f32
      %525 = vector.broadcast %cst_138 : f32 to vector<8x128xf32>
      %c0_139 = arith.constant 0 : index
      %c0_140 = arith.constant 0 : index
      %526 = vector.load %arg9[%c0_139, %c0_140] : memref<8x128xf32, #tpu.memory_space<vmem>>, vector<8x128xf32>
      tpu.vector_store %arg9[%c0_139, %c0_140], %525 {strides = array<i32>} : memref<8x128xf32, #tpu.memory_space<vmem>>, vector<8x128xf32>,
      %cst_141 = arith.constant 0.000000e+00 : f32
      %527 = vector.broadcast %cst_141 : f32 to vector<8x128xf32>
      %c0_142 = arith.constant 0 : index
      %c0_143 = arith.constant 0 : index
      %528 = vector.load %arg10[%c0_142, %c0_143] : memref<8x128xf32, #tpu.memory_space<vmem>>, vector<8x128xf32>
      tpu.vector_store %arg10[%c0_142, %c0_143], %527 {strides = array<i32>} : memref<8x128xf32, #tpu.memory_space<vmem>>, vector<8x128xf32>,
    } else {
    }
    %c0 = arith.constant 0 : index
    %c0_1 = arith.constant 0 : index
    %3 = vector.load %arg3[%c0, %c0_1] : memref<128x512xbf16, #tpu.memory_space<vmem>>, vector<128x512xbf16>
    %c0_2 = arith.constant 0 : index
    %c0_3 = arith.constant 0 : index
    %4 = vector.load %arg4[%c0_2, %c0_3] : memref<128x512xbf16, #tpu.memory_space<vmem>>, vector<128x512xbf16>
    %c0_4 = arith.constant 0 : index
    %c0_5 = arith.constant 0 : index
    %5 = vector.load %arg7[%c0_4, %c0_5] : memref<8x128xf32, #tpu.memory_space<vmem>>, vector<8x128xf32>
    %c0_6 = arith.constant 0 : index
    %c0_7 = arith.constant 0 : index
    %6 = vector.load %arg8[%c0_6, %c0_7] : memref<8x128xf32, #tpu.memory_space<vmem>>, vector<8x128xf32>
    %c0_8 = arith.constant 0 : index
    %c0_9 = arith.constant 0 : index
    %7 = vector.load %arg9[%c0_8, %c0_9] : memref<8x128xf32, #tpu.memory_space<vmem>>, vector<8x128xf32>
    %c0_10 = arith.constant 0 : index
    %c0_11 = arith.constant 0 : index
    %8 = vector.load %arg10[%c0_10, %c0_11] : memref<8x128xf32, #tpu.memory_space<vmem>>, vector<8x128xf32>
    %c0_12 = arith.constant 0 : index
    %c0_13 = arith.constant 0 : index
    %c0_14 = arith.constant 0 : index
    %9 = vector.load %arg1[%c0_12, %c0_13, %c0_14] : memref<8x8x512xbf16, #tpu.memory_space<vmem>>, vector<1x8x512xbf16>
    %10 = vector.shape_cast %9 : vector<1x8x512xbf16> to vector<8x512xbf16>
    %11 = arith.extf %10 : vector<8x512xbf16> to vector<8x512xf32>
    %12 = arith.truncf %5 : vector<8x128xf32> to vector<8x128xbf16>
    %cst = arith.constant dense<0.000000e+00> : vector<8x512xf32>
    %13 = tpu.matmul %12, %3, %cst {dimension_numbers = #tpu.dot_dimension_numbers<[1], [0], [0], [1], [0, 0, 1, 1], [], []>} : vector<8x128xbf16>, vector<128x512xbf16>, vector<8x512xf32> -> vector<8x512xf32>
    %14 = arith.addf %11, %13 : vector<8x512xf32>
    %15 = vector.extract_strided_slice %14 {offsets = [0, 0], sizes = [8, 128], strides = [1, 1]} : vector<8x512xf32> to vector<8x128xf32>
    %16 = arith.negf %15 : vector<8x128xf32>
    %17 = math.exp %16 : vector<8x128xf32>
    %cst_15 = arith.constant 1.000000e+00 : f32
    %18 = vector.broadcast %cst_15 : f32 to vector<8x128xf32>
    %19 = arith.addf %18, %17 : vector<8x128xf32>
    %20 = arith.divf %18, %19 : vector<8x128xf32>
    %21 = vector.extract_strided_slice %14 {offsets = [0, 128], sizes = [8, 128], strides = [1, 1]} : vector<8x512xf32> to vector<8x128xf32>
    %22 = arith.negf %21 : vector<8x128xf32>
    %23 = math.exp %22 : vector<8x128xf32>
    %cst_16 = arith.constant 1.000000e+00 : f32
    %24 = vector.broadcast %cst_16 : f32 to vector<8x128xf32>
    %25 = arith.addf %24, %23 : vector<8x128xf32>
    %26 = arith.divf %24, %25 : vector<8x128xf32>
    %27 = vector.extract_strided_slice %14 {offsets = [0, 256], sizes = [8, 128], strides = [1, 1]} : vector<8x512xf32> to vector<8x128xf32>
    %28 = math.tanh %27 : vector<8x128xf32>
    %29 = vector.extract_strided_slice %14 {offsets = [0, 384], sizes = [8, 128], strides = [1, 1]} : vector<8x512xf32> to vector<8x128xf32>
    %30 = arith.negf %29 : vector<8x128xf32>
    %31 = math.exp %30 : vector<8x128xf32>
    %cst_17 = arith.constant 1.000000e+00 : f32
    %32 = vector.broadcast %cst_17 : f32 to vector<8x128xf32>
    %33 = arith.addf %32, %31 : vector<8x128xf32>
    %34 = arith.divf %32, %33 : vector<8x128xf32>
    %35 = arith.mulf %26, %6 : vector<8x128xf32>
    %36 = arith.mulf %20, %28 : vector<8x128xf32>
    %37 = arith.addf %35, %36 : vector<8x128xf32>
    %38 = math.tanh %37 : vector<8x128xf32>
    %39 = arith.mulf %34, %38 : vector<8x128xf32>
    %c7 = arith.constant 7 : index
    %c0_18 = arith.constant 0 : index
    %c0_19 = arith.constant 0 : index
    %40 = vector.load %arg2[%c7, %c0_18, %c0_19] : memref<8x8x512xbf16, #tpu.memory_space<vmem>>, vector<1x8x512xbf16>
    %41 = vector.shape_cast %40 : vector<1x8x512xbf16> to vector<8x512xbf16>
    %42 = arith.extf %41 : vector<8x512xbf16> to vector<8x512xf32>
    %43 = arith.truncf %7 : vector<8x128xf32> to vector<8x128xbf16>
    %cst_20 = arith.constant dense<0.000000e+00> : vector<8x512xf32>
    %44 = tpu.matmul %43, %4, %cst_20 {dimension_numbers = #tpu.dot_dimension_numbers<[1], [0], [0], [1], [0, 0, 1, 1], [], []>} : vector<8x128xbf16>, vector<128x512xbf16>, vector<8x512xf32> -> vector<8x512xf32>
    %45 = arith.addf %42, %44 : vector<8x512xf32>
    %46 = vector.extract_strided_slice %45 {offsets = [0, 0], sizes = [8, 128], strides = [1, 1]} : vector<8x512xf32> to vector<8x128xf32>
    %47 = arith.negf %46 : vector<8x128xf32>
    %48 = math.exp %47 : vector<8x128xf32>
    %cst_21 = arith.constant 1.000000e+00 : f32
    %49 = vector.broadcast %cst_21 : f32 to vector<8x128xf32>
    %50 = arith.addf %49, %48 : vector<8x128xf32>
    %51 = arith.divf %49, %50 : vector<8x128xf32>
    %52 = vector.extract_strided_slice %45 {offsets = [0, 128], sizes = [8, 128], strides = [1, 1]} : vector<8x512xf32> to vector<8x128xf32>
    %53 = arith.negf %52 : vector<8x128xf32>
    %54 = math.exp %53 : vector<8x128xf32>
    %cst_22 = arith.constant 1.000000e+00 : f32
    %55 = vector.broadcast %cst_22 : f32 to vector<8x128xf32>
    %56 = arith.addf %55, %54 : vector<8x128xf32>
    %57 = arith.divf %55, %56 : vector<8x128xf32>
    %58 = vector.extract_strided_slice %45 {offsets = [0, 256], sizes = [8, 128], strides = [1, 1]} : vector<8x512xf32> to vector<8x128xf32>
    %59 = math.tanh %58 : vector<8x128xf32>
    %60 = vector.extract_strided_slice %45 {offsets = [0, 384], sizes = [8, 128], strides = [1, 1]} : vector<8x512xf32> to vector<8x128xf32>
    %61 = arith.negf %60 : vector<8x128xf32>
    %62 = math.exp %61 : vector<8x128xf32>
    %cst_23 = arith.constant 1.000000e+00 : f32
    %63 = vector.broadcast %cst_23 : f32 to vector<8x128xf32>
    %64 = arith.addf %63, %62 : vector<8x128xf32>
    %65 = arith.divf %63, %64 : vector<8x128xf32>
    %66 = arith.mulf %57, %8 : vector<8x128xf32>
    %67 = arith.mulf %51, %59 : vector<8x128xf32>
    %68 = arith.addf %66, %67 : vector<8x128xf32>
    %69 = math.tanh %68 : vector<8x128xf32>
    %70 = arith.mulf %65, %69 : vector<8x128xf32>
    %c0_i32_24 = arith.constant 0 : i32
    %71 = arith.cmpi eq, %arg0, %c0_i32_24 : i32
    %72 = arith.extui %71 : i1 to i32
    %c0_i32_25 = arith.constant 0 : i32
    %73 = arith.cmpi ne, %72, %c0_i32_25 : i32
    scf.if %73 {
      %521 = arith.truncf %39 : vector<8x128xf32> to vector<8x128xbf16>
      %c0_132 = arith.constant 0 : index
      %c0_133 = arith.constant 0 : index
      %c0_134 = arith.constant 0 : index
      %522 = vector.load %arg5[%c0_132, %c0_133, %c0_134] : memref<2x8x128xbf16, #tpu.memory_space<vmem>>, vector<1x8x128xbf16>
      %523 = vector.shape_cast %522 : vector<1x8x128xbf16> to vector<8x128xbf16>
      %524 = vector.shape_cast %521 : vector<8x128xbf16> to vector<1x8x128xbf16>
      tpu.vector_store %arg5[%c0_132, %c0_133, %c0_134], %524 {strides = array<i32>} : memref<2x8x128xbf16, #tpu.memory_space<vmem>>, vector<1x8x128xbf16>,
    } else {
    }
    %c0_i32_26 = arith.constant 0 : i32
    %74 = arith.cmpi eq, %arg0, %c0_i32_26 : i32
    %75 = arith.extui %74 : i1 to i32
    %c0_i32_27 = arith.constant 0 : i32
    %76 = arith.cmpi ne, %75, %c0_i32_27 : i32
    scf.if %76 {
      %521 = arith.truncf %70 : vector<8x128xf32> to vector<8x128xbf16>
      %c1_132 = arith.constant 1 : index
      %c0_133 = arith.constant 0 : index
      %c0_134 = arith.constant 0 : index
      %522 = vector.load %arg6[%c1_132, %c0_133, %c0_134] : memref<2x8x128xbf16, #tpu.memory_space<vmem>>, vector<1x8x128xbf16>
      %523 = vector.shape_cast %522 : vector<1x8x128xbf16> to vector<8x128xbf16>
      %524 = vector.shape_cast %521 : vector<8x128xbf16> to vector<1x8x128xbf16>
      tpu.vector_store %arg6[%c1_132, %c0_133, %c0_134], %524 {strides = array<i32>} : memref<2x8x128xbf16, #tpu.memory_space<vmem>>, vector<1x8x128xbf16>,
    } else {
    }
    %c1 = arith.constant 1 : index
    %c0_28 = arith.constant 0 : index
    %c0_29 = arith.constant 0 : index
    %77 = vector.load %arg1[%c1, %c0_28, %c0_29] : memref<8x8x512xbf16, #tpu.memory_space<vmem>>, vector<1x8x512xbf16>
    %78 = vector.shape_cast %77 : vector<1x8x512xbf16> to vector<8x512xbf16>
    %79 = arith.extf %78 : vector<8x512xbf16> to vector<8x512xf32>
    %80 = arith.truncf %39 : vector<8x128xf32> to vector<8x128xbf16>
    %cst_30 = arith.constant dense<0.000000e+00> : vector<8x512xf32>
    %81 = tpu.matmul %80, %3, %cst_30 {dimension_numbers = #tpu.dot_dimension_numbers<[1], [0], [0], [1], [0, 0, 1, 1], [], []>} : vector<8x128xbf16>, vector<128x512xbf16>, vector<8x512xf32> -> vector<8x512xf32>
    %82 = arith.addf %79, %81 : vector<8x512xf32>
    %83 = vector.extract_strided_slice %82 {offsets = [0, 0], sizes = [8, 128], strides = [1, 1]} : vector<8x512xf32> to vector<8x128xf32>
    %84 = arith.negf %83 : vector<8x128xf32>
    %85 = math.exp %84 : vector<8x128xf32>
    %cst_31 = arith.constant 1.000000e+00 : f32
    %86 = vector.broadcast %cst_31 : f32 to vector<8x128xf32>
    %87 = arith.addf %86, %85 : vector<8x128xf32>
    %88 = arith.divf %86, %87 : vector<8x128xf32>
    %89 = vector.extract_strided_slice %82 {offsets = [0, 128], sizes = [8, 128], strides = [1, 1]} : vector<8x512xf32> to vector<8x128xf32>
    %90 = arith.negf %89 : vector<8x128xf32>
    %91 = math.exp %90 : vector<8x128xf32>
    %cst_32 = arith.constant 1.000000e+00 : f32
    %92 = vector.broadcast %cst_32 : f32 to vector<8x128xf32>
    %93 = arith.addf %92, %91 : vector<8x128xf32>
    %94 = arith.divf %92, %93 : vector<8x128xf32>
    %95 = vector.extract_strided_slice %82 {offsets = [0, 256], sizes = [8, 128], strides = [1, 1]} : vector<8x512xf32> to vector<8x128xf32>
    %96 = math.tanh %95 : vector<8x128xf32>
    %97 = vector.extract_strided_slice %82 {offsets = [0, 384], sizes = [8, 128], strides = [1, 1]} : vector<8x512xf32> to vector<8x128xf32>
    %98 = arith.negf %97 : vector<8x128xf32>
    %99 = math.exp %98 : vector<8x128xf32>
    %cst_33 = arith.constant 1.000000e+00 : f32
    %100 = vector.broadcast %cst_33 : f32 to vector<8x128xf32>
    %101 = arith.addf %100, %99 : vector<8x128xf32>
    %102 = arith.divf %100, %101 : vector<8x128xf32>
    %103 = arith.mulf %94, %37 : vector<8x128xf32>
    %104 = arith.mulf %88, %96 : vector<8x128xf32>
    %105 = arith.addf %103, %104 : vector<8x128xf32>
    %106 = math.tanh %105 : vector<8x128xf32>
    %107 = arith.mulf %102, %106 : vector<8x128xf32>
    %c6 = arith.constant 6 : index
    %c0_34 = arith.constant 0 : index
    %c0_35 = arith.constant 0 : index
    %108 = vector.load %arg2[%c6, %c0_34, %c0_35] : memref<8x8x512xbf16, #tpu.memory_space<vmem>>, vector<1x8x512xbf16>
    %109 = vector.shape_cast %108 : vector<1x8x512xbf16> to vector<8x512xbf16>
    %110 = arith.extf %109 : vector<8x512xbf16> to vector<8x512xf32>
    %111 = arith.truncf %70 : vector<8x128xf32> to vector<8x128xbf16>
    %cst_36 = arith.constant dense<0.000000e+00> : vector<8x512xf32>
    %112 = tpu.matmul %111, %4, %cst_36 {dimension_numbers = #tpu.dot_dimension_numbers<[1], [0], [0], [1], [0, 0, 1, 1], [], []>} : vector<8x128xbf16>, vector<128x512xbf16>, vector<8x512xf32> -> vector<8x512xf32>
    %113 = arith.addf %110, %112 : vector<8x512xf32>
    %114 = vector.extract_strided_slice %113 {offsets = [0, 0], sizes = [8, 128], strides = [1, 1]} : vector<8x512xf32> to vector<8x128xf32>
    %115 = arith.negf %114 : vector<8x128xf32>
    %116 = math.exp %115 : vector<8x128xf32>
    %cst_37 = arith.constant 1.000000e+00 : f32
    %117 = vector.broadcast %cst_37 : f32 to vector<8x128xf32>
    %118 = arith.addf %117, %116 : vector<8x128xf32>
    %119 = arith.divf %117, %118 : vector<8x128xf32>
    %120 = vector.extract_strided_slice %113 {offsets = [0, 128], sizes = [8, 128], strides = [1, 1]} : vector<8x512xf32> to vector<8x128xf32>
    %121 = arith.negf %120 : vector<8x128xf32>
    %122 = math.exp %121 : vector<8x128xf32>
    %cst_38 = arith.constant 1.000000e+00 : f32
    %123 = vector.broadcast %cst_38 : f32 to vector<8x128xf32>
    %124 = arith.addf %123, %122 : vector<8x128xf32>
    %125 = arith.divf %123, %124 : vector<8x128xf32>
    %126 = vector.extract_strided_slice %113 {offsets = [0, 256], sizes = [8, 128], strides = [1, 1]} : vector<8x512xf32> to vector<8x128xf32>
    %127 = math.tanh %126 : vector<8x128xf32>
    %128 = vector.extract_strided_slice %113 {offsets = [0, 384], sizes = [8, 128], strides = [1, 1]} : vector<8x512xf32> to vector<8x128xf32>
    %129 = arith.negf %128 : vector<8x128xf32>
    %130 = math.exp %129 : vector<8x128xf32>
    %cst_39 = arith.constant 1.000000e+00 : f32
    %131 = vector.broadcast %cst_39 : f32 to vector<8x128xf32>
    %132 = arith.addf %131, %130 : vector<8x128xf32>
    %133 = arith.divf %131, %132 : vector<8x128xf32>
    %134 = arith.mulf %125, %68 : vector<8x128xf32>
    %135 = arith.mulf %119, %127 : vector<8x128xf32>
    %136 = arith.addf %134, %135 : vector<8x128xf32>
    %137 = math.tanh %136 : vector<8x128xf32>
    %138 = arith.mulf %133, %137 : vector<8x128xf32>
    %c2 = arith.constant 2 : index
    %c0_40 = arith.constant 0 : index
    %c0_41 = arith.constant 0 : index
    %139 = vector.load %arg1[%c2, %c0_40, %c0_41] : memref<8x8x512xbf16, #tpu.memory_space<vmem>>, vector<1x8x512xbf16>
    %140 = vector.shape_cast %139 : vector<1x8x512xbf16> to vector<8x512xbf16>
    %141 = arith.extf %140 : vector<8x512xbf16> to vector<8x512xf32>
    %142 = arith.truncf %107 : vector<8x128xf32> to vector<8x128xbf16>
    %cst_42 = arith.constant dense<0.000000e+00> : vector<8x512xf32>
    %143 = tpu.matmul %142, %3, %cst_42 {dimension_numbers = #tpu.dot_dimension_numbers<[1], [0], [0], [1], [0, 0, 1, 1], [], []>} : vector<8x128xbf16>, vector<128x512xbf16>, vector<8x512xf32> -> vector<8x512xf32>
    %144 = arith.addf %141, %143 : vector<8x512xf32>
    %145 = vector.extract_strided_slice %144 {offsets = [0, 0], sizes = [8, 128], strides = [1, 1]} : vector<8x512xf32> to vector<8x128xf32>
    %146 = arith.negf %145 : vector<8x128xf32>
    %147 = math.exp %146 : vector<8x128xf32>
    %cst_43 = arith.constant 1.000000e+00 : f32
    %148 = vector.broadcast %cst_43 : f32 to vector<8x128xf32>
    %149 = arith.addf %148, %147 : vector<8x128xf32>
    %150 = arith.divf %148, %149 : vector<8x128xf32>
    %151 = vector.extract_strided_slice %144 {offsets = [0, 128], sizes = [8, 128], strides = [1, 1]} : vector<8x512xf32> to vector<8x128xf32>
    %152 = arith.negf %151 : vector<8x128xf32>
    %153 = math.exp %152 : vector<8x128xf32>
    %cst_44 = arith.constant 1.000000e+00 : f32
    %154 = vector.broadcast %cst_44 : f32 to vector<8x128xf32>
    %155 = arith.addf %154, %153 : vector<8x128xf32>
    %156 = arith.divf %154, %155 : vector<8x128xf32>
    %157 = vector.extract_strided_slice %144 {offsets = [0, 256], sizes = [8, 128], strides = [1, 1]} : vector<8x512xf32> to vector<8x128xf32>
    %158 = math.tanh %157 : vector<8x128xf32>
    %159 = vector.extract_strided_slice %144 {offsets = [0, 384], sizes = [8, 128], strides = [1, 1]} : vector<8x512xf32> to vector<8x128xf32>
    %160 = arith.negf %159 : vector<8x128xf32>
    %161 = math.exp %160 : vector<8x128xf32>
    %cst_45 = arith.constant 1.000000e+00 : f32
    %162 = vector.broadcast %cst_45 : f32 to vector<8x128xf32>
    %163 = arith.addf %162, %161 : vector<8x128xf32>
    %164 = arith.divf %162, %163 : vector<8x128xf32>
    %165 = arith.mulf %156, %105 : vector<8x128xf32>
    %166 = arith.mulf %150, %158 : vector<8x128xf32>
    %167 = arith.addf %165, %166 : vector<8x128xf32>
    %168 = math.tanh %167 : vector<8x128xf32>
    %169 = arith.mulf %164, %168 : vector<8x128xf32>
    %c5 = arith.constant 5 : index
    %c0_46 = arith.constant 0 : index
    %c0_47 = arith.constant 0 : index
    %170 = vector.load %arg2[%c5, %c0_46, %c0_47] : memref<8x8x512xbf16, #tpu.memory_space<vmem>>, vector<1x8x512xbf16>
    %171 = vector.shape_cast %170 : vector<1x8x512xbf16> to vector<8x512xbf16>
    %172 = arith.extf %171 : vector<8x512xbf16> to vector<8x512xf32>
    %173 = arith.truncf %138 : vector<8x128xf32> to vector<8x128xbf16>
    %cst_48 = arith.constant dense<0.000000e+00> : vector<8x512xf32>
    %174 = tpu.matmul %173, %4, %cst_48 {dimension_numbers = #tpu.dot_dimension_numbers<[1], [0], [0], [1], [0, 0, 1, 1], [], []>} : vector<8x128xbf16>, vector<128x512xbf16>, vector<8x512xf32> -> vector<8x512xf32>
    %175 = arith.addf %172, %174 : vector<8x512xf32>
    %176 = vector.extract_strided_slice %175 {offsets = [0, 0], sizes = [8, 128], strides = [1, 1]} : vector<8x512xf32> to vector<8x128xf32>
    %177 = arith.negf %176 : vector<8x128xf32>
    %178 = math.exp %177 : vector<8x128xf32>
    %cst_49 = arith.constant 1.000000e+00 : f32
    %179 = vector.broadcast %cst_49 : f32 to vector<8x128xf32>
    %180 = arith.addf %179, %178 : vector<8x128xf32>
    %181 = arith.divf %179, %180 : vector<8x128xf32>
    %182 = vector.extract_strided_slice %175 {offsets = [0, 128], sizes = [8, 128], strides = [1, 1]} : vector<8x512xf32> to vector<8x128xf32>
    %183 = arith.negf %182 : vector<8x128xf32>
    %184 = math.exp %183 : vector<8x128xf32>
    %cst_50 = arith.constant 1.000000e+00 : f32
    %185 = vector.broadcast %cst_50 : f32 to vector<8x128xf32>
    %186 = arith.addf %185, %184 : vector<8x128xf32>
    %187 = arith.divf %185, %186 : vector<8x128xf32>
    %188 = vector.extract_strided_slice %175 {offsets = [0, 256], sizes = [8, 128], strides = [1, 1]} : vector<8x512xf32> to vector<8x128xf32>
    %189 = math.tanh %188 : vector<8x128xf32>
    %190 = vector.extract_strided_slice %175 {offsets = [0, 384], sizes = [8, 128], strides = [1, 1]} : vector<8x512xf32> to vector<8x128xf32>
    %191 = arith.negf %190 : vector<8x128xf32>
    %192 = math.exp %191 : vector<8x128xf32>
    %cst_51 = arith.constant 1.000000e+00 : f32
    %193 = vector.broadcast %cst_51 : f32 to vector<8x128xf32>
    %194 = arith.addf %193, %192 : vector<8x128xf32>
    %195 = arith.divf %193, %194 : vector<8x128xf32>
    %196 = arith.mulf %187, %136 : vector<8x128xf32>
    %197 = arith.mulf %181, %189 : vector<8x128xf32>
    %198 = arith.addf %196, %197 : vector<8x128xf32>
    %199 = math.tanh %198 : vector<8x128xf32>
    %200 = arith.mulf %195, %199 : vector<8x128xf32>
    %c3 = arith.constant 3 : index
    %c0_52 = arith.constant 0 : index
    %c0_53 = arith.constant 0 : index
    %201 = vector.load %arg1[%c3, %c0_52, %c0_53] : memref<8x8x512xbf16, #tpu.memory_space<vmem>>, vector<1x8x512xbf16>
    %202 = vector.shape_cast %201 : vector<1x8x512xbf16> to vector<8x512xbf16>
    %203 = arith.extf %202 : vector<8x512xbf16> to vector<8x512xf32>
    %204 = arith.truncf %169 : vector<8x128xf32> to vector<8x128xbf16>
    %cst_54 = arith.constant dense<0.000000e+00> : vector<8x512xf32>
    %205 = tpu.matmul %204, %3, %cst_54 {dimension_numbers = #tpu.dot_dimension_numbers<[1], [0], [0], [1], [0, 0, 1, 1], [], []>} : vector<8x128xbf16>, vector<128x512xbf16>, vector<8x512xf32> -> vector<8x512xf32>
    %206 = arith.addf %203, %205 : vector<8x512xf32>
    %207 = vector.extract_strided_slice %206 {offsets = [0, 0], sizes = [8, 128], strides = [1, 1]} : vector<8x512xf32> to vector<8x128xf32>
    %208 = arith.negf %207 : vector<8x128xf32>
    %209 = math.exp %208 : vector<8x128xf32>
    %cst_55 = arith.constant 1.000000e+00 : f32
    %210 = vector.broadcast %cst_55 : f32 to vector<8x128xf32>
    %211 = arith.addf %210, %209 : vector<8x128xf32>
    %212 = arith.divf %210, %211 : vector<8x128xf32>
    %213 = vector.extract_strided_slice %206 {offsets = [0, 128], sizes = [8, 128], strides = [1, 1]} : vector<8x512xf32> to vector<8x128xf32>
    %214 = arith.negf %213 : vector<8x128xf32>
    %215 = math.exp %214 : vector<8x128xf32>
    %cst_56 = arith.constant 1.000000e+00 : f32
    %216 = vector.broadcast %cst_56 : f32 to vector<8x128xf32>
    %217 = arith.addf %216, %215 : vector<8x128xf32>
    %218 = arith.divf %216, %217 : vector<8x128xf32>
    %219 = vector.extract_strided_slice %206 {offsets = [0, 256], sizes = [8, 128], strides = [1, 1]} : vector<8x512xf32> to vector<8x128xf32>
    %220 = math.tanh %219 : vector<8x128xf32>
    %221 = vector.extract_strided_slice %206 {offsets = [0, 384], sizes = [8, 128], strides = [1, 1]} : vector<8x512xf32> to vector<8x128xf32>
    %222 = arith.negf %221 : vector<8x128xf32>
    %223 = math.exp %222 : vector<8x128xf32>
    %cst_57 = arith.constant 1.000000e+00 : f32
    %224 = vector.broadcast %cst_57 : f32 to vector<8x128xf32>
    %225 = arith.addf %224, %223 : vector<8x128xf32>
    %226 = arith.divf %224, %225 : vector<8x128xf32>
    %227 = arith.mulf %218, %167 : vector<8x128xf32>
    %228 = arith.mulf %212, %220 : vector<8x128xf32>
    %229 = arith.addf %227, %228 : vector<8x128xf32>
    %230 = math.tanh %229 : vector<8x128xf32>
    %231 = arith.mulf %226, %230 : vector<8x128xf32>
    %c4 = arith.constant 4 : index
    %c0_58 = arith.constant 0 : index
    %c0_59 = arith.constant 0 : index
    %232 = vector.load %arg2[%c4, %c0_58, %c0_59] : memref<8x8x512xbf16, #tpu.memory_space<vmem>>, vector<1x8x512xbf16>
    %233 = vector.shape_cast %232 : vector<1x8x512xbf16> to vector<8x512xbf16>
    %234 = arith.extf %233 : vector<8x512xbf16> to vector<8x512xf32>
    %235 = arith.truncf %200 : vector<8x128xf32> to vector<8x128xbf16>
    %cst_60 = arith.constant dense<0.000000e+00> : vector<8x512xf32>
    %236 = tpu.matmul %235, %4, %cst_60 {dimension_numbers = #tpu.dot_dimension_numbers<[1], [0], [0], [1], [0, 0, 1, 1], [], []>} : vector<8x128xbf16>, vector<128x512xbf16>, vector<8x512xf32> -> vector<8x512xf32>
    %237 = arith.addf %234, %236 : vector<8x512xf32>
    %238 = vector.extract_strided_slice %237 {offsets = [0, 0], sizes = [8, 128], strides = [1, 1]} : vector<8x512xf32> to vector<8x128xf32>
    %239 = arith.negf %238 : vector<8x128xf32>
    %240 = math.exp %239 : vector<8x128xf32>
    %cst_61 = arith.constant 1.000000e+00 : f32
    %241 = vector.broadcast %cst_61 : f32 to vector<8x128xf32>
    %242 = arith.addf %241, %240 : vector<8x128xf32>
    %243 = arith.divf %241, %242 : vector<8x128xf32>
    %244 = vector.extract_strided_slice %237 {offsets = [0, 128], sizes = [8, 128], strides = [1, 1]} : vector<8x512xf32> to vector<8x128xf32>
    %245 = arith.negf %244 : vector<8x128xf32>
    %246 = math.exp %245 : vector<8x128xf32>
    %cst_62 = arith.constant 1.000000e+00 : f32
    %247 = vector.broadcast %cst_62 : f32 to vector<8x128xf32>
    %248 = arith.addf %247, %246 : vector<8x128xf32>
    %249 = arith.divf %247, %248 : vector<8x128xf32>
    %250 = vector.extract_strided_slice %237 {offsets = [0, 256], sizes = [8, 128], strides = [1, 1]} : vector<8x512xf32> to vector<8x128xf32>
    %251 = math.tanh %250 : vector<8x128xf32>
    %252 = vector.extract_strided_slice %237 {offsets = [0, 384], sizes = [8, 128], strides = [1, 1]} : vector<8x512xf32> to vector<8x128xf32>
    %253 = arith.negf %252 : vector<8x128xf32>
    %254 = math.exp %253 : vector<8x128xf32>
    %cst_63 = arith.constant 1.000000e+00 : f32
    %255 = vector.broadcast %cst_63 : f32 to vector<8x128xf32>
    %256 = arith.addf %255, %254 : vector<8x128xf32>
    %257 = arith.divf %255, %256 : vector<8x128xf32>
    %258 = arith.mulf %249, %198 : vector<8x128xf32>
    %259 = arith.mulf %243, %251 : vector<8x128xf32>
    %260 = arith.addf %258, %259 : vector<8x128xf32>
    %261 = math.tanh %260 : vector<8x128xf32>
    %262 = arith.mulf %257, %261 : vector<8x128xf32>
    %c4_64 = arith.constant 4 : index
    %c0_65 = arith.constant 0 : index
    %c0_66 = arith.constant 0 : index
    %263 = vector.load %arg1[%c4_64, %c0_65, %c0_66] : memref<8x8x512xbf16, #tpu.memory_space<vmem>>, vector<1x8x512xbf16>
    %264 = vector.shape_cast %263 : vector<1x8x512xbf16> to vector<8x512xbf16>
    %265 = arith.extf %264 : vector<8x512xbf16> to vector<8x512xf32>
    %266 = arith.truncf %231 : vector<8x128xf32> to vector<8x128xbf16>
    %cst_67 = arith.constant dense<0.000000e+00> : vector<8x512xf32>
    %267 = tpu.matmul %266, %3, %cst_67 {dimension_numbers = #tpu.dot_dimension_numbers<[1], [0], [0], [1], [0, 0, 1, 1], [], []>} : vector<8x128xbf16>, vector<128x512xbf16>, vector<8x512xf32> -> vector<8x512xf32>
    %268 = arith.addf %265, %267 : vector<8x512xf32>
    %269 = vector.extract_strided_slice %268 {offsets = [0, 0], sizes = [8, 128], strides = [1, 1]} : vector<8x512xf32> to vector<8x128xf32>
    %270 = arith.negf %269 : vector<8x128xf32>
    %271 = math.exp %270 : vector<8x128xf32>
    %cst_68 = arith.constant 1.000000e+00 : f32
    %272 = vector.broadcast %cst_68 : f32 to vector<8x128xf32>
    %273 = arith.addf %272, %271 : vector<8x128xf32>
    %274 = arith.divf %272, %273 : vector<8x128xf32>
    %275 = vector.extract_strided_slice %268 {offsets = [0, 128], sizes = [8, 128], strides = [1, 1]} : vector<8x512xf32> to vector<8x128xf32>
    %276 = arith.negf %275 : vector<8x128xf32>
    %277 = math.exp %276 : vector<8x128xf32>
    %cst_69 = arith.constant 1.000000e+00 : f32
    %278 = vector.broadcast %cst_69 : f32 to vector<8x128xf32>
    %279 = arith.addf %278, %277 : vector<8x128xf32>
    %280 = arith.divf %278, %279 : vector<8x128xf32>
    %281 = vector.extract_strided_slice %268 {offsets = [0, 256], sizes = [8, 128], strides = [1, 1]} : vector<8x512xf32> to vector<8x128xf32>
    %282 = math.tanh %281 : vector<8x128xf32>
    %283 = vector.extract_strided_slice %268 {offsets = [0, 384], sizes = [8, 128], strides = [1, 1]} : vector<8x512xf32> to vector<8x128xf32>
    %284 = arith.negf %283 : vector<8x128xf32>
    %285 = math.exp %284 : vector<8x128xf32>
    %cst_70 = arith.constant 1.000000e+00 : f32
    %286 = vector.broadcast %cst_70 : f32 to vector<8x128xf32>
    %287 = arith.addf %286, %285 : vector<8x128xf32>
    %288 = arith.divf %286, %287 : vector<8x128xf32>
    %289 = arith.mulf %280, %229 : vector<8x128xf32>
    %290 = arith.mulf %274, %282 : vector<8x128xf32>
    %291 = arith.addf %289, %290 : vector<8x128xf32>
    %292 = math.tanh %291 : vector<8x128xf32>
    %293 = arith.mulf %288, %292 : vector<8x128xf32>
    %c3_71 = arith.constant 3 : index
    %c0_72 = arith.constant 0 : index
    %c0_73 = arith.constant 0 : index
    %294 = vector.load %arg2[%c3_71, %c0_72, %c0_73] : memref<8x8x512xbf16, #tpu.memory_space<vmem>>, vector<1x8x512xbf16>
    %295 = vector.shape_cast %294 : vector<1x8x512xbf16> to vector<8x512xbf16>
    %296 = arith.extf %295 : vector<8x512xbf16> to vector<8x512xf32>
    %297 = arith.truncf %262 : vector<8x128xf32> to vector<8x128xbf16>
    %cst_74 = arith.constant dense<0.000000e+00> : vector<8x512xf32>
    %298 = tpu.matmul %297, %4, %cst_74 {dimension_numbers = #tpu.dot_dimension_numbers<[1], [0], [0], [1], [0, 0, 1, 1], [], []>} : vector<8x128xbf16>, vector<128x512xbf16>, vector<8x512xf32> -> vector<8x512xf32>
    %299 = arith.addf %296, %298 : vector<8x512xf32>
    %300 = vector.extract_strided_slice %299 {offsets = [0, 0], sizes = [8, 128], strides = [1, 1]} : vector<8x512xf32> to vector<8x128xf32>
    %301 = arith.negf %300 : vector<8x128xf32>
    %302 = math.exp %301 : vector<8x128xf32>
    %cst_75 = arith.constant 1.000000e+00 : f32
    %303 = vector.broadcast %cst_75 : f32 to vector<8x128xf32>
    %304 = arith.addf %303, %302 : vector<8x128xf32>
    %305 = arith.divf %303, %304 : vector<8x128xf32>
    %306 = vector.extract_strided_slice %299 {offsets = [0, 128], sizes = [8, 128], strides = [1, 1]} : vector<8x512xf32> to vector<8x128xf32>
    %307 = arith.negf %306 : vector<8x128xf32>
    %308 = math.exp %307 : vector<8x128xf32>
    %cst_76 = arith.constant 1.000000e+00 : f32
    %309 = vector.broadcast %cst_76 : f32 to vector<8x128xf32>
    %310 = arith.addf %309, %308 : vector<8x128xf32>
    %311 = arith.divf %309, %310 : vector<8x128xf32>
    %312 = vector.extract_strided_slice %299 {offsets = [0, 256], sizes = [8, 128], strides = [1, 1]} : vector<8x512xf32> to vector<8x128xf32>
    %313 = math.tanh %312 : vector<8x128xf32>
    %314 = vector.extract_strided_slice %299 {offsets = [0, 384], sizes = [8, 128], strides = [1, 1]} : vector<8x512xf32> to vector<8x128xf32>
    %315 = arith.negf %314 : vector<8x128xf32>
    %316 = math.exp %315 : vector<8x128xf32>
    %cst_77 = arith.constant 1.000000e+00 : f32
    %317 = vector.broadcast %cst_77 : f32 to vector<8x128xf32>
    %318 = arith.addf %317, %316 : vector<8x128xf32>
    %319 = arith.divf %317, %318 : vector<8x128xf32>
    %320 = arith.mulf %311, %260 : vector<8x128xf32>
    %321 = arith.mulf %305, %313 : vector<8x128xf32>
    %322 = arith.addf %320, %321 : vector<8x128xf32>
    %323 = math.tanh %322 : vector<8x128xf32>
    %324 = arith.mulf %319, %323 : vector<8x128xf32>
    %c5_78 = arith.constant 5 : index
    %c0_79 = arith.constant 0 : index
    %c0_80 = arith.constant 0 : index
    %325 = vector.load %arg1[%c5_78, %c0_79, %c0_80] : memref<8x8x512xbf16, #tpu.memory_space<vmem>>, vector<1x8x512xbf16>
    %326 = vector.shape_cast %325 : vector<1x8x512xbf16> to vector<8x512xbf16>
    %327 = arith.extf %326 : vector<8x512xbf16> to vector<8x512xf32>
    %328 = arith.truncf %293 : vector<8x128xf32> to vector<8x128xbf16>
    %cst_81 = arith.constant dense<0.000000e+00> : vector<8x512xf32>
    %329 = tpu.matmul %328, %3, %cst_81 {dimension_numbers = #tpu.dot_dimension_numbers<[1], [0], [0], [1], [0, 0, 1, 1], [], []>} : vector<8x128xbf16>, vector<128x512xbf16>, vector<8x512xf32> -> vector<8x512xf32>
    %330 = arith.addf %327, %329 : vector<8x512xf32>
    %331 = vector.extract_strided_slice %330 {offsets = [0, 0], sizes = [8, 128], strides = [1, 1]} : vector<8x512xf32> to vector<8x128xf32>
    %332 = arith.negf %331 : vector<8x128xf32>
    %333 = math.exp %332 : vector<8x128xf32>
    %cst_82 = arith.constant 1.000000e+00 : f32
    %334 = vector.broadcast %cst_82 : f32 to vector<8x128xf32>
    %335 = arith.addf %334, %333 : vector<8x128xf32>
    %336 = arith.divf %334, %335 : vector<8x128xf32>
    %337 = vector.extract_strided_slice %330 {offsets = [0, 128], sizes = [8, 128], strides = [1, 1]} : vector<8x512xf32> to vector<8x128xf32>
    %338 = arith.negf %337 : vector<8x128xf32>
    %339 = math.exp %338 : vector<8x128xf32>
    %cst_83 = arith.constant 1.000000e+00 : f32
    %340 = vector.broadcast %cst_83 : f32 to vector<8x128xf32>
    %341 = arith.addf %340, %339 : vector<8x128xf32>
    %342 = arith.divf %340, %341 : vector<8x128xf32>
    %343 = vector.extract_strided_slice %330 {offsets = [0, 256], sizes = [8, 128], strides = [1, 1]} : vector<8x512xf32> to vector<8x128xf32>
    %344 = math.tanh %343 : vector<8x128xf32>
    %345 = vector.extract_strided_slice %330 {offsets = [0, 384], sizes = [8, 128], strides = [1, 1]} : vector<8x512xf32> to vector<8x128xf32>
    %346 = arith.negf %345 : vector<8x128xf32>
    %347 = math.exp %346 : vector<8x128xf32>
    %cst_84 = arith.constant 1.000000e+00 : f32
    %348 = vector.broadcast %cst_84 : f32 to vector<8x128xf32>
    %349 = arith.addf %348, %347 : vector<8x128xf32>
    %350 = arith.divf %348, %349 : vector<8x128xf32>
    %351 = arith.mulf %342, %291 : vector<8x128xf32>
    %352 = arith.mulf %336, %344 : vector<8x128xf32>
    %353 = arith.addf %351, %352 : vector<8x128xf32>
    %354 = math.tanh %353 : vector<8x128xf32>
    %355 = arith.mulf %350, %354 : vector<8x128xf32>
    %c2_85 = arith.constant 2 : index
    %c0_86 = arith.constant 0 : index
    %c0_87 = arith.constant 0 : index
    %356 = vector.load %arg2[%c2_85, %c0_86, %c0_87] : memref<8x8x512xbf16, #tpu.memory_space<vmem>>, vector<1x8x512xbf16>
    %357 = vector.shape_cast %356 : vector<1x8x512xbf16> to vector<8x512xbf16>
    %358 = arith.extf %357 : vector<8x512xbf16> to vector<8x512xf32>
    %359 = arith.truncf %324 : vector<8x128xf32> to vector<8x128xbf16>
    %cst_88 = arith.constant dense<0.000000e+00> : vector<8x512xf32>
    %360 = tpu.matmul %359, %4, %cst_88 {dimension_numbers = #tpu.dot_dimension_numbers<[1], [0], [0], [1], [0, 0, 1, 1], [], []>} : vector<8x128xbf16>, vector<128x512xbf16>, vector<8x512xf32> -> vector<8x512xf32>
    %361 = arith.addf %358, %360 : vector<8x512xf32>
    %362 = vector.extract_strided_slice %361 {offsets = [0, 0], sizes = [8, 128], strides = [1, 1]} : vector<8x512xf32> to vector<8x128xf32>
    %363 = arith.negf %362 : vector<8x128xf32>
    %364 = math.exp %363 : vector<8x128xf32>
    %cst_89 = arith.constant 1.000000e+00 : f32
    %365 = vector.broadcast %cst_89 : f32 to vector<8x128xf32>
    %366 = arith.addf %365, %364 : vector<8x128xf32>
    %367 = arith.divf %365, %366 : vector<8x128xf32>
    %368 = vector.extract_strided_slice %361 {offsets = [0, 128], sizes = [8, 128], strides = [1, 1]} : vector<8x512xf32> to vector<8x128xf32>
    %369 = arith.negf %368 : vector<8x128xf32>
    %370 = math.exp %369 : vector<8x128xf32>
    %cst_90 = arith.constant 1.000000e+00 : f32
    %371 = vector.broadcast %cst_90 : f32 to vector<8x128xf32>
    %372 = arith.addf %371, %370 : vector<8x128xf32>
    %373 = arith.divf %371, %372 : vector<8x128xf32>
    %374 = vector.extract_strided_slice %361 {offsets = [0, 256], sizes = [8, 128], strides = [1, 1]} : vector<8x512xf32> to vector<8x128xf32>
    %375 = math.tanh %374 : vector<8x128xf32>
    %376 = vector.extract_strided_slice %361 {offsets = [0, 384], sizes = [8, 128], strides = [1, 1]} : vector<8x512xf32> to vector<8x128xf32>
    %377 = arith.negf %376 : vector<8x128xf32>
    %378 = math.exp %377 : vector<8x128xf32>
    %cst_91 = arith.constant 1.000000e+00 : f32
    %379 = vector.broadcast %cst_91 : f32 to vector<8x128xf32>
    %380 = arith.addf %379, %378 : vector<8x128xf32>
    %381 = arith.divf %379, %380 : vector<8x128xf32>
    %382 = arith.mulf %373, %322 : vector<8x128xf32>
    %383 = arith.mulf %367, %375 : vector<8x128xf32>
    %384 = arith.addf %382, %383 : vector<8x128xf32>
    %385 = math.tanh %384 : vector<8x128xf32>
    %386 = arith.mulf %381, %385 : vector<8x128xf32>
    %c6_92 = arith.constant 6 : index
    %c0_93 = arith.constant 0 : index
    %c0_94 = arith.constant 0 : index
    %387 = vector.load %arg1[%c6_92, %c0_93, %c0_94] : memref<8x8x512xbf16, #tpu.memory_space<vmem>>, vector<1x8x512xbf16>
    %388 = vector.shape_cast %387 : vector<1x8x512xbf16> to vector<8x512xbf16>
    %389 = arith.extf %388 : vector<8x512xbf16> to vector<8x512xf32>
    %390 = arith.truncf %355 : vector<8x128xf32> to vector<8x128xbf16>
    %cst_95 = arith.constant dense<0.000000e+00> : vector<8x512xf32>
    %391 = tpu.matmul %390, %3, %cst_95 {dimension_numbers = #tpu.dot_dimension_numbers<[1], [0], [0], [1], [0, 0, 1, 1], [], []>} : vector<8x128xbf16>, vector<128x512xbf16>, vector<8x512xf32> -> vector<8x512xf32>
    %392 = arith.addf %389, %391 : vector<8x512xf32>
    %393 = vector.extract_strided_slice %392 {offsets = [0, 0], sizes = [8, 128], strides = [1, 1]} : vector<8x512xf32> to vector<8x128xf32>
    %394 = arith.negf %393 : vector<8x128xf32>
    %395 = math.exp %394 : vector<8x128xf32>
    %cst_96 = arith.constant 1.000000e+00 : f32
    %396 = vector.broadcast %cst_96 : f32 to vector<8x128xf32>
    %397 = arith.addf %396, %395 : vector<8x128xf32>
    %398 = arith.divf %396, %397 : vector<8x128xf32>
    %399 = vector.extract_strided_slice %392 {offsets = [0, 128], sizes = [8, 128], strides = [1, 1]} : vector<8x512xf32> to vector<8x128xf32>
    %400 = arith.negf %399 : vector<8x128xf32>
    %401 = math.exp %400 : vector<8x128xf32>
    %cst_97 = arith.constant 1.000000e+00 : f32
    %402 = vector.broadcast %cst_97 : f32 to vector<8x128xf32>
    %403 = arith.addf %402, %401 : vector<8x128xf32>
    %404 = arith.divf %402, %403 : vector<8x128xf32>
    %405 = vector.extract_strided_slice %392 {offsets = [0, 256], sizes = [8, 128], strides = [1, 1]} : vector<8x512xf32> to vector<8x128xf32>
    %406 = math.tanh %405 : vector<8x128xf32>
    %407 = vector.extract_strided_slice %392 {offsets = [0, 384], sizes = [8, 128], strides = [1, 1]} : vector<8x512xf32> to vector<8x128xf32>
    %408 = arith.negf %407 : vector<8x128xf32>
    %409 = math.exp %408 : vector<8x128xf32>
    %cst_98 = arith.constant 1.000000e+00 : f32
    %410 = vector.broadcast %cst_98 : f32 to vector<8x128xf32>
    %411 = arith.addf %410, %409 : vector<8x128xf32>
    %412 = arith.divf %410, %411 : vector<8x128xf32>
    %413 = arith.mulf %404, %353 : vector<8x128xf32>
    %414 = arith.mulf %398, %406 : vector<8x128xf32>
    %415 = arith.addf %413, %414 : vector<8x128xf32>
    %416 = math.tanh %415 : vector<8x128xf32>
    %417 = arith.mulf %412, %416 : vector<8x128xf32>
    %c1_99 = arith.constant 1 : index
    %c0_100 = arith.constant 0 : index
    %c0_101 = arith.constant 0 : index
    %418 = vector.load %arg2[%c1_99, %c0_100, %c0_101] : memref<8x8x512xbf16, #tpu.memory_space<vmem>>, vector<1x8x512xbf16>
    %419 = vector.shape_cast %418 : vector<1x8x512xbf16> to vector<8x512xbf16>
    %420 = arith.extf %419 : vector<8x512xbf16> to vector<8x512xf32>
    %421 = arith.truncf %386 : vector<8x128xf32> to vector<8x128xbf16>
    %cst_102 = arith.constant dense<0.000000e+00> : vector<8x512xf32>
    %422 = tpu.matmul %421, %4, %cst_102 {dimension_numbers = #tpu.dot_dimension_numbers<[1], [0], [0], [1], [0, 0, 1, 1], [], []>} : vector<8x128xbf16>, vector<128x512xbf16>, vector<8x512xf32> -> vector<8x512xf32>
    %423 = arith.addf %420, %422 : vector<8x512xf32>
    %424 = vector.extract_strided_slice %423 {offsets = [0, 0], sizes = [8, 128], strides = [1, 1]} : vector<8x512xf32> to vector<8x128xf32>
    %425 = arith.negf %424 : vector<8x128xf32>
    %426 = math.exp %425 : vector<8x128xf32>
    %cst_103 = arith.constant 1.000000e+00 : f32
    %427 = vector.broadcast %cst_103 : f32 to vector<8x128xf32>
    %428 = arith.addf %427, %426 : vector<8x128xf32>
    %429 = arith.divf %427, %428 : vector<8x128xf32>
    %430 = vector.extract_strided_slice %423 {offsets = [0, 128], sizes = [8, 128], strides = [1, 1]} : vector<8x512xf32> to vector<8x128xf32>
    %431 = arith.negf %430 : vector<8x128xf32>
    %432 = math.exp %431 : vector<8x128xf32>
    %cst_104 = arith.constant 1.000000e+00 : f32
    %433 = vector.broadcast %cst_104 : f32 to vector<8x128xf32>
    %434 = arith.addf %433, %432 : vector<8x128xf32>
    %435 = arith.divf %433, %434 : vector<8x128xf32>
    %436 = vector.extract_strided_slice %423 {offsets = [0, 256], sizes = [8, 128], strides = [1, 1]} : vector<8x512xf32> to vector<8x128xf32>
    %437 = math.tanh %436 : vector<8x128xf32>
    %438 = vector.extract_strided_slice %423 {offsets = [0, 384], sizes = [8, 128], strides = [1, 1]} : vector<8x512xf32> to vector<8x128xf32>
    %439 = arith.negf %438 : vector<8x128xf32>
    %440 = math.exp %439 : vector<8x128xf32>
    %cst_105 = arith.constant 1.000000e+00 : f32
    %441 = vector.broadcast %cst_105 : f32 to vector<8x128xf32>
    %442 = arith.addf %441, %440 : vector<8x128xf32>
    %443 = arith.divf %441, %442 : vector<8x128xf32>
    %444 = arith.mulf %435, %384 : vector<8x128xf32>
    %445 = arith.mulf %429, %437 : vector<8x128xf32>
    %446 = arith.addf %444, %445 : vector<8x128xf32>
    %447 = math.tanh %446 : vector<8x128xf32>
    %448 = arith.mulf %443, %447 : vector<8x128xf32>
    %c7_106 = arith.constant 7 : index
    %c0_107 = arith.constant 0 : index
    %c0_108 = arith.constant 0 : index
    %449 = vector.load %arg1[%c7_106, %c0_107, %c0_108] : memref<8x8x512xbf16, #tpu.memory_space<vmem>>, vector<1x8x512xbf16>
    %450 = vector.shape_cast %449 : vector<1x8x512xbf16> to vector<8x512xbf16>
    %451 = arith.extf %450 : vector<8x512xbf16> to vector<8x512xf32>
    %452 = arith.truncf %417 : vector<8x128xf32> to vector<8x128xbf16>
    %cst_109 = arith.constant dense<0.000000e+00> : vector<8x512xf32>
    %453 = tpu.matmul %452, %3, %cst_109 {dimension_numbers = #tpu.dot_dimension_numbers<[1], [0], [0], [1], [0, 0, 1, 1], [], []>} : vector<8x128xbf16>, vector<128x512xbf16>, vector<8x512xf32> -> vector<8x512xf32>
    %454 = arith.addf %451, %453 : vector<8x512xf32>
    %455 = vector.extract_strided_slice %454 {offsets = [0, 0], sizes = [8, 128], strides = [1, 1]} : vector<8x512xf32> to vector<8x128xf32>
    %456 = arith.negf %455 : vector<8x128xf32>
    %457 = math.exp %456 : vector<8x128xf32>
    %cst_110 = arith.constant 1.000000e+00 : f32
    %458 = vector.broadcast %cst_110 : f32 to vector<8x128xf32>
    %459 = arith.addf %458, %457 : vector<8x128xf32>
    %460 = arith.divf %458, %459 : vector<8x128xf32>
    %461 = vector.extract_strided_slice %454 {offsets = [0, 128], sizes = [8, 128], strides = [1, 1]} : vector<8x512xf32> to vector<8x128xf32>
    %462 = arith.negf %461 : vector<8x128xf32>
    %463 = math.exp %462 : vector<8x128xf32>
    %cst_111 = arith.constant 1.000000e+00 : f32
    %464 = vector.broadcast %cst_111 : f32 to vector<8x128xf32>
    %465 = arith.addf %464, %463 : vector<8x128xf32>
    %466 = arith.divf %464, %465 : vector<8x128xf32>
    %467 = vector.extract_strided_slice %454 {offsets = [0, 256], sizes = [8, 128], strides = [1, 1]} : vector<8x512xf32> to vector<8x128xf32>
    %468 = math.tanh %467 : vector<8x128xf32>
    %469 = vector.extract_strided_slice %454 {offsets = [0, 384], sizes = [8, 128], strides = [1, 1]} : vector<8x512xf32> to vector<8x128xf32>
    %470 = arith.negf %469 : vector<8x128xf32>
    %471 = math.exp %470 : vector<8x128xf32>
    %cst_112 = arith.constant 1.000000e+00 : f32
    %472 = vector.broadcast %cst_112 : f32 to vector<8x128xf32>
    %473 = arith.addf %472, %471 : vector<8x128xf32>
    %474 = arith.divf %472, %473 : vector<8x128xf32>
    %475 = arith.mulf %466, %415 : vector<8x128xf32>
    %476 = arith.mulf %460, %468 : vector<8x128xf32>
    %477 = arith.addf %475, %476 : vector<8x128xf32>
    %478 = math.tanh %477 : vector<8x128xf32>
    %479 = arith.mulf %474, %478 : vector<8x128xf32>
    %c0_113 = arith.constant 0 : index
    %c0_114 = arith.constant 0 : index
    %c0_115 = arith.constant 0 : index
    %480 = vector.load %arg2[%c0_113, %c0_114, %c0_115] : memref<8x8x512xbf16, #tpu.memory_space<vmem>>, vector<1x8x512xbf16>
    %481 = vector.shape_cast %480 : vector<1x8x512xbf16> to vector<8x512xbf16>
    %482 = arith.extf %481 : vector<8x512xbf16> to vector<8x512xf32>
    %483 = arith.truncf %448 : vector<8x128xf32> to vector<8x128xbf16>
    %cst_116 = arith.constant dense<0.000000e+00> : vector<8x512xf32>
    %484 = tpu.matmul %483, %4, %cst_116 {dimension_numbers = #tpu.dot_dimension_numbers<[1], [0], [0], [1], [0, 0, 1, 1], [], []>} : vector<8x128xbf16>, vector<128x512xbf16>, vector<8x512xf32> -> vector<8x512xf32>
    %485 = arith.addf %482, %484 : vector<8x512xf32>
    %486 = vector.extract_strided_slice %485 {offsets = [0, 0], sizes = [8, 128], strides = [1, 1]} : vector<8x512xf32> to vector<8x128xf32>
    %487 = arith.negf %486 : vector<8x128xf32>
    %488 = math.exp %487 : vector<8x128xf32>
    %cst_117 = arith.constant 1.000000e+00 : f32
    %489 = vector.broadcast %cst_117 : f32 to vector<8x128xf32>
    %490 = arith.addf %489, %488 : vector<8x128xf32>
    %491 = arith.divf %489, %490 : vector<8x128xf32>
    %492 = vector.extract_strided_slice %485 {offsets = [0, 128], sizes = [8, 128], strides = [1, 1]} : vector<8x512xf32> to vector<8x128xf32>
    %493 = arith.negf %492 : vector<8x128xf32>
    %494 = math.exp %493 : vector<8x128xf32>
    %cst_118 = arith.constant 1.000000e+00 : f32
    %495 = vector.broadcast %cst_118 : f32 to vector<8x128xf32>
    %496 = arith.addf %495, %494 : vector<8x128xf32>
    %497 = arith.divf %495, %496 : vector<8x128xf32>
    %498 = vector.extract_strided_slice %485 {offsets = [0, 256], sizes = [8, 128], strides = [1, 1]} : vector<8x512xf32> to vector<8x128xf32>
    %499 = math.tanh %498 : vector<8x128xf32>
    %500 = vector.extract_strided_slice %485 {offsets = [0, 384], sizes = [8, 128], strides = [1, 1]} : vector<8x512xf32> to vector<8x128xf32>
    %501 = arith.negf %500 : vector<8x128xf32>
    %502 = math.exp %501 : vector<8x128xf32>
    %cst_119 = arith.constant 1.000000e+00 : f32
    %503 = vector.broadcast %cst_119 : f32 to vector<8x128xf32>
    %504 = arith.addf %503, %502 : vector<8x128xf32>
    %505 = arith.divf %503, %504 : vector<8x128xf32>
    %506 = arith.mulf %497, %446 : vector<8x128xf32>
    %507 = arith.mulf %491, %499 : vector<8x128xf32>
    %508 = arith.addf %506, %507 : vector<8x128xf32>
    %509 = math.tanh %508 : vector<8x128xf32>
    %510 = arith.mulf %505, %509 : vector<8x128xf32>
    %c0_i32_120 = arith.constant 0 : i32
    %511 = arith.cmpi eq, %arg0, %c0_i32_120 : i32
    %512 = arith.extui %511 : i1 to i32
    %c0_i32_121 = arith.constant 0 : i32
    %513 = arith.cmpi ne, %512, %c0_i32_121 : i32
    scf.if %513 {
      %521 = arith.truncf %479 : vector<8x128xf32> to vector<8x128xbf16>
      %c1_132 = arith.constant 1 : index
      %c0_133 = arith.constant 0 : index
      %c0_134 = arith.constant 0 : index
      %522 = vector.load %arg5[%c1_132, %c0_133, %c0_134] : memref<2x8x128xbf16, #tpu.memory_space<vmem>>, vector<1x8x128xbf16>
      %523 = vector.shape_cast %522 : vector<1x8x128xbf16> to vector<8x128xbf16>
      %524 = vector.shape_cast %521 : vector<8x128xbf16> to vector<1x8x128xbf16>
      tpu.vector_store %arg5[%c1_132, %c0_133, %c0_134], %524 {strides = array<i32>} : memref<2x8x128xbf16, #tpu.memory_space<vmem>>, vector<1x8x128xbf16>,
    } else {
    }
    %c0_i32_122 = arith.constant 0 : i32
    %514 = arith.cmpi eq, %arg0, %c0_i32_122 : i32
    %515 = arith.extui %514 : i1 to i32
    %c0_i32_123 = arith.constant 0 : i32
    %516 = arith.cmpi ne, %515, %c0_i32_123 : i32
    scf.if %516 {
      %521 = arith.truncf %510 : vector<8x128xf32> to vector<8x128xbf16>
      %c0_132 = arith.constant 0 : index
      %c0_133 = arith.constant 0 : index
      %c0_134 = arith.constant 0 : index
      %522 = vector.load %arg6[%c0_132, %c0_133, %c0_134] : memref<2x8x128xbf16, #tpu.memory_space<vmem>>, vector<1x8x128xbf16>
      %523 = vector.shape_cast %522 : vector<1x8x128xbf16> to vector<8x128xbf16>
      %524 = vector.shape_cast %521 : vector<8x128xbf16> to vector<1x8x128xbf16>
      tpu.vector_store %arg6[%c0_132, %c0_133, %c0_134], %524 {strides = array<i32>} : memref<2x8x128xbf16, #tpu.memory_space<vmem>>, vector<1x8x128xbf16>,
    } else {
    }
    %c0_124 = arith.constant 0 : index
    %c0_125 = arith.constant 0 : index
    %517 = vector.load %arg7[%c0_124, %c0_125] : memref<8x128xf32, #tpu.memory_space<vmem>>, vector<8x128xf32>
    tpu.vector_store %arg7[%c0_124, %c0_125], %479 {strides = array<i32>} : memref<8x128xf32, #tpu.memory_space<vmem>>, vector<8x128xf32>,
    %c0_126 = arith.constant 0 : index
    %c0_127 = arith.constant 0 : index
    %518 = vector.load %arg8[%c0_126, %c0_127] : memref<8x128xf32, #tpu.memory_space<vmem>>, vector<8x128xf32>
    tpu.vector_store %arg8[%c0_126, %c0_127], %477 {strides = array<i32>} : memref<8x128xf32, #tpu.memory_space<vmem>>, vector<8x128xf32>,
    %c0_128 = arith.constant 0 : index
    %c0_129 = arith.constant 0 : index
    %519 = vector.load %arg9[%c0_128, %c0_129] : memref<8x128xf32, #tpu.memory_space<vmem>>, vector<8x128xf32>
    tpu.vector_store %arg9[%c0_128, %c0_129], %510 {strides = array<i32>} : memref<8x128xf32, #tpu.memory_space<vmem>>, vector<8x128xf32>,
    %c0_130 = arith.constant 0 : index
    %c0_131 = arith.constant 0 : index
    %520 = vector.load %arg10[%c0_130, %c0_131] : memref<8x128xf32, #tpu.memory_space<vmem>>, vector<8x128xf32>
    tpu.vector_store %arg10[%c0_130, %c0_131], %508 {strides = array<i32>} : memref<8x128xf32, #tpu.memory_space<vmem>>, vector<8x128xf32>,
    return
  }
  func.func @transform_0(%arg0: i32) -> (i32, i32, i32) {
    %c0_i32 = arith.constant 0 : i32
    %c0_i32_0 = arith.constant 0 : i32
    %c0_i32_1 = arith.constant 0 : i32
    return %arg0, %c0_i32, %c0_i32_0 : i32, i32, i32
  }
  func.func @transform_1(%arg0: i32) -> (i32, i32, i32) {
    %c0_i32 = arith.constant 0 : i32
    %0 = arith.subi %c0_i32, %arg0 : i32
    %c0_i32_0 = arith.constant 0 : i32
    %c0_i32_1 = arith.constant 0 : i32
    %c0_i32_2 = arith.constant 0 : i32
    return %0, %c0_i32_0, %c0_i32_1 : i32, i32, i32
  }
  func.func @transform_2(%arg0: i32) -> (i32, i32) {
    %c0_i32 = arith.constant 0 : i32
    %c0_i32_0 = arith.constant 0 : i32
    %c0_i32_1 = arith.constant 0 : i32
    return %c0_i32, %c0_i32_0 : i32, i32
  }
  func.func @transform_3(%arg0: i32) -> (i32, i32) {
    %c0_i32 = arith.constant 0 : i32
    %c0_i32_0 = arith.constant 0 : i32
    %c0_i32_1 = arith.constant 0 : i32
    return %c0_i32, %c0_i32_0 : i32, i32
  }
  func.func @transform_4(%arg0: i32) -> (i32, i32, i32) {
    %c0_i32 = arith.constant 0 : i32
    %c0_i32_0 = arith.constant 0 : i32
    %c0_i32_1 = arith.constant 0 : i32
    %c0_i32_2 = arith.constant 0 : i32
    return %c0_i32, %c0_i32_0, %c0_i32_1 : i32, i32, i32
  }
  func.func @transform_5(%arg0: i32) -> (i32, i32, i32) {
    %c0_i32 = arith.constant 0 : i32
    %c0_i32_0 = arith.constant 0 : i32
    %c0_i32_1 = arith.constant 0 : i32
    %c0_i32_2 = arith.constant 0 : i32
    return %c0_i32, %c0_i32_0, %c0_i32_1 : i32, i32, i32
  }
}

</mosaic_0001>

<bundles_post_ra>
// kernel: birnn_forward.2
= control target key start
LH: loop header
LB: loop body
LE: loop exit
PB: predicated region body
PF: predicated region fallthrough
CT: control target
= control target key end

     0   :  { %s4606_s2 = inlined_call_operand.vmem [shape: bf16[128,512], index: 2, kind: input, shape index: {}]   ;;  %s4607_s3 = inlined_call_operand.vmem [shape: bf16[128,512], index: 3, kind: input, shape index: {}]   ;;  %s4608_s0 = inlined_call_operand.vmem [shape: bf16[8,8,512], index: 0, kind: input, shape index: {}]   ;;  %s4609_s1 = inlined_call_operand.vmem [shape: bf16[8,8,512], index: 1, kind: input, shape index: {}]   ;;  %s4610_s4 = inlined_call_operand.vmem [shape: bf16[8,8,128], index: 4, kind: output, shape index: {0}]   ;;  %s4611_s5 = inlined_call_operand.vmem [shape: bf16[8,8,128], index: 5, kind: output, shape index: {1}]  }
   0x1   :  { %v2670_v0 = vld [vmem:[%s4606_s2 + $0xe0] sm:$0xf]  ;;  %v2932_v1 = vld [vmem:[%s4606_s2 + $0xec] sm:$0xf0]  ;;  %v2930_v2 = vld [vmem:[%s4606_s2 + $0xe4] sm:$0xf] }
   0x2   :  { %v3263_v3 = vor.u32 %v2932_v1, %v2670_v0  ;;  %v2672_v4 = vld [vmem:[%s4606_s2 + $0xf0] sm:$0xf0]  ;;  %v2931_v5 = vld [vmem:[%s4606_s2 + $0xec] sm:$0xf]  ;;  %v2680_v6 = vld [vmem:[%s4606_s2 + $0xf8] sm:$0xf0] }
   0x3   :  { %v3274_v7 = vor.u32 %v2930_v2, %v2672_v4  ;;  %v3276_v8 = vor.u32 %v2931_v5, %v2680_v6  ;;  %v2654_v9 = vld [vmem:[%s4606_s2 + $0xc0] sm:$0xf]  ;;  %v2928_v10 = vld [vmem:[%s4606_s2 + $0xcc] sm:$0xf0]  ;;  %v2926_v11 = vld [vmem:[%s4606_s2 + $0xc4] sm:$0xf] }
   0x4   :  { %301 = vmatpush.bf16.msra.mxu0 %v3263_v3  ;;  %v3288_v12 = vor.u32 %v2928_v10, %v2654_v9  ;;  %v2656_v13 = vld [vmem:[%s4606_s2 + $0xd0] sm:$0xf0]  ;;  %v2927_v14 = vld [vmem:[%s4606_s2 + $0xcc] sm:$0xf]  ;;  %v2664_v15 = vld [vmem:[%s4606_s2 + $0xd8] sm:$0xf0] }
   0x5   :  { %314 = vmatpush.bf16.msra.mxu1 %v3274_v7  ;;  %340 = vmatpush.bf16.msra.mxu3 %v3276_v8  ;;  %v3301_v16 = vor.u32 %v2926_v11, %v2656_v13  ;;  %v3303_v17 = vor.u32 %v2927_v14, %v2664_v15  ;;  %v2678_v18 = vld [vmem:[%s4606_s2 + $0xe8] sm:$0xf]  ;;  %v2933_v19 = vld [vmem:[%s4606_s2 + $0xf4] sm:$0xf0]  ;;  %v2638_v20 = vld [vmem:[%s4606_s2 + $0xa0] sm:$0xf] }
   0x6   :  { %v3314_v21 = vor.u32 %v2933_v19, %v2678_v18  ;;  %v2924_v22 = vld [vmem:[%s4606_s2 + $0xac] sm:$0xf0]  ;;  %v2922_v23 = vld [vmem:[%s4606_s2 + $0xa4] sm:$0xf]  ;;  %v2640_v24 = vld [vmem:[%s4606_s2 + $0xb0] sm:$0xf0] }
   0x7   :  { %v2923_v25 = vld [vmem:[%s4606_s2 + $0xac] sm:$0xf]  ;;  %v2648_v26 = vld [vmem:[%s4606_s2 + $0xb8] sm:$0xf0]  ;;  %v2662_v27 = vld [vmem:[%s4606_s2 + $0xc8] sm:$0xf]  ;;  %v3336_v28 = vor.u32 %v2924_v22, %v2638_v20  ;;  %v3349_v32 = vor.u32 %v2922_v23, %v2640_v24 }
   0x8   :  { %302 = vmatpush.bf16.msra.mxu0 %v3288_v12  ;;  %327 = vmatpush.bf16.msra.mxu2 %v3314_v21  ;;  %v2929_v29 = vld [vmem:[%s4606_s2 + $0xd4] sm:$0xf0]  ;;  %v2622_v30 = vld [vmem:[%s4606_s2 + $0x80] sm:$0xf]  ;;  %v2920_v31 = vld [vmem:[%s4606_s2 + $0x8c] sm:$0xf0]  ;;  %v3351_v33 = vor.u32 %v2923_v25, %v2648_v26 }
   0x9   :  { %315 = vmatpush.bf16.msra.mxu1 %v3301_v16  ;;  %341 = vmatpush.bf16.msra.mxu3 %v3303_v17  ;;  %v3353_v34 = vor.u32 %v2929_v29, %v2662_v27  ;;  %v2918_v35 = vld [vmem:[%s4606_s2 + $0x84] sm:$0xf]  ;;  %v2624_v36 = vld [vmem:[%s4606_s2 + $0x90] sm:$0xf0]  ;;  %v2919_v37 = vld [vmem:[%s4606_s2 + $0x8c] sm:$0xf]  ;;  %v3375_v41 = vor.u32 %v2920_v31, %v2622_v30 }
   0xa   :  { %v2632_v38 = vld [vmem:[%s4606_s2 + $0x98] sm:$0xf0]  ;;  %v2646_v39 = vld [vmem:[%s4606_s2 + $0xa8] sm:$0xf]  ;;  %v2925_v40 = vld [vmem:[%s4606_s2 + $0xb4] sm:$0xf0]  ;;  %v3387_v45 = vor.u32 %v2918_v35, %v2624_v36 }
   0xb   :  { %v3377_v42 = vor.u32 %v2925_v40, %v2646_v39  ;;  %v2606_v43 = vld [vmem:[%s4606_s2 + $0x60] sm:$0xf]  ;;  %v2916_v44 = vld [vmem:[%s4606_s2 + $0x6c] sm:$0xf0]  ;;  %v3389_v46 = vor.u32 %v2919_v37, %v2632_v38  ;;  %v2914_v47 = vld [vmem:[%s4606_s2 + $0x64] sm:$0xf] }
   0xc   :  { %303 = vmatpush.bf16.msra.mxu0 %v3336_v28  ;;  %328 = vmatpush.bf16.msra.mxu2 %v3353_v34  ;;  %v2630_v48 = vld [vmem:[%s4606_s2 + $0x88] sm:$0xf]  ;;  %v2921_v49 = vld [vmem:[%s4606_s2 + $0x94] sm:$0xf0]  ;;  %v2608_v50 = vld [vmem:[%s4606_s2 + $0x70] sm:$0xf0]  ;;  %v3411_v53 = vor.u32 %v2916_v44, %v2606_v43 }
   0xd   :  { %316 = vmatpush.bf16.msra.mxu1 %v3349_v32  ;;  %342 = vmatpush.bf16.msra.mxu3 %v3351_v33  ;;  %v2915_v51 = vld [vmem:[%s4606_s2 + $0x6c] sm:$0xf]  ;;  %v2616_v52 = vld [vmem:[%s4606_s2 + $0x78] sm:$0xf0]  ;;  %v3413_v54 = vor.u32 %v2921_v49, %v2630_v48  ;;  %v2590_v55 = vld [vmem:[%s4606_s2 + $0x40] sm:$0xf]  ;;  %v3423_v57 = vor.u32 %v2914_v47, %v2608_v50 }
   0xe   :  { %v2912_v56 = vld [vmem:[%s4606_s2 + $0x4c] sm:$0xf0]  ;;  %v3425_v58 = vor.u32 %v2915_v51, %v2616_v52  ;;  %v2910_v59 = vld [vmem:[%s4606_s2 + $0x44] sm:$0xf]  ;;  %v2614_v60 = vld [vmem:[%s4606_s2 + $0x68] sm:$0xf] }
   0xf   :  { %v2917_v61 = vld [vmem:[%s4606_s2 + $0x74] sm:$0xf0]  ;;  %v2592_v62 = vld [vmem:[%s4606_s2 + $0x50] sm:$0xf0]  ;;  %v2911_v63 = vld [vmem:[%s4606_s2 + $0x4c] sm:$0xf]  ;;  %v3447_v1 = vor.u32 %v2912_v56, %v2590_v55 }
  0x10   :  { %304 = vmatpush.bf16.msra.mxu0 %v3375_v41  ;;  %329 = vmatpush.bf16.msra.mxu2 %v3377_v42  ;;  %v2600_v0 = vld [vmem:[%s4606_s2 + $0x58] sm:$0xf0]  ;;  %v3449_v2 = vor.u32 %v2917_v61, %v2614_v60  ;;  %v2574_v4 = vld [vmem:[%s4606_s2 + $0x20] sm:$0xf]  ;;  %v2908_v5 = vld [vmem:[%s4606_s2 + $0x2c] sm:$0xf0]  ;;  %v3459_v6 = vor.u32 %v2910_v59, %v2592_v62 }
  0x11   :  { %317 = vmatpush.bf16.msra.mxu1 %v3387_v45  ;;  %343 = vmatpush.bf16.msra.mxu3 %v3389_v46  ;;  %v3461_v9 = vor.u32 %v2911_v63, %v2600_v0  ;;  %v2906_v10 = vld [vmem:[%s4606_s2 + $0x24] sm:$0xf]  ;;  %v2598_v11 = vld [vmem:[%s4606_s2 + $0x48] sm:$0xf]  ;;  %v2913_v13 = vld [vmem:[%s4606_s2 + $0x54] sm:$0xf0]  ;;  %v3483_v19 = vor.u32 %v2908_v5, %v2574_v4 }
  0x12   :  { %v2576_v14 = vld [vmem:[%s4606_s2 + $0x30] sm:$0xf0]  ;;  %v2907_v15 = vld [vmem:[%s4606_s2 + $0x2c] sm:$0xf]  ;;  %v2584_v18 = vld [vmem:[%s4606_s2 + $0x38] sm:$0xf0]  ;;  %v3485_v20 = vor.u32 %v2913_v13, %v2598_v11 }
  0x13   :  { %v2558_v22 = vld [vmem:[%s4606_s2] sm:$0xf]  ;;  %v2904_v23 = vld [vmem:[%s4606_s2 + $0xc] sm:$0xf0]  ;;  %v2902_v24 = vld [vmem:[%s4606_s2 + $0x4] sm:$0xf]  ;;  %v3498_v25 = vor.u32 %v2906_v10, %v2576_v14  ;;  %v3500_v26 = vor.u32 %v2907_v15, %v2584_v18 }
  0x14   :  { %305 = vmatpush.bf16.msra.mxu0 %v3411_v53  ;;  %330 = vmatpush.bf16.msra.mxu2 %v3413_v54  ;;  %v2560_v27 = vld [vmem:[%s4606_s2 + $0x10] sm:$0xf0]  ;;  %v2582_v29 = vld [vmem:[%s4606_s2 + $0x28] sm:$0xf]  ;;  %v2909_v30 = vld [vmem:[%s4606_s2 + $0x34] sm:$0xf0]  ;;  %v3531_v40 = vor.u32 %v2904_v23, %v2558_v22 }
  0x15   :  { %318 = vmatpush.bf16.msra.mxu1 %v3423_v57  ;;  %344 = vmatpush.bf16.msra.mxu3 %v3425_v58  ;;  %v2903_v31 = vld [vmem:[%s4606_s2 + $0xc] sm:$0xf]  ;;  %v2568_v35 = vld [vmem:[%s4606_s2 + $0x18] sm:$0xf0]  ;;  %v2803_v36 = vld [vmem:[%s4607_s3 + $0xe0] sm:$0xf]  ;;  %v3539_v47 = vor.u32 %v2909_v30, %v2582_v29  ;;  %v3543_v48 = vor.u32 %v2902_v24, %v2560_v27 }
  0x16   :  { %v2964_v37 = vld [vmem:[%s4607_s3 + $0xec] sm:$0xf0]  ;;  %v2962_v38 = vld [vmem:[%s4607_s3 + $0xe4] sm:$0xf]  ;;  %v2805_v39 = vld [vmem:[%s4607_s3 + $0xf0] sm:$0xf0]  ;;  %v3545_v49 = vor.u32 %v2903_v31, %v2568_v35 }
  0x17   :  { %v2963_v43 = vld [vmem:[%s4607_s3 + $0xec] sm:$0xf]  ;;  %v2813_v44 = vld [vmem:[%s4607_s3 + $0xf8] sm:$0xf0]  ;;  %v2566_v50 = vld [vmem:[%s4606_s2 + $0x8] sm:$0xf]  ;;  %v3553_v52 = vor.u32 %v2964_v37, %v2803_v36  ;;  %v3555_v55 = vor.u32 %v2962_v38, %v2805_v39 }
  0x18   :  { %306 = vmatpush.bf16.msra.mxu0 %v3447_v1  ;;  %331 = vmatpush.bf16.msra.mxu2 %v3449_v2  ;;  %v2905_v51 = vld [vmem:[%s4606_s2 + $0x14] sm:$0xf0]  ;;  %v2787_v56 = vld [vmem:[%s4607_s3 + $0xc0] sm:$0xf]  ;;  %v2811_v59 = vld [vmem:[%s4607_s3 + $0xe8] sm:$0xf]  ;;  %v3566_v61 = vor.u32 %v2963_v43, %v2813_v44 }
  0x19   :  { %319 = vmatpush.bf16.msra.mxu1 %v3459_v6  ;;  %345 = vmatpush.bf16.msra.mxu3 %v3461_v9  ;;  %v2965_v60 = vld [vmem:[%s4607_s3 + $0xf4] sm:$0xf0]  ;;  %v2960_v62 = vld [vmem:[%s4607_s3 + $0xcc] sm:$0xf0]  ;;  %v2958_v63 = vld [vmem:[%s4607_s3 + $0xc4] sm:$0xf]  ;;  %v3585_v10 = vor.u32 %v2905_v51, %v2566_v50 }
  0x1a   :  { %4674 = vst [vmem:[#allocation6_spill] sm:$0xff] %v3566_v61  ;;  %v2789_v0 = vld [vmem:[%s4607_s3 + $0xd0] sm:$0xf0]  ;;  %v2959_v4 = vld [vmem:[%s4607_s3 + $0xcc] sm:$0xf]  ;;  %v3589_v11 = vor.u32 %v2965_v60, %v2811_v59  ;;  %v3593_v13 = vor.u32 %v2960_v62, %v2787_v56  ;;  %v4612_v23 = vmov 0.0|0.0  }
  0x1b   :  { %v2797_v5 = vld [vmem:[%s4607_s3 + $0xd8] sm:$0xf0]  ;;  %v3595_v14 = vor.u32 %v2958_v63, %v2789_v0  ;;  %v2771_v15 = vld [vmem:[%s4607_s3 + $0xa0] sm:$0xf]  ;;  %v2795_v18 = vld [vmem:[%s4607_s3 + $0xc8] sm:$0xf] }
  0x1c   :  { %307 = vmatpush.bf16.msra.mxu0 %v3483_v19  ;;  %332 = vmatpush.bf16.msra.mxu2 %v3485_v20  ;;  %4675 = vst [vmem:[#allocation7_spill] sm:$0xff] %v3589_v11  ;;  %v2961_v22 = vld [vmem:[%s4607_s3 + $0xd4] sm:$0xf0]  ;;  %v3608_v24 = vor.u32 %v2959_v4, %v2797_v5  ;;  %v2956_v27 = vld [vmem:[%s4607_s3 + $0xac] sm:$0xf0] }
  0x1d   :  { %320 = vmatpush.bf16.msra.mxu1 %v3498_v25  ;;  %346 = vmatpush.bf16.msra.mxu3 %v3500_v26  ;;  %4676 = vst [vmem:[#allocation8_spill] sm:$0xff] %v3593_v13  ;;  %v2954_v29 = vld [vmem:[%s4607_s3 + $0xa4] sm:$0xf]  ;;  %v2773_v30 = vld [vmem:[%s4607_s3 + $0xb0] sm:$0xf0]  ;;  %v3629_v36 = vor.u32 %v2961_v22, %v2795_v18  ;;  %v3633_v37 = vor.u32 %v2956_v27, %v2771_v15 }
  0x1e   :  { %4677 = vst [vmem:[#allocation9_spill] sm:$0xff] %v3595_v14  ;;  %v2955_v31 = vld [vmem:[%s4607_s3 + $0xac] sm:$0xf]  ;;  %v2781_v35 = vld [vmem:[%s4607_s3 + $0xb8] sm:$0xf0]  ;;  %v3635_v38 = vor.u32 %v2954_v29, %v2773_v30 }
  0x1f   :  { %4678 = vst [vmem:[#allocation10_spill] sm:$0xff] %v3608_v24  ;;  %v2755_v39 = vld [vmem:[%s4607_s3 + $0x80] sm:$0xf]  ;;  %v2779_v43 = vld [vmem:[%s4607_s3 + $0xa8] sm:$0xf]  ;;  %v3647_v50 = vor.u32 %v2955_v31, %v2781_v35 }
  0x20   :  { %308 = vmatpush.bf16.msra.mxu0 %v3531_v40  ;;  %333 = vmatpush.bf16.msra.mxu2 %v3539_v47  ;;  %4679 = vst [vmem:[#allocation11_spill] sm:$0xff] %v3629_v36  ;;  %v2957_v44 = vld [vmem:[%s4607_s3 + $0xb4] sm:$0xf0]  ;;  %v2952_v51 = vld [vmem:[%s4607_s3 + $0x8c] sm:$0xf0] }
  0x21   :  { %321 = vmatpush.bf16.msra.mxu1 %v3543_v48  ;;  %347 = vmatpush.bf16.msra.mxu3 %v3545_v49  ;;  %4680 = vst [vmem:[#allocation12_spill] sm:$0xff] %v3633_v37  ;;  %v2950_v56 = vld [vmem:[%s4607_s3 + $0x84] sm:$0xf]  ;;  %v2757_v59 = vld [vmem:[%s4607_s3 + $0x90] sm:$0xf0]  ;;  %v3666_v63 = vor.u32 %v2957_v44, %v2779_v43  ;;  %v3670_v0 = vor.u32 %v2952_v51, %v2755_v39 }
  0x22   :  { %4681 = vst [vmem:[#allocation13_spill] sm:$0xff] %v3635_v38  ;;  %v2951_v60 = vld [vmem:[%s4607_s3 + $0x8c] sm:$0xf]  ;;  %v2765_v62 = vld [vmem:[%s4607_s3 + $0x98] sm:$0xf0]  ;;  %v3672_v4 = vor.u32 %v2950_v56, %v2757_v59 }
  0x23   :  { %309 = vmatmul.bf16.vlgmr.msra.gmra.mxu0 %v4612_v23  ;;  %4682 = vst [vmem:[#allocation14_spill] sm:$0xff] %v3647_v50  ;;  %v2739_v5 = vld [vmem:[%s4607_s3 + $0x60] sm:$0xf]  ;;  %v2763_v15 = vld [vmem:[%s4607_s3 + $0x88] sm:$0xf]  ;;  %v3684_v22 = vor.u32 %v2951_v60, %v2765_v62 }
  0x24   :  { %588 = vmatpush.bf16.msrb.mxu0 %v3553_v52  ;;  %322 = vmatmul.bf16.vlgmr.msra.gmra.mxu1 %v4612_v23  ;;  %4683 = vst [vmem:[#allocation15_spill] sm:$0xff] %v3666_v63  ;;  %v2953_v18 = vld [vmem:[%s4607_s3 + $0x94] sm:$0xf0]  ;;  %v2948_v27 = vld [vmem:[%s4607_s3 + $0x6c] sm:$0xf0] }
  0x25   :  { %601 = vmatpush.bf16.msrb.mxu1 %v3555_v55  ;;  %627 = vmatpush.bf16.msrb.mxu3 %v3566_v61  ;;  %4684 = vst [vmem:[#allocation16_spill] sm:$0xff] %v3670_v0  ;;  %v2946_v29 = vld [vmem:[%s4607_s3 + $0x64] sm:$0xf]  ;;  %v2741_v30 = vld [vmem:[%s4607_s3 + $0x70] sm:$0xf0]  ;;  %v3702_v39 = vor.u32 %v2953_v18, %v2763_v15  ;;  %v3706_v43 = vor.u32 %v2948_v27, %v2739_v5 }
  0x26   :  { %334 = vmatpush.bf16.msra.mxu2 %v3585_v10  ;;  %348 = vmatmul.bf16.vlgmr.msra.gmra.mxu3 %v4612_v23  ;;  %4685 = vst [vmem:[#allocation17_spill] sm:$0xff] %v3672_v4  ;;  %v2947_v31 = vld [vmem:[%s4607_s3 + $0x6c] sm:$0xf]  ;;  %v2749_v35 = vld [vmem:[%s4607_s3 + $0x78] sm:$0xf0]  ;;  %v3708_v44 = vor.u32 %v2946_v29, %v2741_v30 }
  0x27   :  { %4686 = vst [vmem:[#allocation18_spill] sm:$0xff] %v3684_v22  ;;  %v2723_v51 = vld [vmem:[%s4607_s3 + $0x40] sm:$0xf]  ;;  %v2747_v56 = vld [vmem:[%s4607_s3 + $0x68] sm:$0xf]  ;;  %v3720_v60 = vor.u32 %v2947_v31, %v2749_v35 }
  0x28   :  { %589 = vmatpush.bf16.msrb.mxu0 %v3593_v13  ;;  %4687 = vst [vmem:[#allocation19_spill] sm:$0xff] %v3702_v39  ;;  %v2949_v59 = vld [vmem:[%s4607_s3 + $0x74] sm:$0xf0]  ;;  %v2944_v62 = vld [vmem:[%s4607_s3 + $0x4c] sm:$0xf0] }
  0x29   :  { %602 = vmatpush.bf16.msrb.mxu1 %v3595_v14  ;;  %628 = vmatpush.bf16.msrb.mxu3 %v3608_v24  ;;  %4688 = vst [vmem:[#allocation20_spill] sm:$0xff] %v3706_v43  ;;  %v2942_v5 = vld [vmem:[%s4607_s3 + $0x44] sm:$0xf]  ;;  %v2725_v15 = vld [vmem:[%s4607_s3 + $0x50] sm:$0xf0]  ;;  %v3738_v29 = vor.u32 %v2949_v59, %v2747_v56  ;;  %v3742_v30 = vor.u32 %v2944_v62, %v2723_v51 }
  0x2a   :  { %614 = vmatpush.bf16.msrb.mxu2 %v3589_v11  ;;  %4689 = vst [vmem:[#allocation21_spill] sm:$0xff] %v3708_v44  ;;  %v2943_v18 = vld [vmem:[%s4607_s3 + $0x4c] sm:$0xf]  ;;  %v2733_v27 = vld [vmem:[%s4607_s3 + $0x58] sm:$0xf0]  ;;  %v3744_v31 = vor.u32 %v2942_v5, %v2725_v15 }
  0x2b   :  { %335 = vmatmul.bf16.vlgmr.msra.gmra.mxu2 %v4612_v23  ;;  %4690 = vst [vmem:[#allocation22_spill] sm:$0xff] %v3720_v60  ;;  %v2707_v35 = vld [vmem:[%s4607_s3 + $0x20] sm:$0xf]  ;;  %v2731_v23 = vld [vmem:[%s4607_s3 + $0x48] sm:$0xf]  ;;  %v3756_v59 = vor.u32 %v2943_v18, %v2733_v27 }
  0x2c   :  { %590 = vmatpush.bf16.msrb.mxu0 %v3633_v37  ;;  %4691 = vst [vmem:[#allocation23_spill] sm:$0xff] %v3738_v29  ;;  %v2945_v56 = vld [vmem:[%s4607_s3 + $0x54] sm:$0xf0]  ;;  %v2940_v51 = vld [vmem:[%s4607_s3 + $0x2c] sm:$0xf0] }
  0x2d   :  { %603 = vmatpush.bf16.msrb.mxu1 %v3635_v38  ;;  %629 = vmatpush.bf16.msrb.mxu3 %v3647_v50  ;;  %4692 = vst [vmem:[#allocation24_spill] sm:$0xff] %v3742_v30  ;;  %v2938_v62 = vld [vmem:[%s4607_s3 + $0x24] sm:$0xf]  ;;  %v2709_v5 = vld [vmem:[%s4607_s3 + $0x30] sm:$0xf0]  ;;  %v3774_v27 = vor.u32 %v2945_v56, %v2731_v23 }
  0x2e   :  { %615 = vmatpush.bf16.msrb.mxu2 %v3629_v36  ;;  %4693 = vst [vmem:[#allocation25_spill] sm:$0xff] %v3744_v31  ;;  %v2939_v15 = vld [vmem:[%s4607_s3 + $0x2c] sm:$0xf]  ;;  %v2717_v18 = vld [vmem:[%s4607_s3 + $0x38] sm:$0xf0] }
  0x2f   :  { %4694 = vst [vmem:[#allocation26_spill] sm:$0xff] %v3756_v59  ;;  %v2941_v23 = vld [vmem:[%s4607_s3 + $0x34] sm:$0xf0]  ;;  %v3792_v56 = vor.u32 %v2939_v15, %v2717_v18  ;;  %v2701_v15 = vld [vmem:[%s4607_s3 + $0x18] sm:$0xf0] }
  0x30   :  { %591 = vmatpush.bf16.msrb.mxu0 %v3670_v0  ;;  %4695 = vst [vmem:[#allocation27_spill] sm:$0xff] %v3774_v27 }
  0x31   :  { %604 = vmatpush.bf16.msrb.mxu1 %v3672_v4  ;;  %630 = vmatpush.bf16.msrb.mxu3 %v3684_v22  ;;  %4698 = vst [vmem:[#allocation30_spill] sm:$0xff] %v3792_v56 }
  0x32   :  { %616 = vmatpush.bf16.msrb.mxu2 %v3666_v63 }
  0x34   :  { %592 = vmatpush.bf16.msrb.mxu0 %v3706_v43  ;;  %v2691_v43 = vld [vmem:[%s4607_s3] sm:$0xf] }
  0x35   :  { %605 = vmatpush.bf16.msrb.mxu1 %v3708_v44  ;;  %631 = vmatpush.bf16.msrb.mxu3 %v3720_v60  ;;  %v3778_v60 = vor.u32 %v2940_v51, %v2707_v35  ;;  %v3780_v44 = vor.u32 %v2938_v62, %v2709_v5  ;;  %v2936_v35 = vld [vmem:[%s4607_s3 + $0xc] sm:$0xf0]  ;;  %v2934_v51 = vld [vmem:[%s4607_s3 + $0x4] sm:$0xf]  ;;  %v2693_v62 = vld [vmem:[%s4607_s3 + $0x10] sm:$0xf0] }
  0x36   :  { %617 = vmatpush.bf16.msrb.mxu2 %v3702_v39  ;;  %v2715_v39 = vld [vmem:[%s4607_s3 + $0x28] sm:$0xf]  ;;  %v2935_v5 = vld [vmem:[%s4607_s3 + $0xc] sm:$0xf] }
  0x37   :  { %4696 = vst [vmem:[#allocation28_spill] sm:$0xff] %v3778_v60  ;;  %v3810_v18 = vor.u32 %v2941_v23, %v2715_v39  ;;  %v2937_v39 = vld [vmem:[%s4607_s3 + $0x14] sm:$0xf0]  ;;  %v4704_v23 = vmov 0.0|0.0  }
  0x38   :  { %593 = vmatpush.bf16.msrb.mxu0 %v3742_v30  ;;  %4697 = vst [vmem:[#allocation29_spill] sm:$0xff] %v3780_v44  ;;  %v3819_v30 = vor.u32 %v2935_v5, %v2701_v15  ;;  %v4709_v5 = vld [vmem:[#allocation23_spill] sm:$0xff]  ;;  %v4710_v15 = vld [vmem:[#allocation24_spill] sm:$0xff] }
  0x39   :  { %606 = vmatpush.bf16.msrb.mxu1 %v3744_v31  ;;  %632 = vmatpush.bf16.msrb.mxu3 %v3756_v59  ;;  %4699 = vst [vmem:[#allocation31_spill] sm:$0xff] %v3810_v18  ;;  %v3814_v59 = vor.u32 %v2936_v35, %v2691_v43  ;;  %v3816_v31 = vor.u32 %v2934_v51, %v2693_v62  ;;  %v4706_v35 = vld [vmem:[#allocation20_spill] sm:$0xff]  ;;  %v4707_v51 = vld [vmem:[#allocation21_spill] sm:$0xff]  ;;  %v4708_v62 = vld [vmem:[#allocation22_spill] sm:$0xff] }
  0x3a   :  { %618 = vmatpush.bf16.msrb.mxu2 %v3738_v29  ;;  %4702 = vst [vmem:[#allocation34_spill] sm:$0xff] %v3819_v30  ;;  %v2699_v29 = vld [vmem:[%s4607_s3 + $0x8] sm:$0xf] }
  0x3b   :  { %4700 = vst [vmem:[#allocation32_spill] sm:$0xff] %v3814_v59  ;;  %v3830_v43 = vor.u32 %v2937_v39, %v2699_v29  ;;  %v4705_v29 = vld [vmem:[#allocation19_spill] sm:$0xff]  ;;  %v4711_v39 = vld [vmem:[#allocation25_spill] sm:$0xff] }
  0x3c   :  { %594 = vmatpush.bf16.msrb.mxu0 %v3778_v60  ;;  %4701 = vst [vmem:[#allocation33_spill] sm:$0xff] %v3816_v31 }
  0x3d   :  { %607 = vmatpush.bf16.msrb.mxu1 %v3780_v44  ;;  %633 = vmatpush.bf16.msrb.mxu3 %v3792_v56  ;;  %4703 = vst [vmem:[#allocation35_spill] sm:$0xff] %v3830_v43 }
  0x3e   :  { %619 = vmatpush.bf16.msrb.mxu2 %v3774_v27 }
  0x40   :  { %595 = vmatpush.bf16.msrb.mxu0 %v3814_v59 }
  0x41   :  { %608 = vmatpush.bf16.msrb.mxu1 %v3816_v31  ;;  %634 = vmatpush.bf16.msrb.mxu3 %v3819_v30 }
  0x42   :  { %620 = vmatpush.bf16.msrb.mxu2 %v3810_v18 }
  0x43   :  { %596 = vmatmul.bf16.vlgmr.msrb.gmra.mxu0 %v4704_v23 }
  0x44   :  { %719 = vmatpush.bf16.msra.mxu0 %v3263_v3  ;;  %609 = vmatmul.bf16.vlgmr.msrb.gmra.mxu1 %v4704_v23 }
  0x45   :  { %732 = vmatpush.bf16.msra.mxu1 %v3274_v7  ;;  %758 = vmatpush.bf16.msra.mxu3 %v3276_v8 }
  0x46   :  { %635 = vmatmul.bf16.vlgmr.msrb.gmra.mxu3 %v4704_v23  ;;  %621 = vmatpush.bf16.msrb.mxu2 %v3830_v43 }
  0x48   :  { %720 = vmatpush.bf16.msra.mxu0 %v3288_v12 }
  0x49   :  { %733 = vmatpush.bf16.msra.mxu1 %v3301_v16  ;;  %759 = vmatpush.bf16.msra.mxu3 %v3303_v17 }
  0x4a   :  { %745 = vmatpush.bf16.msra.mxu2 %v3314_v21 }
  0x4b   :  { %622 = vmatmul.bf16.vlgmr.msrb.gmra.mxu2 %v4704_v23  ;;  %v4712_v23 = vld [vmem:[#allocation26_spill] sm:$0xff] }
  0x4c   :  { %721 = vmatpush.bf16.msra.mxu0 %v3336_v28 }
  0x4d   :  { %734 = vmatpush.bf16.msra.mxu1 %v3349_v32  ;;  %760 = vmatpush.bf16.msra.mxu3 %v3351_v33 }
  0x4e   :  { %746 = vmatpush.bf16.msra.mxu2 %v3353_v34 }
  0x50   :  { %722 = vmatpush.bf16.msra.mxu0 %v3375_v41 }
  0x51   :  { %735 = vmatpush.bf16.msra.mxu1 %v3387_v45  ;;  %761 = vmatpush.bf16.msra.mxu3 %v3389_v46 }
  0x52   :  { %747 = vmatpush.bf16.msra.mxu2 %v3377_v42 }
  0x54   :  { %723 = vmatpush.bf16.msra.mxu0 %v3411_v53 }
  0x55   :  { %736 = vmatpush.bf16.msra.mxu1 %v3423_v57  ;;  %762 = vmatpush.bf16.msra.mxu3 %v3425_v58 }
  0x56   :  { %748 = vmatpush.bf16.msra.mxu2 %v3413_v54 }
  0x58   :  { %724 = vmatpush.bf16.msra.mxu0 %v3447_v1 }
  0x59   :  { %737 = vmatpush.bf16.msra.mxu1 %v3459_v6  ;;  %763 = vmatpush.bf16.msra.mxu3 %v3461_v9 }
  0x5a   :  { %749 = vmatpush.bf16.msra.mxu2 %v3449_v2 }
  0x5c   :  { %725 = vmatpush.bf16.msra.mxu0 %v3483_v19 }
  0x5d   :  { %738 = vmatpush.bf16.msra.mxu1 %v3498_v25  ;;  %764 = vmatpush.bf16.msra.mxu3 %v3500_v26 }
  0x5e   :  { %750 = vmatpush.bf16.msra.mxu2 %v3485_v20 }
  0x60   :  { %726 = vmatpush.bf16.msra.mxu0 %v3531_v40 }
  0x61   :  { %739 = vmatpush.bf16.msra.mxu1 %v3543_v48  ;;  %765 = vmatpush.bf16.msra.mxu3 %v3545_v49 }
  0x62   :  { %751 = vmatpush.bf16.msra.mxu2 %v3539_v47 }
  0x64   :  { %845 = vmatpush.bf16.msrb.mxu0 %v3553_v52 }
  0x65   :  { %858 = vmatpush.bf16.msrb.mxu1 %v3555_v55  ;;  %884 = vmatpush.bf16.msrb.mxu3 %v3566_v61 }
  0x66   :  { %752 = vmatpush.bf16.msra.mxu2 %v3585_v10 }
  0x68   :  { %846 = vmatpush.bf16.msrb.mxu0 %v3593_v13 }
  0x69   :  { %859 = vmatpush.bf16.msrb.mxu1 %v3595_v14  ;;  %885 = vmatpush.bf16.msrb.mxu3 %v3608_v24 }
  0x6a   :  { %871 = vmatpush.bf16.msrb.mxu2 %v3589_v11 }
  0x6c   :  { %847 = vmatpush.bf16.msrb.mxu0 %v3633_v37 }
  0x6d   :  { %860 = vmatpush.bf16.msrb.mxu1 %v3635_v38  ;;  %886 = vmatpush.bf16.msrb.mxu3 %v3647_v50 }
  0x6e   :  { %872 = vmatpush.bf16.msrb.mxu2 %v3629_v36 }
  0x70   :  { %848 = vmatpush.bf16.msrb.mxu0 %v3670_v0 }
  0x71   :  { %861 = vmatpush.bf16.msrb.mxu1 %v3672_v4  ;;  %887 = vmatpush.bf16.msrb.mxu3 %v3684_v22 }
  0x72   :  { %873 = vmatpush.bf16.msrb.mxu2 %v3666_v63 }
  0x74   :  { %849 = vmatpush.bf16.msrb.mxu0 %v4706_v35 }
  0x75   :  { %862 = vmatpush.bf16.msrb.mxu1 %v4707_v51  ;;  %888 = vmatpush.bf16.msrb.mxu3 %v4708_v62 }
  0x76   :  { %874 = vmatpush.bf16.msrb.mxu2 %v4705_v29 }
  0x78   :  { %850 = vmatpush.bf16.msrb.mxu0 %v4710_v15 }
  0x79   :  { %863 = vmatpush.bf16.msrb.mxu1 %v4711_v39  ;;  %889 = vmatpush.bf16.msrb.mxu3 %v4712_v23  ;;  %v134_v23 = vld [vmem:[%s4608_s0] sm:$0xff] }
  0x7a   :  { %875 = vmatpush.bf16.msrb.mxu2 %v4709_v5 }
  0x7c   :  { %851 = vmatpush.bf16.msrb.mxu0 %v3778_v60  ;;  %v137_v60 = vunpack.c.h.bf16 %v134_v23 }
  0x7d   :  { %864 = vmatpush.bf16.msrb.mxu1 %v3780_v44  ;;  %890 = vmatpush.bf16.msrb.mxu3 %v3792_v56 }
  0x7e   :  { %876 = vmatpush.bf16.msrb.mxu2 %v3774_v27  ;;  %v136_v27 = vunpack.c.l.bf16 %v134_v23 }
  0x80   :  { %852 = vmatpush.bf16.msrb.mxu0 %v3814_v59  ;;  %v135_v59 = vld [vmem:[%s4608_s0 + $0x8] sm:$0xff] }
  0x81   :  { %865 = vmatpush.bf16.msrb.mxu1 %v3816_v31  ;;  %891 = vmatpush.bf16.msrb.mxu3 %v3819_v30  ;;  %v139_v30 = vunpack.c.h.bf16 %v135_v59 }
  0x82   :  { %877 = vmatpush.bf16.msrb.mxu2 %v3810_v18 }
  0x86   :  { %878 = vmatpush.bf16.msrb.mxu2 %v3830_v43 }
  0xa0   :  { %v310_v39 = vpop.f32.mrf.mxu0 }
  0xa1   :  { %v353_v44 = vadd.f32 %v310_v39, %v136_v27  ;;  %v323_v15 = vpop.f32.mrf.mxu1 }
  0xa2   :  { %v354_v56 = vadd.f32 %v323_v15, %v137_v60  ;;  %v138_v60 = vunpack.c.l.bf16 %v135_v59 }
  0xa3   :  { %v2684_v18 = vmul.f32 -1.442695, %v353_v44 }
  0xa4   :  { %v2685_v31 = vmul.f32 -1.442695, %v354_v56 }
  0xa5   :  { %2967 = vpow2.f32 %v2684_v18 }
  0xa6   :  { %2969 = vpow2.f32 %v2685_v31 }
  0xa8   :  { %v312_v62 = vpop.f32.mrf.mxu0 }
  0xa9   :  { %v349_v43 = vpop.f32.mrf.mxu3  ;;  %v325_v51 = vpop.f32.mrf.mxu1 }
  0xaa   :  { %v356_v5 = vadd.f32 %v349_v43, %v139_v30 }
  0xab   :  { %v2968_v22 = vpop.eup %2967 }
  0xac   :  { %v2686_v23 = vmul.f32 -1.442695, %v356_v5  ;;  %v2970_v29 = vpop.eup %2969  ;;  %v360_v27 = vadd.f32 1.0, %v2968_v22 }
  0xad   :  { %v379_v39 = vadd.f32 1.0, %v2970_v29 }
  0xae   :  { %v336_v35 = vpop.f32.mrf.mxu2  ;;  %2971 = vpow2.f32 %v2686_v23  ;;  %vm366_vm0 = vweird.f32 %v360_v27  ;;  %v372_v22 = vand.u32 2147483648, %v360_v27  ;;  %v370_v59 = vand.u32 2147483647, %v360_v27  ;;  %v2687_v23 = vld [vmem:[%s4609_s1 + $0x70] sm:$0xff] }
  0xaf   :  { %2973 = vrcp.f32 %v360_v27  ;;  %v355_v44 = vadd.f32 %v336_v35, %v138_v60  ;;  %v391_v51 = vand.u32 2147483648, %v379_v39  ;;  %vm385_vm2 = vweird.f32 %v379_v39 }
  0xb0   :  { %2975 = vrcp.f32 %v379_v39  ;;  %v389_v35 = vand.u32 2147483647, %v379_v39  ;;  %vm371_vm5 = vcmp.eq.f32.partialorder %v370_v59, 8.507059e+37  ;;  %v424_v63 = vunpack.c.h.bf16 %v2687_v23 }
  0xb1   :  { %v351_v15 = vpop.f32.mrf.mxu3  ;;  %2977 = vtanh.f32 %v355_v44 }
  0xb2   :  { %vm390_vm7 = vcmp.eq.f32.partialorder %v389_v35, 8.507059e+37  ;;  %v2688_v35 = vld [vmem:[%s4609_s1 + $0x78] sm:$0xff] }
  0xb4   :  { %v2972_v18 = vpop.eup %2971 }
  0xb5   :  { %v2974_v4 = vpop.eup %2973  ;;  %v3908_v31 = vadd.f32 1.0, %v2972_v18 }
  0xb6   :  { %v338_v56 = vpop.f32.mrf.mxu2  ;;  %v2976_v62 = vpop.eup %2975  ;;  %v362_v30 = vmul.f32 %v2974_v4, %v360_v27  ;;  %vm367_vm1 = vweird.f32 %v2974_v4 }
  0xb7   :  { %v381_v43 = vmul.f32 %v2976_v62, %v379_v39  ;;  %2979 = vrcp.f32 %v3908_v31  ;;  %vm386_vm3 = vweird.f32 %v2976_v62  ;;  %vm3914_vm4 = vmor %vm366_vm0, %vm367_vm1  ;;  %v373_v56 = vor.u32 1.1754944e-38, %v372_v22  ;;  %v2978_v18 = vpop.eup %2977 }
  0xb8   :  { %v363_v29 = vsub.f32 1.0, %v362_v30  ;;  %v392_v30 = vor.u32 1.1754944e-38, %v391_v51  ;;  %vm3918_vm6 = vmor %vm385_vm2, %vm386_vm3  ;;  %v423_v39 = vunpack.c.l.bf16 %v2687_v23  ;;  %vm405_vm8 = vweird.f32 %v3908_v31 }
  0xb9   :  { %v382_v5 = vsub.f32 1.0, %v381_v43  ;;  %v411_v23 = vand.u32 2147483648, %v3908_v31 }
  0xba   :  { %v364_v60 = vmul.f32 %v2974_v4, %v363_v29 }
  0xbb   :  { %v383_v15 = vmul.f32 %v2976_v62, %v382_v5 }
  0xbc   :  { %v365_v0 = vadd.f32 %v2974_v4, %v364_v60 }
  0xbd   :  { %v2980_v43 = vpop.eup %2979  ;;  %v384_v50 = vadd.f32 %v2976_v62, %v383_v15 }
  0xbe   :  { %v401_v29 = vmul.f32 %v2980_v43, %v3908_v31  ;;  %v369_v5 = vsel %vm3914_vm4, %v2974_v4, %v365_v0  ;;  %vm406_vm9 = vweird.f32 %v2980_v43 }
  0xbf   :  { %v374_v22 = vsel %vm371_vm5, %v373_v56, %v369_v5  ;;  %v388_v51 = vsel %vm3918_vm6, %v2976_v62, %v384_v50  ;;  %v409_v56 = vand.u32 2147483647, %v3908_v31  ;;  %vm3936_vm10 = vmor %vm405_vm8, %vm406_vm9 }
  0xc0   :  { %v597_v59 = vpop.f32.mrf.mxu0  ;;  %v402_v38 = vsub.f32 1.0, %v401_v29  ;;  %v393_v37 = vsel %vm390_vm7, %v392_v30, %v388_v51  ;;  %v416_v24 = vmul.f32 %v2978_v18, %v374_v22  ;;  %v426_v30 = vunpack.c.h.bf16 %v2688_v35 }
  0xc1   :  { %v610_v60 = vpop.f32.mrf.mxu1  ;;  %v640_v15 = vadd.f32 %v597_v59, %v423_v39  ;;  %v415_v0 = vmul.f32 0.0, %v393_v37  ;;  %v412_v39 = vor.u32 1.1754944e-38, %v411_v23  ;;  %vm410_vm11 = vcmp.eq.f32.partialorder %v409_v56, 8.507059e+37 }
  0xc2   :  { %v641_v4 = vadd.f32 %v610_v60, %v424_v63  ;;  %v403_v44 = vmul.f32 %v2980_v43, %v402_v38 }
  0xc3   :  { %v2817_v5 = vmul.f32 -1.442695, %v640_v15  ;;  %v3940_v62 = vadd.f32 %v416_v24, %v415_v0 }
  0xc4   :  { %v2818_v18 = vmul.f32 -1.442695, %v641_v4  ;;  %v404_v27 = vadd.f32 %v2980_v43, %v403_v44  ;;  %v425_v44 = vunpack.c.l.bf16 %v2688_v35 }
  0xc5   :  { %2981 = vpow2.f32 %v2817_v5 }
  0xc6   :  { %2983 = vtanh.f32 %v3940_v62  ;;  %v408_v38 = vsel %vm3936_vm10, %v2980_v43, %v404_v27 }
  0xc7   :  { %2985 = vpow2.f32 %v2818_v18  ;;  %v413_v24 = vsel %vm410_vm11, %v412_v39, %v408_v38 }
  0xc8   :  { %v599_v31 = vpop.f32.mrf.mxu0 }
  0xc9   :  { %v636_v37 = vpop.f32.mrf.mxu3  ;;  %v612_v29 = vpop.f32.mrf.mxu1 }
  0xca   :  { %v643_v63 = vadd.f32 %v636_v37, %v426_v30 }
  0xcb   :  { %v2982_v59 = vpop.eup %2981 }
  0xcc   :  { %v2819_v22 = vmul.f32 -1.442695, %v643_v63  ;;  %v2984_v60 = vpop.eup %2983  ;;  %v647_v15 = vadd.f32 1.0, %v2982_v59 }
  0xcd   :  { %v2986_v0 = vpop.eup %2985  ;;  %v419_v23 = vmul.f32 %v2984_v60, %v413_v24 }
  0xce   :  { %v623_v51 = vpop.f32.mrf.mxu2  ;;  %2987 = vpow2.f32 %v2819_v22  ;;  %v666_v4 = vadd.f32 1.0, %v2986_v0  ;;  %v659_v63 = vand.u32 2147483648, %v647_v15  ;;  %v657_v22 = vand.u32 2147483647, %v647_v15 }
  0xcf   :  { %2989 = vrcp.f32 %v647_v15  ;;  %v707_v18 = vpack.c.bf16 %v419_v23, %v419_v23  ;;  %v642_v56 = vadd.f32 %v623_v51, %v425_v44  ;;  %vm653_vm13 = vweird.f32 %v647_v15 }
  0xd0   :  { %2991 = vrcp.f32 %v666_v4  ;;  %v678_v51 = vand.u32 2147483648, %v666_v4  ;;  %v676_v0 = vand.u32 2147483647, %v666_v4  ;;  %vm672_vm0 = vweird.f32 %v666_v4 }
  0xd1   :  { %v638_v5 = vpop.f32.mrf.mxu3  ;;  %708 = vst [vmem:[%s4610_s4] sm:$0xf] %v707_v18  ;;  %727 = vmatmul.bf16.vlgmr.msra.gmra.mxu0 %v707_v18  ;;  %740 = vmatmul.bf16.vlgmr.msra.gmra.mxu1 %v707_v18  ;;  %vm658_vm1 = vcmp.eq.f32.partialorder %v657_v22, 8.507059e+37 }
  0xd2   :  { %753 = vmatmul.bf16.vlgmr.msra.gmra.mxu2 %v707_v18  ;;  %766 = vmatmul.bf16.vlgmr.msra.gmra.mxu3 %v707_v18  ;;  %v660_v5 = vor.u32 1.1754944e-38, %v659_v63  ;;  %vm677_vm3 = vcmp.eq.f32.partialorder %v676_v0, 8.507059e+37 }
  0xd3   :  { %977 = vmatpush.bf16.msra.mxu0 %v3263_v3  ;;  %990 = vmatpush.bf16.msra.mxu1 %v3274_v7 }
  0xd4   :  { %v2988_v43 = vpop.eup %2987  ;;  %1003 = vmatpush.bf16.msra.mxu2 %v3314_v21  ;;  %1016 = vmatpush.bf16.msra.mxu3 %v3276_v8 }
  0xd5   :  { %v3948_v30 = vadd.f32 1.0, %v2988_v43  ;;  %v2990_v35 = vpop.eup %2989  ;;  %v679_v43 = vor.u32 1.1754944e-38, %v678_v51 }
  0xd6   :  { %v625_v50 = vpop.f32.mrf.mxu2  ;;  %v649_v27 = vmul.f32 %v2990_v35, %v647_v15  ;;  %v2992_v39 = vpop.eup %2991  ;;  %vm654_vm12 = vweird.f32 %v2990_v35 }
  0xd7   :  { %2993 = vrcp.f32 %v3948_v30  ;;  %v668_v38 = vmul.f32 %v2992_v39, %v666_v4  ;;  %978 = vmatpush.bf16.msra.mxu0 %v3288_v12  ;;  %991 = vmatpush.bf16.msra.mxu1 %v3301_v16  ;;  %vm673_vm14 = vweird.f32 %v2992_v39  ;;  %vm655_vm15 = vmor %vm653_vm13, %vm654_vm12  ;;  %vm692_vm5 = vweird.f32 %v3948_v30 }
  0xd8   :  { %2995 = vtanh.f32 %v642_v56  ;;  %v650_v37 = vsub.f32 1.0, %v649_v27  ;;  %1004 = vmatpush.bf16.msra.mxu2 %v3353_v34  ;;  %1017 = vmatpush.bf16.msra.mxu3 %v3303_v17  ;;  %vm674_vm2 = vmor %vm672_vm0, %vm673_vm14 }
  0xd9   :  { %v669_v31 = vsub.f32 1.0, %v668_v38 }
  0xda   :  { %v651_v29 = vmul.f32 %v2990_v35, %v650_v37 }
  0xdb   :  { %v670_v59 = vmul.f32 %v2992_v39, %v669_v31  ;;  %979 = vmatpush.bf16.msra.mxu0 %v3336_v28  ;;  %992 = vmatpush.bf16.msra.mxu1 %v3349_v32  ;;  %v698_v31 = vand.u32 2147483648, %v3948_v30 }
  0xdc   :  { %v652_v60 = vadd.f32 %v2990_v35, %v651_v29  ;;  %1005 = vmatpush.bf16.msra.mxu2 %v3377_v42  ;;  %1018 = vmatpush.bf16.msra.mxu3 %v3351_v33  ;;  %v696_v29 = vand.u32 2147483647, %v3948_v30 }
  0xdd   :  { %v2994_v24 = vpop.eup %2993  ;;  %v671_v18 = vadd.f32 %v2992_v39, %v670_v59  ;;  %v699_v51 = vor.u32 1.1754944e-38, %v698_v31  ;;  %v4734_v31 = vld [vmem:[#allocation27_spill] sm:$0xff] }
  0xde   :  { %v2996_v23 = vpop.eup %2995  ;;  %v688_v44 = vmul.f32 %v2994_v24, %v3948_v30  ;;  %v656_v15 = vsel %vm655_vm15, %v2990_v35, %v652_v60  ;;  %vm693_vm4 = vweird.f32 %v2994_v24  ;;  %vm697_vm7 = vcmp.eq.f32.partialorder %v696_v29, 8.507059e+37  ;;  %v4735_v29 = vld [vmem:[#allocation26_spill] sm:$0xff] }
  0xdf   :  { %v661_v50 = vsel %vm658_vm1, %v660_v5, %v656_v15  ;;  %v675_v27 = vsel %vm674_vm2, %v2992_v39, %v671_v18  ;;  %980 = vmatpush.bf16.msra.mxu0 %v3375_v41  ;;  %993 = vmatpush.bf16.msra.mxu1 %v3387_v45  ;;  %vm694_vm6 = vmor %vm692_vm5, %vm693_vm4  ;;  %v4722_v5 = vld [vmem:[#allocation15_spill] sm:$0xff]  ;;  %v4723_v15 = vld [vmem:[#allocation14_spill] sm:$0xff] }
  0xe0   :  { %v689_v56 = vsub.f32 1.0, %v688_v44  ;;  %v703_v37 = vmul.f32 %v2996_v23, %v661_v50  ;;  %v680_v63 = vsel %vm677_vm3, %v679_v43, %v675_v27  ;;  %1006 = vmatpush.bf16.msra.mxu2 %v3413_v54  ;;  %1019 = vmatpush.bf16.msra.mxu3 %v3389_v46  ;;  %v4720_v23 = vld [vmem:[#allocation12_spill] sm:$0xff]  ;;  %v4721_v44 = vld [vmem:[#allocation13_spill] sm:$0xff]  ;;  %v4727_v50 = vld [vmem:[#allocation18_spill] sm:$0xff] }
  0xe1   :  { %v702_v4 = vmul.f32 0.0, %v680_v63  ;;  %v4724_v18 = vld [vmem:[#allocation16_spill] sm:$0xff]  ;;  %v4725_v43 = vld [vmem:[#allocation17_spill] sm:$0xff]  ;;  %v4731_v63 = vld [vmem:[#allocation22_spill] sm:$0xff] }
  0xe2   :  { %v690_v38 = vmul.f32 %v2994_v24, %v689_v56  ;;  %v4726_v56 = vld [vmem:[#allocation19_spill] sm:$0xff]  ;;  %v4728_v27 = vld [vmem:[#allocation20_spill] sm:$0xff] }
  0xe3   :  { %v3969_v35 = vadd.f32 %v703_v37, %v702_v4  ;;  %981 = vmatpush.bf16.msra.mxu0 %v3411_v53  ;;  %994 = vmatpush.bf16.msra.mxu1 %v3423_v57  ;;  %v4729_v37 = vld [vmem:[#allocation21_spill] sm:$0xff]  ;;  %v4732_v4 = vld [vmem:[#allocation24_spill] sm:$0xff] }
  0xe4   :  { %v691_v39 = vadd.f32 %v2994_v24, %v690_v38  ;;  %1007 = vmatpush.bf16.msra.mxu2 %v3449_v2  ;;  %1020 = vmatpush.bf16.msra.mxu3 %v3425_v58  ;;  %v4730_v38 = vld [vmem:[#allocation23_spill] sm:$0xff] }
  0xe5   :  { %2997 = vtanh.f32 %v3969_v35 }
  0xe6   :  { %v695_v22 = vsel %vm694_vm6, %v2994_v24, %v691_v39  ;;  %v4719_v24 = vld [vmem:[#allocation10_spill] sm:$0xff]  ;;  %v4733_v39 = vld [vmem:[#allocation25_spill] sm:$0xff] }
  0xe7   :  { %982 = vmatpush.bf16.msra.mxu0 %v3447_v1  ;;  %995 = vmatpush.bf16.msra.mxu1 %v3459_v6  ;;  %v700_v60 = vsel %vm697_vm7, %v699_v51, %v695_v22  ;;  %v4736_v22 = vld [vmem:[#allocation28_spill] sm:$0xff]  ;;  %v4737_v51 = vld [vmem:[#allocation29_spill] sm:$0xff] }
  0xe8   :  { %1008 = vmatpush.bf16.msra.mxu2 %v3485_v20  ;;  %1021 = vmatpush.bf16.msra.mxu3 %v3461_v9 }
  0xeb   :  { %v2998_v59 = vpop.eup %2997  ;;  %983 = vmatpush.bf16.msra.mxu0 %v3483_v19  ;;  %996 = vmatpush.bf16.msra.mxu1 %v3498_v25 }
  0xec   :  { %v706_v0 = vmul.f32 %v2998_v59, %v700_v60  ;;  %1009 = vmatpush.bf16.msra.mxu2 %v3539_v47  ;;  %1022 = vmatpush.bf16.msra.mxu3 %v3500_v26  ;;  %v4738_v59 = vld [vmem:[#allocation31_spill] sm:$0xff]  ;;  %v4739_v60 = vld [vmem:[#allocation30_spill] sm:$0xff] }
  0xee   :  { %v709_v30 = vpack.c.bf16 %v706_v0, %v706_v0  ;;  %v4740_v0 = vld [vmem:[#allocation32_spill] sm:$0xff] }
  0xef   :  { %984 = vmatpush.bf16.msra.mxu0 %v3531_v40  ;;  %997 = vmatpush.bf16.msra.mxu1 %v3543_v48 }
  0xf0   :  { %2820 = vst [vmem:[%s4611_s5 + $0x1c] sm:$0xf] %v709_v30  ;;  %853 = vmatmul.bf16.vlgmr.msrb.gmra.mxu0 %v709_v30  ;;  %866 = vmatmul.bf16.vlgmr.msrb.gmra.mxu1 %v709_v30 }
  0xf1   :  { %879 = vmatmul.bf16.vlgmr.msrb.gmra.mxu2 %v709_v30  ;;  %892 = vmatmul.bf16.vlgmr.msrb.gmra.mxu3 %v709_v30  ;;  %v4741_v30 = vld [vmem:[#allocation33_spill] sm:$0xff] }
  0xf2   :  { %1010 = vmatpush.bf16.msra.mxu2 %v3585_v10  ;;  %1023 = vmatpush.bf16.msra.mxu3 %v3545_v49 }
  0xf3   :  { %1103 = vmatpush.bf16.msrb.mxu0 %v3553_v52  ;;  %1116 = vmatpush.bf16.msrb.mxu1 %v3555_v55 }
  0xf6   :  { %1129 = vmatpush.bf16.msrb.mxu2 %v3589_v11  ;;  %1142 = vmatpush.bf16.msrb.mxu3 %v3566_v61 }
  0xf7   :  { %1104 = vmatpush.bf16.msrb.mxu0 %v3593_v13  ;;  %1117 = vmatpush.bf16.msrb.mxu1 %v3595_v14 }
  0xfa   :  { %1130 = vmatpush.bf16.msrb.mxu2 %v3629_v36  ;;  %1143 = vmatpush.bf16.msrb.mxu3 %v4719_v24 }
  0xfb   :  { %1105 = vmatpush.bf16.msrb.mxu0 %v4720_v23  ;;  %1118 = vmatpush.bf16.msrb.mxu1 %v4721_v44 }
  0xfe   :  { %1131 = vmatpush.bf16.msrb.mxu2 %v4722_v5  ;;  %1144 = vmatpush.bf16.msrb.mxu3 %v4723_v15 }
  0xff   :  { %1106 = vmatpush.bf16.msrb.mxu0 %v4724_v18  ;;  %1119 = vmatpush.bf16.msrb.mxu1 %v4725_v43 }
 0x102   :  { %1132 = vmatpush.bf16.msrb.mxu2 %v4726_v56  ;;  %1145 = vmatpush.bf16.msrb.mxu3 %v4727_v50 }
 0x103   :  { %1107 = vmatpush.bf16.msrb.mxu0 %v4728_v27  ;;  %1120 = vmatpush.bf16.msrb.mxu1 %v4729_v37 }
 0x106   :  { %1133 = vmatpush.bf16.msrb.mxu2 %v4730_v38  ;;  %1146 = vmatpush.bf16.msrb.mxu3 %v4731_v63  ;;  %v4742_v63 = vld [vmem:[#allocation35_spill] sm:$0xff] }
 0x107   :  { %1108 = vmatpush.bf16.msrb.mxu0 %v4732_v4  ;;  %1121 = vmatpush.bf16.msrb.mxu1 %v4733_v39  ;;  %v4743_v4 = vld [vmem:[#allocation34_spill] sm:$0xff] }
 0x10a   :  { %1134 = vmatpush.bf16.msrb.mxu2 %v4734_v31  ;;  %1147 = vmatpush.bf16.msrb.mxu3 %v4735_v29  ;;  %v2821_v29 = vld [vmem:[%s4608_s0 + $0x10] sm:$0xff] }
 0x10b   :  { %1109 = vmatpush.bf16.msrb.mxu0 %v4736_v22  ;;  %1122 = vmatpush.bf16.msrb.mxu1 %v4737_v51  ;;  %v715_v31 = vunpack.c.l.bf16 %v2821_v29  ;;  %v716_v22 = vunpack.c.h.bf16 %v2821_v29 }
 0x10e   :  { %1135 = vmatpush.bf16.msrb.mxu2 %v4738_v59  ;;  %1148 = vmatpush.bf16.msrb.mxu3 %v4739_v60 }
 0x10f   :  { %1110 = vmatpush.bf16.msrb.mxu0 %v4740_v0  ;;  %1123 = vmatpush.bf16.msrb.mxu1 %v4741_v30  ;;  %v2822_v0 = vld [vmem:[%s4608_s0 + $0x18] sm:$0xff] }
 0x110   :  { %v718_v37 = vunpack.c.h.bf16 %v2822_v0 }
 0x112   :  { %1136 = vmatpush.bf16.msrb.mxu2 %v4742_v63  ;;  %1149 = vmatpush.bf16.msrb.mxu3 %v4743_v4 }
 0x14e   :  { %v728_v39 = vpop.f32.mrf.mxu0  ;;  %v741_v51 = vpop.f32.mrf.mxu1 }
 0x14f   :  { %v771_v38 = vadd.f32 %v728_v39, %v715_v31  ;;  %v772_v59 = vadd.f32 %v741_v51, %v716_v22 }
 0x151   :  { %v2823_v60 = vmul.f32 -1.442695, %v771_v38  ;;  %v2824_v30 = vmul.f32 -1.442695, %v772_v59  ;;  %v717_v38 = vunpack.c.l.bf16 %v2822_v0 }
 0x153   :  { %2999 = vpow2.f32 %v2823_v60 }
 0x154   :  { %3001 = vpow2.f32 %v2824_v30 }
 0x155   :  { %v754_v4 = vpop.f32.mrf.mxu2  ;;  %v767_v63 = vpop.f32.mrf.mxu3 }
 0x156   :  { %v774_v27 = vadd.f32 %v767_v63, %v718_v37  ;;  %v730_v50 = vpop.f32.mrf.mxu0  ;;  %v743_v56 = vpop.f32.mrf.mxu1  ;;  %v773_v30 = vadd.f32 %v754_v4, %v717_v38 }
 0x158   :  { %v2825_v43 = vmul.f32 -1.442695, %v774_v27 }
 0x159   :  { %v3000_v29 = vpop.eup %2999 }
 0x15a   :  { %v3002_v18 = vpop.eup %3001  ;;  %v778_v15 = vadd.f32 1.0, %v3000_v29  ;;  %3003 = vpow2.f32 %v2825_v43 }
 0x15b   :  { %v797_v39 = vadd.f32 1.0, %v3002_v18  ;;  %v2826_v18 = vld [vmem:[%s4609_s1 + $0x60] sm:$0xff] }
 0x15c   :  { %3005 = vrcp.f32 %v778_v15  ;;  %v790_v63 = vand.u32 2147483648, %v778_v15  ;;  %v788_v29 = vand.u32 2147483647, %v778_v15  ;;  %vm784_vm10 = vweird.f32 %v778_v15 }
 0x15d   :  { %3007 = vrcp.f32 %v797_v39  ;;  %v756_v31 = vpop.f32.mrf.mxu2  ;;  %v769_v22 = vpop.f32.mrf.mxu3  ;;  %v809_v43 = vand.u32 2147483648, %v797_v39  ;;  %v807_v4 = vand.u32 2147483647, %v797_v39  ;;  %v842_v44 = vunpack.c.h.bf16 %v2826_v18 }
 0x15e   :  { %vm803_vm11 = vweird.f32 %v797_v39  ;;  %vm789_vm14 = vcmp.eq.f32.partialorder %v788_v29, 8.507059e+37 }
 0x15f   :  { %v810_v23 = vor.u32 1.1754944e-38, %v809_v43  ;;  %vm808_vm15 = vcmp.eq.f32.partialorder %v807_v4, 8.507059e+37  ;;  %v2827_v43 = vld [vmem:[%s4609_s1 + $0x68] sm:$0xff] }
 0x160   :  { %v3004_v51 = vpop.eup %3003 }
 0x161   :  { %v4032_v59 = vadd.f32 1.0, %v3004_v51  ;;  %v841_v51 = vunpack.c.l.bf16 %v2826_v18 }
 0x162   :  { %v3006_v60 = vpop.eup %3005 }
 0x163   :  { %v3008_v5 = vpop.eup %3007  ;;  %v780_v37 = vmul.f32 %v3006_v60, %v778_v15  ;;  %3009 = vrcp.f32 %v4032_v59  ;;  %vm785_vm8 = vweird.f32 %v3006_v60  ;;  %vm823_vm1 = vweird.f32 %v4032_v59 }
 0x164   :  { %v799_v56 = vmul.f32 %v3008_v5, %v797_v39  ;;  %3011 = vtanh.f32 %v773_v30  ;;  %vm804_vm9 = vweird.f32 %v3008_v5  ;;  %vm786_vm12 = vmor %vm784_vm10, %vm785_vm8 }
 0x165   :  { %v781_v50 = vsub.f32 1.0, %v780_v37  ;;  %v791_v37 = vor.u32 1.1754944e-38, %v790_v63  ;;  %vm805_vm13 = vmor %vm803_vm11, %vm804_vm9 }
 0x166   :  { %v800_v27 = vsub.f32 1.0, %v799_v56 }
 0x167   :  { %v782_v0 = vmul.f32 %v3006_v60, %v781_v50 }
 0x168   :  { %v801_v31 = vmul.f32 %v3008_v5, %v800_v27 }
 0x169   :  { %v3010_v22 = vpop.eup %3009  ;;  %v783_v38 = vadd.f32 %v3006_v60, %v782_v0 }
 0x16a   :  { %v802_v30 = vadd.f32 %v3008_v5, %v801_v31  ;;  %v819_v56 = vmul.f32 %v3010_v22, %v4032_v59  ;;  %v3012_v50 = vpop.eup %3011  ;;  %vm824_vm0 = vweird.f32 %v3010_v22 }
 0x16b   :  { %v787_v24 = vsel %vm786_vm12, %v3006_v60, %v783_v38  ;;  %vm825_vm2 = vmor %vm823_vm1, %vm824_vm0 }
 0x16c   :  { %v792_v36 = vsel %vm789_vm14, %v791_v37, %v787_v24  ;;  %v806_v27 = vsel %vm805_vm13, %v3008_v5, %v802_v30  ;;  %v820_v14 = vsub.f32 1.0, %v819_v56  ;;  %v844_v5 = vunpack.c.h.bf16 %v2827_v43 }
 0x16d   :  { %v811_v13 = vsel %vm808_vm15, %v810_v23, %v806_v27  ;;  %v834_v0 = vmul.f32 %v3012_v50, %v792_v36  ;;  %v854_v15 = vpop.f32.mrf.mxu0  ;;  %v867_v61 = vpop.f32.mrf.mxu1  ;;  %v829_v36 = vand.u32 2147483648, %v4032_v59 }
 0x16e   :  { %v833_v39 = vmul.f32 %v811_v13, %v3940_v62  ;;  %v821_v18 = vmul.f32 %v3010_v22, %v820_v14  ;;  %v897_v63 = vadd.f32 %v854_v15, %v841_v51  ;;  %v898_v31 = vadd.f32 %v867_v61, %v842_v44 }
 0x16f   :  { %v827_v13 = vand.u32 2147483647, %v4032_v59  ;;  %v830_v51 = vor.u32 1.1754944e-38, %v829_v36 }
 0x170   :  { %v4043_v60 = vadd.f32 %v834_v0, %v833_v39  ;;  %v2828_v29 = vmul.f32 -1.442695, %v897_v63  ;;  %v2829_v24 = vmul.f32 -1.442695, %v898_v31  ;;  %v822_v4 = vadd.f32 %v3010_v22, %v821_v18 }
 0x171   :  { %vm828_vm3 = vcmp.eq.f32.partialorder %v827_v13, 8.507059e+37 }
 0x172   :  { %3013 = vtanh.f32 %v4043_v60  ;;  %v826_v38 = vsel %vm825_vm2, %v3010_v22, %v822_v4  ;;  %v843_v22 = vunpack.c.l.bf16 %v2827_v43 }
 0x173   :  { %3015 = vpow2.f32 %v2828_v29  ;;  %v831_v56 = vsel %vm828_vm3, %v830_v51, %v826_v38 }
 0x174   :  { %3017 = vpow2.f32 %v2829_v24  ;;  %v880_v61 = vpop.f32.mrf.mxu2  ;;  %v893_v14 = vpop.f32.mrf.mxu3 }
 0x175   :  { %v900_v62 = vadd.f32 %v893_v14, %v844_v5  ;;  %v856_v23 = vpop.f32.mrf.mxu0  ;;  %v869_v44 = vpop.f32.mrf.mxu1  ;;  %v899_v5 = vadd.f32 %v880_v61, %v843_v22 }
 0x177   :  { %v2830_v37 = vmul.f32 -1.442695, %v900_v62 }
 0x178   :  { %v3014_v30 = vpop.eup %3013 }
 0x179   :  { %v3016_v50 = vpop.eup %3015  ;;  %3019 = vpow2.f32 %v2830_v37  ;;  %v837_v27 = vmul.f32 %v3014_v30, %v831_v56 }
 0x17a   :  { %v3018_v0 = vpop.eup %3017  ;;  %v904_v15 = vadd.f32 1.0, %v3016_v50 }
 0x17b   :  { %v923_v59 = vadd.f32 1.0, %v3018_v0  ;;  %v964_v39 = vpack.c.bf16 %v837_v27, %v837_v27 }
 0x17c   :  { %3021 = vrcp.f32 %v904_v15  ;;  %v882_v18 = vpop.f32.mrf.mxu2  ;;  %v895_v63 = vpop.f32.mrf.mxu3  ;;  %v916_v62 = vand.u32 2147483648, %v904_v15  ;;  %v914_v61 = vand.u32 2147483647, %v904_v15  ;;  %vm910_vm6 = vweird.f32 %v904_v15 }
 0x17d   :  { %3023 = vrcp.f32 %v923_v59  ;;  %2831 = vst [vmem:[%s4610_s4 + $0x4] sm:$0xf] %v964_v39  ;;  %985 = vmatmul.bf16.vlgmr.msra.gmra.mxu0 %v964_v39  ;;  %998 = vmatmul.bf16.vlgmr.msra.gmra.mxu1 %v964_v39  ;;  %v935_v23 = vand.u32 2147483648, %v923_v59  ;;  %v933_v37 = vand.u32 2147483647, %v923_v59  ;;  %vm929_vm7 = vweird.f32 %v923_v59 }
 0x17e   :  { %1011 = vmatmul.bf16.vlgmr.msra.gmra.mxu2 %v964_v39  ;;  %1024 = vmatmul.bf16.vlgmr.msra.gmra.mxu3 %v964_v39  ;;  %v917_v50 = vor.u32 1.1754944e-38, %v916_v62  ;;  %vm915_vm10 = vcmp.eq.f32.partialorder %v914_v61, 8.507059e+37  ;;  %v4744_v61 = vld [vmem:[#allocation6_spill] sm:$0xff] }
 0x17f   :  { %v3020_v31 = vpop.eup %3019  ;;  %1235 = vmatpush.bf16.msra.mxu0 %v3263_v3  ;;  %1248 = vmatpush.bf16.msra.mxu1 %v3274_v7  ;;  %v936_v0 = vor.u32 1.1754944e-38, %v935_v23  ;;  %vm934_vm11 = vcmp.eq.f32.partialorder %v933_v37, 8.507059e+37  ;;  %v4747_v37 = vld [vmem:[#allocation11_spill] sm:$0xff] }
 0x180   :  { %v4054_v29 = vadd.f32 1.0, %v3020_v31  ;;  %1261 = vmatpush.bf16.msra.mxu2 %v3314_v21  ;;  %1274 = vmatpush.bf16.msra.mxu3 %v3276_v8 }
 0x182   :  { %v3022_v24 = vpop.eup %3021  ;;  %3025 = vrcp.f32 %v4054_v29  ;;  %vm949_vm13 = vweird.f32 %v4054_v29 }
 0x183   :  { %v3024_v4 = vpop.eup %3023  ;;  %v906_v36 = vmul.f32 %v3022_v24, %v904_v15  ;;  %1236 = vmatpush.bf16.msra.mxu0 %v3288_v12  ;;  %1249 = vmatpush.bf16.msra.mxu1 %v3301_v16  ;;  %3027 = vtanh.f32 %v899_v5  ;;  %vm911_vm4 = vweird.f32 %v3022_v24 }
 0x184   :  { %v925_v43 = vmul.f32 %v3024_v4, %v923_v59  ;;  %1262 = vmatpush.bf16.msra.mxu2 %v3353_v34  ;;  %1275 = vmatpush.bf16.msra.mxu3 %v3303_v17  ;;  %vm930_vm5 = vweird.f32 %v3024_v4  ;;  %vm912_vm8 = vmor %vm910_vm6, %vm911_vm4 }
 0x185   :  { %v907_v13 = vsub.f32 1.0, %v906_v36  ;;  %vm931_vm9 = vmor %vm929_vm7, %vm930_vm5 }
 0x186   :  { %v926_v14 = vsub.f32 1.0, %v925_v43  ;;  %v955_v43 = vand.u32 2147483648, %v4054_v29 }
 0x187   :  { %v908_v44 = vmul.f32 %v3022_v24, %v907_v13  ;;  %1237 = vmatpush.bf16.msra.mxu0 %v3336_v28  ;;  %1250 = vmatpush.bf16.msra.mxu1 %v3349_v32 }
 0x188   :  { %v3026_v38 = vpop.eup %3025  ;;  %v927_v51 = vmul.f32 %v3024_v4, %v926_v14  ;;  %1263 = vmatpush.bf16.msra.mxu2 %v3377_v42  ;;  %1276 = vmatpush.bf16.msra.mxu3 %v3351_v33  ;;  %v956_v14 = vor.u32 1.1754944e-38, %v955_v43  ;;  %v4763_v43 = vld [vmem:[#allocation27_spill] sm:$0xff] }
 0x189   :  { %v909_v30 = vadd.f32 %v3022_v24, %v908_v44  ;;  %v945_v56 = vmul.f32 %v3026_v38, %v4054_v29  ;;  %v3028_v63 = vpop.eup %3027  ;;  %vm950_vm12 = vweird.f32 %v3026_v38 }
 0x18a   :  { %v928_v27 = vadd.f32 %v3024_v4, %v927_v51  ;;  %vm951_vm14 = vmor %vm949_vm13, %vm950_vm12  ;;  %v4746_v51 = vld [vmem:[#allocation9_spill] sm:$0xff] }
 0x18b   :  { %v913_v39 = vsel %vm912_vm8, %v3022_v24, %v909_v30  ;;  %v946_v18 = vsub.f32 1.0, %v945_v56  ;;  %1238 = vmatpush.bf16.msra.mxu0 %v3375_v41  ;;  %1251 = vmatpush.bf16.msra.mxu1 %v3387_v45  ;;  %v4748_v30 = vld [vmem:[#allocation10_spill] sm:$0xff]  ;;  %v4749_v56 = vld [vmem:[#allocation12_spill] sm:$0xff] }
 0x18c   :  { %v918_v22 = vsel %vm915_vm10, %v917_v50, %v913_v39  ;;  %v932_v31 = vsel %vm931_vm9, %v3024_v4, %v928_v27  ;;  %1264 = vmatpush.bf16.msra.mxu2 %v3413_v54  ;;  %1277 = vmatpush.bf16.msra.mxu3 %v3389_v46  ;;  %v4750_v50 = vld [vmem:[#allocation13_spill] sm:$0xff]  ;;  %v4751_v27 = vld [vmem:[#allocation15_spill] sm:$0xff]  ;;  %v4753_v39 = vld [vmem:[#allocation16_spill] sm:$0xff] }
 0x18d   :  { %v937_v15 = vsel %vm934_vm11, %v936_v0, %v932_v31  ;;  %v960_v59 = vmul.f32 %v3028_v63, %v918_v22  ;;  %v947_v5 = vmul.f32 %v3026_v38, %v946_v18  ;;  %v4752_v0 = vld [vmem:[#allocation14_spill] sm:$0xff]  ;;  %v4754_v18 = vld [vmem:[#allocation17_spill] sm:$0xff]  ;;  %v4755_v63 = vld [vmem:[#allocation19_spill] sm:$0xff] }
 0x18e   :  { %v959_v36 = vmul.f32 %v937_v15, %v3969_v35  ;;  %v953_v35 = vand.u32 2147483647, %v4054_v29  ;;  %v4756_v22 = vld [vmem:[#allocation18_spill] sm:$0xff]  ;;  %v4757_v31 = vld [vmem:[#allocation20_spill] sm:$0xff]  ;;  %v4758_v15 = vld [vmem:[#allocation21_spill] sm:$0xff] }
 0x18f   :  { %1239 = vmatpush.bf16.msra.mxu0 %v3411_v53  ;;  %1252 = vmatpush.bf16.msra.mxu1 %v3423_v57  ;;  %v948_v4 = vadd.f32 %v3026_v38, %v947_v5  ;;  %v4760_v5 = vld [vmem:[#allocation22_spill] sm:$0xff] }
 0x190   :  { %v4075_v24 = vadd.f32 %v960_v59, %v959_v36  ;;  %1265 = vmatpush.bf16.msra.mxu2 %v3449_v2  ;;  %1278 = vmatpush.bf16.msra.mxu3 %v3425_v58  ;;  %vm954_vm15 = vcmp.eq.f32.partialorder %v953_v35, 8.507059e+37  ;;  %v4759_v59 = vld [vmem:[#allocation23_spill] sm:$0xff]  ;;  %v4761_v36 = vld [vmem:[#allocation24_spill] sm:$0xff]  ;;  %v4764_v35 = vld [vmem:[#allocation26_spill] sm:$0xff] }
 0x191   :  { %v952_v13 = vsel %vm951_vm14, %v3026_v38, %v948_v4  ;;  %v4745_v38 = vld [vmem:[#allocation8_spill] sm:$0xff]  ;;  %v4762_v4 = vld [vmem:[#allocation25_spill] sm:$0xff] }
 0x192   :  { %3029 = vtanh.f32 %v4075_v24  ;;  %v957_v23 = vsel %vm954_vm15, %v956_v14, %v952_v13  ;;  %v4765_v13 = vld [vmem:[#allocation28_spill] sm:$0xff]  ;;  %v4766_v14 = vld [vmem:[#allocation29_spill] sm:$0xff] }
 0x193   :  { %1240 = vmatpush.bf16.msra.mxu0 %v3447_v1  ;;  %1253 = vmatpush.bf16.msra.mxu1 %v3459_v6 }
 0x194   :  { %1266 = vmatpush.bf16.msra.mxu2 %v3485_v20  ;;  %1279 = vmatpush.bf16.msra.mxu3 %v3461_v9 }
 0x197   :  { %1241 = vmatpush.bf16.msra.mxu0 %v3483_v19  ;;  %1254 = vmatpush.bf16.msra.mxu1 %v3498_v25 }
 0x198   :  { %v3030_v62 = vpop.eup %3029  ;;  %1267 = vmatpush.bf16.msra.mxu2 %v3539_v47  ;;  %1280 = vmatpush.bf16.msra.mxu3 %v3500_v26 }
 0x199   :  { %v963_v29 = vmul.f32 %v3030_v62, %v957_v23  ;;  %v4767_v62 = vld [vmem:[#allocation31_spill] sm:$0xff]  ;;  %v4768_v23 = vld [vmem:[#allocation30_spill] sm:$0xff] }
 0x19b   :  { %v967_v44 = vpack.c.bf16 %v963_v29, %v963_v29  ;;  %1242 = vmatpush.bf16.msra.mxu0 %v3531_v40  ;;  %1255 = vmatpush.bf16.msra.mxu1 %v3543_v48  ;;  %v4769_v29 = vld [vmem:[#allocation32_spill] sm:$0xff] }
 0x19c   :  { %1268 = vmatpush.bf16.msra.mxu2 %v3585_v10  ;;  %1281 = vmatpush.bf16.msra.mxu3 %v3545_v49 }
 0x19d   :  { %2832 = vst [vmem:[%s4611_s5 + $0x18] sm:$0xf] %v967_v44  ;;  %1111 = vmatmul.bf16.vlgmr.msrb.gmra.mxu0 %v967_v44  ;;  %1124 = vmatmul.bf16.vlgmr.msrb.gmra.mxu1 %v967_v44 }
 0x19e   :  { %1137 = vmatmul.bf16.vlgmr.msrb.gmra.mxu2 %v967_v44  ;;  %1150 = vmatmul.bf16.vlgmr.msrb.gmra.mxu3 %v967_v44  ;;  %v4770_v44 = vld [vmem:[#allocation33_spill] sm:$0xff] }
 0x19f   :  { %1361 = vmatpush.bf16.msrb.mxu0 %v3553_v52  ;;  %1374 = vmatpush.bf16.msrb.mxu1 %v3555_v55 }
 0x1a0   :  { %1387 = vmatpush.bf16.msrb.mxu2 %v3589_v11  ;;  %1400 = vmatpush.bf16.msrb.mxu3 %v4744_v61 }
 0x1a3   :  { %1362 = vmatpush.bf16.msrb.mxu0 %v4745_v38  ;;  %1375 = vmatpush.bf16.msrb.mxu1 %v4746_v51 }
 0x1a4   :  { %1388 = vmatpush.bf16.msrb.mxu2 %v4747_v37  ;;  %1401 = vmatpush.bf16.msrb.mxu3 %v4748_v30 }
 0x1a7   :  { %1363 = vmatpush.bf16.msrb.mxu0 %v4749_v56  ;;  %1376 = vmatpush.bf16.msrb.mxu1 %v4750_v50 }
 0x1a8   :  { %1389 = vmatpush.bf16.msrb.mxu2 %v4751_v27  ;;  %1402 = vmatpush.bf16.msrb.mxu3 %v4752_v0 }
 0x1ab   :  { %1364 = vmatpush.bf16.msrb.mxu0 %v4753_v39  ;;  %1377 = vmatpush.bf16.msrb.mxu1 %v4754_v18 }
 0x1ac   :  { %1390 = vmatpush.bf16.msrb.mxu2 %v4755_v63  ;;  %1403 = vmatpush.bf16.msrb.mxu3 %v4756_v22 }
 0x1af   :  { %1365 = vmatpush.bf16.msrb.mxu0 %v4757_v31  ;;  %1378 = vmatpush.bf16.msrb.mxu1 %v4758_v15 }
 0x1b0   :  { %1391 = vmatpush.bf16.msrb.mxu2 %v4759_v59  ;;  %1404 = vmatpush.bf16.msrb.mxu3 %v4760_v5  ;;  %v4771_v5 = vld [vmem:[#allocation35_spill] sm:$0xff] }
 0x1b3   :  { %1366 = vmatpush.bf16.msrb.mxu0 %v4761_v36  ;;  %1379 = vmatpush.bf16.msrb.mxu1 %v4762_v4  ;;  %v4772_v36 = vld [vmem:[#allocation34_spill] sm:$0xff] }
 0x1b4   :  { %1392 = vmatpush.bf16.msrb.mxu2 %v4763_v43  ;;  %1405 = vmatpush.bf16.msrb.mxu3 %v4764_v35  ;;  %v2833_v35 = vld [vmem:[%s4608_s0 + $0x20] sm:$0xff] }
 0x1b5   :  { %v973_v43 = vunpack.c.l.bf16 %v2833_v35 }
 0x1b7   :  { %1367 = vmatpush.bf16.msrb.mxu0 %v4765_v13  ;;  %1380 = vmatpush.bf16.msrb.mxu1 %v4766_v14  ;;  %v974_v13 = vunpack.c.h.bf16 %v2833_v35 }
 0x1b8   :  { %1393 = vmatpush.bf16.msrb.mxu2 %v4767_v62  ;;  %1406 = vmatpush.bf16.msrb.mxu3 %v4768_v23 }
 0x1bb   :  { %1368 = vmatpush.bf16.msrb.mxu0 %v4769_v29  ;;  %1381 = vmatpush.bf16.msrb.mxu1 %v4770_v44  ;;  %v2834_v29 = vld [vmem:[%s4608_s0 + $0x28] sm:$0xff] }
 0x1bc   :  { %1394 = vmatpush.bf16.msrb.mxu2 %v4771_v5  ;;  %1407 = vmatpush.bf16.msrb.mxu3 %v4772_v36  ;;  %v976_v15 = vunpack.c.h.bf16 %v2834_v29 }
 0x1fa   :  { %v986_v4 = vpop.f32.mrf.mxu0  ;;  %v999_v14 = vpop.f32.mrf.mxu1 }
 0x1fb   :  { %v1029_v59 = vadd.f32 %v986_v4, %v973_v43  ;;  %v1030_v62 = vadd.f32 %v999_v14, %v974_v13 }
 0x1fd   :  { %v2835_v23 = vmul.f32 -1.442695, %v1029_v59  ;;  %v2836_v44 = vmul.f32 -1.442695, %v1030_v62  ;;  %v975_v59 = vunpack.c.l.bf16 %v2834_v29 }
 0x1ff   :  { %3031 = vpow2.f32 %v2835_v23 }
 0x200   :  { %3033 = vpow2.f32 %v2836_v44 }
 0x201   :  { %v1012_v36 = vpop.f32.mrf.mxu2  ;;  %v1025_v5 = vpop.f32.mrf.mxu3 }
 0x202   :  { %v1032_v31 = vadd.f32 %v1025_v5, %v976_v15  ;;  %v988_v22 = vpop.f32.mrf.mxu0  ;;  %v1001_v63 = vpop.f32.mrf.mxu1  ;;  %v1031_v44 = vadd.f32 %v1012_v36, %v975_v59 }
 0x204   :  { %v2837_v18 = vmul.f32 -1.442695, %v1032_v31 }
 0x205   :  { %v3032_v35 = vpop.eup %3031 }
 0x206   :  { %v3034_v39 = vpop.eup %3033  ;;  %v1036_v0 = vadd.f32 1.0, %v3032_v35  ;;  %3035 = vpow2.f32 %v2837_v18 }
 0x207   :  { %v1055_v4 = vadd.f32 1.0, %v3034_v39  ;;  %v2838_v39 = vld [vmem:[%s4609_s1 + $0x50] sm:$0xff] }
 0x208   :  { %3037 = vrcp.f32 %v1036_v0  ;;  %v1048_v5 = vand.u32 2147483648, %v1036_v0  ;;  %v1046_v35 = vand.u32 2147483647, %v1036_v0  ;;  %vm1042_vm2 = vweird.f32 %v1036_v0 }
 0x209   :  { %3039 = vrcp.f32 %v1055_v4  ;;  %v1014_v43 = vpop.f32.mrf.mxu2  ;;  %v1027_v13 = vpop.f32.mrf.mxu3  ;;  %v1067_v18 = vand.u32 2147483648, %v1055_v4  ;;  %v1065_v36 = vand.u32 2147483647, %v1055_v4  ;;  %vm1061_vm3 = vweird.f32 %v1055_v4 }
 0x20a   :  { %vm1047_vm6 = vcmp.eq.f32.partialorder %v1046_v35, 8.507059e+37 }
 0x20b   :  { %v1068_v50 = vor.u32 1.1754944e-38, %v1067_v18  ;;  %vm1066_vm7 = vcmp.eq.f32.partialorder %v1065_v36, 8.507059e+37 }
 0x20c   :  { %v3036_v14 = vpop.eup %3035 }
 0x20d   :  { %v4136_v62 = vadd.f32 1.0, %v3036_v14  ;;  %v1099_v14 = vunpack.c.l.bf16 %v2838_v39 }
 0x20e   :  { %v3038_v23 = vpop.eup %3037 }
 0x20f   :  { %v3040_v27 = vpop.eup %3039  ;;  %v1038_v15 = vmul.f32 %v3038_v23, %v1036_v0  ;;  %3041 = vrcp.f32 %v4136_v62  ;;  %vm1043_vm0 = vweird.f32 %v3038_v23  ;;  %vm1081_vm9 = vweird.f32 %v4136_v62 }
 0x210   :  { %v1057_v63 = vmul.f32 %v3040_v27, %v1055_v4  ;;  %3043 = vtanh.f32 %v1031_v44  ;;  %vm1062_vm1 = vweird.f32 %v3040_v27  ;;  %vm1044_vm4 = vmor %vm1042_vm2, %vm1043_vm0 }
 0x211   :  { %v1039_v22 = vsub.f32 1.0, %v1038_v15  ;;  %v1049_v15 = vor.u32 1.1754944e-38, %v1048_v5  ;;  %vm1063_vm5 = vmor %vm1061_vm3, %vm1062_vm1 }
 0x212   :  { %v1058_v31 = vsub.f32 1.0, %v1057_v63 }
 0x213   :  { %v1040_v29 = vmul.f32 %v3038_v23, %v1039_v22  ;;  %v1100_v22 = vunpack.c.h.bf16 %v2838_v39 }
 0x214   :  { %v1059_v43 = vmul.f32 %v3040_v27, %v1058_v31 }
 0x215   :  { %v3042_v13 = vpop.eup %3041  ;;  %v1041_v59 = vadd.f32 %v3038_v23, %v1040_v29 }
 0x216   :  { %v1060_v63 = vadd.f32 %v3040_v27, %v1059_v43  ;;  %v1077_v44 = vmul.f32 %v3042_v13, %v4136_v62  ;;  %v3044_v30 = vpop.eup %3043  ;;  %vm1082_vm8 = vweird.f32 %v3042_v13 }
 0x217   :  { %v1045_v56 = vsel %vm1044_vm4, %v3038_v23, %v1041_v59  ;;  %v2839_v23 = vld [vmem:[%s4609_s1 + $0x58] sm:$0xff]  ;;  %vm1083_vm10 = vmor %vm1081_vm9, %vm1082_vm8 }
 0x218   :  { %v1050_v37 = vsel %vm1047_vm6, %v1049_v15, %v1045_v56  ;;  %v1064_v31 = vsel %vm1063_vm5, %v3040_v27, %v1060_v63  ;;  %v1078_v51 = vsub.f32 1.0, %v1077_v44 }
 0x219   :  { %v1069_v38 = vsel %vm1066_vm7, %v1068_v50, %v1064_v31  ;;  %v1092_v29 = vmul.f32 %v3044_v30, %v1050_v37  ;;  %v1087_v37 = vand.u32 2147483648, %v4136_v62 }
 0x21a   :  { %v1091_v0 = vmul.f32 %v1069_v38, %v4043_v60  ;;  %v1079_v4 = vmul.f32 %v3042_v13, %v1078_v51  ;;  %v1112_v61 = vpop.f32.mrf.mxu0  ;;  %v1125_v5 = vpop.f32.mrf.mxu1  ;;  %v1102_v60 = vunpack.c.h.bf16 %v2839_v23 }
 0x21b   :  { %v1155_v43 = vadd.f32 %v1112_v61, %v1099_v14  ;;  %v1156_v11 = vadd.f32 %v1125_v5, %v1100_v22  ;;  %v1085_v61 = vand.u32 2147483647, %v4136_v62  ;;  %v1088_v50 = vor.u32 1.1754944e-38, %v1087_v37 }
 0x21c   :  { %v4147_v18 = vadd.f32 %v1092_v29, %v1091_v0  ;;  %v1080_v39 = vadd.f32 %v3042_v13, %v1079_v4 }
 0x21d   :  { %v2840_v56 = vmul.f32 -1.442695, %v1155_v43  ;;  %v2841_v27 = vmul.f32 -1.442695, %v1156_v11  ;;  %vm1086_vm11 = vcmp.eq.f32.partialorder %v1085_v61, 8.507059e+37 }
 0x21e   :  { %3045 = vtanh.f32 %v4147_v18  ;;  %v1084_v30 = vsel %vm1083_vm10, %v3042_v13, %v1080_v39  ;;  %v1101_v13 = vunpack.c.l.bf16 %v2839_v23 }
 0x21f   :  { %3047 = vpow2.f32 %v2840_v56  ;;  %v1089_v15 = vsel %vm1086_vm11, %v1088_v50, %v1084_v30 }
 0x220   :  { %3049 = vpow2.f32 %v2841_v27 }
 0x221   :  { %v1138_v38 = vpop.f32.mrf.mxu2  ;;  %v1151_v51 = vpop.f32.mrf.mxu3 }
 0x222   :  { %v1158_v35 = vadd.f32 %v1151_v51, %v1102_v60  ;;  %v1114_v36 = vpop.f32.mrf.mxu0  ;;  %v1127_v11 = vpop.f32.mrf.mxu1  ;;  %v1157_v27 = vadd.f32 %v1138_v38, %v1101_v13 }
 0x224   :  { %v3046_v59 = vpop.eup %3045  ;;  %v2842_v14 = vmul.f32 -1.442695, %v1158_v35 }
 0x225   :  { %v3048_v63 = vpop.eup %3047  ;;  %v1095_v44 = vmul.f32 %v3046_v59, %v1089_v15 }
 0x226   :  { %v3050_v22 = vpop.eup %3049  ;;  %v1162_v31 = vadd.f32 1.0, %v3048_v63  ;;  %3051 = vpow2.f32 %v2842_v14 }
 0x227   :  { %v1181_v62 = vadd.f32 1.0, %v3050_v22  ;;  %v1222_v29 = vpack.c.bf16 %v1095_v44, %v1095_v44 }
 0x228   :  { %3053 = vrcp.f32 %v1162_v31  ;;  %v1174_v51 = vand.u32 2147483648, %v1162_v31  ;;  %v1172_v38 = vand.u32 2147483647, %v1162_v31  ;;  %vm1168_vm14 = vweird.f32 %v1162_v31 }
 0x229   :  { %3055 = vrcp.f32 %v1181_v62  ;;  %v1140_v0 = vpop.f32.mrf.mxu2  ;;  %v1153_v4 = vpop.f32.mrf.mxu3  ;;  %2843 = vst [vmem:[%s4610_s4 + $0x8] sm:$0xf] %v1222_v29  ;;  %1243 = vmatmul.bf16.vlgmr.msra.gmra.mxu0 %v1222_v29  ;;  %1256 = vmatmul.bf16.vlgmr.msra.gmra.mxu1 %v1222_v29  ;;  %v1193_v30 = vand.u32 2147483648, %v1181_v62  ;;  %v1191_v36 = vand.u32 2147483647, %v1181_v62  ;;  %vm1187_vm15 = vweird.f32 %v1181_v62 }
 0x22a   :  { %1269 = vmatmul.bf16.vlgmr.msra.gmra.mxu2 %v1222_v29  ;;  %1282 = vmatmul.bf16.vlgmr.msra.gmra.mxu3 %v1222_v29  ;;  %v1175_v14 = vor.u32 1.1754944e-38, %v1174_v51  ;;  %vm1173_vm2 = vcmp.eq.f32.partialorder %v1172_v38, 8.507059e+37  ;;  %v4774_v38 = vld [vmem:[#allocation6_spill] sm:$0xff] }
 0x22b   :  { %1493 = vmatpush.bf16.msra.mxu0 %v3263_v3  ;;  %1506 = vmatpush.bf16.msra.mxu1 %v3274_v7  ;;  %v1194_v44 = vor.u32 1.1754944e-38, %v1193_v30  ;;  %vm1192_vm3 = vcmp.eq.f32.partialorder %v1191_v36, 8.507059e+37  ;;  %v4776_v36 = vld [vmem:[#allocation9_spill] sm:$0xff] }
 0x22c   :  { %v3052_v5 = vpop.eup %3051  ;;  %1519 = vmatpush.bf16.msra.mxu2 %v3314_v21  ;;  %1532 = vmatpush.bf16.msra.mxu3 %v3276_v8 }
 0x22d   :  { %v4160_v43 = vadd.f32 1.0, %v3052_v5 }
 0x22e   :  { %v3054_v56 = vpop.eup %3053 }
 0x22f   :  { %v3056_v39 = vpop.eup %3055  ;;  %v1164_v37 = vmul.f32 %v3054_v56, %v1162_v31  ;;  %3057 = vrcp.f32 %v4160_v43  ;;  %1494 = vmatpush.bf16.msra.mxu0 %v3288_v12  ;;  %1507 = vmatpush.bf16.msra.mxu1 %v3301_v16  ;;  %vm1169_vm12 = vweird.f32 %v3054_v56  ;;  %vm1207_vm5 = vweird.f32 %v4160_v43 }
 0x230   :  { %v1183_v23 = vmul.f32 %v3056_v39, %v1181_v62  ;;  %1520 = vmatpush.bf16.msra.mxu2 %v3353_v34  ;;  %1533 = vmatpush.bf16.msra.mxu3 %v3303_v17  ;;  %3059 = vtanh.f32 %v1157_v27  ;;  %vm1188_vm13 = vweird.f32 %v3056_v39  ;;  %vm1170_vm0 = vmor %vm1168_vm14, %vm1169_vm12 }
 0x231   :  { %v1165_v60 = vsub.f32 1.0, %v1164_v37  ;;  %vm1189_vm1 = vmor %vm1187_vm15, %vm1188_vm13  ;;  %v1213_v37 = vand.u32 2147483648, %v4160_v43 }
 0x232   :  { %v1184_v61 = vsub.f32 1.0, %v1183_v23 }
 0x233   :  { %v1166_v50 = vmul.f32 %v3054_v56, %v1165_v60  ;;  %1495 = vmatpush.bf16.msra.mxu0 %v3336_v28  ;;  %1508 = vmatpush.bf16.msra.mxu1 %v3349_v32  ;;  %v1214_v60 = vor.u32 1.1754944e-38, %v1213_v37  ;;  %v4793_v37 = vld [vmem:[#allocation27_spill] sm:$0xff] }
 0x234   :  { %v1185_v35 = vmul.f32 %v3056_v39, %v1184_v61  ;;  %1521 = vmatpush.bf16.msra.mxu2 %v3377_v42  ;;  %1534 = vmatpush.bf16.msra.mxu3 %v3351_v33 }
 0x235   :  { %v3058_v11 = vpop.eup %3057  ;;  %v1167_v59 = vadd.f32 %v3054_v56, %v1166_v50  ;;  %v4773_v50 = vld [vmem:[#allocation7_spill] sm:$0xff] }
 0x236   :  { %v1186_v15 = vadd.f32 %v3056_v39, %v1185_v35  ;;  %v1203_v63 = vmul.f32 %v3058_v11, %v4160_v43  ;;  %v3060_v29 = vpop.eup %3059  ;;  %vm1208_vm4 = vweird.f32 %v3058_v11  ;;  %v4775_v35 = vld [vmem:[#allocation8_spill] sm:$0xff] }
 0x237   :  { %v1171_v22 = vsel %vm1170_vm0, %v3054_v56, %v1167_v59  ;;  %1496 = vmatpush.bf16.msra.mxu0 %v3375_v41  ;;  %1509 = vmatpush.bf16.msra.mxu1 %v3387_v45  ;;  %vm1209_vm6 = vmor %vm1207_vm5, %vm1208_vm4  ;;  %v4778_v59 = vld [vmem:[#allocation10_spill] sm:$0xff] }
 0x238   :  { %v1176_v0 = vsel %vm1173_vm2, %v1175_v14, %v1171_v22  ;;  %v1190_v4 = vsel %vm1189_vm1, %v3056_v39, %v1186_v15  ;;  %v1204_v13 = vsub.f32 1.0, %v1203_v63  ;;  %1522 = vmatpush.bf16.msra.mxu2 %v3413_v54  ;;  %1535 = vmatpush.bf16.msra.mxu3 %v3389_v46  ;;  %v4779_v14 = vld [vmem:[#allocation12_spill] sm:$0xff]  ;;  %v4780_v15 = vld [vmem:[#allocation13_spill] sm:$0xff]  ;;  %v4781_v63 = vld [vmem:[#allocation15_spill] sm:$0xff] }
 0x239   :  { %v1195_v31 = vsel %vm1192_vm3, %v1194_v44, %v1190_v4  ;;  %v1218_v62 = vmul.f32 %v3060_v29, %v1176_v0  ;;  %v4782_v44 = vld [vmem:[#allocation14_spill] sm:$0xff]  ;;  %v4783_v22 = vld [vmem:[#allocation16_spill] sm:$0xff]  ;;  %v4784_v29 = vld [vmem:[#allocation17_spill] sm:$0xff] }
 0x23a   :  { %v1217_v5 = vmul.f32 %v1195_v31, %v4075_v24  ;;  %v1205_v27 = vmul.f32 %v3058_v11, %v1204_v13  ;;  %v1211_v24 = vand.u32 2147483647, %v4160_v43  ;;  %v4785_v0 = vld [vmem:[#allocation19_spill] sm:$0xff]  ;;  %v4786_v4 = vld [vmem:[#allocation18_spill] sm:$0xff]  ;;  %v4787_v13 = vld [vmem:[#allocation20_spill] sm:$0xff] }
 0x23b   :  { %1497 = vmatpush.bf16.msra.mxu0 %v3411_v53  ;;  %1510 = vmatpush.bf16.msra.mxu1 %v3423_v57  ;;  %v4788_v31 = vld [vmem:[#allocation21_spill] sm:$0xff] }
 0x23c   :  { %v4179_v56 = vadd.f32 %v1218_v62, %v1217_v5  ;;  %1523 = vmatpush.bf16.msra.mxu2 %v3449_v2  ;;  %1536 = vmatpush.bf16.msra.mxu3 %v3425_v58  ;;  %v1206_v39 = vadd.f32 %v3058_v11, %v1205_v27  ;;  %vm1212_vm7 = vcmp.eq.f32.partialorder %v1211_v24, 8.507059e+37  ;;  %v4789_v62 = vld [vmem:[#allocation23_spill] sm:$0xff]  ;;  %v4790_v5 = vld [vmem:[#allocation22_spill] sm:$0xff]  ;;  %v4791_v27 = vld [vmem:[#allocation24_spill] sm:$0xff] }
 0x23d   :  { %v4794_v24 = vld [vmem:[#allocation26_spill] sm:$0xff] }
 0x23e   :  { %3061 = vtanh.f32 %v4179_v56  ;;  %v1210_v23 = vsel %vm1209_vm6, %v3058_v11, %v1206_v39  ;;  %v4777_v11 = vld [vmem:[#allocation11_spill] sm:$0xff]  ;;  %v4792_v39 = vld [vmem:[#allocation25_spill] sm:$0xff] }
 0x23f   :  { %1498 = vmatpush.bf16.msra.mxu0 %v3447_v1  ;;  %1511 = vmatpush.bf16.msra.mxu1 %v3459_v6  ;;  %v1215_v51 = vsel %vm1212_vm7, %v1214_v60, %v1210_v23  ;;  %v4795_v23 = vld [vmem:[#allocation28_spill] sm:$0xff]  ;;  %v4796_v60 = vld [vmem:[#allocation29_spill] sm:$0xff] }
 0x240   :  { %1524 = vmatpush.bf16.msra.mxu2 %v3485_v20  ;;  %1537 = vmatpush.bf16.msra.mxu3 %v3461_v9 }
 0x243   :  { %1499 = vmatpush.bf16.msra.mxu0 %v3483_v19  ;;  %1512 = vmatpush.bf16.msra.mxu1 %v3498_v25 }
 0x244   :  { %v3062_v61 = vpop.eup %3061  ;;  %1525 = vmatpush.bf16.msra.mxu2 %v3539_v47  ;;  %1538 = vmatpush.bf16.msra.mxu3 %v3500_v26 }
 0x245   :  { %v1221_v43 = vmul.f32 %v3062_v61, %v1215_v51  ;;  %v4797_v61 = vld [vmem:[#allocation31_spill] sm:$0xff]  ;;  %v4798_v51 = vld [vmem:[#allocation30_spill] sm:$0xff] }
 0x247   :  { %v1225_v30 = vpack.c.bf16 %v1221_v43, %v1221_v43  ;;  %1500 = vmatpush.bf16.msra.mxu0 %v3531_v40  ;;  %1513 = vmatpush.bf16.msra.mxu1 %v3543_v48  ;;  %v4799_v43 = vld [vmem:[#allocation32_spill] sm:$0xff] }
 0x248   :  { %1526 = vmatpush.bf16.msra.mxu2 %v3585_v10  ;;  %1539 = vmatpush.bf16.msra.mxu3 %v3545_v49 }
 0x249   :  { %2844 = vst [vmem:[%s4611_s5 + $0x14] sm:$0xf] %v1225_v30  ;;  %1369 = vmatmul.bf16.vlgmr.msrb.gmra.mxu0 %v1225_v30  ;;  %1382 = vmatmul.bf16.vlgmr.msrb.gmra.mxu1 %v1225_v30 }
 0x24a   :  { %1395 = vmatmul.bf16.vlgmr.msrb.gmra.mxu2 %v1225_v30  ;;  %1408 = vmatmul.bf16.vlgmr.msrb.gmra.mxu3 %v1225_v30  ;;  %v4800_v30 = vld [vmem:[#allocation33_spill] sm:$0xff] }
 0x24b   :  { %1619 = vmatpush.bf16.msrb.mxu0 %v3553_v52  ;;  %1632 = vmatpush.bf16.msrb.mxu1 %v3555_v55 }
 0x24c   :  { %1645 = vmatpush.bf16.msrb.mxu2 %v4773_v50  ;;  %1658 = vmatpush.bf16.msrb.mxu3 %v4774_v38 }
 0x24f   :  { %1620 = vmatpush.bf16.msrb.mxu0 %v4775_v35  ;;  %1633 = vmatpush.bf16.msrb.mxu1 %v4776_v36 }
 0x250   :  { %1646 = vmatpush.bf16.msrb.mxu2 %v4777_v11  ;;  %1659 = vmatpush.bf16.msrb.mxu3 %v4778_v59 }
 0x253   :  { %1621 = vmatpush.bf16.msrb.mxu0 %v4779_v14  ;;  %1634 = vmatpush.bf16.msrb.mxu1 %v4780_v15 }
 0x254   :  { %1647 = vmatpush.bf16.msrb.mxu2 %v4781_v63  ;;  %1660 = vmatpush.bf16.msrb.mxu3 %v4782_v44 }
 0x257   :  { %1622 = vmatpush.bf16.msrb.mxu0 %v4783_v22  ;;  %1635 = vmatpush.bf16.msrb.mxu1 %v4784_v29 }
 0x258   :  { %1648 = vmatpush.bf16.msrb.mxu2 %v4785_v0  ;;  %1661 = vmatpush.bf16.msrb.mxu3 %v4786_v4 }
 0x25b   :  { %1623 = vmatpush.bf16.msrb.mxu0 %v4787_v13  ;;  %1636 = vmatpush.bf16.msrb.mxu1 %v4788_v31 }
 0x25c   :  { %1649 = vmatpush.bf16.msrb.mxu2 %v4789_v62  ;;  %1662 = vmatpush.bf16.msrb.mxu3 %v4790_v5  ;;  %v4801_v5 = vld [vmem:[#allocation35_spill] sm:$0xff] }
 0x25f   :  { %1624 = vmatpush.bf16.msrb.mxu0 %v4791_v27  ;;  %1637 = vmatpush.bf16.msrb.mxu1 %v4792_v39  ;;  %v4802_v27 = vld [vmem:[#allocation34_spill] sm:$0xff] }
 0x260   :  { %1650 = vmatpush.bf16.msrb.mxu2 %v4793_v37  ;;  %1663 = vmatpush.bf16.msrb.mxu3 %v4794_v24  ;;  %v2845_v24 = vld [vmem:[%s4608_s0 + $0x30] sm:$0xff] }
 0x261   :  { %v1231_v37 = vunpack.c.l.bf16 %v2845_v24 }
 0x263   :  { %1625 = vmatpush.bf16.msrb.mxu0 %v4795_v23  ;;  %1638 = vmatpush.bf16.msrb.mxu1 %v4796_v60  ;;  %v1232_v23 = vunpack.c.h.bf16 %v2845_v24 }
 0x264   :  { %1651 = vmatpush.bf16.msrb.mxu2 %v4797_v61  ;;  %1664 = vmatpush.bf16.msrb.mxu3 %v4798_v51 }
 0x267   :  { %1626 = vmatpush.bf16.msrb.mxu0 %v4799_v43  ;;  %1639 = vmatpush.bf16.msrb.mxu1 %v4800_v30  ;;  %v2846_v43 = vld [vmem:[%s4608_s0 + $0x38] sm:$0xff] }
 0x268   :  { %1652 = vmatpush.bf16.msrb.mxu2 %v4801_v5  ;;  %1665 = vmatpush.bf16.msrb.mxu3 %v4802_v27  ;;  %v1234_v31 = vunpack.c.h.bf16 %v2846_v43 }
 0x2a6   :  { %v1244_v39 = vpop.f32.mrf.mxu0  ;;  %v1257_v60 = vpop.f32.mrf.mxu1 }
 0x2a7   :  { %v1287_v62 = vadd.f32 %v1244_v39, %v1231_v37  ;;  %v1288_v61 = vadd.f32 %v1257_v60, %v1232_v23 }
 0x2a9   :  { %v2847_v51 = vmul.f32 -1.442695, %v1287_v62  ;;  %v2848_v30 = vmul.f32 -1.442695, %v1288_v61  ;;  %v1233_v62 = vunpack.c.l.bf16 %v2846_v43 }
 0x2ab   :  { %3063 = vpow2.f32 %v2847_v51 }
 0x2ac   :  { %3065 = vpow2.f32 %v2848_v30 }
 0x2ad   :  { %v1270_v27 = vpop.f32.mrf.mxu2  ;;  %v1283_v5 = vpop.f32.mrf.mxu3 }
 0x2ae   :  { %v1290_v13 = vadd.f32 %v1283_v5, %v1234_v31  ;;  %v1246_v4 = vpop.f32.mrf.mxu0  ;;  %v1259_v0 = vpop.f32.mrf.mxu1  ;;  %v1289_v30 = vadd.f32 %v1270_v27, %v1233_v62 }
 0x2b0   :  { %v2849_v29 = vmul.f32 -1.442695, %v1290_v13 }
 0x2b1   :  { %v3064_v24 = vpop.eup %3063 }
 0x2b2   :  { %v3066_v22 = vpop.eup %3065  ;;  %v1294_v44 = vadd.f32 1.0, %v3064_v24  ;;  %3067 = vpow2.f32 %v2849_v29 }
 0x2b3   :  { %v1313_v39 = vadd.f32 1.0, %v3066_v22  ;;  %v2850_v22 = vld [vmem:[%s4609_s1 + $0x40] sm:$0xff] }
 0x2b4   :  { %3069 = vrcp.f32 %v1294_v44  ;;  %v1306_v5 = vand.u32 2147483648, %v1294_v44  ;;  %v1304_v24 = vand.u32 2147483647, %v1294_v44  ;;  %vm1300_vm10 = vweird.f32 %v1294_v44 }
 0x2b5   :  { %3071 = vrcp.f32 %v1313_v39  ;;  %v1272_v37 = vpop.f32.mrf.mxu2  ;;  %v1285_v23 = vpop.f32.mrf.mxu3  ;;  %v1325_v29 = vand.u32 2147483648, %v1313_v39  ;;  %v1323_v27 = vand.u32 2147483647, %v1313_v39  ;;  %vm1319_vm11 = vweird.f32 %v1313_v39 }
 0x2b6   :  { %vm1305_vm14 = vcmp.eq.f32.partialorder %v1304_v24, 8.507059e+37 }
 0x2b7   :  { %v1326_v15 = vor.u32 1.1754944e-38, %v1325_v29  ;;  %vm1324_vm15 = vcmp.eq.f32.partialorder %v1323_v27, 8.507059e+37 }
 0x2b8   :  { %v3068_v60 = vpop.eup %3067 }
 0x2b9   :  { %v4240_v61 = vadd.f32 1.0, %v3068_v60  ;;  %v1357_v60 = vunpack.c.l.bf16 %v2850_v22 }
 0x2ba   :  { %v3070_v51 = vpop.eup %3069 }
 0x2bb   :  { %v3072_v63 = vpop.eup %3071  ;;  %v1296_v31 = vmul.f32 %v3070_v51, %v1294_v44  ;;  %3073 = vrcp.f32 %v4240_v61  ;;  %vm1301_vm8 = vweird.f32 %v3070_v51  ;;  %vm1339_vm1 = vweird.f32 %v4240_v61 }
 0x2bc   :  { %v1315_v0 = vmul.f32 %v3072_v63, %v1313_v39  ;;  %3075 = vtanh.f32 %v1289_v30  ;;  %vm1320_vm9 = vweird.f32 %v3072_v63  ;;  %vm1302_vm12 = vmor %vm1300_vm10, %vm1301_vm8 }
 0x2bd   :  { %v1297_v4 = vsub.f32 1.0, %v1296_v31  ;;  %v1307_v31 = vor.u32 1.1754944e-38, %v1306_v5  ;;  %vm1321_vm13 = vmor %vm1319_vm11, %vm1320_vm9 }
 0x2be   :  { %v1316_v13 = vsub.f32 1.0, %v1315_v0 }
 0x2bf   :  { %v1298_v43 = vmul.f32 %v3070_v51, %v1297_v4  ;;  %v1358_v4 = vunpack.c.h.bf16 %v2850_v22 }
 0x2c0   :  { %v1317_v37 = vmul.f32 %v3072_v63, %v1316_v13 }
 0x2c1   :  { %v3074_v23 = vpop.eup %3073  ;;  %v1299_v62 = vadd.f32 %v3070_v51, %v1298_v43 }
 0x2c2   :  { %v1318_v0 = vadd.f32 %v3072_v63, %v1317_v37  ;;  %v1335_v30 = vmul.f32 %v3074_v23, %v4240_v61  ;;  %v3076_v59 = vpop.eup %3075  ;;  %vm1340_vm0 = vweird.f32 %v3074_v23 }
 0x2c3   :  { %v1303_v14 = vsel %vm1302_vm12, %v3070_v51, %v1299_v62  ;;  %v2851_v51 = vld [vmem:[%s4609_s1 + $0x48] sm:$0xff]  ;;  %vm1341_vm2 = vmor %vm1339_vm1, %vm1340_vm0 }
 0x2c4   :  { %v1308_v11 = vsel %vm1305_vm14, %v1307_v31, %v1303_v14  ;;  %v1322_v13 = vsel %vm1321_vm13, %v3072_v63, %v1318_v0  ;;  %v1336_v36 = vsub.f32 1.0, %v1335_v30 }
 0x2c5   :  { %v1327_v35 = vsel %vm1324_vm15, %v1326_v15, %v1322_v13  ;;  %v1350_v43 = vmul.f32 %v3076_v59, %v1308_v11  ;;  %v1345_v11 = vand.u32 2147483648, %v4240_v61 }
 0x2c6   :  { %v1349_v44 = vmul.f32 %v1327_v35, %v4147_v18  ;;  %v1337_v39 = vmul.f32 %v3074_v23, %v1336_v36  ;;  %v1370_v38 = vpop.f32.mrf.mxu0  ;;  %v1383_v5 = vpop.f32.mrf.mxu1  ;;  %v1360_v18 = vunpack.c.h.bf16 %v2851_v51 }
 0x2c7   :  { %v1413_v37 = vadd.f32 %v1370_v38, %v1357_v60  ;;  %v1414_v50 = vadd.f32 %v1383_v5, %v1358_v4  ;;  %v1343_v38 = vand.u32 2147483647, %v4240_v61  ;;  %v1346_v15 = vor.u32 1.1754944e-38, %v1345_v11 }
 0x2c8   :  { %v4251_v29 = vadd.f32 %v1350_v43, %v1349_v44  ;;  %v1338_v22 = vadd.f32 %v3074_v23, %v1337_v39 }
 0x2c9   :  { %v2852_v14 = vmul.f32 -1.442695, %v1413_v37  ;;  %v2853_v63 = vmul.f32 -1.442695, %v1414_v50  ;;  %vm1344_vm3 = vcmp.eq.f32.partialorder %v1343_v38, 8.507059e+37 }
 0x2ca   :  { %3077 = vtanh.f32 %v4251_v29  ;;  %v1342_v59 = vsel %vm1341_vm2, %v3074_v23, %v1338_v22  ;;  %v1359_v23 = vunpack.c.l.bf16 %v2851_v51 }
 0x2cb   :  { %3079 = vpow2.f32 %v2852_v14  ;;  %v1347_v31 = vsel %vm1344_vm3, %v1346_v15, %v1342_v59 }
 0x2cc   :  { %3081 = vpow2.f32 %v2853_v63 }
 0x2cd   :  { %v1396_v35 = vpop.f32.mrf.mxu2  ;;  %v1409_v36 = vpop.f32.mrf.mxu3 }
 0x2ce   :  { %v1416_v24 = vadd.f32 %v1409_v36, %v1360_v18  ;;  %v1372_v27 = vpop.f32.mrf.mxu0  ;;  %v1385_v50 = vpop.f32.mrf.mxu1  ;;  %v1415_v63 = vadd.f32 %v1396_v35, %v1359_v23 }
 0x2d0   :  { %v3078_v62 = vpop.eup %3077  ;;  %v2854_v60 = vmul.f32 -1.442695, %v1416_v24 }
 0x2d1   :  { %v3080_v0 = vpop.eup %3079  ;;  %v1353_v30 = vmul.f32 %v3078_v62, %v1347_v31 }
 0x2d2   :  { %v3082_v4 = vpop.eup %3081  ;;  %v1420_v13 = vadd.f32 1.0, %v3080_v0  ;;  %3083 = vpow2.f32 %v2854_v60 }
 0x2d3   :  { %v1439_v61 = vadd.f32 1.0, %v3082_v4  ;;  %v1480_v43 = vpack.c.bf16 %v1353_v30, %v1353_v30 }
 0x2d4   :  { %3085 = vrcp.f32 %v1420_v13  ;;  %v1432_v36 = vand.u32 2147483648, %v1420_v13  ;;  %v1430_v35 = vand.u32 2147483647, %v1420_v13  ;;  %vm1426_vm6 = vweird.f32 %v1420_v13 }
 0x2d5   :  { %3087 = vrcp.f32 %v1439_v61  ;;  %v1398_v44 = vpop.f32.mrf.mxu2  ;;  %v1411_v39 = vpop.f32.mrf.mxu3  ;;  %2855 = vst [vmem:[%s4610_s4 + $0xc] sm:$0xf] %v1480_v43  ;;  %1501 = vmatmul.bf16.vlgmr.msra.gmra.mxu0 %v1480_v43  ;;  %1514 = vmatmul.bf16.vlgmr.msra.gmra.mxu1 %v1480_v43  ;;  %v1451_v59 = vand.u32 2147483648, %v1439_v61  ;;  %v1449_v27 = vand.u32 2147483647, %v1439_v61  ;;  %vm1445_vm7 = vweird.f32 %v1439_v61 }
 0x2d6   :  { %1527 = vmatmul.bf16.vlgmr.msra.gmra.mxu2 %v1480_v43  ;;  %1540 = vmatmul.bf16.vlgmr.msra.gmra.mxu3 %v1480_v43  ;;  %v1433_v60 = vor.u32 1.1754944e-38, %v1432_v36  ;;  %vm1431_vm10 = vcmp.eq.f32.partialorder %v1430_v35, 8.507059e+37  ;;  %v4804_v35 = vld [vmem:[#allocation6_spill] sm:$0xff] }
 0x2d7   :  { %1751 = vmatpush.bf16.msra.mxu0 %v3263_v3  ;;  %1764 = vmatpush.bf16.msra.mxu1 %v3274_v7  ;;  %v1452_v30 = vor.u32 1.1754944e-38, %v1451_v59  ;;  %vm1450_vm11 = vcmp.eq.f32.partialorder %v1449_v27, 8.507059e+37  ;;  %v4806_v27 = vld [vmem:[#allocation9_spill] sm:$0xff] }
 0x2d8   :  { %v3084_v5 = vpop.eup %3083  ;;  %1777 = vmatpush.bf16.msra.mxu2 %v3314_v21  ;;  %1790 = vmatpush.bf16.msra.mxu3 %v3276_v8 }
 0x2d9   :  { %v4264_v37 = vadd.f32 1.0, %v3084_v5 }
 0x2da   :  { %v3086_v14 = vpop.eup %3085 }
 0x2db   :  { %v3088_v22 = vpop.eup %3087  ;;  %v1422_v11 = vmul.f32 %v3086_v14, %v1420_v13  ;;  %3089 = vrcp.f32 %v4264_v37  ;;  %1752 = vmatpush.bf16.msra.mxu0 %v3288_v12  ;;  %1765 = vmatpush.bf16.msra.mxu1 %v3301_v16  ;;  %vm1427_vm4 = vweird.f32 %v3086_v14  ;;  %vm1465_vm13 = vweird.f32 %v4264_v37 }
 0x2dc   :  { %v1441_v51 = vmul.f32 %v3088_v22, %v1439_v61  ;;  %1778 = vmatpush.bf16.msra.mxu2 %v3353_v34  ;;  %1791 = vmatpush.bf16.msra.mxu3 %v3303_v17  ;;  %3091 = vtanh.f32 %v1415_v63  ;;  %vm1446_vm5 = vweird.f32 %v3088_v22  ;;  %vm1428_vm8 = vmor %vm1426_vm6, %vm1427_vm4 }
 0x2dd   :  { %v1423_v18 = vsub.f32 1.0, %v1422_v11  ;;  %vm1447_vm9 = vmor %vm1445_vm7, %vm1446_vm5  ;;  %v1471_v11 = vand.u32 2147483648, %v4264_v37 }
 0x2de   :  { %v1442_v38 = vsub.f32 1.0, %v1441_v51 }
 0x2df   :  { %v1424_v15 = vmul.f32 %v3086_v14, %v1423_v18  ;;  %1753 = vmatpush.bf16.msra.mxu0 %v3336_v28  ;;  %1766 = vmatpush.bf16.msra.mxu1 %v3349_v32  ;;  %v1472_v18 = vor.u32 1.1754944e-38, %v1471_v11  ;;  %v4823_v11 = vld [vmem:[#allocation27_spill] sm:$0xff] }
 0x2e0   :  { %v1443_v24 = vmul.f32 %v3088_v22, %v1442_v38  ;;  %1779 = vmatpush.bf16.msra.mxu2 %v3377_v42  ;;  %1792 = vmatpush.bf16.msra.mxu3 %v3351_v33 }
 0x2e1   :  { %v3090_v50 = vpop.eup %3089  ;;  %v1425_v62 = vadd.f32 %v3086_v14, %v1424_v15  ;;  %v4803_v15 = vld [vmem:[#allocation7_spill] sm:$0xff] }
 0x2e2   :  { %v1444_v31 = vadd.f32 %v3088_v22, %v1443_v24  ;;  %v1461_v0 = vmul.f32 %v3090_v50, %v4264_v37  ;;  %v3092_v43 = vpop.eup %3091  ;;  %vm1466_vm12 = vweird.f32 %v3090_v50  ;;  %v4805_v24 = vld [vmem:[#allocation8_spill] sm:$0xff] }
 0x2e3   :  { %v1429_v4 = vsel %vm1428_vm8, %v3086_v14, %v1425_v62  ;;  %1754 = vmatpush.bf16.msra.mxu0 %v3375_v41  ;;  %1767 = vmatpush.bf16.msra.mxu1 %v3387_v45  ;;  %vm1467_vm14 = vmor %vm1465_vm13, %vm1466_vm12  ;;  %v4808_v62 = vld [vmem:[#allocation10_spill] sm:$0xff] }
 0x2e4   :  { %v1434_v44 = vsel %vm1431_vm10, %v1433_v60, %v1429_v4  ;;  %v1448_v39 = vsel %vm1447_vm9, %v3088_v22, %v1444_v31  ;;  %v1462_v23 = vsub.f32 1.0, %v1461_v0  ;;  %1780 = vmatpush.bf16.msra.mxu2 %v3413_v54  ;;  %1793 = vmatpush.bf16.msra.mxu3 %v3389_v46  ;;  %v4809_v60 = vld [vmem:[#allocation12_spill] sm:$0xff]  ;;  %v4810_v31 = vld [vmem:[#allocation13_spill] sm:$0xff]  ;;  %v4811_v0 = vld [vmem:[#allocation15_spill] sm:$0xff] }
 0x2e5   :  { %v1453_v13 = vsel %vm1450_vm11, %v1452_v30, %v1448_v39  ;;  %v1476_v61 = vmul.f32 %v3092_v43, %v1434_v44  ;;  %v4812_v30 = vld [vmem:[#allocation14_spill] sm:$0xff]  ;;  %v4813_v4 = vld [vmem:[#allocation16_spill] sm:$0xff]  ;;  %v4814_v43 = vld [vmem:[#allocation17_spill] sm:$0xff] }
 0x2e6   :  { %v1475_v5 = vmul.f32 %v1453_v13, %v4179_v56  ;;  %v1463_v63 = vmul.f32 %v3090_v50, %v1462_v23  ;;  %v1469_v56 = vand.u32 2147483647, %v4264_v37  ;;  %v4815_v44 = vld [vmem:[#allocation19_spill] sm:$0xff]  ;;  %v4816_v39 = vld [vmem:[#allocation18_spill] sm:$0xff]  ;;  %v4817_v23 = vld [vmem:[#allocation20_spill] sm:$0xff] }
 0x2e7   :  { %1755 = vmatpush.bf16.msra.mxu0 %v3411_v53  ;;  %1768 = vmatpush.bf16.msra.mxu1 %v3423_v57  ;;  %v4818_v13 = vld [vmem:[#allocation21_spill] sm:$0xff] }
 0x2e8   :  { %v4283_v14 = vadd.f32 %v1476_v61, %v1475_v5  ;;  %1781 = vmatpush.bf16.msra.mxu2 %v3449_v2  ;;  %1794 = vmatpush.bf16.msra.mxu3 %v3425_v58  ;;  %v1464_v22 = vadd.f32 %v3090_v50, %v1463_v63  ;;  %vm1470_vm15 = vcmp.eq.f32.partialorder %v1469_v56, 8.507059e+37  ;;  %v4819_v61 = vld [vmem:[#allocation23_spill] sm:$0xff]  ;;  %v4820_v5 = vld [vmem:[#allocation22_spill] sm:$0xff]  ;;  %v4821_v63 = vld [vmem:[#allocation24_spill] sm:$0xff] }
 0x2e9   :  { %v4824_v56 = vld [vmem:[#allocation26_spill] sm:$0xff] }
 0x2ea   :  { %3093 = vtanh.f32 %v4283_v14  ;;  %v1468_v51 = vsel %vm1467_vm14, %v3090_v50, %v1464_v22  ;;  %v4807_v50 = vld [vmem:[#allocation11_spill] sm:$0xff]  ;;  %v4822_v22 = vld [vmem:[#allocation25_spill] sm:$0xff] }
 0x2eb   :  { %1756 = vmatpush.bf16.msra.mxu0 %v3447_v1  ;;  %1769 = vmatpush.bf16.msra.mxu1 %v3459_v6  ;;  %v1473_v36 = vsel %vm1470_vm15, %v1472_v18, %v1468_v51  ;;  %v4825_v51 = vld [vmem:[#allocation28_spill] sm:$0xff]  ;;  %v4826_v18 = vld [vmem:[#allocation29_spill] sm:$0xff] }
 0x2ec   :  { %1782 = vmatpush.bf16.msra.mxu2 %v3485_v20  ;;  %1795 = vmatpush.bf16.msra.mxu3 %v3461_v9 }
 0x2ef   :  { %1757 = vmatpush.bf16.msra.mxu0 %v3483_v19  ;;  %1770 = vmatpush.bf16.msra.mxu1 %v3498_v25 }
 0x2f0   :  { %v3094_v38 = vpop.eup %3093  ;;  %1783 = vmatpush.bf16.msra.mxu2 %v3539_v47  ;;  %1796 = vmatpush.bf16.msra.mxu3 %v3500_v26 }
 0x2f1   :  { %v1479_v37 = vmul.f32 %v3094_v38, %v1473_v36  ;;  %v4827_v38 = vld [vmem:[#allocation31_spill] sm:$0xff]  ;;  %v4828_v36 = vld [vmem:[#allocation30_spill] sm:$0xff] }
 0x2f3   :  { %v1483_v59 = vpack.c.bf16 %v1479_v37, %v1479_v37  ;;  %1758 = vmatpush.bf16.msra.mxu0 %v3531_v40  ;;  %1771 = vmatpush.bf16.msra.mxu1 %v3543_v48  ;;  %v4829_v37 = vld [vmem:[#allocation32_spill] sm:$0xff] }
 0x2f4   :  { %1784 = vmatpush.bf16.msra.mxu2 %v3585_v10  ;;  %1797 = vmatpush.bf16.msra.mxu3 %v3545_v49 }
 0x2f5   :  { %2856 = vst [vmem:[%s4611_s5 + $0x10] sm:$0xf] %v1483_v59  ;;  %1627 = vmatmul.bf16.vlgmr.msrb.gmra.mxu0 %v1483_v59  ;;  %1640 = vmatmul.bf16.vlgmr.msrb.gmra.mxu1 %v1483_v59 }
 0x2f6   :  { %1653 = vmatmul.bf16.vlgmr.msrb.gmra.mxu2 %v1483_v59  ;;  %1666 = vmatmul.bf16.vlgmr.msrb.gmra.mxu3 %v1483_v59  ;;  %v4830_v59 = vld [vmem:[#allocation33_spill] sm:$0xff] }
 0x2f7   :  { %1877 = vmatpush.bf16.msrb.mxu0 %v3553_v52  ;;  %1890 = vmatpush.bf16.msrb.mxu1 %v3555_v55 }
 0x2f8   :  { %1903 = vmatpush.bf16.msrb.mxu2 %v4803_v15  ;;  %1916 = vmatpush.bf16.msrb.mxu3 %v4804_v35 }
 0x2fb   :  { %1878 = vmatpush.bf16.msrb.mxu0 %v4805_v24  ;;  %1891 = vmatpush.bf16.msrb.mxu1 %v4806_v27 }
 0x2fc   :  { %1904 = vmatpush.bf16.msrb.mxu2 %v4807_v50  ;;  %1917 = vmatpush.bf16.msrb.mxu3 %v4808_v62 }
 0x2ff   :  { %1879 = vmatpush.bf16.msrb.mxu0 %v4809_v60  ;;  %1892 = vmatpush.bf16.msrb.mxu1 %v4810_v31 }
 0x300   :  { %1905 = vmatpush.bf16.msrb.mxu2 %v4811_v0  ;;  %1918 = vmatpush.bf16.msrb.mxu3 %v4812_v30 }
 0x303   :  { %1880 = vmatpush.bf16.msrb.mxu0 %v4813_v4  ;;  %1893 = vmatpush.bf16.msrb.mxu1 %v4814_v43 }
 0x304   :  { %1906 = vmatpush.bf16.msrb.mxu2 %v4815_v44  ;;  %1919 = vmatpush.bf16.msrb.mxu3 %v4816_v39 }
 0x307   :  { %1881 = vmatpush.bf16.msrb.mxu0 %v4817_v23  ;;  %1894 = vmatpush.bf16.msrb.mxu1 %v4818_v13 }
 0x308   :  { %1907 = vmatpush.bf16.msrb.mxu2 %v4819_v61  ;;  %1920 = vmatpush.bf16.msrb.mxu3 %v4820_v5  ;;  %v4831_v5 = vld [vmem:[#allocation35_spill] sm:$0xff] }
 0x30b   :  { %1882 = vmatpush.bf16.msrb.mxu0 %v4821_v63  ;;  %1895 = vmatpush.bf16.msrb.mxu1 %v4822_v22  ;;  %v4832_v63 = vld [vmem:[#allocation34_spill] sm:$0xff] }
 0x30c   :  { %1908 = vmatpush.bf16.msrb.mxu2 %v4823_v11  ;;  %1921 = vmatpush.bf16.msrb.mxu3 %v4824_v56  ;;  %v2857_v56 = vld [vmem:[%s4608_s0 + $0x40] sm:$0xff] }
 0x30d   :  { %v1489_v11 = vunpack.c.l.bf16 %v2857_v56 }
 0x30f   :  { %1883 = vmatpush.bf16.msrb.mxu0 %v4825_v51  ;;  %1896 = vmatpush.bf16.msrb.mxu1 %v4826_v18  ;;  %v1490_v51 = vunpack.c.h.bf16 %v2857_v56 }
 0x310   :  { %1909 = vmatpush.bf16.msrb.mxu2 %v4827_v38  ;;  %1922 = vmatpush.bf16.msrb.mxu3 %v4828_v36 }
 0x313   :  { %1884 = vmatpush.bf16.msrb.mxu0 %v4829_v37  ;;  %1897 = vmatpush.bf16.msrb.mxu1 %v4830_v59  ;;  %v2858_v37 = vld [vmem:[%s4608_s0 + $0x48] sm:$0xff] }
 0x314   :  { %1910 = vmatpush.bf16.msrb.mxu2 %v4831_v5  ;;  %1923 = vmatpush.bf16.msrb.mxu3 %v4832_v63  ;;  %v1492_v13 = vunpack.c.h.bf16 %v2858_v37 }
 0x352   :  { %v1502_v22 = vpop.f32.mrf.mxu0  ;;  %v1515_v18 = vpop.f32.mrf.mxu1 }
 0x353   :  { %v1545_v61 = vadd.f32 %v1502_v22, %v1489_v11  ;;  %v1546_v38 = vadd.f32 %v1515_v18, %v1490_v51 }
 0x355   :  { %v2859_v36 = vmul.f32 -1.442695, %v1545_v61  ;;  %v2860_v59 = vmul.f32 -1.442695, %v1546_v38  ;;  %v1491_v61 = vunpack.c.l.bf16 %v2858_v37 }
 0x357   :  { %3095 = vpow2.f32 %v2859_v36 }
 0x358   :  { %3097 = vpow2.f32 %v2860_v59 }
 0x359   :  { %v1528_v63 = vpop.f32.mrf.mxu2  ;;  %v1541_v5 = vpop.f32.mrf.mxu3 }
 0x35a   :  { %v1548_v23 = vadd.f32 %v1541_v5, %v1492_v13  ;;  %v1504_v39 = vpop.f32.mrf.mxu0  ;;  %v1517_v44 = vpop.f32.mrf.mxu1  ;;  %v1547_v59 = vadd.f32 %v1528_v63, %v1491_v61 }
 0x35c   :  { %v2861_v43 = vmul.f32 -1.442695, %v1548_v23 }
 0x35d   :  { %v3096_v56 = vpop.eup %3095 }
 0x35e   :  { %v3098_v4 = vpop.eup %3097  ;;  %v1552_v30 = vadd.f32 1.0, %v3096_v56  ;;  %3099 = vpow2.f32 %v2861_v43 }
 0x35f   :  { %v1571_v22 = vadd.f32 1.0, %v3098_v4  ;;  %v2862_v4 = vld [vmem:[%s4609_s1 + $0x30] sm:$0xff] }
 0x360   :  { %3101 = vrcp.f32 %v1552_v30  ;;  %v1564_v5 = vand.u32 2147483648, %v1552_v30  ;;  %v1562_v56 = vand.u32 2147483647, %v1552_v30  ;;  %vm1558_vm2 = vweird.f32 %v1552_v30 }
 0x361   :  { %3103 = vrcp.f32 %v1571_v22  ;;  %v1530_v11 = vpop.f32.mrf.mxu2  ;;  %v1543_v51 = vpop.f32.mrf.mxu3  ;;  %v1583_v43 = vand.u32 2147483648, %v1571_v22  ;;  %v1581_v63 = vand.u32 2147483647, %v1571_v22  ;;  %vm1577_vm3 = vweird.f32 %v1571_v22 }
 0x362   :  { %vm1563_vm6 = vcmp.eq.f32.partialorder %v1562_v56, 8.507059e+37 }
 0x363   :  { %v1584_v31 = vor.u32 1.1754944e-38, %v1583_v43  ;;  %vm1582_vm7 = vcmp.eq.f32.partialorder %v1581_v63, 8.507059e+37 }
 0x364   :  { %v3100_v18 = vpop.eup %3099 }
 0x365   :  { %v4344_v38 = vadd.f32 1.0, %v3100_v18  ;;  %v1615_v18 = vunpack.c.l.bf16 %v2862_v4 }
 0x366   :  { %v3102_v36 = vpop.eup %3101 }
 0x367   :  { %v3104_v0 = vpop.eup %3103  ;;  %v1554_v13 = vmul.f32 %v3102_v36, %v1552_v30  ;;  %3105 = vrcp.f32 %v4344_v38  ;;  %vm1559_vm0 = vweird.f32 %v3102_v36  ;;  %vm1597_vm9 = vweird.f32 %v4344_v38 }
 0x368   :  { %v1573_v44 = vmul.f32 %v3104_v0, %v1571_v22  ;;  %3107 = vtanh.f32 %v1547_v59  ;;  %vm1578_vm1 = vweird.f32 %v3104_v0  ;;  %vm1560_vm4 = vmor %vm1558_vm2, %vm1559_vm0 }
 0x369   :  { %v1555_v39 = vsub.f32 1.0, %v1554_v13  ;;  %v1565_v13 = vor.u32 1.1754944e-38, %v1564_v5  ;;  %vm1579_vm5 = vmor %vm1577_vm3, %vm1578_vm1 }
 0x36a   :  { %v1574_v23 = vsub.f32 1.0, %v1573_v44 }
 0x36b   :  { %v1556_v37 = vmul.f32 %v3102_v36, %v1555_v39  ;;  %v1616_v39 = vunpack.c.h.bf16 %v2862_v4 }
 0x36c   :  { %v1575_v11 = vmul.f32 %v3104_v0, %v1574_v23 }
 0x36d   :  { %v3106_v51 = vpop.eup %3105  ;;  %v1557_v61 = vadd.f32 %v3102_v36, %v1556_v37 }
 0x36e   :  { %v1576_v44 = vadd.f32 %v3104_v0, %v1575_v11  ;;  %v1593_v59 = vmul.f32 %v3106_v51, %v4344_v38  ;;  %v3108_v62 = vpop.eup %3107  ;;  %vm1598_vm8 = vweird.f32 %v3106_v51 }
 0x36f   :  { %v1561_v60 = vsel %vm1560_vm4, %v3102_v36, %v1557_v61  ;;  %v2863_v36 = vld [vmem:[%s4609_s1 + $0x38] sm:$0xff]  ;;  %vm1599_vm10 = vmor %vm1597_vm9, %vm1598_vm8 }
 0x370   :  { %v1566_v50 = vsel %vm1563_vm6, %v1565_v13, %v1561_v60  ;;  %v1580_v23 = vsel %vm1579_vm5, %v3104_v0, %v1576_v44  ;;  %v1594_v27 = vsub.f32 1.0, %v1593_v59 }
 0x371   :  { %v1585_v24 = vsel %vm1582_vm7, %v1584_v31, %v1580_v23  ;;  %v1608_v37 = vmul.f32 %v3108_v62, %v1566_v50  ;;  %v1603_v50 = vand.u32 2147483648, %v4344_v38 }
 0x372   :  { %v1607_v30 = vmul.f32 %v1585_v24, %v4251_v29  ;;  %v1595_v22 = vmul.f32 %v3106_v51, %v1594_v27  ;;  %v1628_v35 = vpop.f32.mrf.mxu0  ;;  %v1641_v5 = vpop.f32.mrf.mxu1  ;;  %v1618_v29 = vunpack.c.h.bf16 %v2863_v36 }
 0x373   :  { %v1671_v11 = vadd.f32 %v1628_v35, %v1615_v18  ;;  %v1672_v15 = vadd.f32 %v1641_v5, %v1616_v39  ;;  %v1601_v35 = vand.u32 2147483647, %v4344_v38  ;;  %v1604_v31 = vor.u32 1.1754944e-38, %v1603_v50 }
 0x374   :  { %v4355_v43 = vadd.f32 %v1608_v37, %v1607_v30  ;;  %v1596_v4 = vadd.f32 %v3106_v51, %v1595_v22 }
 0x375   :  { %v2864_v60 = vmul.f32 -1.442695, %v1671_v11  ;;  %v2865_v0 = vmul.f32 -1.442695, %v1672_v15  ;;  %vm1602_vm11 = vcmp.eq.f32.partialorder %v1601_v35, 8.507059e+37 }
 0x376   :  { %3109 = vtanh.f32 %v4355_v43  ;;  %v1600_v62 = vsel %vm1599_vm10, %v3106_v51, %v1596_v4  ;;  %v1617_v51 = vunpack.c.l.bf16 %v2863_v36 }
 0x377   :  { %3111 = vpow2.f32 %v2864_v60  ;;  %v1605_v13 = vsel %vm1602_vm11, %v1604_v31, %v1600_v62 }
 0x378   :  { %3113 = vpow2.f32 %v2865_v0 }
 0x379   :  { %v1654_v24 = vpop.f32.mrf.mxu2  ;;  %v1667_v27 = vpop.f32.mrf.mxu3 }
 0x37a   :  { %v1674_v56 = vadd.f32 %v1667_v27, %v1618_v29  ;;  %v1630_v63 = vpop.f32.mrf.mxu0  ;;  %v1643_v15 = vpop.f32.mrf.mxu1  ;;  %v1673_v0 = vadd.f32 %v1654_v24, %v1617_v51 }
 0x37c   :  { %v3110_v61 = vpop.eup %3109  ;;  %v2866_v18 = vmul.f32 -1.442695, %v1674_v56 }
 0x37d   :  { %v3112_v44 = vpop.eup %3111  ;;  %v1611_v59 = vmul.f32 %v3110_v61, %v1605_v13 }
 0x37e   :  { %v3114_v39 = vpop.eup %3113  ;;  %v1678_v23 = vadd.f32 1.0, %v3112_v44  ;;  %3115 = vpow2.f32 %v2866_v18 }
 0x37f   :  { %v1697_v38 = vadd.f32 1.0, %v3114_v39  ;;  %v1738_v37 = vpack.c.bf16 %v1611_v59, %v1611_v59 }
 0x380   :  { %3117 = vrcp.f32 %v1678_v23  ;;  %v1690_v27 = vand.u32 2147483648, %v1678_v23  ;;  %v1688_v24 = vand.u32 2147483647, %v1678_v23  ;;  %vm1684_vm14 = vweird.f32 %v1678_v23 }
 0x381   :  { %3119 = vrcp.f32 %v1697_v38  ;;  %v1656_v30 = vpop.f32.mrf.mxu2  ;;  %v1669_v22 = vpop.f32.mrf.mxu3  ;;  %2867 = vst [vmem:[%s4610_s4 + $0x10] sm:$0xf] %v1738_v37  ;;  %1759 = vmatmul.bf16.vlgmr.msra.gmra.mxu0 %v1738_v37  ;;  %1772 = vmatmul.bf16.vlgmr.msra.gmra.mxu1 %v1738_v37  ;;  %v1709_v62 = vand.u32 2147483648, %v1697_v38  ;;  %v1707_v63 = vand.u32 2147483647, %v1697_v38  ;;  %vm1703_vm15 = vweird.f32 %v1697_v38 }
 0x382   :  { %1785 = vmatmul.bf16.vlgmr.msra.gmra.mxu2 %v1738_v37  ;;  %1798 = vmatmul.bf16.vlgmr.msra.gmra.mxu3 %v1738_v37  ;;  %v1691_v18 = vor.u32 1.1754944e-38, %v1690_v27  ;;  %vm1689_vm2 = vcmp.eq.f32.partialorder %v1688_v24, 8.507059e+37  ;;  %v4834_v24 = vld [vmem:[#allocation6_spill] sm:$0xff] }
 0x383   :  { %2009 = vmatpush.bf16.msra.mxu0 %v3263_v3  ;;  %2022 = vmatpush.bf16.msra.mxu1 %v3274_v7  ;;  %v1710_v59 = vor.u32 1.1754944e-38, %v1709_v62  ;;  %vm1708_vm3 = vcmp.eq.f32.partialorder %v1707_v63, 8.507059e+37  ;;  %v4836_v63 = vld [vmem:[#allocation9_spill] sm:$0xff] }
 0x384   :  { %v3116_v5 = vpop.eup %3115  ;;  %2035 = vmatpush.bf16.msra.mxu2 %v3314_v21  ;;  %2048 = vmatpush.bf16.msra.mxu3 %v3276_v8 }
 0x385   :  { %v4368_v11 = vadd.f32 1.0, %v3116_v5 }
 0x386   :  { %v3118_v60 = vpop.eup %3117 }
 0x387   :  { %v3120_v4 = vpop.eup %3119  ;;  %v1680_v50 = vmul.f32 %v3118_v60, %v1678_v23  ;;  %3121 = vrcp.f32 %v4368_v11  ;;  %2010 = vmatpush.bf16.msra.mxu0 %v3288_v12  ;;  %2023 = vmatpush.bf16.msra.mxu1 %v3301_v16  ;;  %vm1685_vm12 = vweird.f32 %v3118_v60  ;;  %vm1723_vm5 = vweird.f32 %v4368_v11 }
 0x388   :  { %v1699_v36 = vmul.f32 %v3120_v4, %v1697_v38  ;;  %2036 = vmatpush.bf16.msra.mxu2 %v3353_v34  ;;  %2049 = vmatpush.bf16.msra.mxu3 %v3303_v17  ;;  %3123 = vtanh.f32 %v1673_v0  ;;  %vm1704_vm13 = vweird.f32 %v3120_v4  ;;  %vm1686_vm0 = vmor %vm1684_vm14, %vm1685_vm12 }
 0x389   :  { %v1681_v29 = vsub.f32 1.0, %v1680_v50  ;;  %vm1705_vm1 = vmor %vm1703_vm15, %vm1704_vm13  ;;  %v1729_v50 = vand.u32 2147483648, %v4368_v11 }
 0x38a   :  { %v1700_v35 = vsub.f32 1.0, %v1699_v36 }
 0x38b   :  { %v1682_v31 = vmul.f32 %v3118_v60, %v1681_v29  ;;  %2011 = vmatpush.bf16.msra.mxu0 %v3336_v28  ;;  %2024 = vmatpush.bf16.msra.mxu1 %v3349_v32  ;;  %v1730_v29 = vor.u32 1.1754944e-38, %v1729_v50  ;;  %v4853_v50 = vld [vmem:[#allocation27_spill] sm:$0xff] }
 0x38c   :  { %v1701_v56 = vmul.f32 %v3120_v4, %v1700_v35  ;;  %2037 = vmatpush.bf16.msra.mxu2 %v3377_v42  ;;  %2050 = vmatpush.bf16.msra.mxu3 %v3351_v33 }
 0x38d   :  { %v3122_v15 = vpop.eup %3121  ;;  %v1683_v61 = vadd.f32 %v3118_v60, %v1682_v31  ;;  %v4833_v31 = vld [vmem:[#allocation7_spill] sm:$0xff] }
 0x38e   :  { %v1702_v13 = vadd.f32 %v3120_v4, %v1701_v56  ;;  %v1719_v44 = vmul.f32 %v3122_v15, %v4368_v11  ;;  %v3124_v37 = vpop.eup %3123  ;;  %vm1724_vm4 = vweird.f32 %v3122_v15  ;;  %v4835_v56 = vld [vmem:[#allocation8_spill] sm:$0xff] }
 0x38f   :  { %v1687_v39 = vsel %vm1686_vm0, %v3118_v60, %v1683_v61  ;;  %2012 = vmatpush.bf16.msra.mxu0 %v3375_v41  ;;  %2025 = vmatpush.bf16.msra.mxu1 %v3387_v45  ;;  %vm1725_vm6 = vmor %vm1723_vm5, %vm1724_vm4  ;;  %v4838_v61 = vld [vmem:[#allocation10_spill] sm:$0xff] }
 0x390   :  { %v1692_v30 = vsel %vm1689_vm2, %v1691_v18, %v1687_v39  ;;  %v1706_v22 = vsel %vm1705_vm1, %v3120_v4, %v1702_v13  ;;  %v1720_v51 = vsub.f32 1.0, %v1719_v44  ;;  %2038 = vmatpush.bf16.msra.mxu2 %v3413_v54  ;;  %2051 = vmatpush.bf16.msra.mxu3 %v3389_v46  ;;  %v4839_v18 = vld [vmem:[#allocation12_spill] sm:$0xff]  ;;  %v4840_v13 = vld [vmem:[#allocation13_spill] sm:$0xff]  ;;  %v4841_v44 = vld [vmem:[#allocation15_spill] sm:$0xff] }
 0x391   :  { %v1711_v23 = vsel %vm1708_vm3, %v1710_v59, %v1706_v22  ;;  %v1734_v38 = vmul.f32 %v3124_v37, %v1692_v30  ;;  %v4842_v59 = vld [vmem:[#allocation14_spill] sm:$0xff]  ;;  %v4843_v39 = vld [vmem:[#allocation16_spill] sm:$0xff]  ;;  %v4844_v37 = vld [vmem:[#allocation17_spill] sm:$0xff] }
 0x392   :  { %v1733_v5 = vmul.f32 %v1711_v23, %v4283_v14  ;;  %v1721_v0 = vmul.f32 %v3122_v15, %v1720_v51  ;;  %v1727_v14 = vand.u32 2147483647, %v4368_v11  ;;  %v4845_v30 = vld [vmem:[#allocation19_spill] sm:$0xff]  ;;  %v4846_v22 = vld [vmem:[#allocation18_spill] sm:$0xff]  ;;  %v4847_v51 = vld [vmem:[#allocation20_spill] sm:$0xff] }
 0x393   :  { %2013 = vmatpush.bf16.msra.mxu0 %v3411_v53  ;;  %2026 = vmatpush.bf16.msra.mxu1 %v3423_v57  ;;  %v4848_v23 = vld [vmem:[#allocation21_spill] sm:$0xff] }
 0x394   :  { %v4387_v60 = vadd.f32 %v1734_v38, %v1733_v5  ;;  %2039 = vmatpush.bf16.msra.mxu2 %v3449_v2  ;;  %2052 = vmatpush.bf16.msra.mxu3 %v3425_v58  ;;  %v1722_v4 = vadd.f32 %v3122_v15, %v1721_v0  ;;  %vm1728_vm7 = vcmp.eq.f32.partialorder %v1727_v14, 8.507059e+37  ;;  %v4849_v38 = vld [vmem:[#allocation23_spill] sm:$0xff]  ;;  %v4850_v5 = vld [vmem:[#allocation22_spill] sm:$0xff]  ;;  %v4851_v0 = vld [vmem:[#allocation24_spill] sm:$0xff] }
 0x395   :  { %v4854_v14 = vld [vmem:[#allocation26_spill] sm:$0xff] }
 0x396   :  { %3125 = vtanh.f32 %v4387_v60  ;;  %v1726_v36 = vsel %vm1725_vm6, %v3122_v15, %v1722_v4  ;;  %v4837_v15 = vld [vmem:[#allocation11_spill] sm:$0xff]  ;;  %v4852_v4 = vld [vmem:[#allocation25_spill] sm:$0xff] }
 0x397   :  { %2014 = vmatpush.bf16.msra.mxu0 %v3447_v1  ;;  %2027 = vmatpush.bf16.msra.mxu1 %v3459_v6  ;;  %v1731_v27 = vsel %vm1728_vm7, %v1730_v29, %v1726_v36  ;;  %v4855_v36 = vld [vmem:[#allocation28_spill] sm:$0xff]  ;;  %v4856_v29 = vld [vmem:[#allocation29_spill] sm:$0xff] }
 0x398   :  { %2040 = vmatpush.bf16.msra.mxu2 %v3485_v20  ;;  %2053 = vmatpush.bf16.msra.mxu3 %v3461_v9 }
 0x39b   :  { %2015 = vmatpush.bf16.msra.mxu0 %v3483_v19  ;;  %2028 = vmatpush.bf16.msra.mxu1 %v3498_v25 }
 0x39c   :  { %v3126_v35 = vpop.eup %3125  ;;  %2041 = vmatpush.bf16.msra.mxu2 %v3539_v47  ;;  %2054 = vmatpush.bf16.msra.mxu3 %v3500_v26 }
 0x39d   :  { %v1737_v11 = vmul.f32 %v3126_v35, %v1731_v27  ;;  %v4857_v35 = vld [vmem:[#allocation31_spill] sm:$0xff]  ;;  %v4858_v27 = vld [vmem:[#allocation30_spill] sm:$0xff] }
 0x39f   :  { %v1741_v62 = vpack.c.bf16 %v1737_v11, %v1737_v11  ;;  %2016 = vmatpush.bf16.msra.mxu0 %v3531_v40  ;;  %2029 = vmatpush.bf16.msra.mxu1 %v3543_v48  ;;  %v4859_v11 = vld [vmem:[#allocation32_spill] sm:$0xff] }
 0x3a0   :  { %2042 = vmatpush.bf16.msra.mxu2 %v3585_v10  ;;  %2055 = vmatpush.bf16.msra.mxu3 %v3545_v49 }
 0x3a1   :  { %2868 = vst [vmem:[%s4611_s5 + $0xc] sm:$0xf] %v1741_v62  ;;  %1885 = vmatmul.bf16.vlgmr.msrb.gmra.mxu0 %v1741_v62  ;;  %1898 = vmatmul.bf16.vlgmr.msrb.gmra.mxu1 %v1741_v62 }
 0x3a2   :  { %1911 = vmatmul.bf16.vlgmr.msrb.gmra.mxu2 %v1741_v62  ;;  %1924 = vmatmul.bf16.vlgmr.msrb.gmra.mxu3 %v1741_v62  ;;  %v4860_v62 = vld [vmem:[#allocation33_spill] sm:$0xff] }
 0x3a3   :  { %2135 = vmatpush.bf16.msrb.mxu0 %v3553_v52  ;;  %2148 = vmatpush.bf16.msrb.mxu1 %v3555_v55 }
 0x3a4   :  { %2161 = vmatpush.bf16.msrb.mxu2 %v4833_v31  ;;  %2174 = vmatpush.bf16.msrb.mxu3 %v4834_v24 }
 0x3a7   :  { %2136 = vmatpush.bf16.msrb.mxu0 %v4835_v56  ;;  %2149 = vmatpush.bf16.msrb.mxu1 %v4836_v63 }
 0x3a8   :  { %2162 = vmatpush.bf16.msrb.mxu2 %v4837_v15  ;;  %2175 = vmatpush.bf16.msrb.mxu3 %v4838_v61 }
 0x3ab   :  { %2137 = vmatpush.bf16.msrb.mxu0 %v4839_v18  ;;  %2150 = vmatpush.bf16.msrb.mxu1 %v4840_v13 }
 0x3ac   :  { %2163 = vmatpush.bf16.msrb.mxu2 %v4841_v44  ;;  %2176 = vmatpush.bf16.msrb.mxu3 %v4842_v59 }
 0x3af   :  { %2138 = vmatpush.bf16.msrb.mxu0 %v4843_v39  ;;  %2151 = vmatpush.bf16.msrb.mxu1 %v4844_v37 }
 0x3b0   :  { %2164 = vmatpush.bf16.msrb.mxu2 %v4845_v30  ;;  %2177 = vmatpush.bf16.msrb.mxu3 %v4846_v22 }
 0x3b3   :  { %2139 = vmatpush.bf16.msrb.mxu0 %v4847_v51  ;;  %2152 = vmatpush.bf16.msrb.mxu1 %v4848_v23 }
 0x3b4   :  { %2165 = vmatpush.bf16.msrb.mxu2 %v4849_v38  ;;  %2178 = vmatpush.bf16.msrb.mxu3 %v4850_v5  ;;  %v4861_v5 = vld [vmem:[#allocation35_spill] sm:$0xff] }
 0x3b7   :  { %2140 = vmatpush.bf16.msrb.mxu0 %v4851_v0  ;;  %2153 = vmatpush.bf16.msrb.mxu1 %v4852_v4  ;;  %v4862_v0 = vld [vmem:[#allocation34_spill] sm:$0xff] }
 0x3b8   :  { %2166 = vmatpush.bf16.msrb.mxu2 %v4853_v50  ;;  %2179 = vmatpush.bf16.msrb.mxu3 %v4854_v14  ;;  %v2869_v14 = vld [vmem:[%s4608_s0 + $0x50] sm:$0xff] }
 0x3b9   :  { %v1747_v50 = vunpack.c.l.bf16 %v2869_v14 }
 0x3bb   :  { %2141 = vmatpush.bf16.msrb.mxu0 %v4855_v36  ;;  %2154 = vmatpush.bf16.msrb.mxu1 %v4856_v29  ;;  %v1748_v36 = vunpack.c.h.bf16 %v2869_v14 }
 0x3bc   :  { %2167 = vmatpush.bf16.msrb.mxu2 %v4857_v35  ;;  %2180 = vmatpush.bf16.msrb.mxu3 %v4858_v27 }
 0x3bf   :  { %2142 = vmatpush.bf16.msrb.mxu0 %v4859_v11  ;;  %2155 = vmatpush.bf16.msrb.mxu1 %v4860_v62  ;;  %v2870_v11 = vld [vmem:[%s4608_s0 + $0x58] sm:$0xff] }
 0x3c0   :  { %2168 = vmatpush.bf16.msrb.mxu2 %v4861_v5  ;;  %2181 = vmatpush.bf16.msrb.mxu3 %v4862_v0  ;;  %v1750_v23 = vunpack.c.h.bf16 %v2870_v11 }
 0x3fe   :  { %v1760_v4 = vpop.f32.mrf.mxu0  ;;  %v1773_v29 = vpop.f32.mrf.mxu1 }
 0x3ff   :  { %v1803_v38 = vadd.f32 %v1760_v4, %v1747_v50  ;;  %v1804_v35 = vadd.f32 %v1773_v29, %v1748_v36 }
 0x401   :  { %v2871_v27 = vmul.f32 -1.442695, %v1803_v38  ;;  %v2872_v62 = vmul.f32 -1.442695, %v1804_v35  ;;  %v1749_v38 = vunpack.c.l.bf16 %v2870_v11 }
 0x403   :  { %3127 = vpow2.f32 %v2871_v27 }
 0x404   :  { %3129 = vpow2.f32 %v2872_v62 }
 0x405   :  { %v1786_v0 = vpop.f32.mrf.mxu2  ;;  %v1799_v5 = vpop.f32.mrf.mxu3 }
 0x406   :  { %v1806_v51 = vadd.f32 %v1799_v5, %v1750_v23  ;;  %v1762_v22 = vpop.f32.mrf.mxu0  ;;  %v1775_v30 = vpop.f32.mrf.mxu1  ;;  %v1805_v62 = vadd.f32 %v1786_v0, %v1749_v38 }
 0x408   :  { %v2873_v37 = vmul.f32 -1.442695, %v1806_v51 }
 0x409   :  { %v3128_v14 = vpop.eup %3127 }
 0x40a   :  { %v3130_v39 = vpop.eup %3129  ;;  %v1810_v59 = vadd.f32 1.0, %v3128_v14  ;;  %3131 = vpow2.f32 %v2873_v37 }
 0x40b   :  { %v1829_v4 = vadd.f32 1.0, %v3130_v39  ;;  %v2874_v39 = vld [vmem:[%s4609_s1 + $0x20] sm:$0xff] }
 0x40c   :  { %3133 = vrcp.f32 %v1810_v59  ;;  %v1822_v5 = vand.u32 2147483648, %v1810_v59  ;;  %v1820_v14 = vand.u32 2147483647, %v1810_v59  ;;  %vm1816_vm10 = vweird.f32 %v1810_v59 }
 0x40d   :  { %3135 = vrcp.f32 %v1829_v4  ;;  %v1788_v50 = vpop.f32.mrf.mxu2  ;;  %v1801_v36 = vpop.f32.mrf.mxu3  ;;  %v1841_v37 = vand.u32 2147483648, %v1829_v4  ;;  %v1839_v0 = vand.u32 2147483647, %v1829_v4  ;;  %vm1835_vm11 = vweird.f32 %v1829_v4 }
 0x40e   :  { %vm1821_vm14 = vcmp.eq.f32.partialorder %v1820_v14, 8.507059e+37 }
 0x40f   :  { %v1842_v13 = vor.u32 1.1754944e-38, %v1841_v37  ;;  %vm1840_vm15 = vcmp.eq.f32.partialorder %v1839_v0, 8.507059e+37 }
 0x410   :  { %v3132_v29 = vpop.eup %3131 }
 0x411   :  { %v4448_v35 = vadd.f32 1.0, %v3132_v29  ;;  %v1873_v29 = vunpack.c.l.bf16 %v2874_v39 }
 0x412   :  { %v3134_v27 = vpop.eup %3133 }
 0x413   :  { %v3136_v44 = vpop.eup %3135  ;;  %v1812_v23 = vmul.f32 %v3134_v27, %v1810_v59  ;;  %3137 = vrcp.f32 %v4448_v35  ;;  %vm1817_vm8 = vweird.f32 %v3134_v27  ;;  %vm1855_vm1 = vweird.f32 %v4448_v35 }
 0x414   :  { %v1831_v30 = vmul.f32 %v3136_v44, %v1829_v4  ;;  %3139 = vtanh.f32 %v1805_v62  ;;  %vm1836_vm9 = vweird.f32 %v3136_v44  ;;  %vm1818_vm12 = vmor %vm1816_vm10, %vm1817_vm8 }
 0x415   :  { %v1813_v22 = vsub.f32 1.0, %v1812_v23  ;;  %v1823_v23 = vor.u32 1.1754944e-38, %v1822_v5  ;;  %vm1837_vm13 = vmor %vm1835_vm11, %vm1836_vm9 }
 0x416   :  { %v1832_v51 = vsub.f32 1.0, %v1831_v30 }
 0x417   :  { %v1814_v11 = vmul.f32 %v3134_v27, %v1813_v22  ;;  %v1874_v22 = vunpack.c.h.bf16 %v2874_v39 }
 0x418   :  { %v1833_v50 = vmul.f32 %v3136_v44, %v1832_v51 }
 0x419   :  { %v3138_v36 = vpop.eup %3137  ;;  %v1815_v38 = vadd.f32 %v3134_v27, %v1814_v11 }
 0x41a   :  { %v1834_v30 = vadd.f32 %v3136_v44, %v1833_v50  ;;  %v1851_v62 = vmul.f32 %v3138_v36, %v4448_v35  ;;  %v3140_v61 = vpop.eup %3139  ;;  %vm1856_vm0 = vweird.f32 %v3138_v36 }
 0x41b   :  { %v1819_v18 = vsel %vm1818_vm12, %v3134_v27, %v1815_v38  ;;  %v2875_v27 = vld [vmem:[%s4609_s1 + $0x28] sm:$0xff]  ;;  %vm1857_vm2 = vmor %vm1855_vm1, %vm1856_vm0 }
 0x41c   :  { %v1824_v15 = vsel %vm1821_vm14, %v1823_v23, %v1819_v18  ;;  %v1838_v51 = vsel %vm1837_vm13, %v3136_v44, %v1834_v30  ;;  %v1852_v63 = vsub.f32 1.0, %v1851_v62 }
 0x41d   :  { %v1843_v56 = vsel %vm1840_vm15, %v1842_v13, %v1838_v51  ;;  %v1866_v11 = vmul.f32 %v3140_v61, %v1824_v15  ;;  %v1861_v15 = vand.u32 2147483648, %v4448_v35 }
 0x41e   :  { %v1865_v59 = vmul.f32 %v1843_v56, %v4355_v43  ;;  %v1853_v4 = vmul.f32 %v3138_v36, %v1852_v63  ;;  %v1886_v24 = vpop.f32.mrf.mxu0  ;;  %v1899_v5 = vpop.f32.mrf.mxu1  ;;  %v1876_v43 = vunpack.c.h.bf16 %v2875_v27 }
 0x41f   :  { %v1929_v50 = vadd.f32 %v1886_v24, %v1873_v29  ;;  %v1930_v31 = vadd.f32 %v1899_v5, %v1874_v22  ;;  %v1859_v24 = vand.u32 2147483647, %v4448_v35  ;;  %v1862_v13 = vor.u32 1.1754944e-38, %v1861_v15 }
 0x420   :  { %v4459_v37 = vadd.f32 %v1866_v11, %v1865_v59  ;;  %v1854_v39 = vadd.f32 %v3138_v36, %v1853_v4 }
 0x421   :  { %v2876_v18 = vmul.f32 -1.442695, %v1929_v50  ;;  %v2877_v44 = vmul.f32 -1.442695, %v1930_v31  ;;  %vm1860_vm3 = vcmp.eq.f32.partialorder %v1859_v24, 8.507059e+37 }
 0x422   :  { %3141 = vtanh.f32 %v4459_v37  ;;  %v1858_v61 = vsel %vm1857_vm2, %v3138_v36, %v1854_v39  ;;  %v1875_v36 = vunpack.c.l.bf16 %v2875_v27 }
 0x423   :  { %3143 = vpow2.f32 %v2876_v18  ;;  %v1863_v23 = vsel %vm1860_vm3, %v1862_v13, %v1858_v61 }
 0x424   :  { %3145 = vpow2.f32 %v2877_v44 }
 0x425   :  { %v1912_v56 = vpop.f32.mrf.mxu2  ;;  %v1925_v63 = vpop.f32.mrf.mxu3 }
 0x426   :  { %v1932_v14 = vadd.f32 %v1925_v63, %v1876_v43  ;;  %v1888_v0 = vpop.f32.mrf.mxu0  ;;  %v1901_v31 = vpop.f32.mrf.mxu1  ;;  %v1931_v44 = vadd.f32 %v1912_v56, %v1875_v36  ;;  %v4885_v36 = vld [vmem:[#allocation28_spill] sm:$0xff] }
 0x428   :  { %v3142_v38 = vpop.eup %3141  ;;  %v2878_v29 = vmul.f32 -1.442695, %v1932_v14 }
 0x429   :  { %v3144_v30 = vpop.eup %3143  ;;  %v1869_v62 = vmul.f32 %v3142_v38, %v1863_v23  ;;  %v4876_v23 = vld [vmem:[#allocation18_spill] sm:$0xff] }
 0x42a   :  { %v3146_v22 = vpop.eup %3145  ;;  %v1936_v51 = vadd.f32 1.0, %v3144_v30  ;;  %3147 = vpow2.f32 %v2878_v29  ;;  %v4877_v30 = vld [vmem:[#allocation20_spill] sm:$0xff] }
 0x42b   :  { %v1955_v35 = vadd.f32 1.0, %v3146_v22  ;;  %v1996_v11 = vpack.c.bf16 %v1869_v62, %v1869_v62  ;;  %v4878_v62 = vld [vmem:[#allocation21_spill] sm:$0xff]  ;;  %v4879_v22 = vld [vmem:[#allocation23_spill] sm:$0xff] }
 0x42c   :  { %3149 = vrcp.f32 %v1936_v51  ;;  %v1946_v24 = vand.u32 2147483647, %v1936_v51  ;;  %vm1942_vm6 = vweird.f32 %v1936_v51 }
 0x42d   :  { %3151 = vrcp.f32 %v1955_v35  ;;  %v1914_v59 = vpop.f32.mrf.mxu2  ;;  %v1927_v4 = vpop.f32.mrf.mxu3  ;;  %2879 = vst [vmem:[%s4610_s4 + $0x14] sm:$0xf] %v1996_v11  ;;  %2017 = vmatmul.bf16.vlgmr.msra.gmra.mxu0 %v1996_v11  ;;  %2030 = vmatmul.bf16.vlgmr.msra.gmra.mxu1 %v1996_v11  ;;  %v1967_v27 = vand.u32 2147483648, %v1955_v35  ;;  %vm1961_vm7 = vweird.f32 %v1955_v35 }
 0x42e   :  { %2043 = vmatmul.bf16.vlgmr.msra.gmra.mxu2 %v1996_v11  ;;  %2056 = vmatmul.bf16.vlgmr.msra.gmra.mxu3 %v1996_v11  ;;  %vm1947_vm10 = vcmp.eq.f32.partialorder %v1946_v24, 8.507059e+37  ;;  %v4882_v11 = vld [vmem:[#allocation25_spill] sm:$0xff]  ;;  %v4883_v59 = vld [vmem:[#allocation27_spill] sm:$0xff]  ;;  %v4884_v4 = vld [vmem:[#allocation26_spill] sm:$0xff] }
 0x42f   :  { %2267 = vmatpush.bf16.msra.mxu0 %v3263_v3  ;;  %2280 = vmatpush.bf16.msra.mxu1 %v3274_v7 }
 0x430   :  { %v3148_v5 = vpop.eup %3147  ;;  %2293 = vmatpush.bf16.msra.mxu2 %v3314_v21  ;;  %2306 = vmatpush.bf16.msra.mxu3 %v3276_v8  ;;  %v1948_v8 = vand.u32 2147483648, %v1936_v51 }
 0x431   :  { %v4472_v50 = vadd.f32 1.0, %v3148_v5  ;;  %v4886_v5 = vld [vmem:[#allocation29_spill] sm:$0xff] }
 0x432   :  { %v3150_v18 = vpop.eup %3149  ;;  %v1949_v56 = vor.u32 1.1754944e-38, %v1948_v8 }
 0x433   :  { %v3152_v39 = vpop.eup %3151  ;;  %v1938_v15 = vmul.f32 %v3150_v18, %v1936_v51  ;;  %3153 = vrcp.f32 %v4472_v50  ;;  %2268 = vmatpush.bf16.msra.mxu0 %v3288_v12  ;;  %2281 = vmatpush.bf16.msra.mxu1 %v3301_v16  ;;  %vm1943_vm4 = vweird.f32 %v3150_v18  ;;  %v1965_v16 = vand.u32 2147483647, %v1955_v35  ;;  %v4880_v51 = vld [vmem:[#allocation22_spill] sm:$0xff] }
 0x434   :  { %v1957_v3 = vmul.f32 %v3152_v39, %v1955_v35  ;;  %2294 = vmatpush.bf16.msra.mxu2 %v3353_v34  ;;  %2307 = vmatpush.bf16.msra.mxu3 %v3303_v17  ;;  %3155 = vtanh.f32 %v1931_v44  ;;  %vm1962_vm5 = vweird.f32 %v3152_v39  ;;  %vm1944_vm8 = vmor %vm1942_vm6, %vm1943_vm4  ;;  %vm1981_vm13 = vweird.f32 %v4472_v50  ;;  %v4881_v35 = vld [vmem:[#allocation24_spill] sm:$0xff] }
 0x435   :  { %v1939_v7 = vsub.f32 1.0, %v1938_v15  ;;  %vm1963_vm9 = vmor %vm1961_vm7, %vm1962_vm5  ;;  %vm1966_vm11 = vcmp.eq.f32.partialorder %v1965_v16, 8.507059e+37  ;;  %v4889_v44 = vld [vmem:[#allocation32_spill] sm:$0xff]  ;;  %v4891_v15 = vld [vmem:[#allocation35_spill] sm:$0xff] }
 0x436   :  { %v1958_v21 = vsub.f32 1.0, %v1957_v3  ;;  %v4892_v3 = vld [vmem:[#allocation34_spill] sm:$0xff]  ;;  %v2882_v16 = vld [vmem:[%s4608_s0 + $0x68] sm:$0xff] }
 0x437   :  { %v1940_v43 = vmul.f32 %v3150_v18, %v1939_v7  ;;  %2269 = vmatpush.bf16.msra.mxu0 %v3336_v28  ;;  %2282 = vmatpush.bf16.msra.mxu1 %v3349_v32  ;;  %v1968_v28 = vor.u32 1.1754944e-38, %v1967_v27  ;;  %v2881_v7 = vld [vmem:[%s4608_s0 + $0x60] sm:$0xff] }
 0x438   :  { %v1959_v12 = vmul.f32 %v3152_v39, %v1958_v21  ;;  %2295 = vmatpush.bf16.msra.mxu2 %v3377_v42  ;;  %2308 = vmatpush.bf16.msra.mxu3 %v3351_v33  ;;  %v2005_v21 = vunpack.c.l.bf16 %v2881_v7  ;;  %v2006_v8 = vunpack.c.h.bf16 %v2881_v7 }
 0x439   :  { %v3154_v17 = vpop.eup %3153  ;;  %v1941_v34 = vadd.f32 %v3150_v18, %v1940_v43 }
 0x43a   :  { %v1960_v63 = vadd.f32 %v3152_v39, %v1959_v12  ;;  %v1977_v61 = vmul.f32 %v3154_v17, %v4472_v50  ;;  %v3156_v32 = vpop.eup %3155  ;;  %vm1982_vm12 = vweird.f32 %v3154_v17 }
 0x43b   :  { %v1945_v13 = vsel %vm1944_vm8, %v3150_v18, %v1941_v34  ;;  %2270 = vmatpush.bf16.msra.mxu0 %v3375_v41  ;;  %2283 = vmatpush.bf16.msra.mxu1 %v3387_v45  ;;  %vm1983_vm14 = vmor %vm1981_vm13, %vm1982_vm12  ;;  %v4888_v18 = vld [vmem:[#allocation30_spill] sm:$0xff] }
 0x43c   :  { %v1950_v42 = vsel %vm1947_vm10, %v1949_v56, %v1945_v13  ;;  %v1964_v33 = vsel %vm1963_vm9, %v3152_v39, %v1960_v63  ;;  %v1978_v14 = vsub.f32 1.0, %v1977_v61  ;;  %2296 = vmatpush.bf16.msra.mxu2 %v3413_v54  ;;  %2309 = vmatpush.bf16.msra.mxu3 %v3389_v46  ;;  %v1987_v46 = vand.u32 2147483648, %v4472_v50  ;;  %v4890_v39 = vld [vmem:[#allocation33_spill] sm:$0xff] }
 0x43d   :  { %v1969_v0 = vsel %vm1966_vm11, %v1968_v28, %v1964_v33  ;;  %v1992_v31 = vmul.f32 %v3156_v32, %v1950_v42  ;;  %v1985_v54 = vand.u32 2147483647, %v4472_v50  ;;  %v4887_v50 = vld [vmem:[#allocation31_spill] sm:$0xff]  ;;  %v2008_v56 = vunpack.c.h.bf16 %v2882_v16 }
 0x43e   :  { %v1991_v38 = vmul.f32 %v1969_v0, %v4387_v60  ;;  %v1979_v29 = vmul.f32 %v3154_v17, %v1978_v14  ;;  %v4875_v60 = vld [vmem:[#allocation19_spill] sm:$0xff] }
 0x43f   :  { %2271 = vmatpush.bf16.msra.mxu0 %v3411_v53  ;;  %2284 = vmatpush.bf16.msra.mxu1 %v3423_v57  ;;  %v1988_v57 = vor.u32 1.1754944e-38, %v1987_v46  ;;  %vm1986_vm15 = vcmp.eq.f32.partialorder %v1985_v54, 8.507059e+37 }
 0x440   :  { %v4491_v41 = vadd.f32 %v1992_v31, %v1991_v38  ;;  %2297 = vmatpush.bf16.msra.mxu2 %v3449_v2  ;;  %2310 = vmatpush.bf16.msra.mxu3 %v3425_v58  ;;  %v1980_v45 = vadd.f32 %v3154_v17, %v1979_v29 }
 0x442   :  { %3157 = vtanh.f32 %v4491_v41  ;;  %v1984_v53 = vsel %vm1983_vm14, %v3154_v17, %v1980_v45  ;;  %v2007_v45 = vunpack.c.l.bf16 %v2882_v16 }
 0x443   :  { %2272 = vmatpush.bf16.msra.mxu0 %v3447_v1  ;;  %2285 = vmatpush.bf16.msra.mxu1 %v3459_v6  ;;  %v1989_v2 = vsel %vm1986_vm15, %v1988_v57, %v1984_v53 }
 0x444   :  { %2298 = vmatpush.bf16.msra.mxu2 %v3485_v20  ;;  %2311 = vmatpush.bf16.msra.mxu3 %v3461_v9  ;;  %v4863_v9 = vld [vmem:[#allocation7_spill] sm:$0xff]  ;;  %v4865_v20 = vld [vmem:[#allocation8_spill] sm:$0xff] }
 0x447   :  { %2273 = vmatpush.bf16.msra.mxu0 %v3483_v19  ;;  %2286 = vmatpush.bf16.msra.mxu1 %v3498_v25  ;;  %v4864_v19 = vld [vmem:[#allocation6_spill] sm:$0xff]  ;;  %v4866_v25 = vld [vmem:[#allocation9_spill] sm:$0xff] }
 0x448   :  { %v3158_v58 = vpop.eup %3157  ;;  %2299 = vmatpush.bf16.msra.mxu2 %v3539_v47  ;;  %2312 = vmatpush.bf16.msra.mxu3 %v3500_v26  ;;  %v4867_v26 = vld [vmem:[#allocation11_spill] sm:$0xff]  ;;  %v4869_v47 = vld [vmem:[#allocation12_spill] sm:$0xff] }
 0x449   :  { %v1995_v1 = vmul.f32 %v3158_v58, %v1989_v2 }
 0x44b   :  { %v1999_v6 = vpack.c.bf16 %v1995_v1, %v1995_v1  ;;  %2274 = vmatpush.bf16.msra.mxu0 %v3531_v40  ;;  %2287 = vmatpush.bf16.msra.mxu1 %v3543_v48  ;;  %v4868_v40 = vld [vmem:[#allocation10_spill] sm:$0xff]  ;;  %v4870_v48 = vld [vmem:[#allocation13_spill] sm:$0xff] }
 0x44c   :  { %2300 = vmatpush.bf16.msra.mxu2 %v3585_v10  ;;  %2313 = vmatpush.bf16.msra.mxu3 %v3545_v49  ;;  %v4871_v49 = vld [vmem:[#allocation15_spill] sm:$0xff]  ;;  %v4874_v10 = vld [vmem:[#allocation17_spill] sm:$0xff] }
 0x44d   :  { %2880 = vst [vmem:[%s4611_s5 + $0x8] sm:$0xf] %v1999_v6  ;;  %2143 = vmatmul.bf16.vlgmr.msrb.gmra.mxu0 %v1999_v6  ;;  %2156 = vmatmul.bf16.vlgmr.msrb.gmra.mxu1 %v1999_v6 }
 0x44e   :  { %2169 = vmatmul.bf16.vlgmr.msrb.gmra.mxu2 %v1999_v6  ;;  %2182 = vmatmul.bf16.vlgmr.msrb.gmra.mxu3 %v1999_v6 }
 0x44f   :  { %2392 = vmatpush.bf16.msrb.mxu0 %v3553_v52  ;;  %2405 = vmatpush.bf16.msrb.mxu1 %v3555_v55  ;;  %v4872_v52 = vld [vmem:[#allocation14_spill] sm:$0xff]  ;;  %v4873_v55 = vld [vmem:[#allocation16_spill] sm:$0xff] }
 0x450   :  { %2418 = vmatpush.bf16.msrb.mxu2 %v4863_v9  ;;  %2431 = vmatpush.bf16.msrb.mxu3 %v4864_v19 }
 0x453   :  { %2393 = vmatpush.bf16.msrb.mxu0 %v4865_v20  ;;  %2406 = vmatpush.bf16.msrb.mxu1 %v4866_v25  ;;  %v2886_v20 = vld [vmem:[%s4609_s1 + $0x10] sm:$0xff] }
 0x454   :  { %2419 = vmatpush.bf16.msrb.mxu2 %v4867_v26  ;;  %2432 = vmatpush.bf16.msrb.mxu3 %v4868_v40 }
 0x457   :  { %2394 = vmatpush.bf16.msrb.mxu0 %v4869_v47  ;;  %2407 = vmatpush.bf16.msrb.mxu1 %v4870_v48 }
 0x458   :  { %2420 = vmatpush.bf16.msrb.mxu2 %v4871_v49  ;;  %2433 = vmatpush.bf16.msrb.mxu3 %v4872_v52 }
 0x45b   :  { %2395 = vmatpush.bf16.msrb.mxu0 %v4873_v55  ;;  %2408 = vmatpush.bf16.msrb.mxu1 %v4874_v10  ;;  %v2131_v55 = vunpack.c.l.bf16 %v2886_v20 }
 0x45c   :  { %2421 = vmatpush.bf16.msrb.mxu2 %v4875_v60  ;;  %2434 = vmatpush.bf16.msrb.mxu3 %v4876_v23 }
 0x45f   :  { %2396 = vmatpush.bf16.msrb.mxu0 %v4877_v30  ;;  %2409 = vmatpush.bf16.msrb.mxu1 %v4878_v62 }
 0x460   :  { %2422 = vmatpush.bf16.msrb.mxu2 %v4879_v22  ;;  %2435 = vmatpush.bf16.msrb.mxu3 %v4880_v51  ;;  %v2132_v22 = vunpack.c.h.bf16 %v2886_v20 }
 0x463   :  { %2397 = vmatpush.bf16.msrb.mxu0 %v4881_v35  ;;  %2410 = vmatpush.bf16.msrb.mxu1 %v4882_v11 }
 0x464   :  { %2423 = vmatpush.bf16.msrb.mxu2 %v4883_v59  ;;  %2436 = vmatpush.bf16.msrb.mxu3 %v4884_v4 }
 0x467   :  { %2398 = vmatpush.bf16.msrb.mxu0 %v4885_v36  ;;  %2411 = vmatpush.bf16.msrb.mxu1 %v4886_v5 }
 0x468   :  { %2424 = vmatpush.bf16.msrb.mxu2 %v4887_v50  ;;  %2437 = vmatpush.bf16.msrb.mxu3 %v4888_v18 }
 0x46b   :  { %2399 = vmatpush.bf16.msrb.mxu0 %v4889_v44  ;;  %2412 = vmatpush.bf16.msrb.mxu1 %v4890_v39 }
 0x46c   :  { %2425 = vmatpush.bf16.msrb.mxu2 %v4891_v15  ;;  %2438 = vmatpush.bf16.msrb.mxu3 %v4892_v3  ;;  %v2887_v3 = vld [vmem:[%s4609_s1 + $0x18] sm:$0xff] }
 0x4aa   :  { %v2018_v27 = vpop.f32.mrf.mxu0  ;;  %v2031_v43 = vpop.f32.mrf.mxu1 }
 0x4ab   :  { %v2061_v24 = vadd.f32 %v2018_v27, %v2005_v21  ;;  %v2062_v12 = vadd.f32 %v2031_v43, %v2006_v8 }
 0x4ad   :  { %v2883_v17 = vmul.f32 -1.442695, %v2061_v24  ;;  %v2884_v34 = vmul.f32 -1.442695, %v2062_v12 }
 0x4af   :  { %3159 = vpow2.f32 %v2883_v17 }
 0x4b0   :  { %3161 = vpow2.f32 %v2884_v34 }
 0x4b1   :  { %v2044_v63 = vpop.f32.mrf.mxu2  ;;  %v2057_v61 = vpop.f32.mrf.mxu3 }
 0x4b2   :  { %v2064_v28 = vadd.f32 %v2057_v61, %v2008_v56  ;;  %v2020_v13 = vpop.f32.mrf.mxu0  ;;  %v2033_v32 = vpop.f32.mrf.mxu1  ;;  %v2063_v57 = vadd.f32 %v2044_v63, %v2007_v45 }
 0x4b4   :  { %v2885_v42 = vmul.f32 -1.442695, %v2064_v28 }
 0x4b5   :  { %v3160_v33 = vpop.eup %3159 }
 0x4b6   :  { %v3162_v14 = vpop.eup %3161  ;;  %v2068_v0 = vadd.f32 1.0, %v3160_v33  ;;  %3163 = vpow2.f32 %v2885_v42 }
 0x4b7   :  { %v2087_v31 = vadd.f32 1.0, %v3162_v14 }
 0x4b8   :  { %3165 = vrcp.f32 %v2068_v0  ;;  %v2080_v19 = vand.u32 2147483648, %v2068_v0  ;;  %v2078_v40 = vand.u32 2147483647, %v2068_v0  ;;  %vm2074_vm2 = vweird.f32 %v2068_v0 }
 0x4b9   :  { %3167 = vrcp.f32 %v2087_v31  ;;  %v2046_v38 = vpop.f32.mrf.mxu2  ;;  %v2059_v29 = vpop.f32.mrf.mxu3  ;;  %v2099_v25 = vand.u32 2147483648, %v2087_v31  ;;  %v2097_v48 = vand.u32 2147483647, %v2087_v31  ;;  %vm2093_vm3 = vweird.f32 %v2087_v31 }
 0x4ba   :  { %v2081_v10 = vor.u32 1.1754944e-38, %v2080_v19  ;;  %vm2079_vm6 = vcmp.eq.f32.partialorder %v2078_v40, 8.507059e+37 }
 0x4bb   :  { %v2100_v30 = vor.u32 1.1754944e-38, %v2099_v25  ;;  %vm2098_vm7 = vcmp.eq.f32.partialorder %v2097_v48, 8.507059e+37 }
 0x4bc   :  { %v3164_v46 = vpop.eup %3163 }
 0x4bd   :  { %v4552_v54 = vadd.f32 1.0, %v3164_v46  ;;  %v2133_v46 = vunpack.c.l.bf16 %v2887_v3 }
 0x4be   :  { %v3166_v53 = vpop.eup %3165 }
 0x4bf   :  { %v3168_v58 = vpop.eup %3167  ;;  %v2070_v2 = vmul.f32 %v3166_v53, %v2068_v0  ;;  %3169 = vrcp.f32 %v4552_v54  ;;  %vm2075_vm0 = vweird.f32 %v3166_v53  ;;  %v2119_v43 = vand.u32 2147483648, %v4552_v54 }
 0x4c0   :  { %v2089_v1 = vmul.f32 %v3168_v58, %v2087_v31  ;;  %3171 = vtanh.f32 %v2063_v57  ;;  %vm2094_vm1 = vweird.f32 %v3168_v58  ;;  %vm2076_vm4 = vmor %vm2074_vm2, %vm2075_vm0  ;;  %vm2113_vm9 = vweird.f32 %v4552_v54 }
 0x4c1   :  { %v2071_v6 = vsub.f32 1.0, %v2070_v2  ;;  %vm2095_vm5 = vmor %vm2093_vm3, %vm2094_vm1  ;;  %v2117_v24 = vand.u32 2147483647, %v4552_v54  ;;  %v2120_v34 = vor.u32 1.1754944e-38, %v2119_v43 }
 0x4c2   :  { %v2090_v9 = vsub.f32 1.0, %v2089_v1 }
 0x4c3   :  { %v2072_v26 = vmul.f32 %v3166_v53, %v2071_v6  ;;  %vm2118_vm11 = vcmp.eq.f32.partialorder %v2117_v24, 8.507059e+37 }
 0x4c4   :  { %v2091_v47 = vmul.f32 %v3168_v58, %v2090_v9 }
 0x4c5   :  { %v3170_v49 = vpop.eup %3169  ;;  %v2073_v52 = vadd.f32 %v3166_v53, %v2072_v26 }
 0x4c6   :  { %v2092_v60 = vadd.f32 %v3168_v58, %v2091_v47  ;;  %v2109_v23 = vmul.f32 %v3170_v49, %v4552_v54  ;;  %v3172_v51 = vpop.eup %3171  ;;  %vm2114_vm8 = vweird.f32 %v3170_v49 }
 0x4c7   :  { %v2077_v62 = vsel %vm2076_vm4, %v3166_v53, %v2073_v52  ;;  %vm2115_vm10 = vmor %vm2113_vm9, %vm2114_vm8 }
 0x4c8   :  { %v2082_v35 = vsel %vm2079_vm6, %v2081_v10, %v2077_v62  ;;  %v2096_v11 = vsel %vm2095_vm5, %v3168_v58, %v2092_v60  ;;  %v2110_v59 = vsub.f32 1.0, %v2109_v23 }
 0x4c9   :  { %v2101_v4 = vsel %vm2098_vm7, %v2100_v30, %v2096_v11  ;;  %v2124_v36 = vmul.f32 %v3172_v51, %v2082_v35 }
 0x4ca   :  { %v2123_v5 = vmul.f32 %v2101_v4, %v4459_v37  ;;  %v2111_v50 = vmul.f32 %v3170_v49, %v2110_v59  ;;  %v2144_v18 = vpop.f32.mrf.mxu0  ;;  %v2157_v44 = vpop.f32.mrf.mxu1  ;;  %v2134_v37 = vunpack.c.h.bf16 %v2887_v3 }
 0x4cb   :  { %v2187_v39 = vadd.f32 %v2144_v18, %v2131_v55  ;;  %v2188_v15 = vadd.f32 %v2157_v44, %v2132_v22 }
 0x4cc   :  { %v4563_v7 = vadd.f32 %v2124_v36, %v2123_v5  ;;  %v2112_v27 = vadd.f32 %v3170_v49, %v2111_v50 }
 0x4cd   :  { %v2888_v21 = vmul.f32 -1.442695, %v2187_v39  ;;  %v2889_v8 = vmul.f32 -1.442695, %v2188_v15 }
 0x4ce   :  { %3173 = vtanh.f32 %v4563_v7  ;;  %v2116_v17 = vsel %vm2115_vm10, %v3170_v49, %v2112_v27 }
 0x4cf   :  { %3175 = vpow2.f32 %v2888_v21  ;;  %v2121_v32 = vsel %vm2118_vm11, %v2120_v34, %v2116_v17  ;;  %v2894_v34 = vld [vmem:[%s4608_s0 + $0x78] sm:$0xff] }
 0x4d0   :  { %3177 = vpow2.f32 %v2889_v8 }
 0x4d1   :  { %v2170_v12 = vpop.f32.mrf.mxu2  ;;  %v2183_v16 = vpop.f32.mrf.mxu3 }
 0x4d2   :  { %v2190_v56 = vadd.f32 %v2183_v16, %v2134_v37  ;;  %v2146_v63 = vpop.f32.mrf.mxu0  ;;  %v2159_v61 = vpop.f32.mrf.mxu1  ;;  %v2189_v58 = vadd.f32 %v2170_v12, %v2133_v46 }
 0x4d3   :  { %v2266_v61 = vunpack.c.h.bf16 %v2894_v34 }
 0x4d4   :  { %v3174_v28 = vpop.eup %3173  ;;  %v2890_v13 = vmul.f32 -1.442695, %v2190_v56 }
 0x4d5   :  { %v3176_v42 = vpop.eup %3175  ;;  %v2127_v33 = vmul.f32 %v3174_v28, %v2121_v32 }
 0x4d6   :  { %v3178_v14 = vpop.eup %3177  ;;  %v2194_v0 = vadd.f32 1.0, %v3176_v42  ;;  %3179 = vpow2.f32 %v2890_v13 }
 0x4d7   :  { %v2213_v31 = vadd.f32 1.0, %v3178_v14  ;;  %v2254_v38 = vpack.c.bf16 %v2127_v33, %v2127_v33 }
 0x4d8   :  { %3181 = vrcp.f32 %v2194_v0  ;;  %v2206_v20 = vand.u32 2147483648, %v2194_v0  ;;  %v2204_v40 = vand.u32 2147483647, %v2194_v0  ;;  %vm2200_vm14 = vweird.f32 %v2194_v0 }
 0x4d9   :  { %3183 = vrcp.f32 %v2213_v31  ;;  %v2172_v29 = vpop.f32.mrf.mxu2  ;;  %v2185_v45 = vpop.f32.mrf.mxu3  ;;  %2891 = vst [vmem:[%s4610_s4 + $0x18] sm:$0xf] %v2254_v38  ;;  %2275 = vmatmul.bf16.vlgmr.msra.gmra.mxu0 %v2254_v38  ;;  %2288 = vmatmul.bf16.vlgmr.msra.gmra.mxu1 %v2254_v38  ;;  %v2225_v25 = vand.u32 2147483648, %v2213_v31  ;;  %v2223_v48 = vand.u32 2147483647, %v2213_v31  ;;  %vm2219_vm15 = vweird.f32 %v2213_v31 }
 0x4da   :  { %2301 = vmatmul.bf16.vlgmr.msra.gmra.mxu2 %v2254_v38  ;;  %2314 = vmatmul.bf16.vlgmr.msra.gmra.mxu3 %v2254_v38  ;;  %v2207_v55 = vor.u32 1.1754944e-38, %v2206_v20  ;;  %vm2205_vm2 = vcmp.eq.f32.partialorder %v2204_v40, 8.507059e+37 }
 0x4db   :  { %v2226_v23 = vor.u32 1.1754944e-38, %v2225_v25  ;;  %vm2224_vm3 = vcmp.eq.f32.partialorder %v2223_v48, 8.507059e+37 }
 0x4dc   :  { %v3180_v54 = vpop.eup %3179 }
 0x4dd   :  { %v2233_v53 = vadd.f32 1.0, %v3180_v54  ;;  %v2265_v54 = vunpack.c.l.bf16 %v2894_v34 }
 0x4de   :  { %v3182_v57 = vpop.eup %3181 }
 0x4df   :  { %v3184_v2 = vpop.eup %3183  ;;  %v2196_v1 = vmul.f32 %v3182_v57, %v2194_v0  ;;  %3185 = vrcp.f32 %v2233_v53  ;;  %vm2201_vm12 = vweird.f32 %v3182_v57  ;;  %v2245_v18 = vand.u32 2147483648, %v2233_v53 }
 0x4e0   :  { %v2215_v6 = vmul.f32 %v3184_v2, %v2213_v31  ;;  %3187 = vtanh.f32 %v2189_v58  ;;  %vm2220_vm13 = vweird.f32 %v3184_v2  ;;  %vm2202_vm0 = vmor %vm2200_vm14, %vm2201_vm12  ;;  %vm2239_vm5 = vweird.f32 %v2233_v53 }
 0x4e1   :  { %v2197_v9 = vsub.f32 1.0, %v2196_v1  ;;  %vm2221_vm1 = vmor %vm2219_vm15, %vm2220_vm13  ;;  %v2243_v44 = vand.u32 2147483647, %v2233_v53  ;;  %v2246_v15 = vor.u32 1.1754944e-38, %v2245_v18 }
 0x4e2   :  { %v2216_v19 = vsub.f32 1.0, %v2215_v6 }
 0x4e3   :  { %v2198_v26 = vmul.f32 %v3182_v57, %v2197_v9  ;;  %vm2244_vm7 = vcmp.eq.f32.partialorder %v2243_v44, 8.507059e+37 }
 0x4e4   :  { %v2217_v47 = vmul.f32 %v3184_v2, %v2216_v19 }
 0x4e5   :  { %v3186_v49 = vpop.eup %3185  ;;  %v2199_v52 = vadd.f32 %v3182_v57, %v2198_v26  ;;  %v2386_v26 = vld [vmem:[%s4609_s1] sm:$0xff] }
 0x4e6   :  { %v2218_v10 = vadd.f32 %v3184_v2, %v2217_v47  ;;  %v2235_v60 = vmul.f32 %v3186_v49, %v2233_v53  ;;  %v3188_v62 = vpop.eup %3187  ;;  %vm2240_vm4 = vweird.f32 %v3186_v49 }
 0x4e7   :  { %v2203_v30 = vsel %vm2202_vm0, %v3182_v57, %v2199_v52  ;;  %vm2241_vm6 = vmor %vm2239_vm5, %vm2240_vm4 }
 0x4e8   :  { %v2208_v22 = vsel %vm2205_vm2, %v2207_v55, %v2203_v30  ;;  %v2222_v51 = vsel %vm2221_vm1, %v3184_v2, %v2218_v10  ;;  %v2236_v35 = vsub.f32 1.0, %v2235_v60  ;;  %v2388_v60 = vunpack.c.l.bf16 %v2386_v26 }
 0x4e9   :  { %v2227_v11 = vsel %vm2224_vm3, %v2226_v23, %v2222_v51  ;;  %v2250_v59 = vmul.f32 %v3188_v62, %v2208_v22 }
 0x4ea   :  { %v2249_v4 = vmul.f32 %v2227_v11, %v4491_v41  ;;  %v2237_v36 = vmul.f32 %v3186_v49, %v2236_v35  ;;  %v2893_v41 = vld [vmem:[%s4608_s0 + $0x70] sm:$0xff]  ;;  %v2389_v35 = vunpack.c.h.bf16 %v2386_v26 }
 0x4eb   :  { %v2263_v43 = vunpack.c.l.bf16 %v2893_v41  ;;  %v2264_v37 = vunpack.c.h.bf16 %v2893_v41 }
 0x4ec   :  { %v4573_v5 = vadd.f32 %v2250_v59, %v2249_v4  ;;  %v2238_v50 = vadd.f32 %v3186_v49, %v2237_v36 }
 0x4ee   :  { %3189 = vtanh.f32 %v4573_v5  ;;  %v2242_v39 = vsel %vm2241_vm6, %v3186_v49, %v2238_v50 }
 0x4ef   :  { %v2247_v21 = vsel %vm2244_vm7, %v2246_v15, %v2242_v39 }
 0x4f4   :  { %v3190_v3 = vpop.eup %3189 }
 0x4f5   :  { %v2253_v8 = vmul.f32 %v3190_v3, %v2247_v21 }
 0x4f7   :  { %v2257_v27 = vpack.c.bf16 %v2253_v8, %v2253_v8 }
 0x4f9   :  { %2892 = vst [vmem:[%s4611_s5 + $0x4] sm:$0xf] %v2257_v27  ;;  %2400 = vmatmul.bf16.vlgmr.msrb.gmra.mxu0 %v2257_v27  ;;  %2413 = vmatmul.bf16.vlgmr.msrb.gmra.mxu1 %v2257_v27 }
 0x4fa   :  { %2426 = vmatmul.bf16.vlgmr.msrb.gmra.mxu2 %v2257_v27  ;;  %2439 = vmatmul.bf16.vlgmr.msrb.gmra.mxu3 %v2257_v27  ;;  %v2387_v27 = vld [vmem:[%s4609_s1 + $0x8] sm:$0xff] }
 0x556   :  { %v2276_v24 = vpop.f32.mrf.mxu0  ;;  %v2289_v12 = vpop.f32.mrf.mxu1 }
 0x557   :  { %v2319_v16 = vadd.f32 %v2276_v24, %v2263_v43  ;;  %v2320_v17 = vadd.f32 %v2289_v12, %v2264_v37 }
 0x559   :  { %v2895_v56 = vmul.f32 -1.442695, %v2319_v16  ;;  %v2896_v63 = vmul.f32 -1.442695, %v2320_v17  ;;  %v2391_v16 = vunpack.c.h.bf16 %v2387_v27 }
 0x55b   :  { %3191 = vpow2.f32 %v2895_v56 }
 0x55c   :  { %3193 = vpow2.f32 %v2896_v63 }
 0x55d   :  { %v2302_v28 = vpop.f32.mrf.mxu2  ;;  %v2315_v13 = vpop.f32.mrf.mxu3 }
 0x55e   :  { %v2322_v32 = vadd.f32 %v2315_v13, %v2266_v61  ;;  %v2278_v42 = vpop.f32.mrf.mxu0  ;;  %v2291_v33 = vpop.f32.mrf.mxu1  ;;  %v2321_v2 = vadd.f32 %v2302_v28, %v2265_v54 }
 0x560   :  { %v2897_v14 = vmul.f32 -1.442695, %v2322_v32 }
 0x561   :  { %v3192_v0 = vpop.eup %3191 }
 0x562   :  { %v3194_v31 = vpop.eup %3193  ;;  %v2326_v38 = vadd.f32 1.0, %v3192_v0  ;;  %3195 = vpow2.f32 %v2897_v14 }
 0x563   :  { %v2345_v29 = vadd.f32 1.0, %v3194_v31 }
 0x564   :  { %3197 = vrcp.f32 %v2326_v38  ;;  %v2338_v25 = vand.u32 2147483648, %v2326_v38  ;;  %v2336_v48 = vand.u32 2147483647, %v2326_v38  ;;  %vm2332_vm10 = vweird.f32 %v2326_v38 }
 0x565   :  { %3199 = vrcp.f32 %v2345_v29  ;;  %v2304_v45 = vpop.f32.mrf.mxu2  ;;  %v2317_v46 = vpop.f32.mrf.mxu3  ;;  %v2357_v40 = vand.u32 2147483648, %v2345_v29  ;;  %v2355_v52 = vand.u32 2147483647, %v2345_v29  ;;  %vm2351_vm11 = vweird.f32 %v2345_v29 }
 0x566   :  { %v2339_v23 = vor.u32 1.1754944e-38, %v2338_v25  ;;  %vm2337_vm14 = vcmp.eq.f32.partialorder %v2336_v48, 8.507059e+37 }
 0x567   :  { %v2358_v22 = vor.u32 1.1754944e-38, %v2357_v40  ;;  %vm2356_vm15 = vcmp.eq.f32.partialorder %v2355_v52, 8.507059e+37 }
 0x568   :  { %v3196_v53 = vpop.eup %3195 }
 0x569   :  { %v4585_v57 = vadd.f32 1.0, %v3196_v53  ;;  %v2390_v53 = vunpack.c.l.bf16 %v2387_v27 }
 0x56a   :  { %v3198_v58 = vpop.eup %3197 }
 0x56b   :  { %v3200_v1 = vpop.eup %3199  ;;  %v2328_v6 = vmul.f32 %v3198_v58, %v2326_v38  ;;  %3201 = vrcp.f32 %v4585_v57  ;;  %vm2333_vm8 = vweird.f32 %v3198_v58  ;;  %v2377_v12 = vand.u32 2147483648, %v4585_v57 }
 0x56c   :  { %v2347_v9 = vmul.f32 %v3200_v1, %v2345_v29  ;;  %3203 = vtanh.f32 %v2321_v2  ;;  %vm2352_vm9 = vweird.f32 %v3200_v1  ;;  %vm2334_vm12 = vmor %vm2332_vm10, %vm2333_vm8  ;;  %vm2371_vm1 = vweird.f32 %v4585_v57 }
 0x56d   :  { %v2329_v19 = vsub.f32 1.0, %v2328_v6  ;;  %vm2353_vm13 = vmor %vm2351_vm11, %vm2352_vm9  ;;  %v2378_v63 = vor.u32 1.1754944e-38, %v2377_v12 }
 0x56e   :  { %v2348_v20 = vsub.f32 1.0, %v2347_v9 }
 0x56f   :  { %v2330_v47 = vmul.f32 %v3198_v58, %v2329_v19 }
 0x570   :  { %v2349_v49 = vmul.f32 %v3200_v1, %v2348_v20 }
 0x571   :  { %v3202_v55 = vpop.eup %3201  ;;  %v2331_v10 = vadd.f32 %v3198_v58, %v2330_v47 }
 0x572   :  { %v2350_v30 = vadd.f32 %v3200_v1, %v2349_v49  ;;  %v2367_v62 = vmul.f32 %v3202_v55, %v4585_v57  ;;  %v3204_v11 = vpop.eup %3203  ;;  %vm2372_vm0 = vweird.f32 %v3202_v55 }
 0x573   :  { %v2335_v51 = vsel %vm2334_vm12, %v3198_v58, %v2331_v10  ;;  %vm2373_vm2 = vmor %vm2371_vm1, %vm2372_vm0 }
 0x574   :  { %v2340_v59 = vsel %vm2337_vm14, %v2339_v23, %v2335_v51  ;;  %v2354_v4 = vsel %vm2353_vm13, %v3200_v1, %v2350_v30  ;;  %v2368_v36 = vsub.f32 1.0, %v2367_v62 }
 0x575   :  { %v2359_v50 = vsel %vm2356_vm15, %v2358_v22, %v2354_v4  ;;  %v2382_v18 = vmul.f32 %v3204_v11, %v2340_v59 }
 0x576   :  { %v2381_v44 = vmul.f32 %v2359_v50, %v4563_v7  ;;  %v2369_v39 = vmul.f32 %v3202_v55, %v2368_v36  ;;  %v2401_v15 = vpop.f32.mrf.mxu0  ;;  %v2414_v3 = vpop.f32.mrf.mxu1  ;;  %v2375_v7 = vand.u32 2147483647, %v4585_v57 }
 0x577   :  { %v2444_v21 = vadd.f32 %v2401_v15, %v2388_v60  ;;  %v2445_v8 = vadd.f32 %v2414_v3, %v2389_v35 }
 0x578   :  { %v2383_v41 = vadd.f32 %v2382_v18, %v2381_v44  ;;  %v2370_v43 = vadd.f32 %v3202_v55, %v2369_v39  ;;  %vm2376_vm3 = vcmp.eq.f32.partialorder %v2375_v7, 8.507059e+37 }
 0x579   :  { %v2898_v37 = vmul.f32 -1.442695, %v2444_v21  ;;  %v2899_v24 = vmul.f32 -1.442695, %v2445_v8 }
 0x57a   :  { %3205 = vtanh.f32 %v2383_v41  ;;  %v2374_v17 = vsel %vm2373_vm2, %v3202_v55, %v2370_v43 }
 0x57b   :  { %3207 = vpow2.f32 %v2898_v37  ;;  %v2379_v42 = vsel %vm2376_vm3, %v2378_v63, %v2374_v17 }
 0x57c   :  { %3209 = vpow2.f32 %v2899_v24 }
 0x57d   :  { %v2427_v34 = vpop.f32.mrf.mxu2  ;;  %v2440_v56 = vpop.f32.mrf.mxu3 }
 0x57e   :  { %v2447_v61 = vadd.f32 %v2440_v56, %v2391_v16  ;;  %v2403_v28 = vpop.f32.mrf.mxu0  ;;  %v2416_v13 = vpop.f32.mrf.mxu1  ;;  %v2446_v1 = vadd.f32 %v2427_v34, %v2390_v53 }
 0x580   :  { %v3206_v32 = vpop.eup %3205  ;;  %v2900_v33 = vmul.f32 -1.442695, %v2447_v61 }
 0x581   :  { %v3208_v14 = vpop.eup %3207  ;;  %v2385_v0 = vmul.f32 %v3206_v32, %v2379_v42 }
 0x582   :  { %v3210_v31 = vpop.eup %3209  ;;  %v2451_v38 = vadd.f32 1.0, %v3208_v14  ;;  %3211 = vpow2.f32 %v2900_v33 }
 0x583   :  { %v2511_v29 = vpack.c.bf16 %v2385_v0, %v2385_v0  ;;  %v2470_v45 = vadd.f32 1.0, %v3210_v31 }
 0x584   :  { %3213 = vrcp.f32 %v2451_v38  ;;  %v2463_v26 = vand.u32 2147483648, %v2451_v38  ;;  %v2461_v48 = vand.u32 2147483647, %v2451_v38  ;;  %vm2457_vm6 = vweird.f32 %v2451_v38 }
 0x585   :  { %2901 = vst [vmem:[%s4610_s4 + $0x1c] sm:$0xf] %v2511_v29  ;;  %3215 = vrcp.f32 %v2470_v45  ;;  %v2429_v46 = vpop.f32.mrf.mxu2  ;;  %v2442_v54 = vpop.f32.mrf.mxu3  ;;  %v2482_v40 = vand.u32 2147483648, %v2470_v45  ;;  %v2480_v52 = vand.u32 2147483647, %v2470_v45  ;;  %vm2476_vm7 = vweird.f32 %v2470_v45 }
 0x586   :  { %v2464_v60 = vor.u32 1.1754944e-38, %v2463_v26  ;;  %vm2462_vm10 = vcmp.eq.f32.partialorder %v2461_v48, 8.507059e+37 }
 0x587   :  { %v2483_v62 = vor.u32 1.1754944e-38, %v2482_v40  ;;  %vm2481_vm11 = vcmp.eq.f32.partialorder %v2480_v52, 8.507059e+37 }
 0x588   :  { %v3212_v57 = vpop.eup %3211 }
 0x589   :  { %v2490_v58 = vadd.f32 1.0, %v3212_v57 }
 0x58a   :  { %v3214_v2 = vpop.eup %3213 }
 0x58b   :  { %v3216_v6 = vpop.eup %3215  ;;  %v2453_v9 = vmul.f32 %v3214_v2, %v2451_v38  ;;  %3217 = vrcp.f32 %v2490_v58  ;;  %vm2458_vm4 = vweird.f32 %v3214_v2  ;;  %v2502_v15 = vand.u32 2147483648, %v2490_v58 }
 0x58c   :  { %v2472_v19 = vmul.f32 %v3216_v6, %v2470_v45  ;;  %3219 = vtanh.f32 %v2446_v1  ;;  %vm2477_vm5 = vweird.f32 %v3216_v6  ;;  %vm2459_vm8 = vmor %vm2457_vm6, %vm2458_vm4  ;;  %vm2496_vm13 = vweird.f32 %v2490_v58 }
 0x58d   :  { %v2454_v20 = vsub.f32 1.0, %v2453_v9  ;;  %vm2478_vm9 = vmor %vm2476_vm7, %vm2477_vm5  ;;  %v2500_v3 = vand.u32 2147483647, %v2490_v58  ;;  %v2503_v8 = vor.u32 1.1754944e-38, %v2502_v15 }
 0x58e   :  { %v2473_v25 = vsub.f32 1.0, %v2472_v19 }
 0x58f   :  { %v2455_v47 = vmul.f32 %v3214_v2, %v2454_v20  ;;  %vm2501_vm15 = vcmp.eq.f32.partialorder %v2500_v3, 8.507059e+37 }
 0x590   :  { %v2474_v49 = vmul.f32 %v3216_v6, %v2473_v25 }
 0x591   :  { %v3218_v55 = vpop.eup %3217  ;;  %v2456_v10 = vadd.f32 %v3214_v2, %v2455_v47 }
 0x592   :  { %v2475_v23 = vadd.f32 %v3216_v6, %v2474_v49  ;;  %v2492_v30 = vmul.f32 %v3218_v55, %v2490_v58  ;;  %v3220_v51 = vpop.eup %3219  ;;  %vm2497_vm12 = vweird.f32 %v3218_v55 }
 0x593   :  { %v2460_v22 = vsel %vm2459_vm8, %v3214_v2, %v2456_v10  ;;  %vm2498_vm14 = vmor %vm2496_vm13, %vm2497_vm12 }
 0x594   :  { %v2465_v35 = vsel %vm2462_vm10, %v2464_v60, %v2460_v22  ;;  %v2479_v11 = vsel %vm2478_vm9, %v3216_v6, %v2475_v23  ;;  %v2493_v59 = vsub.f32 1.0, %v2492_v30 }
 0x595   :  { %v2484_v4 = vsel %vm2481_vm11, %v2483_v62, %v2479_v11  ;;  %v2507_v36 = vmul.f32 %v3220_v51, %v2465_v35 }
 0x596   :  { %v2506_v50 = vmul.f32 %v2484_v4, %v4573_v5  ;;  %v2494_v18 = vmul.f32 %v3218_v55, %v2493_v59 }
 0x598   :  { %v2508_v44 = vadd.f32 %v2507_v36, %v2506_v50  ;;  %v2495_v39 = vadd.f32 %v3218_v55, %v2494_v18 }
 0x59a   :  { %3221 = vtanh.f32 %v2508_v44  ;;  %v2499_v21 = vsel %vm2498_vm14, %v3218_v55, %v2495_v39 }
 0x59b   :  { %v2504_v41 = vsel %vm2501_vm15, %v2503_v8, %v2499_v21 }
 0x5a0   :  { %v3222_v27 = vpop.eup %3221 }
 0x5a1   :  { %v2510_v43 = vmul.f32 %v3222_v27, %v2504_v41 }
 0x5a3   :  { %v2514_v37 = vpack.c.bf16 %v2510_v43, %v2510_v43 }
 0x5a5   :  { %2515 = vst [vmem:[%s4611_s5] sm:$0xf] %v2514_v37 }

// kernel: birnn_forward.3
= control target key start
LH: loop header
LB: loop body
LE: loop exit
PB: predicated region body
PF: predicated region fallthrough
CT: control target
= control target key end

     0   :  { %s4506_s2 = inlined_call_operand.vmem [shape: bf16[128,512], index: 2, kind: input, shape index: {}]   ;;  %s4507_s3 = inlined_call_operand.vmem [shape: bf16[128,512], index: 3, kind: input, shape index: {}]   ;;  %s4508_s0 = inlined_call_operand.vmem [shape: bf16[8,8,512], index: 0, kind: input, shape index: {}]   ;;  %s4509_s1 = inlined_call_operand.vmem [shape: bf16[8,8,512], index: 1, kind: input, shape index: {}]   ;;  %s4510_s4 = inlined_call_operand.vmem [shape: bf16[2,8,128], index: 4, kind: output, shape index: {0}]   ;;  %s4511_s5 = inlined_call_operand.vmem [shape: bf16[2,8,128], index: 5, kind: output, shape index: {1}]  }
   0x1   :  { %v2618_v0 = vld [vmem:[%s4506_s2 + $0xe0] sm:$0xf]  ;;  %v2868_v1 = vld [vmem:[%s4506_s2 + $0xec] sm:$0xf0]  ;;  %v2866_v2 = vld [vmem:[%s4506_s2 + $0xe4] sm:$0xf] }
   0x2   :  { %v3199_v3 = vor.u32 %v2868_v1, %v2618_v0  ;;  %v2620_v4 = vld [vmem:[%s4506_s2 + $0xf0] sm:$0xf0]  ;;  %v2867_v5 = vld [vmem:[%s4506_s2 + $0xec] sm:$0xf]  ;;  %v2628_v6 = vld [vmem:[%s4506_s2 + $0xf8] sm:$0xf0] }
   0x3   :  { %v3210_v7 = vor.u32 %v2866_v2, %v2620_v4  ;;  %v3212_v8 = vor.u32 %v2867_v5, %v2628_v6  ;;  %v2602_v9 = vld [vmem:[%s4506_s2 + $0xc0] sm:$0xf]  ;;  %v2864_v10 = vld [vmem:[%s4506_s2 + $0xcc] sm:$0xf0]  ;;  %v2862_v11 = vld [vmem:[%s4506_s2 + $0xc4] sm:$0xf] }
   0x4   :  { %287 = vmatpush.bf16.msra.mxu0 %v3199_v3  ;;  %v3224_v12 = vor.u32 %v2864_v10, %v2602_v9  ;;  %v2604_v13 = vld [vmem:[%s4506_s2 + $0xd0] sm:$0xf0]  ;;  %v2863_v14 = vld [vmem:[%s4506_s2 + $0xcc] sm:$0xf]  ;;  %v2612_v15 = vld [vmem:[%s4506_s2 + $0xd8] sm:$0xf0] }
   0x5   :  { %300 = vmatpush.bf16.msra.mxu1 %v3210_v7  ;;  %326 = vmatpush.bf16.msra.mxu3 %v3212_v8  ;;  %v3237_v16 = vor.u32 %v2862_v11, %v2604_v13  ;;  %v3239_v17 = vor.u32 %v2863_v14, %v2612_v15  ;;  %v2626_v18 = vld [vmem:[%s4506_s2 + $0xe8] sm:$0xf]  ;;  %v2869_v19 = vld [vmem:[%s4506_s2 + $0xf4] sm:$0xf0]  ;;  %v2586_v20 = vld [vmem:[%s4506_s2 + $0xa0] sm:$0xf] }
   0x6   :  { %v3250_v21 = vor.u32 %v2869_v19, %v2626_v18  ;;  %v2860_v22 = vld [vmem:[%s4506_s2 + $0xac] sm:$0xf0]  ;;  %v2858_v23 = vld [vmem:[%s4506_s2 + $0xa4] sm:$0xf]  ;;  %v2588_v24 = vld [vmem:[%s4506_s2 + $0xb0] sm:$0xf0] }
   0x7   :  { %v2859_v25 = vld [vmem:[%s4506_s2 + $0xac] sm:$0xf]  ;;  %v2596_v26 = vld [vmem:[%s4506_s2 + $0xb8] sm:$0xf0]  ;;  %v2610_v27 = vld [vmem:[%s4506_s2 + $0xc8] sm:$0xf]  ;;  %v3272_v28 = vor.u32 %v2860_v22, %v2586_v20  ;;  %v3285_v32 = vor.u32 %v2858_v23, %v2588_v24 }
   0x8   :  { %288 = vmatpush.bf16.msra.mxu0 %v3224_v12  ;;  %313 = vmatpush.bf16.msra.mxu2 %v3250_v21  ;;  %v2865_v29 = vld [vmem:[%s4506_s2 + $0xd4] sm:$0xf0]  ;;  %v2570_v30 = vld [vmem:[%s4506_s2 + $0x80] sm:$0xf]  ;;  %v2856_v31 = vld [vmem:[%s4506_s2 + $0x8c] sm:$0xf0]  ;;  %v3287_v33 = vor.u32 %v2859_v25, %v2596_v26 }
   0x9   :  { %301 = vmatpush.bf16.msra.mxu1 %v3237_v16  ;;  %327 = vmatpush.bf16.msra.mxu3 %v3239_v17  ;;  %v3289_v34 = vor.u32 %v2865_v29, %v2610_v27  ;;  %v2854_v35 = vld [vmem:[%s4506_s2 + $0x84] sm:$0xf]  ;;  %v2572_v36 = vld [vmem:[%s4506_s2 + $0x90] sm:$0xf0]  ;;  %v2855_v37 = vld [vmem:[%s4506_s2 + $0x8c] sm:$0xf]  ;;  %v3311_v41 = vor.u32 %v2856_v31, %v2570_v30 }
   0xa   :  { %v2580_v38 = vld [vmem:[%s4506_s2 + $0x98] sm:$0xf0]  ;;  %v2594_v39 = vld [vmem:[%s4506_s2 + $0xa8] sm:$0xf]  ;;  %v2861_v40 = vld [vmem:[%s4506_s2 + $0xb4] sm:$0xf0]  ;;  %v3323_v45 = vor.u32 %v2854_v35, %v2572_v36 }
   0xb   :  { %v3313_v42 = vor.u32 %v2861_v40, %v2594_v39  ;;  %v2554_v43 = vld [vmem:[%s4506_s2 + $0x60] sm:$0xf]  ;;  %v2852_v44 = vld [vmem:[%s4506_s2 + $0x6c] sm:$0xf0]  ;;  %v3325_v46 = vor.u32 %v2855_v37, %v2580_v38  ;;  %v2850_v47 = vld [vmem:[%s4506_s2 + $0x64] sm:$0xf] }
   0xc   :  { %289 = vmatpush.bf16.msra.mxu0 %v3272_v28  ;;  %314 = vmatpush.bf16.msra.mxu2 %v3289_v34  ;;  %v2578_v48 = vld [vmem:[%s4506_s2 + $0x88] sm:$0xf]  ;;  %v2857_v49 = vld [vmem:[%s4506_s2 + $0x94] sm:$0xf0]  ;;  %v2556_v50 = vld [vmem:[%s4506_s2 + $0x70] sm:$0xf0]  ;;  %v3347_v53 = vor.u32 %v2852_v44, %v2554_v43 }
   0xd   :  { %302 = vmatpush.bf16.msra.mxu1 %v3285_v32  ;;  %328 = vmatpush.bf16.msra.mxu3 %v3287_v33  ;;  %v2851_v51 = vld [vmem:[%s4506_s2 + $0x6c] sm:$0xf]  ;;  %v2564_v52 = vld [vmem:[%s4506_s2 + $0x78] sm:$0xf0]  ;;  %v3349_v54 = vor.u32 %v2857_v49, %v2578_v48  ;;  %v2538_v55 = vld [vmem:[%s4506_s2 + $0x40] sm:$0xf]  ;;  %v3359_v57 = vor.u32 %v2850_v47, %v2556_v50 }
   0xe   :  { %v2848_v56 = vld [vmem:[%s4506_s2 + $0x4c] sm:$0xf0]  ;;  %v3361_v58 = vor.u32 %v2851_v51, %v2564_v52  ;;  %v2846_v59 = vld [vmem:[%s4506_s2 + $0x44] sm:$0xf]  ;;  %v2562_v60 = vld [vmem:[%s4506_s2 + $0x68] sm:$0xf] }
   0xf   :  { %v2853_v61 = vld [vmem:[%s4506_s2 + $0x74] sm:$0xf0]  ;;  %v2540_v62 = vld [vmem:[%s4506_s2 + $0x50] sm:$0xf0]  ;;  %v2847_v63 = vld [vmem:[%s4506_s2 + $0x4c] sm:$0xf]  ;;  %v3383_v1 = vor.u32 %v2848_v56, %v2538_v55 }
  0x10   :  { %290 = vmatpush.bf16.msra.mxu0 %v3311_v41  ;;  %315 = vmatpush.bf16.msra.mxu2 %v3313_v42  ;;  %v2548_v0 = vld [vmem:[%s4506_s2 + $0x58] sm:$0xf0]  ;;  %v3385_v2 = vor.u32 %v2853_v61, %v2562_v60  ;;  %v2522_v4 = vld [vmem:[%s4506_s2 + $0x20] sm:$0xf]  ;;  %v2844_v5 = vld [vmem:[%s4506_s2 + $0x2c] sm:$0xf0]  ;;  %v3395_v6 = vor.u32 %v2846_v59, %v2540_v62 }
  0x11   :  { %303 = vmatpush.bf16.msra.mxu1 %v3323_v45  ;;  %329 = vmatpush.bf16.msra.mxu3 %v3325_v46  ;;  %v3397_v9 = vor.u32 %v2847_v63, %v2548_v0  ;;  %v2842_v10 = vld [vmem:[%s4506_s2 + $0x24] sm:$0xf]  ;;  %v2546_v11 = vld [vmem:[%s4506_s2 + $0x48] sm:$0xf]  ;;  %v2849_v13 = vld [vmem:[%s4506_s2 + $0x54] sm:$0xf0]  ;;  %v3419_v19 = vor.u32 %v2844_v5, %v2522_v4 }
  0x12   :  { %v2524_v14 = vld [vmem:[%s4506_s2 + $0x30] sm:$0xf0]  ;;  %v2843_v15 = vld [vmem:[%s4506_s2 + $0x2c] sm:$0xf]  ;;  %v2532_v18 = vld [vmem:[%s4506_s2 + $0x38] sm:$0xf0]  ;;  %v3421_v20 = vor.u32 %v2849_v13, %v2546_v11 }
  0x13   :  { %v2506_v22 = vld [vmem:[%s4506_s2] sm:$0xf]  ;;  %v2840_v23 = vld [vmem:[%s4506_s2 + $0xc] sm:$0xf0]  ;;  %v2838_v24 = vld [vmem:[%s4506_s2 + $0x4] sm:$0xf]  ;;  %v3434_v25 = vor.u32 %v2842_v10, %v2524_v14  ;;  %v3436_v26 = vor.u32 %v2843_v15, %v2532_v18 }
  0x14   :  { %291 = vmatpush.bf16.msra.mxu0 %v3347_v53  ;;  %316 = vmatpush.bf16.msra.mxu2 %v3349_v54  ;;  %v2508_v27 = vld [vmem:[%s4506_s2 + $0x10] sm:$0xf0]  ;;  %v2530_v29 = vld [vmem:[%s4506_s2 + $0x28] sm:$0xf]  ;;  %v2845_v30 = vld [vmem:[%s4506_s2 + $0x34] sm:$0xf0]  ;;  %v3467_v40 = vor.u32 %v2840_v23, %v2506_v22 }
  0x15   :  { %304 = vmatpush.bf16.msra.mxu1 %v3359_v57  ;;  %330 = vmatpush.bf16.msra.mxu3 %v3361_v58  ;;  %v2839_v31 = vld [vmem:[%s4506_s2 + $0xc] sm:$0xf]  ;;  %v2516_v35 = vld [vmem:[%s4506_s2 + $0x18] sm:$0xf0]  ;;  %v2751_v36 = vld [vmem:[%s4507_s3 + $0xe0] sm:$0xf]  ;;  %v3475_v47 = vor.u32 %v2845_v30, %v2530_v29  ;;  %v3479_v48 = vor.u32 %v2838_v24, %v2508_v27 }
  0x16   :  { %v2900_v37 = vld [vmem:[%s4507_s3 + $0xec] sm:$0xf0]  ;;  %v2898_v38 = vld [vmem:[%s4507_s3 + $0xe4] sm:$0xf]  ;;  %v2753_v39 = vld [vmem:[%s4507_s3 + $0xf0] sm:$0xf0]  ;;  %v3481_v49 = vor.u32 %v2839_v31, %v2516_v35 }
  0x17   :  { %v2899_v43 = vld [vmem:[%s4507_s3 + $0xec] sm:$0xf]  ;;  %v2761_v44 = vld [vmem:[%s4507_s3 + $0xf8] sm:$0xf0]  ;;  %v2514_v50 = vld [vmem:[%s4506_s2 + $0x8] sm:$0xf]  ;;  %v3489_v52 = vor.u32 %v2900_v37, %v2751_v36  ;;  %v3491_v55 = vor.u32 %v2898_v38, %v2753_v39 }
  0x18   :  { %292 = vmatpush.bf16.msra.mxu0 %v3383_v1  ;;  %317 = vmatpush.bf16.msra.mxu2 %v3385_v2  ;;  %v2841_v51 = vld [vmem:[%s4506_s2 + $0x14] sm:$0xf0]  ;;  %v2735_v56 = vld [vmem:[%s4507_s3 + $0xc0] sm:$0xf]  ;;  %v2759_v59 = vld [vmem:[%s4507_s3 + $0xe8] sm:$0xf]  ;;  %v3502_v61 = vor.u32 %v2899_v43, %v2761_v44 }
  0x19   :  { %305 = vmatpush.bf16.msra.mxu1 %v3395_v6  ;;  %331 = vmatpush.bf16.msra.mxu3 %v3397_v9  ;;  %v2901_v60 = vld [vmem:[%s4507_s3 + $0xf4] sm:$0xf0]  ;;  %v2896_v62 = vld [vmem:[%s4507_s3 + $0xcc] sm:$0xf0]  ;;  %v2894_v63 = vld [vmem:[%s4507_s3 + $0xc4] sm:$0xf]  ;;  %v3521_v10 = vor.u32 %v2841_v51, %v2514_v50 }
  0x1a   :  { %4574 = vst [vmem:[#allocation6_spill] sm:$0xff] %v3502_v61  ;;  %v2737_v0 = vld [vmem:[%s4507_s3 + $0xd0] sm:$0xf0]  ;;  %v2895_v4 = vld [vmem:[%s4507_s3 + $0xcc] sm:$0xf]  ;;  %v3525_v11 = vor.u32 %v2901_v60, %v2759_v59  ;;  %v3529_v13 = vor.u32 %v2896_v62, %v2735_v56  ;;  %v4512_v23 = vmov 0.0|0.0  }
  0x1b   :  { %v2745_v5 = vld [vmem:[%s4507_s3 + $0xd8] sm:$0xf0]  ;;  %v3531_v14 = vor.u32 %v2894_v63, %v2737_v0  ;;  %v2719_v15 = vld [vmem:[%s4507_s3 + $0xa0] sm:$0xf]  ;;  %v2743_v18 = vld [vmem:[%s4507_s3 + $0xc8] sm:$0xf] }
  0x1c   :  { %293 = vmatpush.bf16.msra.mxu0 %v3419_v19  ;;  %318 = vmatpush.bf16.msra.mxu2 %v3421_v20  ;;  %4575 = vst [vmem:[#allocation7_spill] sm:$0xff] %v3525_v11  ;;  %v2897_v22 = vld [vmem:[%s4507_s3 + $0xd4] sm:$0xf0]  ;;  %v3544_v24 = vor.u32 %v2895_v4, %v2745_v5  ;;  %v2892_v27 = vld [vmem:[%s4507_s3 + $0xac] sm:$0xf0] }
  0x1d   :  { %306 = vmatpush.bf16.msra.mxu1 %v3434_v25  ;;  %332 = vmatpush.bf16.msra.mxu3 %v3436_v26  ;;  %4576 = vst [vmem:[#allocation8_spill] sm:$0xff] %v3529_v13  ;;  %v2890_v29 = vld [vmem:[%s4507_s3 + $0xa4] sm:$0xf]  ;;  %v2721_v30 = vld [vmem:[%s4507_s3 + $0xb0] sm:$0xf0]  ;;  %v3565_v36 = vor.u32 %v2897_v22, %v2743_v18  ;;  %v3569_v37 = vor.u32 %v2892_v27, %v2719_v15 }
  0x1e   :  { %4577 = vst [vmem:[#allocation9_spill] sm:$0xff] %v3531_v14  ;;  %v2891_v31 = vld [vmem:[%s4507_s3 + $0xac] sm:$0xf]  ;;  %v2729_v35 = vld [vmem:[%s4507_s3 + $0xb8] sm:$0xf0]  ;;  %v3571_v38 = vor.u32 %v2890_v29, %v2721_v30 }
  0x1f   :  { %4578 = vst [vmem:[#allocation10_spill] sm:$0xff] %v3544_v24  ;;  %v2703_v39 = vld [vmem:[%s4507_s3 + $0x80] sm:$0xf]  ;;  %v2727_v43 = vld [vmem:[%s4507_s3 + $0xa8] sm:$0xf]  ;;  %v3583_v50 = vor.u32 %v2891_v31, %v2729_v35 }
  0x20   :  { %294 = vmatpush.bf16.msra.mxu0 %v3467_v40  ;;  %319 = vmatpush.bf16.msra.mxu2 %v3475_v47  ;;  %4579 = vst [vmem:[#allocation11_spill] sm:$0xff] %v3565_v36  ;;  %v2893_v44 = vld [vmem:[%s4507_s3 + $0xb4] sm:$0xf0]  ;;  %v2888_v51 = vld [vmem:[%s4507_s3 + $0x8c] sm:$0xf0] }
  0x21   :  { %307 = vmatpush.bf16.msra.mxu1 %v3479_v48  ;;  %333 = vmatpush.bf16.msra.mxu3 %v3481_v49  ;;  %4580 = vst [vmem:[#allocation12_spill] sm:$0xff] %v3569_v37  ;;  %v2886_v56 = vld [vmem:[%s4507_s3 + $0x84] sm:$0xf]  ;;  %v2705_v59 = vld [vmem:[%s4507_s3 + $0x90] sm:$0xf0]  ;;  %v3602_v63 = vor.u32 %v2893_v44, %v2727_v43  ;;  %v3606_v0 = vor.u32 %v2888_v51, %v2703_v39 }
  0x22   :  { %4581 = vst [vmem:[#allocation13_spill] sm:$0xff] %v3571_v38  ;;  %v2887_v60 = vld [vmem:[%s4507_s3 + $0x8c] sm:$0xf]  ;;  %v2713_v62 = vld [vmem:[%s4507_s3 + $0x98] sm:$0xf0]  ;;  %v3608_v4 = vor.u32 %v2886_v56, %v2705_v59 }
  0x23   :  { %295 = vmatmul.bf16.vlgmr.msra.gmra.mxu0 %v4512_v23  ;;  %4582 = vst [vmem:[#allocation14_spill] sm:$0xff] %v3583_v50  ;;  %v2687_v5 = vld [vmem:[%s4507_s3 + $0x60] sm:$0xf]  ;;  %v2711_v15 = vld [vmem:[%s4507_s3 + $0x88] sm:$0xf]  ;;  %v3620_v22 = vor.u32 %v2887_v60, %v2713_v62 }
  0x24   :  { %574 = vmatpush.bf16.msrb.mxu0 %v3489_v52  ;;  %308 = vmatmul.bf16.vlgmr.msra.gmra.mxu1 %v4512_v23  ;;  %4583 = vst [vmem:[#allocation15_spill] sm:$0xff] %v3602_v63  ;;  %v2889_v18 = vld [vmem:[%s4507_s3 + $0x94] sm:$0xf0]  ;;  %v2884_v27 = vld [vmem:[%s4507_s3 + $0x6c] sm:$0xf0] }
  0x25   :  { %587 = vmatpush.bf16.msrb.mxu1 %v3491_v55  ;;  %613 = vmatpush.bf16.msrb.mxu3 %v3502_v61  ;;  %4584 = vst [vmem:[#allocation16_spill] sm:$0xff] %v3606_v0  ;;  %v2882_v29 = vld [vmem:[%s4507_s3 + $0x64] sm:$0xf]  ;;  %v2689_v30 = vld [vmem:[%s4507_s3 + $0x70] sm:$0xf0]  ;;  %v3638_v39 = vor.u32 %v2889_v18, %v2711_v15  ;;  %v3642_v43 = vor.u32 %v2884_v27, %v2687_v5 }
  0x26   :  { %320 = vmatpush.bf16.msra.mxu2 %v3521_v10  ;;  %334 = vmatmul.bf16.vlgmr.msra.gmra.mxu3 %v4512_v23  ;;  %4585 = vst [vmem:[#allocation17_spill] sm:$0xff] %v3608_v4  ;;  %v2883_v31 = vld [vmem:[%s4507_s3 + $0x6c] sm:$0xf]  ;;  %v2697_v35 = vld [vmem:[%s4507_s3 + $0x78] sm:$0xf0]  ;;  %v3644_v44 = vor.u32 %v2882_v29, %v2689_v30 }
  0x27   :  { %4586 = vst [vmem:[#allocation18_spill] sm:$0xff] %v3620_v22  ;;  %v2671_v51 = vld [vmem:[%s4507_s3 + $0x40] sm:$0xf]  ;;  %v2695_v56 = vld [vmem:[%s4507_s3 + $0x68] sm:$0xf]  ;;  %v3656_v60 = vor.u32 %v2883_v31, %v2697_v35 }
  0x28   :  { %575 = vmatpush.bf16.msrb.mxu0 %v3529_v13  ;;  %4587 = vst [vmem:[#allocation19_spill] sm:$0xff] %v3638_v39  ;;  %v2885_v59 = vld [vmem:[%s4507_s3 + $0x74] sm:$0xf0]  ;;  %v2880_v62 = vld [vmem:[%s4507_s3 + $0x4c] sm:$0xf0] }
  0x29   :  { %588 = vmatpush.bf16.msrb.mxu1 %v3531_v14  ;;  %614 = vmatpush.bf16.msrb.mxu3 %v3544_v24  ;;  %4588 = vst [vmem:[#allocation20_spill] sm:$0xff] %v3642_v43  ;;  %v2878_v5 = vld [vmem:[%s4507_s3 + $0x44] sm:$0xf]  ;;  %v2673_v15 = vld [vmem:[%s4507_s3 + $0x50] sm:$0xf0]  ;;  %v3674_v29 = vor.u32 %v2885_v59, %v2695_v56  ;;  %v3678_v30 = vor.u32 %v2880_v62, %v2671_v51 }
  0x2a   :  { %600 = vmatpush.bf16.msrb.mxu2 %v3525_v11  ;;  %4589 = vst [vmem:[#allocation21_spill] sm:$0xff] %v3644_v44  ;;  %v2879_v18 = vld [vmem:[%s4507_s3 + $0x4c] sm:$0xf]  ;;  %v2681_v27 = vld [vmem:[%s4507_s3 + $0x58] sm:$0xf0]  ;;  %v3680_v31 = vor.u32 %v2878_v5, %v2673_v15 }
  0x2b   :  { %321 = vmatmul.bf16.vlgmr.msra.gmra.mxu2 %v4512_v23  ;;  %4590 = vst [vmem:[#allocation22_spill] sm:$0xff] %v3656_v60  ;;  %v2655_v35 = vld [vmem:[%s4507_s3 + $0x20] sm:$0xf]  ;;  %v2679_v23 = vld [vmem:[%s4507_s3 + $0x48] sm:$0xf]  ;;  %v3692_v59 = vor.u32 %v2879_v18, %v2681_v27 }
  0x2c   :  { %576 = vmatpush.bf16.msrb.mxu0 %v3569_v37  ;;  %4591 = vst [vmem:[#allocation23_spill] sm:$0xff] %v3674_v29  ;;  %v2881_v56 = vld [vmem:[%s4507_s3 + $0x54] sm:$0xf0]  ;;  %v2876_v51 = vld [vmem:[%s4507_s3 + $0x2c] sm:$0xf0] }
  0x2d   :  { %589 = vmatpush.bf16.msrb.mxu1 %v3571_v38  ;;  %615 = vmatpush.bf16.msrb.mxu3 %v3583_v50  ;;  %4592 = vst [vmem:[#allocation24_spill] sm:$0xff] %v3678_v30  ;;  %v2874_v62 = vld [vmem:[%s4507_s3 + $0x24] sm:$0xf]  ;;  %v2657_v5 = vld [vmem:[%s4507_s3 + $0x30] sm:$0xf0]  ;;  %v3710_v27 = vor.u32 %v2881_v56, %v2679_v23 }
  0x2e   :  { %601 = vmatpush.bf16.msrb.mxu2 %v3565_v36  ;;  %4593 = vst [vmem:[#allocation25_spill] sm:$0xff] %v3680_v31  ;;  %v2875_v15 = vld [vmem:[%s4507_s3 + $0x2c] sm:$0xf]  ;;  %v2665_v18 = vld [vmem:[%s4507_s3 + $0x38] sm:$0xf0] }
  0x2f   :  { %4594 = vst [vmem:[#allocation26_spill] sm:$0xff] %v3692_v59  ;;  %v2877_v23 = vld [vmem:[%s4507_s3 + $0x34] sm:$0xf0]  ;;  %v3728_v56 = vor.u32 %v2875_v15, %v2665_v18  ;;  %v2649_v15 = vld [vmem:[%s4507_s3 + $0x18] sm:$0xf0] }
  0x30   :  { %577 = vmatpush.bf16.msrb.mxu0 %v3606_v0  ;;  %4595 = vst [vmem:[#allocation27_spill] sm:$0xff] %v3710_v27 }
  0x31   :  { %590 = vmatpush.bf16.msrb.mxu1 %v3608_v4  ;;  %616 = vmatpush.bf16.msrb.mxu3 %v3620_v22  ;;  %4598 = vst [vmem:[#allocation30_spill] sm:$0xff] %v3728_v56 }
  0x32   :  { %602 = vmatpush.bf16.msrb.mxu2 %v3602_v63 }
  0x34   :  { %578 = vmatpush.bf16.msrb.mxu0 %v3642_v43  ;;  %v2639_v43 = vld [vmem:[%s4507_s3] sm:$0xf] }
  0x35   :  { %591 = vmatpush.bf16.msrb.mxu1 %v3644_v44  ;;  %617 = vmatpush.bf16.msrb.mxu3 %v3656_v60  ;;  %v3714_v60 = vor.u32 %v2876_v51, %v2655_v35  ;;  %v3716_v44 = vor.u32 %v2874_v62, %v2657_v5  ;;  %v2872_v35 = vld [vmem:[%s4507_s3 + $0xc] sm:$0xf0]  ;;  %v2870_v51 = vld [vmem:[%s4507_s3 + $0x4] sm:$0xf]  ;;  %v2641_v62 = vld [vmem:[%s4507_s3 + $0x10] sm:$0xf0] }
  0x36   :  { %603 = vmatpush.bf16.msrb.mxu2 %v3638_v39  ;;  %v2663_v39 = vld [vmem:[%s4507_s3 + $0x28] sm:$0xf]  ;;  %v2871_v5 = vld [vmem:[%s4507_s3 + $0xc] sm:$0xf] }
  0x37   :  { %4596 = vst [vmem:[#allocation28_spill] sm:$0xff] %v3714_v60  ;;  %v3746_v18 = vor.u32 %v2877_v23, %v2663_v39  ;;  %v2873_v39 = vld [vmem:[%s4507_s3 + $0x14] sm:$0xf0]  ;;  %v4604_v23 = vmov 0.0|0.0  }
  0x38   :  { %579 = vmatpush.bf16.msrb.mxu0 %v3678_v30  ;;  %4597 = vst [vmem:[#allocation29_spill] sm:$0xff] %v3716_v44  ;;  %v3755_v30 = vor.u32 %v2871_v5, %v2649_v15  ;;  %v4609_v5 = vld [vmem:[#allocation23_spill] sm:$0xff]  ;;  %v4610_v15 = vld [vmem:[#allocation24_spill] sm:$0xff] }
  0x39   :  { %592 = vmatpush.bf16.msrb.mxu1 %v3680_v31  ;;  %618 = vmatpush.bf16.msrb.mxu3 %v3692_v59  ;;  %4599 = vst [vmem:[#allocation31_spill] sm:$0xff] %v3746_v18  ;;  %v3750_v59 = vor.u32 %v2872_v35, %v2639_v43  ;;  %v3752_v31 = vor.u32 %v2870_v51, %v2641_v62  ;;  %v4606_v35 = vld [vmem:[#allocation20_spill] sm:$0xff]  ;;  %v4607_v51 = vld [vmem:[#allocation21_spill] sm:$0xff]  ;;  %v4608_v62 = vld [vmem:[#allocation22_spill] sm:$0xff] }
  0x3a   :  { %604 = vmatpush.bf16.msrb.mxu2 %v3674_v29  ;;  %4602 = vst [vmem:[#allocation34_spill] sm:$0xff] %v3755_v30  ;;  %v2647_v29 = vld [vmem:[%s4507_s3 + $0x8] sm:$0xf] }
  0x3b   :  { %4600 = vst [vmem:[#allocation32_spill] sm:$0xff] %v3750_v59  ;;  %v3766_v43 = vor.u32 %v2873_v39, %v2647_v29  ;;  %v4605_v29 = vld [vmem:[#allocation19_spill] sm:$0xff]  ;;  %v4611_v39 = vld [vmem:[#allocation25_spill] sm:$0xff] }
  0x3c   :  { %580 = vmatpush.bf16.msrb.mxu0 %v3714_v60  ;;  %4601 = vst [vmem:[#allocation33_spill] sm:$0xff] %v3752_v31 }
  0x3d   :  { %593 = vmatpush.bf16.msrb.mxu1 %v3716_v44  ;;  %619 = vmatpush.bf16.msrb.mxu3 %v3728_v56  ;;  %4603 = vst [vmem:[#allocation35_spill] sm:$0xff] %v3766_v43 }
  0x3e   :  { %605 = vmatpush.bf16.msrb.mxu2 %v3710_v27 }
  0x40   :  { %581 = vmatpush.bf16.msrb.mxu0 %v3750_v59 }
  0x41   :  { %594 = vmatpush.bf16.msrb.mxu1 %v3752_v31  ;;  %620 = vmatpush.bf16.msrb.mxu3 %v3755_v30 }
  0x42   :  { %606 = vmatpush.bf16.msrb.mxu2 %v3746_v18 }
  0x43   :  { %582 = vmatmul.bf16.vlgmr.msrb.gmra.mxu0 %v4604_v23 }
  0x44   :  { %709 = vmatpush.bf16.msra.mxu0 %v3199_v3  ;;  %595 = vmatmul.bf16.vlgmr.msrb.gmra.mxu1 %v4604_v23 }
  0x45   :  { %722 = vmatpush.bf16.msra.mxu1 %v3210_v7  ;;  %748 = vmatpush.bf16.msra.mxu3 %v3212_v8 }
  0x46   :  { %621 = vmatmul.bf16.vlgmr.msrb.gmra.mxu3 %v4604_v23  ;;  %607 = vmatpush.bf16.msrb.mxu2 %v3766_v43 }
  0x48   :  { %710 = vmatpush.bf16.msra.mxu0 %v3224_v12 }
  0x49   :  { %723 = vmatpush.bf16.msra.mxu1 %v3237_v16  ;;  %749 = vmatpush.bf16.msra.mxu3 %v3239_v17 }
  0x4a   :  { %735 = vmatpush.bf16.msra.mxu2 %v3250_v21 }
  0x4b   :  { %608 = vmatmul.bf16.vlgmr.msrb.gmra.mxu2 %v4604_v23  ;;  %v4612_v23 = vld [vmem:[#allocation26_spill] sm:$0xff] }
  0x4c   :  { %711 = vmatpush.bf16.msra.mxu0 %v3272_v28 }
  0x4d   :  { %724 = vmatpush.bf16.msra.mxu1 %v3285_v32  ;;  %750 = vmatpush.bf16.msra.mxu3 %v3287_v33 }
  0x4e   :  { %736 = vmatpush.bf16.msra.mxu2 %v3289_v34 }
  0x50   :  { %712 = vmatpush.bf16.msra.mxu0 %v3311_v41 }
  0x51   :  { %725 = vmatpush.bf16.msra.mxu1 %v3323_v45  ;;  %751 = vmatpush.bf16.msra.mxu3 %v3325_v46 }
  0x52   :  { %737 = vmatpush.bf16.msra.mxu2 %v3313_v42 }
  0x54   :  { %713 = vmatpush.bf16.msra.mxu0 %v3347_v53 }
  0x55   :  { %726 = vmatpush.bf16.msra.mxu1 %v3359_v57  ;;  %752 = vmatpush.bf16.msra.mxu3 %v3361_v58 }
  0x56   :  { %738 = vmatpush.bf16.msra.mxu2 %v3349_v54 }
  0x58   :  { %714 = vmatpush.bf16.msra.mxu0 %v3383_v1 }
  0x59   :  { %727 = vmatpush.bf16.msra.mxu1 %v3395_v6  ;;  %753 = vmatpush.bf16.msra.mxu3 %v3397_v9 }
  0x5a   :  { %739 = vmatpush.bf16.msra.mxu2 %v3385_v2 }
  0x5c   :  { %715 = vmatpush.bf16.msra.mxu0 %v3419_v19 }
  0x5d   :  { %728 = vmatpush.bf16.msra.mxu1 %v3434_v25  ;;  %754 = vmatpush.bf16.msra.mxu3 %v3436_v26 }
  0x5e   :  { %740 = vmatpush.bf16.msra.mxu2 %v3421_v20 }
  0x60   :  { %716 = vmatpush.bf16.msra.mxu0 %v3467_v40 }
  0x61   :  { %729 = vmatpush.bf16.msra.mxu1 %v3479_v48  ;;  %755 = vmatpush.bf16.msra.mxu3 %v3481_v49 }
  0x62   :  { %741 = vmatpush.bf16.msra.mxu2 %v3475_v47 }
  0x64   :  { %836 = vmatpush.bf16.msrb.mxu0 %v3489_v52 }
  0x65   :  { %849 = vmatpush.bf16.msrb.mxu1 %v3491_v55  ;;  %875 = vmatpush.bf16.msrb.mxu3 %v3502_v61 }
  0x66   :  { %742 = vmatpush.bf16.msra.mxu2 %v3521_v10 }
  0x68   :  { %837 = vmatpush.bf16.msrb.mxu0 %v3529_v13 }
  0x69   :  { %850 = vmatpush.bf16.msrb.mxu1 %v3531_v14  ;;  %876 = vmatpush.bf16.msrb.mxu3 %v3544_v24 }
  0x6a   :  { %862 = vmatpush.bf16.msrb.mxu2 %v3525_v11 }
  0x6c   :  { %838 = vmatpush.bf16.msrb.mxu0 %v3569_v37 }
  0x6d   :  { %851 = vmatpush.bf16.msrb.mxu1 %v3571_v38  ;;  %877 = vmatpush.bf16.msrb.mxu3 %v3583_v50 }
  0x6e   :  { %863 = vmatpush.bf16.msrb.mxu2 %v3565_v36 }
  0x70   :  { %839 = vmatpush.bf16.msrb.mxu0 %v3606_v0 }
  0x71   :  { %852 = vmatpush.bf16.msrb.mxu1 %v3608_v4  ;;  %878 = vmatpush.bf16.msrb.mxu3 %v3620_v22 }
  0x72   :  { %864 = vmatpush.bf16.msrb.mxu2 %v3602_v63 }
  0x74   :  { %840 = vmatpush.bf16.msrb.mxu0 %v4606_v35 }
  0x75   :  { %853 = vmatpush.bf16.msrb.mxu1 %v4607_v51  ;;  %879 = vmatpush.bf16.msrb.mxu3 %v4608_v62 }
  0x76   :  { %865 = vmatpush.bf16.msrb.mxu2 %v4605_v29 }
  0x78   :  { %841 = vmatpush.bf16.msrb.mxu0 %v4610_v15 }
  0x79   :  { %854 = vmatpush.bf16.msrb.mxu1 %v4611_v39  ;;  %880 = vmatpush.bf16.msrb.mxu3 %v4612_v23  ;;  %v120_v23 = vld [vmem:[%s4508_s0] sm:$0xff] }
  0x7a   :  { %866 = vmatpush.bf16.msrb.mxu2 %v4609_v5 }
  0x7c   :  { %842 = vmatpush.bf16.msrb.mxu0 %v3714_v60  ;;  %v123_v60 = vunpack.c.h.bf16 %v120_v23 }
  0x7d   :  { %855 = vmatpush.bf16.msrb.mxu1 %v3716_v44  ;;  %881 = vmatpush.bf16.msrb.mxu3 %v3728_v56 }
  0x7e   :  { %867 = vmatpush.bf16.msrb.mxu2 %v3710_v27  ;;  %v122_v27 = vunpack.c.l.bf16 %v120_v23 }
  0x80   :  { %843 = vmatpush.bf16.msrb.mxu0 %v3750_v59  ;;  %v121_v59 = vld [vmem:[%s4508_s0 + $0x8] sm:$0xff] }
  0x81   :  { %856 = vmatpush.bf16.msrb.mxu1 %v3752_v31  ;;  %882 = vmatpush.bf16.msrb.mxu3 %v3755_v30  ;;  %v125_v30 = vunpack.c.h.bf16 %v121_v59 }
  0x82   :  { %868 = vmatpush.bf16.msrb.mxu2 %v3746_v18 }
  0x86   :  { %869 = vmatpush.bf16.msrb.mxu2 %v3766_v43 }
  0xa0   :  { %v296_v39 = vpop.f32.mrf.mxu0 }
  0xa1   :  { %v339_v44 = vadd.f32 %v296_v39, %v122_v27  ;;  %v309_v15 = vpop.f32.mrf.mxu1 }
  0xa2   :  { %v340_v56 = vadd.f32 %v309_v15, %v123_v60  ;;  %v124_v60 = vunpack.c.l.bf16 %v121_v59 }
  0xa3   :  { %v2632_v18 = vmul.f32 -1.442695, %v339_v44 }
  0xa4   :  { %v2633_v31 = vmul.f32 -1.442695, %v340_v56 }
  0xa5   :  { %2903 = vpow2.f32 %v2632_v18 }
  0xa6   :  { %2905 = vpow2.f32 %v2633_v31 }
  0xa8   :  { %v298_v62 = vpop.f32.mrf.mxu0 }
  0xa9   :  { %v335_v43 = vpop.f32.mrf.mxu3  ;;  %v311_v51 = vpop.f32.mrf.mxu1 }
  0xaa   :  { %v342_v5 = vadd.f32 %v335_v43, %v125_v30 }
  0xab   :  { %v2904_v22 = vpop.eup %2903 }
  0xac   :  { %v2634_v23 = vmul.f32 -1.442695, %v342_v5  ;;  %v2906_v29 = vpop.eup %2905  ;;  %v346_v27 = vadd.f32 1.0, %v2904_v22 }
  0xad   :  { %v365_v39 = vadd.f32 1.0, %v2906_v29 }
  0xae   :  { %v322_v35 = vpop.f32.mrf.mxu2  ;;  %2907 = vpow2.f32 %v2634_v23  ;;  %vm352_vm0 = vweird.f32 %v346_v27  ;;  %v358_v22 = vand.u32 2147483648, %v346_v27  ;;  %v356_v59 = vand.u32 2147483647, %v346_v27  ;;  %v2635_v23 = vld [vmem:[%s4509_s1 + $0x70] sm:$0xff] }
  0xaf   :  { %2909 = vrcp.f32 %v346_v27  ;;  %v341_v44 = vadd.f32 %v322_v35, %v124_v60  ;;  %v377_v51 = vand.u32 2147483648, %v365_v39  ;;  %vm371_vm2 = vweird.f32 %v365_v39 }
  0xb0   :  { %2911 = vrcp.f32 %v365_v39  ;;  %v375_v35 = vand.u32 2147483647, %v365_v39  ;;  %vm357_vm5 = vcmp.eq.f32.partialorder %v356_v59, 8.507059e+37  ;;  %v410_v63 = vunpack.c.h.bf16 %v2635_v23 }
  0xb1   :  { %v337_v15 = vpop.f32.mrf.mxu3  ;;  %2913 = vtanh.f32 %v341_v44 }
  0xb2   :  { %vm376_vm7 = vcmp.eq.f32.partialorder %v375_v35, 8.507059e+37  ;;  %v2636_v35 = vld [vmem:[%s4509_s1 + $0x78] sm:$0xff] }
  0xb4   :  { %v2908_v18 = vpop.eup %2907 }
  0xb5   :  { %v2910_v4 = vpop.eup %2909  ;;  %v3844_v31 = vadd.f32 1.0, %v2908_v18 }
  0xb6   :  { %v324_v56 = vpop.f32.mrf.mxu2  ;;  %v2912_v62 = vpop.eup %2911  ;;  %v348_v30 = vmul.f32 %v2910_v4, %v346_v27  ;;  %vm353_vm1 = vweird.f32 %v2910_v4 }
  0xb7   :  { %v367_v43 = vmul.f32 %v2912_v62, %v365_v39  ;;  %2915 = vrcp.f32 %v3844_v31  ;;  %vm372_vm3 = vweird.f32 %v2912_v62  ;;  %vm3850_vm4 = vmor %vm352_vm0, %vm353_vm1  ;;  %v359_v56 = vor.u32 1.1754944e-38, %v358_v22  ;;  %v2914_v18 = vpop.eup %2913 }
  0xb8   :  { %v349_v29 = vsub.f32 1.0, %v348_v30  ;;  %v378_v30 = vor.u32 1.1754944e-38, %v377_v51  ;;  %vm3854_vm6 = vmor %vm371_vm2, %vm372_vm3  ;;  %v409_v39 = vunpack.c.l.bf16 %v2635_v23  ;;  %vm391_vm8 = vweird.f32 %v3844_v31 }
  0xb9   :  { %v368_v5 = vsub.f32 1.0, %v367_v43  ;;  %v397_v23 = vand.u32 2147483648, %v3844_v31 }
  0xba   :  { %v350_v60 = vmul.f32 %v2910_v4, %v349_v29 }
  0xbb   :  { %v369_v15 = vmul.f32 %v2912_v62, %v368_v5 }
  0xbc   :  { %v351_v0 = vadd.f32 %v2910_v4, %v350_v60 }
  0xbd   :  { %v2916_v43 = vpop.eup %2915  ;;  %v370_v50 = vadd.f32 %v2912_v62, %v369_v15 }
  0xbe   :  { %v387_v29 = vmul.f32 %v2916_v43, %v3844_v31  ;;  %v355_v5 = vsel %vm3850_vm4, %v2910_v4, %v351_v0  ;;  %vm392_vm9 = vweird.f32 %v2916_v43 }
  0xbf   :  { %v360_v22 = vsel %vm357_vm5, %v359_v56, %v355_v5  ;;  %v374_v51 = vsel %vm3854_vm6, %v2912_v62, %v370_v50  ;;  %v395_v56 = vand.u32 2147483647, %v3844_v31  ;;  %vm3872_vm10 = vmor %vm391_vm8, %vm392_vm9 }
  0xc0   :  { %v583_v59 = vpop.f32.mrf.mxu0  ;;  %v388_v38 = vsub.f32 1.0, %v387_v29  ;;  %v379_v37 = vsel %vm376_vm7, %v378_v30, %v374_v51  ;;  %v402_v24 = vmul.f32 %v2914_v18, %v360_v22  ;;  %v412_v30 = vunpack.c.h.bf16 %v2636_v35 }
  0xc1   :  { %v596_v60 = vpop.f32.mrf.mxu1  ;;  %v626_v15 = vadd.f32 %v583_v59, %v409_v39  ;;  %v401_v0 = vmul.f32 0.0, %v379_v37  ;;  %v398_v39 = vor.u32 1.1754944e-38, %v397_v23  ;;  %vm396_vm11 = vcmp.eq.f32.partialorder %v395_v56, 8.507059e+37 }
  0xc2   :  { %v627_v4 = vadd.f32 %v596_v60, %v410_v63  ;;  %v389_v44 = vmul.f32 %v2916_v43, %v388_v38 }
  0xc3   :  { %v2765_v5 = vmul.f32 -1.442695, %v626_v15  ;;  %v3876_v62 = vadd.f32 %v402_v24, %v401_v0 }
  0xc4   :  { %v2766_v18 = vmul.f32 -1.442695, %v627_v4  ;;  %v390_v27 = vadd.f32 %v2916_v43, %v389_v44  ;;  %v411_v44 = vunpack.c.l.bf16 %v2636_v35 }
  0xc5   :  { %2917 = vpow2.f32 %v2765_v5 }
  0xc6   :  { %2919 = vtanh.f32 %v3876_v62  ;;  %v394_v38 = vsel %vm3872_vm10, %v2916_v43, %v390_v27 }
  0xc7   :  { %2921 = vpow2.f32 %v2766_v18  ;;  %v399_v24 = vsel %vm396_vm11, %v398_v39, %v394_v38 }
  0xc8   :  { %v585_v31 = vpop.f32.mrf.mxu0 }
  0xc9   :  { %v622_v37 = vpop.f32.mrf.mxu3  ;;  %v598_v29 = vpop.f32.mrf.mxu1 }
  0xca   :  { %v629_v63 = vadd.f32 %v622_v37, %v412_v30 }
  0xcb   :  { %v2918_v59 = vpop.eup %2917 }
  0xcc   :  { %v2767_v22 = vmul.f32 -1.442695, %v629_v63  ;;  %v2920_v60 = vpop.eup %2919  ;;  %v633_v15 = vadd.f32 1.0, %v2918_v59 }
  0xcd   :  { %v2922_v0 = vpop.eup %2921  ;;  %v405_v23 = vmul.f32 %v2920_v60, %v399_v24 }
  0xce   :  { %v609_v51 = vpop.f32.mrf.mxu2  ;;  %2923 = vpow2.f32 %v2767_v22  ;;  %v652_v4 = vadd.f32 1.0, %v2922_v0  ;;  %v645_v63 = vand.u32 2147483648, %v633_v15  ;;  %v643_v22 = vand.u32 2147483647, %v633_v15 }
  0xcf   :  { %2925 = vrcp.f32 %v633_v15  ;;  %v696_v18 = vpack.c.bf16 %v405_v23, %v405_v23  ;;  %v628_v56 = vadd.f32 %v609_v51, %v411_v44  ;;  %vm639_vm13 = vweird.f32 %v633_v15 }
  0xd0   :  { %2927 = vrcp.f32 %v652_v4  ;;  %v664_v51 = vand.u32 2147483648, %v652_v4  ;;  %v662_v0 = vand.u32 2147483647, %v652_v4  ;;  %vm658_vm0 = vweird.f32 %v652_v4 }
  0xd1   :  { %v624_v5 = vpop.f32.mrf.mxu3  ;;  %717 = vmatmul.bf16.vlgmr.msra.gmra.mxu0 %v696_v18  ;;  %730 = vmatmul.bf16.vlgmr.msra.gmra.mxu1 %v696_v18  ;;  %697 = vst [vmem:[%s4510_s4] sm:$0xf] %v696_v18  ;;  %vm644_vm1 = vcmp.eq.f32.partialorder %v643_v22, 8.507059e+37 }
  0xd2   :  { %743 = vmatmul.bf16.vlgmr.msra.gmra.mxu2 %v696_v18  ;;  %756 = vmatmul.bf16.vlgmr.msra.gmra.mxu3 %v696_v18  ;;  %v646_v5 = vor.u32 1.1754944e-38, %v645_v63  ;;  %vm663_vm3 = vcmp.eq.f32.partialorder %v662_v0, 8.507059e+37 }
  0xd3   :  { %963 = vmatpush.bf16.msra.mxu0 %v3199_v3  ;;  %976 = vmatpush.bf16.msra.mxu1 %v3210_v7 }
  0xd4   :  { %v2924_v43 = vpop.eup %2923  ;;  %989 = vmatpush.bf16.msra.mxu2 %v3250_v21  ;;  %1002 = vmatpush.bf16.msra.mxu3 %v3212_v8 }
  0xd5   :  { %v3884_v30 = vadd.f32 1.0, %v2924_v43  ;;  %v2926_v35 = vpop.eup %2925  ;;  %v665_v43 = vor.u32 1.1754944e-38, %v664_v51 }
  0xd6   :  { %v611_v50 = vpop.f32.mrf.mxu2  ;;  %v635_v27 = vmul.f32 %v2926_v35, %v633_v15  ;;  %v2928_v39 = vpop.eup %2927  ;;  %vm640_vm12 = vweird.f32 %v2926_v35 }
  0xd7   :  { %2929 = vrcp.f32 %v3884_v30  ;;  %v654_v38 = vmul.f32 %v2928_v39, %v652_v4  ;;  %964 = vmatpush.bf16.msra.mxu0 %v3224_v12  ;;  %977 = vmatpush.bf16.msra.mxu1 %v3237_v16  ;;  %vm659_vm14 = vweird.f32 %v2928_v39  ;;  %vm641_vm15 = vmor %vm639_vm13, %vm640_vm12  ;;  %vm678_vm5 = vweird.f32 %v3884_v30 }
  0xd8   :  { %2931 = vtanh.f32 %v628_v56  ;;  %v636_v37 = vsub.f32 1.0, %v635_v27  ;;  %990 = vmatpush.bf16.msra.mxu2 %v3289_v34  ;;  %1003 = vmatpush.bf16.msra.mxu3 %v3239_v17  ;;  %vm660_vm2 = vmor %vm658_vm0, %vm659_vm14 }
  0xd9   :  { %v655_v31 = vsub.f32 1.0, %v654_v38 }
  0xda   :  { %v637_v29 = vmul.f32 %v2926_v35, %v636_v37 }
  0xdb   :  { %v656_v59 = vmul.f32 %v2928_v39, %v655_v31  ;;  %965 = vmatpush.bf16.msra.mxu0 %v3272_v28  ;;  %978 = vmatpush.bf16.msra.mxu1 %v3285_v32  ;;  %v684_v31 = vand.u32 2147483648, %v3884_v30 }
  0xdc   :  { %v638_v60 = vadd.f32 %v2926_v35, %v637_v29  ;;  %991 = vmatpush.bf16.msra.mxu2 %v3313_v42  ;;  %1004 = vmatpush.bf16.msra.mxu3 %v3287_v33  ;;  %v682_v29 = vand.u32 2147483647, %v3884_v30 }
  0xdd   :  { %v2930_v24 = vpop.eup %2929  ;;  %v657_v18 = vadd.f32 %v2928_v39, %v656_v59  ;;  %v685_v51 = vor.u32 1.1754944e-38, %v684_v31  ;;  %v4634_v31 = vld [vmem:[#allocation27_spill] sm:$0xff] }
  0xde   :  { %v2932_v23 = vpop.eup %2931  ;;  %v674_v44 = vmul.f32 %v2930_v24, %v3884_v30  ;;  %v642_v15 = vsel %vm641_vm15, %v2926_v35, %v638_v60  ;;  %vm679_vm4 = vweird.f32 %v2930_v24  ;;  %vm683_vm7 = vcmp.eq.f32.partialorder %v682_v29, 8.507059e+37  ;;  %v4635_v29 = vld [vmem:[#allocation26_spill] sm:$0xff] }
  0xdf   :  { %v647_v50 = vsel %vm644_vm1, %v646_v5, %v642_v15  ;;  %v661_v27 = vsel %vm660_vm2, %v2928_v39, %v657_v18  ;;  %966 = vmatpush.bf16.msra.mxu0 %v3311_v41  ;;  %979 = vmatpush.bf16.msra.mxu1 %v3323_v45  ;;  %vm680_vm6 = vmor %vm678_vm5, %vm679_vm4  ;;  %v4622_v5 = vld [vmem:[#allocation15_spill] sm:$0xff]  ;;  %v4623_v15 = vld [vmem:[#allocation14_spill] sm:$0xff] }
  0xe0   :  { %v675_v56 = vsub.f32 1.0, %v674_v44  ;;  %v689_v37 = vmul.f32 %v2932_v23, %v647_v50  ;;  %v666_v63 = vsel %vm663_vm3, %v665_v43, %v661_v27  ;;  %992 = vmatpush.bf16.msra.mxu2 %v3349_v54  ;;  %1005 = vmatpush.bf16.msra.mxu3 %v3325_v46  ;;  %v4620_v23 = vld [vmem:[#allocation12_spill] sm:$0xff]  ;;  %v4621_v44 = vld [vmem:[#allocation13_spill] sm:$0xff]  ;;  %v4627_v50 = vld [vmem:[#allocation18_spill] sm:$0xff] }
  0xe1   :  { %v688_v4 = vmul.f32 0.0, %v666_v63  ;;  %v4624_v18 = vld [vmem:[#allocation16_spill] sm:$0xff]  ;;  %v4625_v43 = vld [vmem:[#allocation17_spill] sm:$0xff]  ;;  %v4631_v63 = vld [vmem:[#allocation22_spill] sm:$0xff] }
  0xe2   :  { %v676_v38 = vmul.f32 %v2930_v24, %v675_v56  ;;  %v4626_v56 = vld [vmem:[#allocation19_spill] sm:$0xff]  ;;  %v4628_v27 = vld [vmem:[#allocation20_spill] sm:$0xff] }
  0xe3   :  { %v3905_v35 = vadd.f32 %v689_v37, %v688_v4  ;;  %967 = vmatpush.bf16.msra.mxu0 %v3347_v53  ;;  %980 = vmatpush.bf16.msra.mxu1 %v3359_v57  ;;  %v4629_v37 = vld [vmem:[#allocation21_spill] sm:$0xff]  ;;  %v4632_v4 = vld [vmem:[#allocation24_spill] sm:$0xff] }
  0xe4   :  { %v677_v39 = vadd.f32 %v2930_v24, %v676_v38  ;;  %993 = vmatpush.bf16.msra.mxu2 %v3385_v2  ;;  %1006 = vmatpush.bf16.msra.mxu3 %v3361_v58  ;;  %v4630_v38 = vld [vmem:[#allocation23_spill] sm:$0xff] }
  0xe5   :  { %2933 = vtanh.f32 %v3905_v35 }
  0xe6   :  { %v681_v22 = vsel %vm680_vm6, %v2930_v24, %v677_v39  ;;  %v4619_v24 = vld [vmem:[#allocation10_spill] sm:$0xff]  ;;  %v4633_v39 = vld [vmem:[#allocation25_spill] sm:$0xff] }
  0xe7   :  { %968 = vmatpush.bf16.msra.mxu0 %v3383_v1  ;;  %981 = vmatpush.bf16.msra.mxu1 %v3395_v6  ;;  %v686_v60 = vsel %vm683_vm7, %v685_v51, %v681_v22  ;;  %v4636_v22 = vld [vmem:[#allocation28_spill] sm:$0xff]  ;;  %v4637_v51 = vld [vmem:[#allocation29_spill] sm:$0xff] }
  0xe8   :  { %994 = vmatpush.bf16.msra.mxu2 %v3421_v20  ;;  %1007 = vmatpush.bf16.msra.mxu3 %v3397_v9 }
  0xeb   :  { %v2934_v59 = vpop.eup %2933  ;;  %969 = vmatpush.bf16.msra.mxu0 %v3419_v19  ;;  %982 = vmatpush.bf16.msra.mxu1 %v3434_v25 }
  0xec   :  { %v692_v0 = vmul.f32 %v2934_v59, %v686_v60  ;;  %995 = vmatpush.bf16.msra.mxu2 %v3475_v47  ;;  %1008 = vmatpush.bf16.msra.mxu3 %v3436_v26  ;;  %v4638_v59 = vld [vmem:[#allocation31_spill] sm:$0xff]  ;;  %v4639_v60 = vld [vmem:[#allocation30_spill] sm:$0xff] }
  0xee   :  { %v698_v30 = vpack.c.bf16 %v692_v0, %v692_v0  ;;  %v4640_v0 = vld [vmem:[#allocation32_spill] sm:$0xff] }
  0xef   :  { %970 = vmatpush.bf16.msra.mxu0 %v3467_v40  ;;  %983 = vmatpush.bf16.msra.mxu1 %v3479_v48 }
  0xf0   :  { %844 = vmatmul.bf16.vlgmr.msrb.gmra.mxu0 %v698_v30  ;;  %857 = vmatmul.bf16.vlgmr.msrb.gmra.mxu1 %v698_v30  ;;  %2768 = vst [vmem:[%s4511_s5 + $0x4] sm:$0xf] %v698_v30 }
  0xf1   :  { %870 = vmatmul.bf16.vlgmr.msrb.gmra.mxu2 %v698_v30  ;;  %883 = vmatmul.bf16.vlgmr.msrb.gmra.mxu3 %v698_v30  ;;  %v4641_v30 = vld [vmem:[#allocation33_spill] sm:$0xff] }
  0xf2   :  { %996 = vmatpush.bf16.msra.mxu2 %v3521_v10  ;;  %1009 = vmatpush.bf16.msra.mxu3 %v3481_v49 }
  0xf3   :  { %1090 = vmatpush.bf16.msrb.mxu0 %v3489_v52  ;;  %1103 = vmatpush.bf16.msrb.mxu1 %v3491_v55 }
  0xf6   :  { %1116 = vmatpush.bf16.msrb.mxu2 %v3525_v11  ;;  %1129 = vmatpush.bf16.msrb.mxu3 %v3502_v61 }
  0xf7   :  { %1091 = vmatpush.bf16.msrb.mxu0 %v3529_v13  ;;  %1104 = vmatpush.bf16.msrb.mxu1 %v3531_v14 }
  0xfa   :  { %1117 = vmatpush.bf16.msrb.mxu2 %v3565_v36  ;;  %1130 = vmatpush.bf16.msrb.mxu3 %v4619_v24 }
  0xfb   :  { %1092 = vmatpush.bf16.msrb.mxu0 %v4620_v23  ;;  %1105 = vmatpush.bf16.msrb.mxu1 %v4621_v44 }
  0xfe   :  { %1118 = vmatpush.bf16.msrb.mxu2 %v4622_v5  ;;  %1131 = vmatpush.bf16.msrb.mxu3 %v4623_v15 }
  0xff   :  { %1093 = vmatpush.bf16.msrb.mxu0 %v4624_v18  ;;  %1106 = vmatpush.bf16.msrb.mxu1 %v4625_v43 }
 0x102   :  { %1119 = vmatpush.bf16.msrb.mxu2 %v4626_v56  ;;  %1132 = vmatpush.bf16.msrb.mxu3 %v4627_v50 }
 0x103   :  { %1094 = vmatpush.bf16.msrb.mxu0 %v4628_v27  ;;  %1107 = vmatpush.bf16.msrb.mxu1 %v4629_v37 }
 0x106   :  { %1120 = vmatpush.bf16.msrb.mxu2 %v4630_v38  ;;  %1133 = vmatpush.bf16.msrb.mxu3 %v4631_v63  ;;  %v4642_v63 = vld [vmem:[#allocation35_spill] sm:$0xff] }
 0x107   :  { %1095 = vmatpush.bf16.msrb.mxu0 %v4632_v4  ;;  %1108 = vmatpush.bf16.msrb.mxu1 %v4633_v39  ;;  %v4643_v4 = vld [vmem:[#allocation34_spill] sm:$0xff] }
 0x10a   :  { %1121 = vmatpush.bf16.msrb.mxu2 %v4634_v31  ;;  %1134 = vmatpush.bf16.msrb.mxu3 %v4635_v29  ;;  %v2769_v29 = vld [vmem:[%s4508_s0 + $0x10] sm:$0xff] }
 0x10b   :  { %1096 = vmatpush.bf16.msrb.mxu0 %v4636_v22  ;;  %1109 = vmatpush.bf16.msrb.mxu1 %v4637_v51  ;;  %v704_v31 = vunpack.c.l.bf16 %v2769_v29  ;;  %v705_v22 = vunpack.c.h.bf16 %v2769_v29 }
 0x10e   :  { %1122 = vmatpush.bf16.msrb.mxu2 %v4638_v59  ;;  %1135 = vmatpush.bf16.msrb.mxu3 %v4639_v60 }
 0x10f   :  { %1097 = vmatpush.bf16.msrb.mxu0 %v4640_v0  ;;  %1110 = vmatpush.bf16.msrb.mxu1 %v4641_v30  ;;  %v2770_v0 = vld [vmem:[%s4508_s0 + $0x18] sm:$0xff] }
 0x110   :  { %v707_v37 = vunpack.c.h.bf16 %v2770_v0 }
 0x112   :  { %1123 = vmatpush.bf16.msrb.mxu2 %v4642_v63  ;;  %1136 = vmatpush.bf16.msrb.mxu3 %v4643_v4 }
 0x14e   :  { %v718_v39 = vpop.f32.mrf.mxu0  ;;  %v731_v51 = vpop.f32.mrf.mxu1 }
 0x14f   :  { %v761_v38 = vadd.f32 %v718_v39, %v704_v31  ;;  %v762_v59 = vadd.f32 %v731_v51, %v705_v22 }
 0x151   :  { %v2771_v60 = vmul.f32 -1.442695, %v761_v38  ;;  %v2772_v30 = vmul.f32 -1.442695, %v762_v59  ;;  %v706_v38 = vunpack.c.l.bf16 %v2770_v0 }
 0x153   :  { %2935 = vpow2.f32 %v2771_v60 }
 0x154   :  { %2937 = vpow2.f32 %v2772_v30 }
 0x155   :  { %v744_v4 = vpop.f32.mrf.mxu2  ;;  %v757_v63 = vpop.f32.mrf.mxu3 }
 0x156   :  { %v764_v27 = vadd.f32 %v757_v63, %v707_v37  ;;  %v720_v50 = vpop.f32.mrf.mxu0  ;;  %v733_v56 = vpop.f32.mrf.mxu1  ;;  %v763_v30 = vadd.f32 %v744_v4, %v706_v38 }
 0x158   :  { %v2773_v43 = vmul.f32 -1.442695, %v764_v27 }
 0x159   :  { %v2936_v29 = vpop.eup %2935 }
 0x15a   :  { %v2938_v18 = vpop.eup %2937  ;;  %v768_v15 = vadd.f32 1.0, %v2936_v29  ;;  %2939 = vpow2.f32 %v2773_v43 }
 0x15b   :  { %v787_v39 = vadd.f32 1.0, %v2938_v18  ;;  %v2774_v18 = vld [vmem:[%s4509_s1 + $0x60] sm:$0xff] }
 0x15c   :  { %2941 = vrcp.f32 %v768_v15  ;;  %v780_v63 = vand.u32 2147483648, %v768_v15  ;;  %v778_v29 = vand.u32 2147483647, %v768_v15  ;;  %vm774_vm10 = vweird.f32 %v768_v15 }
 0x15d   :  { %2943 = vrcp.f32 %v787_v39  ;;  %v746_v31 = vpop.f32.mrf.mxu2  ;;  %v759_v22 = vpop.f32.mrf.mxu3  ;;  %v799_v43 = vand.u32 2147483648, %v787_v39  ;;  %v797_v4 = vand.u32 2147483647, %v787_v39  ;;  %v832_v44 = vunpack.c.h.bf16 %v2774_v18 }
 0x15e   :  { %vm793_vm11 = vweird.f32 %v787_v39  ;;  %vm779_vm14 = vcmp.eq.f32.partialorder %v778_v29, 8.507059e+37 }
 0x15f   :  { %v800_v23 = vor.u32 1.1754944e-38, %v799_v43  ;;  %vm798_vm15 = vcmp.eq.f32.partialorder %v797_v4, 8.507059e+37 }
 0x160   :  { %v2940_v51 = vpop.eup %2939 }
 0x161   :  { %v3968_v59 = vadd.f32 1.0, %v2940_v51  ;;  %v831_v51 = vunpack.c.l.bf16 %v2774_v18 }
 0x162   :  { %v2942_v60 = vpop.eup %2941 }
 0x163   :  { %v2944_v5 = vpop.eup %2943  ;;  %v770_v37 = vmul.f32 %v2942_v60, %v768_v15  ;;  %2945 = vrcp.f32 %v3968_v59  ;;  %vm775_vm8 = vweird.f32 %v2942_v60  ;;  %vm813_vm1 = vweird.f32 %v3968_v59 }
 0x164   :  { %v789_v56 = vmul.f32 %v2944_v5, %v787_v39  ;;  %2947 = vtanh.f32 %v763_v30  ;;  %vm794_vm9 = vweird.f32 %v2944_v5  ;;  %vm776_vm12 = vmor %vm774_vm10, %vm775_vm8 }
 0x165   :  { %v771_v50 = vsub.f32 1.0, %v770_v37  ;;  %v781_v37 = vor.u32 1.1754944e-38, %v780_v63  ;;  %vm795_vm13 = vmor %vm793_vm11, %vm794_vm9 }
 0x166   :  { %v790_v27 = vsub.f32 1.0, %v789_v56 }
 0x167   :  { %v772_v0 = vmul.f32 %v2942_v60, %v771_v50 }
 0x168   :  { %v791_v31 = vmul.f32 %v2944_v5, %v790_v27 }
 0x169   :  { %v2946_v22 = vpop.eup %2945  ;;  %v773_v38 = vadd.f32 %v2942_v60, %v772_v0 }
 0x16a   :  { %v792_v30 = vadd.f32 %v2944_v5, %v791_v31  ;;  %v809_v56 = vmul.f32 %v2946_v22, %v3968_v59  ;;  %v2948_v50 = vpop.eup %2947  ;;  %v2775_v31 = vld [vmem:[%s4509_s1 + $0x68] sm:$0xff]  ;;  %vm814_vm0 = vweird.f32 %v2946_v22 }
 0x16b   :  { %v777_v24 = vsel %vm776_vm12, %v2942_v60, %v773_v38  ;;  %vm815_vm2 = vmor %vm813_vm1, %vm814_vm0 }
 0x16c   :  { %v782_v36 = vsel %vm779_vm14, %v781_v37, %v777_v24  ;;  %v796_v27 = vsel %vm795_vm13, %v2944_v5, %v792_v30  ;;  %v810_v14 = vsub.f32 1.0, %v809_v56  ;;  %v834_v5 = vunpack.c.h.bf16 %v2775_v31 }
 0x16d   :  { %v801_v13 = vsel %vm798_vm15, %v800_v23, %v796_v27  ;;  %v824_v0 = vmul.f32 %v2948_v50, %v782_v36  ;;  %v845_v15 = vpop.f32.mrf.mxu0  ;;  %v858_v61 = vpop.f32.mrf.mxu1  ;;  %v819_v36 = vand.u32 2147483648, %v3968_v59 }
 0x16e   :  { %v823_v39 = vmul.f32 %v801_v13, %v3876_v62  ;;  %v888_v18 = vadd.f32 %v845_v15, %v831_v51  ;;  %v889_v63 = vadd.f32 %v858_v61, %v832_v44  ;;  %v811_v43 = vmul.f32 %v2946_v22, %v810_v14 }
 0x16f   :  { %v817_v61 = vand.u32 2147483647, %v3968_v59  ;;  %v820_v51 = vor.u32 1.1754944e-38, %v819_v36 }
 0x170   :  { %v3979_v60 = vadd.f32 %v824_v0, %v823_v39  ;;  %v2776_v29 = vmul.f32 -1.442695, %v888_v18  ;;  %v2777_v24 = vmul.f32 -1.442695, %v889_v63  ;;  %v812_v4 = vadd.f32 %v2946_v22, %v811_v43 }
 0x171   :  { %vm818_vm3 = vcmp.eq.f32.partialorder %v817_v61, 8.507059e+37  ;;  %v833_v43 = vunpack.c.l.bf16 %v2775_v31 }
 0x172   :  { %2949 = vtanh.f32 %v3979_v60  ;;  %v816_v38 = vsel %vm815_vm2, %v2946_v22, %v812_v4 }
 0x173   :  { %2951 = vpow2.f32 %v2776_v29  ;;  %v821_v56 = vsel %vm818_vm3, %v820_v51, %v816_v38 }
 0x174   :  { %2953 = vpow2.f32 %v2777_v24  ;;  %v871_v13 = vpop.f32.mrf.mxu2  ;;  %v884_v62 = vpop.f32.mrf.mxu3 }
 0x175   :  { %v891_v14 = vadd.f32 %v884_v62, %v834_v5  ;;  %v847_v23 = vpop.f32.mrf.mxu0  ;;  %v860_v44 = vpop.f32.mrf.mxu1  ;;  %v890_v5 = vadd.f32 %v871_v13, %v833_v43 }
 0x177   :  { %v2778_v37 = vmul.f32 -1.442695, %v891_v14 }
 0x178   :  { %v2950_v30 = vpop.eup %2949 }
 0x179   :  { %v2952_v50 = vpop.eup %2951  ;;  %2955 = vpow2.f32 %v2778_v37  ;;  %v827_v27 = vmul.f32 %v2950_v30, %v821_v56 }
 0x17a   :  { %v2954_v0 = vpop.eup %2953  ;;  %v895_v15 = vadd.f32 1.0, %v2952_v50 }
 0x17b   :  { %v914_v39 = vadd.f32 1.0, %v2954_v0  ;;  %v962_v59 = vpack.c.bf16 %v827_v27, %v827_v27 }
 0x17c   :  { %2957 = vrcp.f32 %v895_v15  ;;  %v873_v18 = vpop.f32.mrf.mxu2  ;;  %v886_v63 = vpop.f32.mrf.mxu3  ;;  %v907_v14 = vand.u32 2147483648, %v895_v15  ;;  %v905_v13 = vand.u32 2147483647, %v895_v15  ;;  %vm901_vm6 = vweird.f32 %v895_v15 }
 0x17d   :  { %2959 = vrcp.f32 %v914_v39  ;;  %971 = vmatmul.bf16.vlgmr.msra.gmra.mxu0 %v962_v59  ;;  %984 = vmatmul.bf16.vlgmr.msra.gmra.mxu1 %v962_v59  ;;  %v926_v23 = vand.u32 2147483648, %v914_v39  ;;  %v924_v37 = vand.u32 2147483647, %v914_v39  ;;  %vm920_vm7 = vweird.f32 %v914_v39 }
 0x17e   :  { %997 = vmatmul.bf16.vlgmr.msra.gmra.mxu2 %v962_v59  ;;  %1010 = vmatmul.bf16.vlgmr.msra.gmra.mxu3 %v962_v59  ;;  %v908_v50 = vor.u32 1.1754944e-38, %v907_v14  ;;  %vm906_vm10 = vcmp.eq.f32.partialorder %v905_v13, 8.507059e+37  ;;  %v4644_v13 = vld [vmem:[#allocation6_spill] sm:$0xff] }
 0x17f   :  { %v2956_v22 = vpop.eup %2955  ;;  %1217 = vmatpush.bf16.msra.mxu0 %v3199_v3  ;;  %1230 = vmatpush.bf16.msra.mxu1 %v3210_v7  ;;  %v927_v0 = vor.u32 1.1754944e-38, %v926_v23  ;;  %vm925_vm11 = vcmp.eq.f32.partialorder %v924_v37, 8.507059e+37  ;;  %v4647_v37 = vld [vmem:[#allocation11_spill] sm:$0xff] }
 0x180   :  { %v3987_v29 = vadd.f32 1.0, %v2956_v22  ;;  %1243 = vmatpush.bf16.msra.mxu2 %v3250_v21  ;;  %1256 = vmatpush.bf16.msra.mxu3 %v3212_v8 }
 0x182   :  { %v2958_v24 = vpop.eup %2957  ;;  %2961 = vrcp.f32 %v3987_v29  ;;  %vm940_vm13 = vweird.f32 %v3987_v29 }
 0x183   :  { %v2960_v4 = vpop.eup %2959  ;;  %v897_v36 = vmul.f32 %v2958_v24, %v895_v15  ;;  %1218 = vmatpush.bf16.msra.mxu0 %v3224_v12  ;;  %1231 = vmatpush.bf16.msra.mxu1 %v3237_v16  ;;  %2963 = vtanh.f32 %v890_v5  ;;  %vm902_vm4 = vweird.f32 %v2958_v24 }
 0x184   :  { %v916_v31 = vmul.f32 %v2960_v4, %v914_v39  ;;  %1244 = vmatpush.bf16.msra.mxu2 %v3289_v34  ;;  %1257 = vmatpush.bf16.msra.mxu3 %v3239_v17  ;;  %vm921_vm5 = vweird.f32 %v2960_v4  ;;  %vm903_vm8 = vmor %vm901_vm6, %vm902_vm4 }
 0x185   :  { %v898_v61 = vsub.f32 1.0, %v897_v36  ;;  %vm922_vm9 = vmor %vm920_vm7, %vm921_vm5 }
 0x186   :  { %v917_v62 = vsub.f32 1.0, %v916_v31  ;;  %v946_v31 = vand.u32 2147483648, %v3987_v29 }
 0x187   :  { %v899_v44 = vmul.f32 %v2958_v24, %v898_v61  ;;  %1219 = vmatpush.bf16.msra.mxu0 %v3272_v28  ;;  %1232 = vmatpush.bf16.msra.mxu1 %v3285_v32 }
 0x188   :  { %v2962_v38 = vpop.eup %2961  ;;  %v918_v51 = vmul.f32 %v2960_v4, %v917_v62  ;;  %1245 = vmatpush.bf16.msra.mxu2 %v3313_v42  ;;  %1258 = vmatpush.bf16.msra.mxu3 %v3287_v33  ;;  %v947_v62 = vor.u32 1.1754944e-38, %v946_v31  ;;  %v4663_v31 = vld [vmem:[#allocation27_spill] sm:$0xff] }
 0x189   :  { %v900_v30 = vadd.f32 %v2958_v24, %v899_v44  ;;  %v936_v56 = vmul.f32 %v2962_v38, %v3987_v29  ;;  %v2964_v63 = vpop.eup %2963  ;;  %vm941_vm12 = vweird.f32 %v2962_v38 }
 0x18a   :  { %v919_v27 = vadd.f32 %v2960_v4, %v918_v51  ;;  %vm942_vm14 = vmor %vm940_vm13, %vm941_vm12  ;;  %v4646_v51 = vld [vmem:[#allocation9_spill] sm:$0xff] }
 0x18b   :  { %v904_v59 = vsel %vm903_vm8, %v2958_v24, %v900_v30  ;;  %v937_v18 = vsub.f32 1.0, %v936_v56  ;;  %1220 = vmatpush.bf16.msra.mxu0 %v3311_v41  ;;  %1233 = vmatpush.bf16.msra.mxu1 %v3323_v45  ;;  %v4648_v30 = vld [vmem:[#allocation10_spill] sm:$0xff]  ;;  %v4649_v56 = vld [vmem:[#allocation12_spill] sm:$0xff] }
 0x18c   :  { %v909_v43 = vsel %vm906_vm10, %v908_v50, %v904_v59  ;;  %v923_v22 = vsel %vm922_vm9, %v2960_v4, %v919_v27  ;;  %1246 = vmatpush.bf16.msra.mxu2 %v3349_v54  ;;  %1259 = vmatpush.bf16.msra.mxu3 %v3325_v46  ;;  %v4650_v50 = vld [vmem:[#allocation13_spill] sm:$0xff]  ;;  %v4651_v27 = vld [vmem:[#allocation15_spill] sm:$0xff]  ;;  %v4653_v59 = vld [vmem:[#allocation16_spill] sm:$0xff] }
 0x18d   :  { %v928_v15 = vsel %vm925_vm11, %v927_v0, %v923_v22  ;;  %v951_v39 = vmul.f32 %v2964_v63, %v909_v43  ;;  %v938_v5 = vmul.f32 %v2962_v38, %v937_v18  ;;  %v4652_v0 = vld [vmem:[#allocation14_spill] sm:$0xff]  ;;  %v4654_v18 = vld [vmem:[#allocation17_spill] sm:$0xff]  ;;  %v4655_v63 = vld [vmem:[#allocation19_spill] sm:$0xff] }
 0x18e   :  { %v950_v36 = vmul.f32 %v928_v15, %v3905_v35  ;;  %v944_v35 = vand.u32 2147483647, %v3987_v29  ;;  %v4656_v43 = vld [vmem:[#allocation18_spill] sm:$0xff]  ;;  %v4657_v22 = vld [vmem:[#allocation20_spill] sm:$0xff]  ;;  %v4658_v15 = vld [vmem:[#allocation21_spill] sm:$0xff] }
 0x18f   :  { %1221 = vmatpush.bf16.msra.mxu0 %v3347_v53  ;;  %1234 = vmatpush.bf16.msra.mxu1 %v3359_v57  ;;  %v939_v4 = vadd.f32 %v2962_v38, %v938_v5  ;;  %v4660_v5 = vld [vmem:[#allocation22_spill] sm:$0xff] }
 0x190   :  { %v4008_v24 = vadd.f32 %v951_v39, %v950_v36  ;;  %1247 = vmatpush.bf16.msra.mxu2 %v3385_v2  ;;  %1260 = vmatpush.bf16.msra.mxu3 %v3361_v58  ;;  %vm945_vm15 = vcmp.eq.f32.partialorder %v944_v35, 8.507059e+37  ;;  %v4659_v39 = vld [vmem:[#allocation23_spill] sm:$0xff]  ;;  %v4661_v36 = vld [vmem:[#allocation24_spill] sm:$0xff]  ;;  %v4664_v35 = vld [vmem:[#allocation26_spill] sm:$0xff] }
 0x191   :  { %v943_v61 = vsel %vm942_vm14, %v2962_v38, %v939_v4  ;;  %v4645_v38 = vld [vmem:[#allocation8_spill] sm:$0xff]  ;;  %v4662_v4 = vld [vmem:[#allocation25_spill] sm:$0xff] }
 0x192   :  { %2965 = vtanh.f32 %v4008_v24  ;;  %v948_v23 = vsel %vm945_vm15, %v947_v62, %v943_v61  ;;  %v4665_v61 = vld [vmem:[#allocation28_spill] sm:$0xff]  ;;  %v4666_v62 = vld [vmem:[#allocation29_spill] sm:$0xff] }
 0x193   :  { %1222 = vmatpush.bf16.msra.mxu0 %v3383_v1  ;;  %1235 = vmatpush.bf16.msra.mxu1 %v3395_v6 }
 0x194   :  { %1248 = vmatpush.bf16.msra.mxu2 %v3421_v20  ;;  %1261 = vmatpush.bf16.msra.mxu3 %v3397_v9 }
 0x197   :  { %1223 = vmatpush.bf16.msra.mxu0 %v3419_v19  ;;  %1236 = vmatpush.bf16.msra.mxu1 %v3434_v25 }
 0x198   :  { %v2966_v14 = vpop.eup %2965  ;;  %1249 = vmatpush.bf16.msra.mxu2 %v3475_v47  ;;  %1262 = vmatpush.bf16.msra.mxu3 %v3436_v26 }
 0x199   :  { %v954_v29 = vmul.f32 %v2966_v14, %v948_v23  ;;  %v4667_v14 = vld [vmem:[#allocation31_spill] sm:$0xff]  ;;  %v4668_v23 = vld [vmem:[#allocation30_spill] sm:$0xff] }
 0x19b   :  { %v1089_v44 = vpack.c.bf16 %v954_v29, %v954_v29  ;;  %1224 = vmatpush.bf16.msra.mxu0 %v3467_v40  ;;  %1237 = vmatpush.bf16.msra.mxu1 %v3479_v48  ;;  %v4669_v29 = vld [vmem:[#allocation32_spill] sm:$0xff] }
 0x19c   :  { %1250 = vmatpush.bf16.msra.mxu2 %v3521_v10  ;;  %1263 = vmatpush.bf16.msra.mxu3 %v3481_v49 }
 0x19d   :  { %1098 = vmatmul.bf16.vlgmr.msrb.gmra.mxu0 %v1089_v44  ;;  %1111 = vmatmul.bf16.vlgmr.msrb.gmra.mxu1 %v1089_v44 }
 0x19e   :  { %1124 = vmatmul.bf16.vlgmr.msrb.gmra.mxu2 %v1089_v44  ;;  %1137 = vmatmul.bf16.vlgmr.msrb.gmra.mxu3 %v1089_v44  ;;  %v4670_v44 = vld [vmem:[#allocation33_spill] sm:$0xff] }
 0x19f   :  { %1344 = vmatpush.bf16.msrb.mxu0 %v3489_v52  ;;  %1357 = vmatpush.bf16.msrb.mxu1 %v3491_v55 }
 0x1a0   :  { %1370 = vmatpush.bf16.msrb.mxu2 %v3525_v11  ;;  %1383 = vmatpush.bf16.msrb.mxu3 %v4644_v13 }
 0x1a3   :  { %1345 = vmatpush.bf16.msrb.mxu0 %v4645_v38  ;;  %1358 = vmatpush.bf16.msrb.mxu1 %v4646_v51 }
 0x1a4   :  { %1371 = vmatpush.bf16.msrb.mxu2 %v4647_v37  ;;  %1384 = vmatpush.bf16.msrb.mxu3 %v4648_v30 }
 0x1a7   :  { %1346 = vmatpush.bf16.msrb.mxu0 %v4649_v56  ;;  %1359 = vmatpush.bf16.msrb.mxu1 %v4650_v50 }
 0x1a8   :  { %1372 = vmatpush.bf16.msrb.mxu2 %v4651_v27  ;;  %1385 = vmatpush.bf16.msrb.mxu3 %v4652_v0 }
 0x1ab   :  { %1347 = vmatpush.bf16.msrb.mxu0 %v4653_v59  ;;  %1360 = vmatpush.bf16.msrb.mxu1 %v4654_v18 }
 0x1ac   :  { %1373 = vmatpush.bf16.msrb.mxu2 %v4655_v63  ;;  %1386 = vmatpush.bf16.msrb.mxu3 %v4656_v43 }
 0x1af   :  { %1348 = vmatpush.bf16.msrb.mxu0 %v4657_v22  ;;  %1361 = vmatpush.bf16.msrb.mxu1 %v4658_v15 }
 0x1b0   :  { %1374 = vmatpush.bf16.msrb.mxu2 %v4659_v39  ;;  %1387 = vmatpush.bf16.msrb.mxu3 %v4660_v5  ;;  %v4671_v5 = vld [vmem:[#allocation35_spill] sm:$0xff] }
 0x1b3   :  { %1349 = vmatpush.bf16.msrb.mxu0 %v4661_v36  ;;  %1362 = vmatpush.bf16.msrb.mxu1 %v4662_v4  ;;  %v4672_v36 = vld [vmem:[#allocation34_spill] sm:$0xff] }
 0x1b4   :  { %1375 = vmatpush.bf16.msrb.mxu2 %v4663_v31  ;;  %1388 = vmatpush.bf16.msrb.mxu3 %v4664_v35  ;;  %v2779_v35 = vld [vmem:[%s4508_s0 + $0x20] sm:$0xff] }
 0x1b5   :  { %v958_v31 = vunpack.c.l.bf16 %v2779_v35 }
 0x1b7   :  { %1350 = vmatpush.bf16.msrb.mxu0 %v4665_v61  ;;  %1363 = vmatpush.bf16.msrb.mxu1 %v4666_v62  ;;  %v959_v61 = vunpack.c.h.bf16 %v2779_v35 }
 0x1b8   :  { %1376 = vmatpush.bf16.msrb.mxu2 %v4667_v14  ;;  %1389 = vmatpush.bf16.msrb.mxu3 %v4668_v23 }
 0x1bb   :  { %1351 = vmatpush.bf16.msrb.mxu0 %v4669_v29  ;;  %1364 = vmatpush.bf16.msrb.mxu1 %v4670_v44  ;;  %v2780_v29 = vld [vmem:[%s4508_s0 + $0x28] sm:$0xff] }
 0x1bc   :  { %1377 = vmatpush.bf16.msrb.mxu2 %v4671_v5  ;;  %1390 = vmatpush.bf16.msrb.mxu3 %v4672_v36  ;;  %v961_v15 = vunpack.c.h.bf16 %v2780_v29 }
 0x1fa   :  { %v972_v4 = vpop.f32.mrf.mxu0  ;;  %v985_v62 = vpop.f32.mrf.mxu1 }
 0x1fb   :  { %v1015_v39 = vadd.f32 %v972_v4, %v958_v31  ;;  %v1016_v14 = vadd.f32 %v985_v62, %v959_v61 }
 0x1fd   :  { %v2781_v23 = vmul.f32 -1.442695, %v1015_v39  ;;  %v2782_v44 = vmul.f32 -1.442695, %v1016_v14  ;;  %v960_v39 = vunpack.c.l.bf16 %v2780_v29 }
 0x1ff   :  { %2967 = vpow2.f32 %v2781_v23 }
 0x200   :  { %2969 = vpow2.f32 %v2782_v44 }
 0x201   :  { %v998_v36 = vpop.f32.mrf.mxu2  ;;  %v1011_v5 = vpop.f32.mrf.mxu3 }
 0x202   :  { %v1018_v22 = vadd.f32 %v1011_v5, %v961_v15  ;;  %v974_v43 = vpop.f32.mrf.mxu0  ;;  %v987_v63 = vpop.f32.mrf.mxu1  ;;  %v1017_v44 = vadd.f32 %v998_v36, %v960_v39 }
 0x204   :  { %v2783_v18 = vmul.f32 -1.442695, %v1018_v22 }
 0x205   :  { %v2968_v35 = vpop.eup %2967 }
 0x206   :  { %v2970_v59 = vpop.eup %2969  ;;  %v1022_v0 = vadd.f32 1.0, %v2968_v35  ;;  %2971 = vpow2.f32 %v2783_v18 }
 0x207   :  { %v1041_v4 = vadd.f32 1.0, %v2970_v59  ;;  %v2784_v59 = vld [vmem:[%s4509_s1 + $0x50] sm:$0xff] }
 0x208   :  { %2973 = vrcp.f32 %v1022_v0  ;;  %v1034_v5 = vand.u32 2147483648, %v1022_v0  ;;  %v1032_v35 = vand.u32 2147483647, %v1022_v0  ;;  %vm1028_vm2 = vweird.f32 %v1022_v0 }
 0x209   :  { %2975 = vrcp.f32 %v1041_v4  ;;  %v1000_v31 = vpop.f32.mrf.mxu2  ;;  %v1013_v61 = vpop.f32.mrf.mxu3  ;;  %v1053_v18 = vand.u32 2147483648, %v1041_v4  ;;  %v1051_v36 = vand.u32 2147483647, %v1041_v4  ;;  %vm1047_vm3 = vweird.f32 %v1041_v4 }
 0x20a   :  { %vm1033_vm6 = vcmp.eq.f32.partialorder %v1032_v35, 8.507059e+37 }
 0x20b   :  { %v1054_v50 = vor.u32 1.1754944e-38, %v1053_v18  ;;  %vm1052_vm7 = vcmp.eq.f32.partialorder %v1051_v36, 8.507059e+37 }
 0x20c   :  { %v2972_v62 = vpop.eup %2971 }
 0x20d   :  { %v4066_v14 = vadd.f32 1.0, %v2972_v62  ;;  %v1085_v62 = vunpack.c.l.bf16 %v2784_v59 }
 0x20e   :  { %v2974_v23 = vpop.eup %2973 }
 0x20f   :  { %v2976_v27 = vpop.eup %2975  ;;  %v1024_v15 = vmul.f32 %v2974_v23, %v1022_v0  ;;  %2977 = vrcp.f32 %v4066_v14  ;;  %vm1029_vm0 = vweird.f32 %v2974_v23  ;;  %vm1067_vm9 = vweird.f32 %v4066_v14 }
 0x210   :  { %v1043_v63 = vmul.f32 %v2976_v27, %v1041_v4  ;;  %2979 = vtanh.f32 %v1017_v44  ;;  %vm1048_vm1 = vweird.f32 %v2976_v27  ;;  %vm1030_vm4 = vmor %vm1028_vm2, %vm1029_vm0 }
 0x211   :  { %v1025_v43 = vsub.f32 1.0, %v1024_v15  ;;  %v1035_v15 = vor.u32 1.1754944e-38, %v1034_v5  ;;  %vm1049_vm5 = vmor %vm1047_vm3, %vm1048_vm1 }
 0x212   :  { %v1044_v22 = vsub.f32 1.0, %v1043_v63 }
 0x213   :  { %v1026_v29 = vmul.f32 %v2974_v23, %v1025_v43  ;;  %v1086_v43 = vunpack.c.h.bf16 %v2784_v59 }
 0x214   :  { %v1045_v31 = vmul.f32 %v2976_v27, %v1044_v22 }
 0x215   :  { %v2978_v61 = vpop.eup %2977  ;;  %v1027_v39 = vadd.f32 %v2974_v23, %v1026_v29 }
 0x216   :  { %v1046_v63 = vadd.f32 %v2976_v27, %v1045_v31  ;;  %v1063_v44 = vmul.f32 %v2978_v61, %v4066_v14  ;;  %v2980_v30 = vpop.eup %2979  ;;  %vm1068_vm8 = vweird.f32 %v2978_v61 }
 0x217   :  { %v1031_v56 = vsel %vm1030_vm4, %v2974_v23, %v1027_v39  ;;  %v2785_v23 = vld [vmem:[%s4509_s1 + $0x58] sm:$0xff]  ;;  %vm1069_vm10 = vmor %vm1067_vm9, %vm1068_vm8 }
 0x218   :  { %v1036_v37 = vsel %vm1033_vm6, %v1035_v15, %v1031_v56  ;;  %v1050_v22 = vsel %vm1049_vm5, %v2976_v27, %v1046_v63  ;;  %v1064_v51 = vsub.f32 1.0, %v1063_v44 }
 0x219   :  { %v1055_v38 = vsel %vm1052_vm7, %v1054_v50, %v1050_v22  ;;  %v1078_v29 = vmul.f32 %v2980_v30, %v1036_v37  ;;  %v1088_v37 = vunpack.c.h.bf16 %v2785_v23 }
 0x21a   :  { %v1077_v0 = vmul.f32 %v1055_v38, %v3979_v60  ;;  %v1099_v4 = vpop.f32.mrf.mxu0  ;;  %v1112_v13 = vpop.f32.mrf.mxu1  ;;  %v1065_v5 = vmul.f32 %v2978_v61, %v1064_v51  ;;  %v1073_v60 = vand.u32 2147483648, %v4066_v14 }
 0x21b   :  { %v1142_v31 = vadd.f32 %v1099_v4, %v1085_v62  ;;  %v1143_v11 = vadd.f32 %v1112_v13, %v1086_v43  ;;  %v1071_v13 = vand.u32 2147483647, %v4066_v14 }
 0x21c   :  { %v4077_v18 = vadd.f32 %v1078_v29, %v1077_v0  ;;  %v1066_v27 = vadd.f32 %v2978_v61, %v1065_v5  ;;  %v1074_v36 = vor.u32 1.1754944e-38, %v1073_v60 }
 0x21d   :  { %v2786_v59 = vmul.f32 -1.442695, %v1142_v31  ;;  %v2787_v56 = vmul.f32 -1.442695, %v1143_v11  ;;  %vm1072_vm11 = vcmp.eq.f32.partialorder %v1071_v13, 8.507059e+37 }
 0x21e   :  { %2981 = vtanh.f32 %v4077_v18  ;;  %v1070_v30 = vsel %vm1069_vm10, %v2978_v61, %v1066_v27  ;;  %v1087_v61 = vunpack.c.l.bf16 %v2785_v23 }
 0x21f   :  { %2983 = vpow2.f32 %v2786_v59  ;;  %v1075_v15 = vsel %vm1072_vm11, %v1074_v36, %v1070_v30 }
 0x220   :  { %2985 = vpow2.f32 %v2787_v56 }
 0x221   :  { %v1125_v38 = vpop.f32.mrf.mxu2  ;;  %v1138_v51 = vpop.f32.mrf.mxu3 }
 0x222   :  { %v1145_v50 = vadd.f32 %v1138_v51, %v1088_v37  ;;  %v1101_v35 = vpop.f32.mrf.mxu0  ;;  %v1114_v11 = vpop.f32.mrf.mxu1  ;;  %v1144_v56 = vadd.f32 %v1125_v38, %v1087_v61 }
 0x224   :  { %v2982_v39 = vpop.eup %2981  ;;  %v2788_v62 = vmul.f32 -1.442695, %v1145_v50 }
 0x225   :  { %v2984_v63 = vpop.eup %2983  ;;  %v1081_v44 = vmul.f32 %v2982_v39, %v1075_v15 }
 0x226   :  { %v2986_v43 = vpop.eup %2985  ;;  %v1149_v22 = vadd.f32 1.0, %v2984_v63  ;;  %2987 = vpow2.f32 %v2788_v62 }
 0x227   :  { %v1168_v29 = vadd.f32 1.0, %v2986_v43  ;;  %v1216_v14 = vpack.c.bf16 %v1081_v44, %v1081_v44 }
 0x228   :  { %2989 = vrcp.f32 %v1149_v22  ;;  %v1161_v51 = vand.u32 2147483648, %v1149_v22  ;;  %v1159_v38 = vand.u32 2147483647, %v1149_v22  ;;  %vm1155_vm14 = vweird.f32 %v1149_v22 }
 0x229   :  { %2991 = vrcp.f32 %v1168_v29  ;;  %v1127_v0 = vpop.f32.mrf.mxu2  ;;  %v1140_v4 = vpop.f32.mrf.mxu3  ;;  %1225 = vmatmul.bf16.vlgmr.msra.gmra.mxu0 %v1216_v14  ;;  %1238 = vmatmul.bf16.vlgmr.msra.gmra.mxu1 %v1216_v14  ;;  %v1180_v30 = vand.u32 2147483648, %v1168_v29  ;;  %v1178_v11 = vand.u32 2147483647, %v1168_v29  ;;  %vm1174_vm15 = vweird.f32 %v1168_v29 }
 0x22a   :  { %1251 = vmatmul.bf16.vlgmr.msra.gmra.mxu2 %v1216_v14  ;;  %1264 = vmatmul.bf16.vlgmr.msra.gmra.mxu3 %v1216_v14  ;;  %v1162_v62 = vor.u32 1.1754944e-38, %v1161_v51  ;;  %vm1160_vm2 = vcmp.eq.f32.partialorder %v1159_v38, 8.507059e+37  ;;  %v4674_v38 = vld [vmem:[#allocation6_spill] sm:$0xff] }
 0x22b   :  { %1471 = vmatpush.bf16.msra.mxu0 %v3199_v3  ;;  %1484 = vmatpush.bf16.msra.mxu1 %v3210_v7  ;;  %v1181_v44 = vor.u32 1.1754944e-38, %v1180_v30  ;;  %vm1179_vm3 = vcmp.eq.f32.partialorder %v1178_v11, 8.507059e+37  ;;  %v4676_v11 = vld [vmem:[#allocation9_spill] sm:$0xff] }
 0x22c   :  { %v2988_v5 = vpop.eup %2987  ;;  %1497 = vmatpush.bf16.msra.mxu2 %v3250_v21  ;;  %1510 = vmatpush.bf16.msra.mxu3 %v3212_v8 }
 0x22d   :  { %v4087_v31 = vadd.f32 1.0, %v2988_v5 }
 0x22e   :  { %v2990_v59 = vpop.eup %2989 }
 0x22f   :  { %v2992_v27 = vpop.eup %2991  ;;  %v1151_v37 = vmul.f32 %v2990_v59, %v1149_v22  ;;  %2993 = vrcp.f32 %v4087_v31  ;;  %1472 = vmatpush.bf16.msra.mxu0 %v3224_v12  ;;  %1485 = vmatpush.bf16.msra.mxu1 %v3237_v16  ;;  %vm1156_vm12 = vweird.f32 %v2990_v59  ;;  %vm1194_vm5 = vweird.f32 %v4087_v31 }
 0x230   :  { %v1170_v23 = vmul.f32 %v2992_v27, %v1168_v29  ;;  %1498 = vmatpush.bf16.msra.mxu2 %v3289_v34  ;;  %1511 = vmatpush.bf16.msra.mxu3 %v3239_v17  ;;  %2995 = vtanh.f32 %v1144_v56  ;;  %vm1175_vm13 = vweird.f32 %v2992_v27  ;;  %vm1157_vm0 = vmor %vm1155_vm14, %vm1156_vm12 }
 0x231   :  { %v1152_v60 = vsub.f32 1.0, %v1151_v37  ;;  %vm1176_vm1 = vmor %vm1174_vm15, %vm1175_vm13  ;;  %v1200_v37 = vand.u32 2147483648, %v4087_v31 }
 0x232   :  { %v1171_v13 = vsub.f32 1.0, %v1170_v23 }
 0x233   :  { %v1153_v50 = vmul.f32 %v2990_v59, %v1152_v60  ;;  %1473 = vmatpush.bf16.msra.mxu0 %v3272_v28  ;;  %1486 = vmatpush.bf16.msra.mxu1 %v3285_v32  ;;  %v1201_v60 = vor.u32 1.1754944e-38, %v1200_v37  ;;  %v4693_v37 = vld [vmem:[#allocation27_spill] sm:$0xff] }
 0x234   :  { %v1172_v35 = vmul.f32 %v2992_v27, %v1171_v13  ;;  %1499 = vmatpush.bf16.msra.mxu2 %v3313_v42  ;;  %1512 = vmatpush.bf16.msra.mxu3 %v3287_v33 }
 0x235   :  { %v2994_v36 = vpop.eup %2993  ;;  %v1154_v39 = vadd.f32 %v2990_v59, %v1153_v50  ;;  %v4673_v50 = vld [vmem:[#allocation7_spill] sm:$0xff] }
 0x236   :  { %v1173_v15 = vadd.f32 %v2992_v27, %v1172_v35  ;;  %v1190_v63 = vmul.f32 %v2994_v36, %v4087_v31  ;;  %v2996_v14 = vpop.eup %2995  ;;  %vm1195_vm4 = vweird.f32 %v2994_v36  ;;  %v4675_v35 = vld [vmem:[#allocation8_spill] sm:$0xff] }
 0x237   :  { %v1158_v43 = vsel %vm1157_vm0, %v2990_v59, %v1154_v39  ;;  %1474 = vmatpush.bf16.msra.mxu0 %v3311_v41  ;;  %1487 = vmatpush.bf16.msra.mxu1 %v3323_v45  ;;  %vm1196_vm6 = vmor %vm1194_vm5, %vm1195_vm4  ;;  %v4678_v39 = vld [vmem:[#allocation10_spill] sm:$0xff] }
 0x238   :  { %v1163_v0 = vsel %vm1160_vm2, %v1162_v62, %v1158_v43  ;;  %v1177_v4 = vsel %vm1176_vm1, %v2992_v27, %v1173_v15  ;;  %v1191_v61 = vsub.f32 1.0, %v1190_v63  ;;  %1500 = vmatpush.bf16.msra.mxu2 %v3349_v54  ;;  %1513 = vmatpush.bf16.msra.mxu3 %v3325_v46  ;;  %v4679_v62 = vld [vmem:[#allocation12_spill] sm:$0xff]  ;;  %v4680_v15 = vld [vmem:[#allocation13_spill] sm:$0xff]  ;;  %v4681_v63 = vld [vmem:[#allocation15_spill] sm:$0xff] }
 0x239   :  { %v1182_v22 = vsel %vm1179_vm3, %v1181_v44, %v1177_v4  ;;  %v1205_v29 = vmul.f32 %v2996_v14, %v1163_v0  ;;  %v4682_v44 = vld [vmem:[#allocation14_spill] sm:$0xff]  ;;  %v4683_v43 = vld [vmem:[#allocation16_spill] sm:$0xff]  ;;  %v4684_v14 = vld [vmem:[#allocation17_spill] sm:$0xff] }
 0x23a   :  { %v1204_v5 = vmul.f32 %v1182_v22, %v4008_v24  ;;  %v1192_v56 = vmul.f32 %v2994_v36, %v1191_v61  ;;  %v1198_v24 = vand.u32 2147483647, %v4087_v31  ;;  %v4685_v0 = vld [vmem:[#allocation19_spill] sm:$0xff]  ;;  %v4686_v4 = vld [vmem:[#allocation18_spill] sm:$0xff]  ;;  %v4687_v61 = vld [vmem:[#allocation20_spill] sm:$0xff] }
 0x23b   :  { %1475 = vmatpush.bf16.msra.mxu0 %v3347_v53  ;;  %1488 = vmatpush.bf16.msra.mxu1 %v3359_v57  ;;  %v4688_v22 = vld [vmem:[#allocation21_spill] sm:$0xff] }
 0x23c   :  { %v4106_v59 = vadd.f32 %v1205_v29, %v1204_v5  ;;  %1501 = vmatpush.bf16.msra.mxu2 %v3385_v2  ;;  %1514 = vmatpush.bf16.msra.mxu3 %v3361_v58  ;;  %v1193_v27 = vadd.f32 %v2994_v36, %v1192_v56  ;;  %vm1199_vm7 = vcmp.eq.f32.partialorder %v1198_v24, 8.507059e+37  ;;  %v4689_v29 = vld [vmem:[#allocation23_spill] sm:$0xff]  ;;  %v4690_v5 = vld [vmem:[#allocation22_spill] sm:$0xff]  ;;  %v4691_v56 = vld [vmem:[#allocation24_spill] sm:$0xff] }
 0x23d   :  { %v4694_v24 = vld [vmem:[#allocation26_spill] sm:$0xff] }
 0x23e   :  { %2997 = vtanh.f32 %v4106_v59  ;;  %v1197_v23 = vsel %vm1196_vm6, %v2994_v36, %v1193_v27  ;;  %v4677_v36 = vld [vmem:[#allocation11_spill] sm:$0xff]  ;;  %v4692_v27 = vld [vmem:[#allocation25_spill] sm:$0xff] }
 0x23f   :  { %1476 = vmatpush.bf16.msra.mxu0 %v3383_v1  ;;  %1489 = vmatpush.bf16.msra.mxu1 %v3395_v6  ;;  %v1202_v51 = vsel %vm1199_vm7, %v1201_v60, %v1197_v23  ;;  %v4695_v23 = vld [vmem:[#allocation28_spill] sm:$0xff]  ;;  %v4696_v60 = vld [vmem:[#allocation29_spill] sm:$0xff] }
 0x240   :  { %1502 = vmatpush.bf16.msra.mxu2 %v3421_v20  ;;  %1515 = vmatpush.bf16.msra.mxu3 %v3397_v9 }
 0x243   :  { %1477 = vmatpush.bf16.msra.mxu0 %v3419_v19  ;;  %1490 = vmatpush.bf16.msra.mxu1 %v3434_v25 }
 0x244   :  { %v2998_v13 = vpop.eup %2997  ;;  %1503 = vmatpush.bf16.msra.mxu2 %v3475_v47  ;;  %1516 = vmatpush.bf16.msra.mxu3 %v3436_v26 }
 0x245   :  { %v1208_v31 = vmul.f32 %v2998_v13, %v1202_v51  ;;  %v4697_v13 = vld [vmem:[#allocation31_spill] sm:$0xff]  ;;  %v4698_v51 = vld [vmem:[#allocation30_spill] sm:$0xff] }
 0x247   :  { %v1343_v30 = vpack.c.bf16 %v1208_v31, %v1208_v31  ;;  %1478 = vmatpush.bf16.msra.mxu0 %v3467_v40  ;;  %1491 = vmatpush.bf16.msra.mxu1 %v3479_v48  ;;  %v4699_v31 = vld [vmem:[#allocation32_spill] sm:$0xff] }
 0x248   :  { %1504 = vmatpush.bf16.msra.mxu2 %v3521_v10  ;;  %1517 = vmatpush.bf16.msra.mxu3 %v3481_v49 }
 0x249   :  { %1352 = vmatmul.bf16.vlgmr.msrb.gmra.mxu0 %v1343_v30  ;;  %1365 = vmatmul.bf16.vlgmr.msrb.gmra.mxu1 %v1343_v30 }
 0x24a   :  { %1378 = vmatmul.bf16.vlgmr.msrb.gmra.mxu2 %v1343_v30  ;;  %1391 = vmatmul.bf16.vlgmr.msrb.gmra.mxu3 %v1343_v30  ;;  %v4700_v30 = vld [vmem:[#allocation33_spill] sm:$0xff] }
 0x24b   :  { %1598 = vmatpush.bf16.msrb.mxu0 %v3489_v52  ;;  %1611 = vmatpush.bf16.msrb.mxu1 %v3491_v55 }
 0x24c   :  { %1624 = vmatpush.bf16.msrb.mxu2 %v4673_v50  ;;  %1637 = vmatpush.bf16.msrb.mxu3 %v4674_v38 }
 0x24f   :  { %1599 = vmatpush.bf16.msrb.mxu0 %v4675_v35  ;;  %1612 = vmatpush.bf16.msrb.mxu1 %v4676_v11 }
 0x250   :  { %1625 = vmatpush.bf16.msrb.mxu2 %v4677_v36  ;;  %1638 = vmatpush.bf16.msrb.mxu3 %v4678_v39 }
 0x253   :  { %1600 = vmatpush.bf16.msrb.mxu0 %v4679_v62  ;;  %1613 = vmatpush.bf16.msrb.mxu1 %v4680_v15 }
 0x254   :  { %1626 = vmatpush.bf16.msrb.mxu2 %v4681_v63  ;;  %1639 = vmatpush.bf16.msrb.mxu3 %v4682_v44 }
 0x257   :  { %1601 = vmatpush.bf16.msrb.mxu0 %v4683_v43  ;;  %1614 = vmatpush.bf16.msrb.mxu1 %v4684_v14 }
 0x258   :  { %1627 = vmatpush.bf16.msrb.mxu2 %v4685_v0  ;;  %1640 = vmatpush.bf16.msrb.mxu3 %v4686_v4 }
 0x25b   :  { %1602 = vmatpush.bf16.msrb.mxu0 %v4687_v61  ;;  %1615 = vmatpush.bf16.msrb.mxu1 %v4688_v22 }
 0x25c   :  { %1628 = vmatpush.bf16.msrb.mxu2 %v4689_v29  ;;  %1641 = vmatpush.bf16.msrb.mxu3 %v4690_v5  ;;  %v4701_v5 = vld [vmem:[#allocation35_spill] sm:$0xff] }
 0x25f   :  { %1603 = vmatpush.bf16.msrb.mxu0 %v4691_v56  ;;  %1616 = vmatpush.bf16.msrb.mxu1 %v4692_v27  ;;  %v4702_v56 = vld [vmem:[#allocation34_spill] sm:$0xff] }
 0x260   :  { %1629 = vmatpush.bf16.msrb.mxu2 %v4693_v37  ;;  %1642 = vmatpush.bf16.msrb.mxu3 %v4694_v24  ;;  %v2789_v24 = vld [vmem:[%s4508_s0 + $0x30] sm:$0xff] }
 0x261   :  { %v1212_v37 = vunpack.c.l.bf16 %v2789_v24 }
 0x263   :  { %1604 = vmatpush.bf16.msrb.mxu0 %v4695_v23  ;;  %1617 = vmatpush.bf16.msrb.mxu1 %v4696_v60  ;;  %v1213_v23 = vunpack.c.h.bf16 %v2789_v24 }
 0x264   :  { %1630 = vmatpush.bf16.msrb.mxu2 %v4697_v13  ;;  %1643 = vmatpush.bf16.msrb.mxu3 %v4698_v51 }
 0x267   :  { %1605 = vmatpush.bf16.msrb.mxu0 %v4699_v31  ;;  %1618 = vmatpush.bf16.msrb.mxu1 %v4700_v30  ;;  %v2790_v31 = vld [vmem:[%s4508_s0 + $0x38] sm:$0xff] }
 0x268   :  { %1631 = vmatpush.bf16.msrb.mxu2 %v4701_v5  ;;  %1644 = vmatpush.bf16.msrb.mxu3 %v4702_v56  ;;  %v1215_v22 = vunpack.c.h.bf16 %v2790_v31 }
 0x2a6   :  { %v1226_v27 = vpop.f32.mrf.mxu0  ;;  %v1239_v60 = vpop.f32.mrf.mxu1 }
 0x2a7   :  { %v1269_v29 = vadd.f32 %v1226_v27, %v1212_v37  ;;  %v1270_v13 = vadd.f32 %v1239_v60, %v1213_v23 }
 0x2a9   :  { %v2791_v51 = vmul.f32 -1.442695, %v1269_v29  ;;  %v2792_v30 = vmul.f32 -1.442695, %v1270_v13  ;;  %v1214_v29 = vunpack.c.l.bf16 %v2790_v31 }
 0x2ab   :  { %2999 = vpow2.f32 %v2791_v51 }
 0x2ac   :  { %3001 = vpow2.f32 %v2792_v30 }
 0x2ad   :  { %v1252_v56 = vpop.f32.mrf.mxu2  ;;  %v1265_v5 = vpop.f32.mrf.mxu3 }
 0x2ae   :  { %v1272_v61 = vadd.f32 %v1265_v5, %v1215_v22  ;;  %v1228_v4 = vpop.f32.mrf.mxu0  ;;  %v1241_v0 = vpop.f32.mrf.mxu1  ;;  %v1271_v30 = vadd.f32 %v1252_v56, %v1214_v29 }
 0x2b0   :  { %v2793_v14 = vmul.f32 -1.442695, %v1272_v61 }
 0x2b1   :  { %v3000_v24 = vpop.eup %2999 }
 0x2b2   :  { %v3002_v43 = vpop.eup %3001  ;;  %v1276_v44 = vadd.f32 1.0, %v3000_v24  ;;  %3003 = vpow2.f32 %v2793_v14 }
 0x2b3   :  { %v1295_v27 = vadd.f32 1.0, %v3002_v43  ;;  %v2794_v43 = vld [vmem:[%s4509_s1 + $0x40] sm:$0xff] }
 0x2b4   :  { %3005 = vrcp.f32 %v1276_v44  ;;  %v1288_v5 = vand.u32 2147483648, %v1276_v44  ;;  %v1286_v24 = vand.u32 2147483647, %v1276_v44  ;;  %vm1282_vm10 = vweird.f32 %v1276_v44 }
 0x2b5   :  { %3007 = vrcp.f32 %v1295_v27  ;;  %v1254_v37 = vpop.f32.mrf.mxu2  ;;  %v1267_v23 = vpop.f32.mrf.mxu3  ;;  %v1307_v14 = vand.u32 2147483648, %v1295_v27  ;;  %v1305_v56 = vand.u32 2147483647, %v1295_v27  ;;  %vm1301_vm11 = vweird.f32 %v1295_v27 }
 0x2b6   :  { %vm1287_vm14 = vcmp.eq.f32.partialorder %v1286_v24, 8.507059e+37 }
 0x2b7   :  { %v1308_v15 = vor.u32 1.1754944e-38, %v1307_v14  ;;  %vm1306_vm15 = vcmp.eq.f32.partialorder %v1305_v56, 8.507059e+37 }
 0x2b8   :  { %v3004_v60 = vpop.eup %3003 }
 0x2b9   :  { %v4164_v13 = vadd.f32 1.0, %v3004_v60  ;;  %v1339_v60 = vunpack.c.l.bf16 %v2794_v43 }
 0x2ba   :  { %v3006_v51 = vpop.eup %3005 }
 0x2bb   :  { %v3008_v63 = vpop.eup %3007  ;;  %v1278_v22 = vmul.f32 %v3006_v51, %v1276_v44  ;;  %3009 = vrcp.f32 %v4164_v13  ;;  %vm1283_vm8 = vweird.f32 %v3006_v51  ;;  %vm1321_vm1 = vweird.f32 %v4164_v13 }
 0x2bc   :  { %v1297_v0 = vmul.f32 %v3008_v63, %v1295_v27  ;;  %3011 = vtanh.f32 %v1271_v30  ;;  %vm1302_vm9 = vweird.f32 %v3008_v63  ;;  %vm1284_vm12 = vmor %vm1282_vm10, %vm1283_vm8 }
 0x2bd   :  { %v1279_v4 = vsub.f32 1.0, %v1278_v22  ;;  %v1289_v22 = vor.u32 1.1754944e-38, %v1288_v5  ;;  %vm1303_vm13 = vmor %vm1301_vm11, %vm1302_vm9 }
 0x2be   :  { %v1298_v61 = vsub.f32 1.0, %v1297_v0 }
 0x2bf   :  { %v1280_v31 = vmul.f32 %v3006_v51, %v1279_v4  ;;  %v1340_v4 = vunpack.c.h.bf16 %v2794_v43 }
 0x2c0   :  { %v1299_v37 = vmul.f32 %v3008_v63, %v1298_v61 }
 0x2c1   :  { %v3010_v23 = vpop.eup %3009  ;;  %v1281_v29 = vadd.f32 %v3006_v51, %v1280_v31 }
 0x2c2   :  { %v1300_v0 = vadd.f32 %v3008_v63, %v1299_v37  ;;  %v1317_v30 = vmul.f32 %v3010_v23, %v4164_v13  ;;  %v3012_v39 = vpop.eup %3011  ;;  %vm1322_vm0 = vweird.f32 %v3010_v23 }
 0x2c3   :  { %v1285_v62 = vsel %vm1284_vm12, %v3006_v51, %v1281_v29  ;;  %v2795_v51 = vld [vmem:[%s4509_s1 + $0x48] sm:$0xff]  ;;  %vm1323_vm2 = vmor %vm1321_vm1, %vm1322_vm0 }
 0x2c4   :  { %v1290_v36 = vsel %vm1287_vm14, %v1289_v22, %v1285_v62  ;;  %v1304_v61 = vsel %vm1303_vm13, %v3008_v63, %v1300_v0  ;;  %v1318_v11 = vsub.f32 1.0, %v1317_v30 }
 0x2c5   :  { %v1309_v35 = vsel %vm1306_vm15, %v1308_v15, %v1304_v61  ;;  %v1332_v31 = vmul.f32 %v3012_v39, %v1290_v36  ;;  %v1342_v36 = vunpack.c.h.bf16 %v2795_v51 }
 0x2c6   :  { %v1331_v44 = vmul.f32 %v1309_v35, %v4077_v18  ;;  %v1353_v27 = vpop.f32.mrf.mxu0  ;;  %v1366_v38 = vpop.f32.mrf.mxu1  ;;  %v1319_v5 = vmul.f32 %v3010_v23, %v1318_v11  ;;  %v1327_v18 = vand.u32 2147483648, %v4164_v13 }
 0x2c7   :  { %v1396_v37 = vadd.f32 %v1353_v27, %v1339_v60  ;;  %v1397_v50 = vadd.f32 %v1366_v38, %v1340_v4  ;;  %v1325_v38 = vand.u32 2147483647, %v4164_v13 }
 0x2c8   :  { %v4175_v14 = vadd.f32 %v1332_v31, %v1331_v44  ;;  %v1320_v63 = vadd.f32 %v3010_v23, %v1319_v5  ;;  %v1328_v56 = vor.u32 1.1754944e-38, %v1327_v18 }
 0x2c9   :  { %v2796_v43 = vmul.f32 -1.442695, %v1396_v37  ;;  %v2797_v62 = vmul.f32 -1.442695, %v1397_v50  ;;  %vm1326_vm3 = vcmp.eq.f32.partialorder %v1325_v38, 8.507059e+37 }
 0x2ca   :  { %3013 = vtanh.f32 %v4175_v14  ;;  %v1324_v39 = vsel %vm1323_vm2, %v3010_v23, %v1320_v63  ;;  %v1341_v23 = vunpack.c.l.bf16 %v2795_v51 }
 0x2cb   :  { %3015 = vpow2.f32 %v2796_v43  ;;  %v1329_v22 = vsel %vm1326_vm3, %v1328_v56, %v1324_v39 }
 0x2cc   :  { %3017 = vpow2.f32 %v2797_v62 }
 0x2cd   :  { %v1379_v35 = vpop.f32.mrf.mxu2  ;;  %v1392_v11 = vpop.f32.mrf.mxu3 }
 0x2ce   :  { %v1399_v15 = vadd.f32 %v1392_v11, %v1342_v36  ;;  %v1355_v24 = vpop.f32.mrf.mxu0  ;;  %v1368_v50 = vpop.f32.mrf.mxu1  ;;  %v1398_v62 = vadd.f32 %v1379_v35, %v1341_v23 }
 0x2d0   :  { %v3014_v29 = vpop.eup %3013  ;;  %v2798_v60 = vmul.f32 -1.442695, %v1399_v15 }
 0x2d1   :  { %v3016_v0 = vpop.eup %3015  ;;  %v1335_v30 = vmul.f32 %v3014_v29, %v1329_v22 }
 0x2d2   :  { %v3018_v4 = vpop.eup %3017  ;;  %v1403_v61 = vadd.f32 1.0, %v3016_v0  ;;  %3019 = vpow2.f32 %v2798_v60 }
 0x2d3   :  { %v1422_v31 = vadd.f32 1.0, %v3018_v4  ;;  %v1470_v13 = vpack.c.bf16 %v1335_v30, %v1335_v30 }
 0x2d4   :  { %3021 = vrcp.f32 %v1403_v61  ;;  %v1415_v11 = vand.u32 2147483648, %v1403_v61  ;;  %v1413_v35 = vand.u32 2147483647, %v1403_v61  ;;  %vm1409_vm6 = vweird.f32 %v1403_v61 }
 0x2d5   :  { %3023 = vrcp.f32 %v1422_v31  ;;  %v1381_v44 = vpop.f32.mrf.mxu2  ;;  %v1394_v27 = vpop.f32.mrf.mxu3  ;;  %1479 = vmatmul.bf16.vlgmr.msra.gmra.mxu0 %v1470_v13  ;;  %1492 = vmatmul.bf16.vlgmr.msra.gmra.mxu1 %v1470_v13  ;;  %v1434_v39 = vand.u32 2147483648, %v1422_v31  ;;  %v1432_v50 = vand.u32 2147483647, %v1422_v31  ;;  %vm1428_vm7 = vweird.f32 %v1422_v31 }
 0x2d6   :  { %1505 = vmatmul.bf16.vlgmr.msra.gmra.mxu2 %v1470_v13  ;;  %1518 = vmatmul.bf16.vlgmr.msra.gmra.mxu3 %v1470_v13  ;;  %v1416_v60 = vor.u32 1.1754944e-38, %v1415_v11  ;;  %vm1414_vm10 = vcmp.eq.f32.partialorder %v1413_v35, 8.507059e+37  ;;  %v4704_v35 = vld [vmem:[#allocation6_spill] sm:$0xff] }
 0x2d7   :  { %1725 = vmatpush.bf16.msra.mxu0 %v3199_v3  ;;  %1738 = vmatpush.bf16.msra.mxu1 %v3210_v7  ;;  %v1435_v30 = vor.u32 1.1754944e-38, %v1434_v39  ;;  %vm1433_vm11 = vcmp.eq.f32.partialorder %v1432_v50, 8.507059e+37  ;;  %v4706_v50 = vld [vmem:[#allocation9_spill] sm:$0xff] }
 0x2d8   :  { %v3020_v5 = vpop.eup %3019  ;;  %1751 = vmatpush.bf16.msra.mxu2 %v3250_v21  ;;  %1764 = vmatpush.bf16.msra.mxu3 %v3212_v8 }
 0x2d9   :  { %v4185_v37 = vadd.f32 1.0, %v3020_v5 }
 0x2da   :  { %v3022_v43 = vpop.eup %3021 }
 0x2db   :  { %v3024_v63 = vpop.eup %3023  ;;  %v1405_v36 = vmul.f32 %v3022_v43, %v1403_v61  ;;  %3025 = vrcp.f32 %v4185_v37  ;;  %1726 = vmatpush.bf16.msra.mxu0 %v3224_v12  ;;  %1739 = vmatpush.bf16.msra.mxu1 %v3237_v16  ;;  %vm1410_vm4 = vweird.f32 %v3022_v43  ;;  %vm1448_vm13 = vweird.f32 %v4185_v37 }
 0x2dc   :  { %v1424_v51 = vmul.f32 %v3024_v63, %v1422_v31  ;;  %1752 = vmatpush.bf16.msra.mxu2 %v3289_v34  ;;  %1765 = vmatpush.bf16.msra.mxu3 %v3239_v17  ;;  %3027 = vtanh.f32 %v1398_v62  ;;  %vm1429_vm5 = vweird.f32 %v3024_v63  ;;  %vm1411_vm8 = vmor %vm1409_vm6, %vm1410_vm4 }
 0x2dd   :  { %v1406_v18 = vsub.f32 1.0, %v1405_v36  ;;  %vm1430_vm9 = vmor %vm1428_vm7, %vm1429_vm5  ;;  %v1454_v36 = vand.u32 2147483648, %v4185_v37 }
 0x2de   :  { %v1425_v38 = vsub.f32 1.0, %v1424_v51 }
 0x2df   :  { %v1407_v15 = vmul.f32 %v3022_v43, %v1406_v18  ;;  %1727 = vmatpush.bf16.msra.mxu0 %v3272_v28  ;;  %1740 = vmatpush.bf16.msra.mxu1 %v3285_v32  ;;  %v1455_v18 = vor.u32 1.1754944e-38, %v1454_v36  ;;  %v4723_v36 = vld [vmem:[#allocation27_spill] sm:$0xff] }
 0x2e0   :  { %v1426_v24 = vmul.f32 %v3024_v63, %v1425_v38  ;;  %1753 = vmatpush.bf16.msra.mxu2 %v3313_v42  ;;  %1766 = vmatpush.bf16.msra.mxu3 %v3287_v33 }
 0x2e1   :  { %v3026_v56 = vpop.eup %3025  ;;  %v1408_v29 = vadd.f32 %v3022_v43, %v1407_v15  ;;  %v4703_v15 = vld [vmem:[#allocation7_spill] sm:$0xff] }
 0x2e2   :  { %v1427_v22 = vadd.f32 %v3024_v63, %v1426_v24  ;;  %v1444_v0 = vmul.f32 %v3026_v56, %v4185_v37  ;;  %v3028_v13 = vpop.eup %3027  ;;  %vm1449_vm12 = vweird.f32 %v3026_v56  ;;  %v4705_v24 = vld [vmem:[#allocation8_spill] sm:$0xff] }
 0x2e3   :  { %v1412_v4 = vsel %vm1411_vm8, %v3022_v43, %v1408_v29  ;;  %1728 = vmatpush.bf16.msra.mxu0 %v3311_v41  ;;  %1741 = vmatpush.bf16.msra.mxu1 %v3323_v45  ;;  %vm1450_vm14 = vmor %vm1448_vm13, %vm1449_vm12  ;;  %v4708_v29 = vld [vmem:[#allocation10_spill] sm:$0xff] }
 0x2e4   :  { %v1417_v44 = vsel %vm1414_vm10, %v1416_v60, %v1412_v4  ;;  %v1431_v27 = vsel %vm1430_vm9, %v3024_v63, %v1427_v22  ;;  %v1445_v23 = vsub.f32 1.0, %v1444_v0  ;;  %1754 = vmatpush.bf16.msra.mxu2 %v3349_v54  ;;  %1767 = vmatpush.bf16.msra.mxu3 %v3325_v46  ;;  %v4709_v60 = vld [vmem:[#allocation12_spill] sm:$0xff]  ;;  %v4710_v22 = vld [vmem:[#allocation13_spill] sm:$0xff]  ;;  %v4711_v0 = vld [vmem:[#allocation15_spill] sm:$0xff] }
 0x2e5   :  { %v1436_v61 = vsel %vm1433_vm11, %v1435_v30, %v1431_v27  ;;  %v1459_v31 = vmul.f32 %v3028_v13, %v1417_v44  ;;  %v4712_v30 = vld [vmem:[#allocation14_spill] sm:$0xff]  ;;  %v4713_v4 = vld [vmem:[#allocation16_spill] sm:$0xff]  ;;  %v4714_v13 = vld [vmem:[#allocation17_spill] sm:$0xff] }
 0x2e6   :  { %v1458_v5 = vmul.f32 %v1436_v61, %v4106_v59  ;;  %v1446_v62 = vmul.f32 %v3026_v56, %v1445_v23  ;;  %v1452_v59 = vand.u32 2147483647, %v4185_v37  ;;  %v4715_v44 = vld [vmem:[#allocation19_spill] sm:$0xff]  ;;  %v4716_v27 = vld [vmem:[#allocation18_spill] sm:$0xff]  ;;  %v4717_v23 = vld [vmem:[#allocation20_spill] sm:$0xff] }
 0x2e7   :  { %1729 = vmatpush.bf16.msra.mxu0 %v3347_v53  ;;  %1742 = vmatpush.bf16.msra.mxu1 %v3359_v57  ;;  %v4718_v61 = vld [vmem:[#allocation21_spill] sm:$0xff] }
 0x2e8   :  { %v4204_v43 = vadd.f32 %v1459_v31, %v1458_v5  ;;  %1755 = vmatpush.bf16.msra.mxu2 %v3385_v2  ;;  %1768 = vmatpush.bf16.msra.mxu3 %v3361_v58  ;;  %v1447_v63 = vadd.f32 %v3026_v56, %v1446_v62  ;;  %vm1453_vm15 = vcmp.eq.f32.partialorder %v1452_v59, 8.507059e+37  ;;  %v4719_v31 = vld [vmem:[#allocation23_spill] sm:$0xff]  ;;  %v4720_v5 = vld [vmem:[#allocation22_spill] sm:$0xff]  ;;  %v4721_v62 = vld [vmem:[#allocation24_spill] sm:$0xff] }
 0x2e9   :  { %v4724_v59 = vld [vmem:[#allocation26_spill] sm:$0xff] }
 0x2ea   :  { %3029 = vtanh.f32 %v4204_v43  ;;  %v1451_v51 = vsel %vm1450_vm14, %v3026_v56, %v1447_v63  ;;  %v4707_v56 = vld [vmem:[#allocation11_spill] sm:$0xff]  ;;  %v4722_v63 = vld [vmem:[#allocation25_spill] sm:$0xff] }
 0x2eb   :  { %1730 = vmatpush.bf16.msra.mxu0 %v3383_v1  ;;  %1743 = vmatpush.bf16.msra.mxu1 %v3395_v6  ;;  %v1456_v11 = vsel %vm1453_vm15, %v1455_v18, %v1451_v51  ;;  %v4725_v51 = vld [vmem:[#allocation28_spill] sm:$0xff]  ;;  %v4726_v18 = vld [vmem:[#allocation29_spill] sm:$0xff] }
 0x2ec   :  { %1756 = vmatpush.bf16.msra.mxu2 %v3421_v20  ;;  %1769 = vmatpush.bf16.msra.mxu3 %v3397_v9 }
 0x2ef   :  { %1731 = vmatpush.bf16.msra.mxu0 %v3419_v19  ;;  %1744 = vmatpush.bf16.msra.mxu1 %v3434_v25 }
 0x2f0   :  { %v3030_v38 = vpop.eup %3029  ;;  %1757 = vmatpush.bf16.msra.mxu2 %v3475_v47  ;;  %1770 = vmatpush.bf16.msra.mxu3 %v3436_v26 }
 0x2f1   :  { %v1462_v37 = vmul.f32 %v3030_v38, %v1456_v11  ;;  %v4727_v38 = vld [vmem:[#allocation31_spill] sm:$0xff]  ;;  %v4728_v11 = vld [vmem:[#allocation30_spill] sm:$0xff] }
 0x2f3   :  { %v1597_v39 = vpack.c.bf16 %v1462_v37, %v1462_v37  ;;  %1732 = vmatpush.bf16.msra.mxu0 %v3467_v40  ;;  %1745 = vmatpush.bf16.msra.mxu1 %v3479_v48  ;;  %v4729_v37 = vld [vmem:[#allocation32_spill] sm:$0xff] }
 0x2f4   :  { %1758 = vmatpush.bf16.msra.mxu2 %v3521_v10  ;;  %1771 = vmatpush.bf16.msra.mxu3 %v3481_v49 }
 0x2f5   :  { %1606 = vmatmul.bf16.vlgmr.msrb.gmra.mxu0 %v1597_v39  ;;  %1619 = vmatmul.bf16.vlgmr.msrb.gmra.mxu1 %v1597_v39 }
 0x2f6   :  { %1632 = vmatmul.bf16.vlgmr.msrb.gmra.mxu2 %v1597_v39  ;;  %1645 = vmatmul.bf16.vlgmr.msrb.gmra.mxu3 %v1597_v39  ;;  %v4730_v39 = vld [vmem:[#allocation33_spill] sm:$0xff] }
 0x2f7   :  { %1852 = vmatpush.bf16.msrb.mxu0 %v3489_v52  ;;  %1865 = vmatpush.bf16.msrb.mxu1 %v3491_v55 }
 0x2f8   :  { %1878 = vmatpush.bf16.msrb.mxu2 %v4703_v15  ;;  %1891 = vmatpush.bf16.msrb.mxu3 %v4704_v35 }
 0x2fb   :  { %1853 = vmatpush.bf16.msrb.mxu0 %v4705_v24  ;;  %1866 = vmatpush.bf16.msrb.mxu1 %v4706_v50 }
 0x2fc   :  { %1879 = vmatpush.bf16.msrb.mxu2 %v4707_v56  ;;  %1892 = vmatpush.bf16.msrb.mxu3 %v4708_v29 }
 0x2ff   :  { %1854 = vmatpush.bf16.msrb.mxu0 %v4709_v60  ;;  %1867 = vmatpush.bf16.msrb.mxu1 %v4710_v22 }
 0x300   :  { %1880 = vmatpush.bf16.msrb.mxu2 %v4711_v0  ;;  %1893 = vmatpush.bf16.msrb.mxu3 %v4712_v30 }
 0x303   :  { %1855 = vmatpush.bf16.msrb.mxu0 %v4713_v4  ;;  %1868 = vmatpush.bf16.msrb.mxu1 %v4714_v13 }
 0x304   :  { %1881 = vmatpush.bf16.msrb.mxu2 %v4715_v44  ;;  %1894 = vmatpush.bf16.msrb.mxu3 %v4716_v27 }
 0x307   :  { %1856 = vmatpush.bf16.msrb.mxu0 %v4717_v23  ;;  %1869 = vmatpush.bf16.msrb.mxu1 %v4718_v61 }
 0x308   :  { %1882 = vmatpush.bf16.msrb.mxu2 %v4719_v31  ;;  %1895 = vmatpush.bf16.msrb.mxu3 %v4720_v5  ;;  %v4731_v5 = vld [vmem:[#allocation35_spill] sm:$0xff] }
 0x30b   :  { %1857 = vmatpush.bf16.msrb.mxu0 %v4721_v62  ;;  %1870 = vmatpush.bf16.msrb.mxu1 %v4722_v63  ;;  %v4732_v62 = vld [vmem:[#allocation34_spill] sm:$0xff] }
 0x30c   :  { %1883 = vmatpush.bf16.msrb.mxu2 %v4723_v36  ;;  %1896 = vmatpush.bf16.msrb.mxu3 %v4724_v59  ;;  %v2799_v59 = vld [vmem:[%s4508_s0 + $0x40] sm:$0xff] }
 0x30d   :  { %v1466_v36 = vunpack.c.l.bf16 %v2799_v59 }
 0x30f   :  { %1858 = vmatpush.bf16.msrb.mxu0 %v4725_v51  ;;  %1871 = vmatpush.bf16.msrb.mxu1 %v4726_v18  ;;  %v1467_v51 = vunpack.c.h.bf16 %v2799_v59 }
 0x310   :  { %1884 = vmatpush.bf16.msrb.mxu2 %v4727_v38  ;;  %1897 = vmatpush.bf16.msrb.mxu3 %v4728_v11 }
 0x313   :  { %1859 = vmatpush.bf16.msrb.mxu0 %v4729_v37  ;;  %1872 = vmatpush.bf16.msrb.mxu1 %v4730_v39  ;;  %v2800_v37 = vld [vmem:[%s4508_s0 + $0x48] sm:$0xff] }
 0x314   :  { %1885 = vmatpush.bf16.msrb.mxu2 %v4731_v5  ;;  %1898 = vmatpush.bf16.msrb.mxu3 %v4732_v62  ;;  %v1469_v61 = vunpack.c.h.bf16 %v2800_v37 }
 0x352   :  { %v1480_v63 = vpop.f32.mrf.mxu0  ;;  %v1493_v18 = vpop.f32.mrf.mxu1 }
 0x353   :  { %v1523_v31 = vadd.f32 %v1480_v63, %v1466_v36  ;;  %v1524_v38 = vadd.f32 %v1493_v18, %v1467_v51 }
 0x355   :  { %v2801_v11 = vmul.f32 -1.442695, %v1523_v31  ;;  %v2802_v39 = vmul.f32 -1.442695, %v1524_v38  ;;  %v1468_v31 = vunpack.c.l.bf16 %v2800_v37 }
 0x357   :  { %3031 = vpow2.f32 %v2801_v11 }
 0x358   :  { %3033 = vpow2.f32 %v2802_v39 }
 0x359   :  { %v1506_v62 = vpop.f32.mrf.mxu2  ;;  %v1519_v5 = vpop.f32.mrf.mxu3 }
 0x35a   :  { %v1526_v23 = vadd.f32 %v1519_v5, %v1469_v61  ;;  %v1482_v27 = vpop.f32.mrf.mxu0  ;;  %v1495_v44 = vpop.f32.mrf.mxu1  ;;  %v1525_v39 = vadd.f32 %v1506_v62, %v1468_v31 }
 0x35c   :  { %v2803_v13 = vmul.f32 -1.442695, %v1526_v23 }
 0x35d   :  { %v3032_v59 = vpop.eup %3031 }
 0x35e   :  { %v3034_v4 = vpop.eup %3033  ;;  %v1530_v30 = vadd.f32 1.0, %v3032_v59  ;;  %3035 = vpow2.f32 %v2803_v13 }
 0x35f   :  { %v1549_v63 = vadd.f32 1.0, %v3034_v4  ;;  %v2804_v4 = vld [vmem:[%s4509_s1 + $0x30] sm:$0xff] }
 0x360   :  { %3037 = vrcp.f32 %v1530_v30  ;;  %v1542_v5 = vand.u32 2147483648, %v1530_v30  ;;  %v1540_v59 = vand.u32 2147483647, %v1530_v30  ;;  %vm1536_vm2 = vweird.f32 %v1530_v30 }
 0x361   :  { %3039 = vrcp.f32 %v1549_v63  ;;  %v1508_v36 = vpop.f32.mrf.mxu2  ;;  %v1521_v51 = vpop.f32.mrf.mxu3  ;;  %v1561_v13 = vand.u32 2147483648, %v1549_v63  ;;  %v1559_v62 = vand.u32 2147483647, %v1549_v63  ;;  %vm1555_vm3 = vweird.f32 %v1549_v63 }
 0x362   :  { %vm1541_vm6 = vcmp.eq.f32.partialorder %v1540_v59, 8.507059e+37 }
 0x363   :  { %v1562_v22 = vor.u32 1.1754944e-38, %v1561_v13  ;;  %vm1560_vm7 = vcmp.eq.f32.partialorder %v1559_v62, 8.507059e+37 }
 0x364   :  { %v3036_v18 = vpop.eup %3035 }
 0x365   :  { %v4262_v38 = vadd.f32 1.0, %v3036_v18  ;;  %v1593_v18 = vunpack.c.l.bf16 %v2804_v4 }
 0x366   :  { %v3038_v11 = vpop.eup %3037 }
 0x367   :  { %v3040_v0 = vpop.eup %3039  ;;  %v1532_v61 = vmul.f32 %v3038_v11, %v1530_v30  ;;  %3041 = vrcp.f32 %v4262_v38  ;;  %vm1537_vm0 = vweird.f32 %v3038_v11  ;;  %vm1575_vm9 = vweird.f32 %v4262_v38 }
 0x368   :  { %v1551_v44 = vmul.f32 %v3040_v0, %v1549_v63  ;;  %3043 = vtanh.f32 %v1525_v39  ;;  %vm1556_vm1 = vweird.f32 %v3040_v0  ;;  %vm1538_vm4 = vmor %vm1536_vm2, %vm1537_vm0 }
 0x369   :  { %v1533_v27 = vsub.f32 1.0, %v1532_v61  ;;  %v1543_v61 = vor.u32 1.1754944e-38, %v1542_v5  ;;  %vm1557_vm5 = vmor %vm1555_vm3, %vm1556_vm1 }
 0x36a   :  { %v1552_v23 = vsub.f32 1.0, %v1551_v44 }
 0x36b   :  { %v1534_v37 = vmul.f32 %v3038_v11, %v1533_v27  ;;  %v1594_v27 = vunpack.c.h.bf16 %v2804_v4 }
 0x36c   :  { %v1553_v36 = vmul.f32 %v3040_v0, %v1552_v23 }
 0x36d   :  { %v3042_v51 = vpop.eup %3041  ;;  %v1535_v31 = vadd.f32 %v3038_v11, %v1534_v37 }
 0x36e   :  { %v1554_v44 = vadd.f32 %v3040_v0, %v1553_v36  ;;  %v1571_v39 = vmul.f32 %v3042_v51, %v4262_v38  ;;  %v3044_v29 = vpop.eup %3043  ;;  %vm1576_vm8 = vweird.f32 %v3042_v51 }
 0x36f   :  { %v1539_v60 = vsel %vm1538_vm4, %v3038_v11, %v1535_v31  ;;  %v2805_v11 = vld [vmem:[%s4509_s1 + $0x38] sm:$0xff]  ;;  %vm1577_vm10 = vmor %vm1575_vm9, %vm1576_vm8 }
 0x370   :  { %v1544_v56 = vsel %vm1541_vm6, %v1543_v61, %v1539_v60  ;;  %v1558_v23 = vsel %vm1557_vm5, %v3040_v0, %v1554_v44  ;;  %v1572_v50 = vsub.f32 1.0, %v1571_v39 }
 0x371   :  { %v1563_v24 = vsel %vm1560_vm7, %v1562_v22, %v1558_v23  ;;  %v1586_v37 = vmul.f32 %v3044_v29, %v1544_v56  ;;  %v1596_v56 = vunpack.c.h.bf16 %v2805_v11 }
 0x372   :  { %v1585_v30 = vmul.f32 %v1563_v24, %v4175_v14  ;;  %v1607_v63 = vpop.f32.mrf.mxu0  ;;  %v1620_v35 = vpop.f32.mrf.mxu1  ;;  %v1573_v5 = vmul.f32 %v3042_v51, %v1572_v50  ;;  %v1581_v14 = vand.u32 2147483648, %v4262_v38 }
 0x373   :  { %v1650_v36 = vadd.f32 %v1607_v63, %v1593_v18  ;;  %v1651_v15 = vadd.f32 %v1620_v35, %v1594_v27  ;;  %v1579_v35 = vand.u32 2147483647, %v4262_v38 }
 0x374   :  { %v4273_v13 = vadd.f32 %v1586_v37, %v1585_v30  ;;  %v1574_v0 = vadd.f32 %v3042_v51, %v1573_v5  ;;  %v1582_v62 = vor.u32 1.1754944e-38, %v1581_v14 }
 0x375   :  { %v2806_v4 = vmul.f32 -1.442695, %v1650_v36  ;;  %v2807_v60 = vmul.f32 -1.442695, %v1651_v15  ;;  %vm1580_vm11 = vcmp.eq.f32.partialorder %v1579_v35, 8.507059e+37 }
 0x376   :  { %3045 = vtanh.f32 %v4273_v13  ;;  %v1578_v29 = vsel %vm1577_vm10, %v3042_v51, %v1574_v0  ;;  %v1595_v51 = vunpack.c.l.bf16 %v2805_v11 }
 0x377   :  { %3047 = vpow2.f32 %v2806_v4  ;;  %v1583_v61 = vsel %vm1580_vm11, %v1582_v62, %v1578_v29 }
 0x378   :  { %3049 = vpow2.f32 %v2807_v60 }
 0x379   :  { %v1633_v24 = vpop.f32.mrf.mxu2  ;;  %v1646_v50 = vpop.f32.mrf.mxu3 }
 0x37a   :  { %v1653_v22 = vadd.f32 %v1646_v50, %v1596_v56  ;;  %v1609_v59 = vpop.f32.mrf.mxu0  ;;  %v1622_v15 = vpop.f32.mrf.mxu1  ;;  %v1652_v60 = vadd.f32 %v1633_v24, %v1595_v51 }
 0x37c   :  { %v3046_v31 = vpop.eup %3045  ;;  %v2808_v18 = vmul.f32 -1.442695, %v1653_v22 }
 0x37d   :  { %v3048_v44 = vpop.eup %3047  ;;  %v1589_v39 = vmul.f32 %v3046_v31, %v1583_v61 }
 0x37e   :  { %v3050_v27 = vpop.eup %3049  ;;  %v1657_v23 = vadd.f32 1.0, %v3048_v44  ;;  %3051 = vpow2.f32 %v2808_v18 }
 0x37f   :  { %v1676_v37 = vadd.f32 1.0, %v3050_v27  ;;  %v1724_v38 = vpack.c.bf16 %v1589_v39, %v1589_v39 }
 0x380   :  { %3053 = vrcp.f32 %v1657_v23  ;;  %v1669_v50 = vand.u32 2147483648, %v1657_v23  ;;  %v1667_v24 = vand.u32 2147483647, %v1657_v23  ;;  %vm1663_vm14 = vweird.f32 %v1657_v23 }
 0x381   :  { %3055 = vrcp.f32 %v1676_v37  ;;  %v1635_v30 = vpop.f32.mrf.mxu2  ;;  %v1648_v63 = vpop.f32.mrf.mxu3  ;;  %1733 = vmatmul.bf16.vlgmr.msra.gmra.mxu0 %v1724_v38  ;;  %1746 = vmatmul.bf16.vlgmr.msra.gmra.mxu1 %v1724_v38  ;;  %v1688_v29 = vand.u32 2147483648, %v1676_v37  ;;  %v1686_v15 = vand.u32 2147483647, %v1676_v37  ;;  %vm1682_vm15 = vweird.f32 %v1676_v37 }
 0x382   :  { %1759 = vmatmul.bf16.vlgmr.msra.gmra.mxu2 %v1724_v38  ;;  %1772 = vmatmul.bf16.vlgmr.msra.gmra.mxu3 %v1724_v38  ;;  %v1670_v18 = vor.u32 1.1754944e-38, %v1669_v50  ;;  %vm1668_vm2 = vcmp.eq.f32.partialorder %v1667_v24, 8.507059e+37  ;;  %v4734_v24 = vld [vmem:[#allocation6_spill] sm:$0xff] }
 0x383   :  { %1979 = vmatpush.bf16.msra.mxu0 %v3199_v3  ;;  %1992 = vmatpush.bf16.msra.mxu1 %v3210_v7  ;;  %v1689_v39 = vor.u32 1.1754944e-38, %v1688_v29  ;;  %vm1687_vm3 = vcmp.eq.f32.partialorder %v1686_v15, 8.507059e+37  ;;  %v4736_v15 = vld [vmem:[#allocation9_spill] sm:$0xff] }
 0x384   :  { %v3052_v5 = vpop.eup %3051  ;;  %2005 = vmatpush.bf16.msra.mxu2 %v3250_v21  ;;  %2018 = vmatpush.bf16.msra.mxu3 %v3212_v8 }
 0x385   :  { %v4283_v36 = vadd.f32 1.0, %v3052_v5 }
 0x386   :  { %v3054_v4 = vpop.eup %3053 }
 0x387   :  { %v3056_v0 = vpop.eup %3055  ;;  %v1659_v56 = vmul.f32 %v3054_v4, %v1657_v23  ;;  %3057 = vrcp.f32 %v4283_v36  ;;  %1980 = vmatpush.bf16.msra.mxu0 %v3224_v12  ;;  %1993 = vmatpush.bf16.msra.mxu1 %v3237_v16  ;;  %vm1664_vm12 = vweird.f32 %v3054_v4  ;;  %vm1702_vm5 = vweird.f32 %v4283_v36 }
 0x388   :  { %v1678_v11 = vmul.f32 %v3056_v0, %v1676_v37  ;;  %2006 = vmatpush.bf16.msra.mxu2 %v3289_v34  ;;  %2019 = vmatpush.bf16.msra.mxu3 %v3239_v17  ;;  %3059 = vtanh.f32 %v1652_v60  ;;  %vm1683_vm13 = vweird.f32 %v3056_v0  ;;  %vm1665_vm0 = vmor %vm1663_vm14, %vm1664_vm12 }
 0x389   :  { %v1660_v14 = vsub.f32 1.0, %v1659_v56  ;;  %vm1684_vm1 = vmor %vm1682_vm15, %vm1683_vm13  ;;  %v1708_v56 = vand.u32 2147483648, %v4283_v36 }
 0x38a   :  { %v1679_v35 = vsub.f32 1.0, %v1678_v11 }
 0x38b   :  { %v1661_v22 = vmul.f32 %v3054_v4, %v1660_v14  ;;  %1981 = vmatpush.bf16.msra.mxu0 %v3272_v28  ;;  %1994 = vmatpush.bf16.msra.mxu1 %v3285_v32  ;;  %v1709_v14 = vor.u32 1.1754944e-38, %v1708_v56  ;;  %v4753_v56 = vld [vmem:[#allocation27_spill] sm:$0xff] }
 0x38c   :  { %v1680_v59 = vmul.f32 %v3056_v0, %v1679_v35  ;;  %2007 = vmatpush.bf16.msra.mxu2 %v3313_v42  ;;  %2020 = vmatpush.bf16.msra.mxu3 %v3287_v33 }
 0x38d   :  { %v3058_v62 = vpop.eup %3057  ;;  %v1662_v31 = vadd.f32 %v3054_v4, %v1661_v22  ;;  %v4733_v22 = vld [vmem:[#allocation7_spill] sm:$0xff] }
 0x38e   :  { %v1681_v61 = vadd.f32 %v3056_v0, %v1680_v59  ;;  %v1698_v44 = vmul.f32 %v3058_v62, %v4283_v36  ;;  %v3060_v38 = vpop.eup %3059  ;;  %vm1703_vm4 = vweird.f32 %v3058_v62  ;;  %v4735_v59 = vld [vmem:[#allocation8_spill] sm:$0xff] }
 0x38f   :  { %v1666_v27 = vsel %vm1665_vm0, %v3054_v4, %v1662_v31  ;;  %1982 = vmatpush.bf16.msra.mxu0 %v3311_v41  ;;  %1995 = vmatpush.bf16.msra.mxu1 %v3323_v45  ;;  %vm1704_vm6 = vmor %vm1702_vm5, %vm1703_vm4  ;;  %v4738_v31 = vld [vmem:[#allocation10_spill] sm:$0xff] }
 0x390   :  { %v1671_v30 = vsel %vm1668_vm2, %v1670_v18, %v1666_v27  ;;  %v1685_v63 = vsel %vm1684_vm1, %v3056_v0, %v1681_v61  ;;  %v1699_v51 = vsub.f32 1.0, %v1698_v44  ;;  %2008 = vmatpush.bf16.msra.mxu2 %v3349_v54  ;;  %2021 = vmatpush.bf16.msra.mxu3 %v3325_v46  ;;  %v4739_v18 = vld [vmem:[#allocation12_spill] sm:$0xff]  ;;  %v4740_v61 = vld [vmem:[#allocation13_spill] sm:$0xff]  ;;  %v4741_v44 = vld [vmem:[#allocation15_spill] sm:$0xff] }
 0x391   :  { %v1690_v23 = vsel %vm1687_vm3, %v1689_v39, %v1685_v63  ;;  %v1713_v37 = vmul.f32 %v3060_v38, %v1671_v30  ;;  %v4742_v39 = vld [vmem:[#allocation14_spill] sm:$0xff]  ;;  %v4743_v27 = vld [vmem:[#allocation16_spill] sm:$0xff]  ;;  %v4744_v38 = vld [vmem:[#allocation17_spill] sm:$0xff] }
 0x392   :  { %v1712_v5 = vmul.f32 %v1690_v23, %v4204_v43  ;;  %v1700_v60 = vmul.f32 %v3058_v62, %v1699_v51  ;;  %v1706_v43 = vand.u32 2147483647, %v4283_v36  ;;  %v4745_v30 = vld [vmem:[#allocation19_spill] sm:$0xff]  ;;  %v4746_v63 = vld [vmem:[#allocation18_spill] sm:$0xff]  ;;  %v4747_v51 = vld [vmem:[#allocation20_spill] sm:$0xff] }
 0x393   :  { %1983 = vmatpush.bf16.msra.mxu0 %v3347_v53  ;;  %1996 = vmatpush.bf16.msra.mxu1 %v3359_v57  ;;  %v4748_v23 = vld [vmem:[#allocation21_spill] sm:$0xff] }
 0x394   :  { %v4302_v4 = vadd.f32 %v1713_v37, %v1712_v5  ;;  %2009 = vmatpush.bf16.msra.mxu2 %v3385_v2  ;;  %2022 = vmatpush.bf16.msra.mxu3 %v3361_v58  ;;  %v1701_v0 = vadd.f32 %v3058_v62, %v1700_v60  ;;  %vm1707_vm7 = vcmp.eq.f32.partialorder %v1706_v43, 8.507059e+37  ;;  %v4749_v37 = vld [vmem:[#allocation23_spill] sm:$0xff]  ;;  %v4750_v5 = vld [vmem:[#allocation22_spill] sm:$0xff]  ;;  %v4751_v60 = vld [vmem:[#allocation24_spill] sm:$0xff] }
 0x395   :  { %v4754_v43 = vld [vmem:[#allocation26_spill] sm:$0xff] }
 0x396   :  { %3061 = vtanh.f32 %v4302_v4  ;;  %v1705_v11 = vsel %vm1704_vm6, %v3058_v62, %v1701_v0  ;;  %v4737_v62 = vld [vmem:[#allocation11_spill] sm:$0xff]  ;;  %v4752_v0 = vld [vmem:[#allocation25_spill] sm:$0xff] }
 0x397   :  { %1984 = vmatpush.bf16.msra.mxu0 %v3383_v1  ;;  %1997 = vmatpush.bf16.msra.mxu1 %v3395_v6  ;;  %v1710_v50 = vsel %vm1707_vm7, %v1709_v14, %v1705_v11  ;;  %v4755_v11 = vld [vmem:[#allocation28_spill] sm:$0xff]  ;;  %v4756_v14 = vld [vmem:[#allocation29_spill] sm:$0xff] }
 0x398   :  { %2010 = vmatpush.bf16.msra.mxu2 %v3421_v20  ;;  %2023 = vmatpush.bf16.msra.mxu3 %v3397_v9 }
 0x39b   :  { %1985 = vmatpush.bf16.msra.mxu0 %v3419_v19  ;;  %1998 = vmatpush.bf16.msra.mxu1 %v3434_v25 }
 0x39c   :  { %v3062_v35 = vpop.eup %3061  ;;  %2011 = vmatpush.bf16.msra.mxu2 %v3475_v47  ;;  %2024 = vmatpush.bf16.msra.mxu3 %v3436_v26 }
 0x39d   :  { %v1716_v36 = vmul.f32 %v3062_v35, %v1710_v50  ;;  %v4757_v35 = vld [vmem:[#allocation31_spill] sm:$0xff]  ;;  %v4758_v50 = vld [vmem:[#allocation30_spill] sm:$0xff] }
 0x39f   :  { %v1851_v29 = vpack.c.bf16 %v1716_v36, %v1716_v36  ;;  %1986 = vmatpush.bf16.msra.mxu0 %v3467_v40  ;;  %1999 = vmatpush.bf16.msra.mxu1 %v3479_v48  ;;  %v4759_v36 = vld [vmem:[#allocation32_spill] sm:$0xff] }
 0x3a0   :  { %2012 = vmatpush.bf16.msra.mxu2 %v3521_v10  ;;  %2025 = vmatpush.bf16.msra.mxu3 %v3481_v49 }
 0x3a1   :  { %1860 = vmatmul.bf16.vlgmr.msrb.gmra.mxu0 %v1851_v29  ;;  %1873 = vmatmul.bf16.vlgmr.msrb.gmra.mxu1 %v1851_v29 }
 0x3a2   :  { %1886 = vmatmul.bf16.vlgmr.msrb.gmra.mxu2 %v1851_v29  ;;  %1899 = vmatmul.bf16.vlgmr.msrb.gmra.mxu3 %v1851_v29  ;;  %v4760_v29 = vld [vmem:[#allocation33_spill] sm:$0xff] }
 0x3a3   :  { %2106 = vmatpush.bf16.msrb.mxu0 %v3489_v52  ;;  %2119 = vmatpush.bf16.msrb.mxu1 %v3491_v55 }
 0x3a4   :  { %2132 = vmatpush.bf16.msrb.mxu2 %v4733_v22  ;;  %2145 = vmatpush.bf16.msrb.mxu3 %v4734_v24 }
 0x3a7   :  { %2107 = vmatpush.bf16.msrb.mxu0 %v4735_v59  ;;  %2120 = vmatpush.bf16.msrb.mxu1 %v4736_v15 }
 0x3a8   :  { %2133 = vmatpush.bf16.msrb.mxu2 %v4737_v62  ;;  %2146 = vmatpush.bf16.msrb.mxu3 %v4738_v31 }
 0x3ab   :  { %2108 = vmatpush.bf16.msrb.mxu0 %v4739_v18  ;;  %2121 = vmatpush.bf16.msrb.mxu1 %v4740_v61 }
 0x3ac   :  { %2134 = vmatpush.bf16.msrb.mxu2 %v4741_v44  ;;  %2147 = vmatpush.bf16.msrb.mxu3 %v4742_v39 }
 0x3af   :  { %2109 = vmatpush.bf16.msrb.mxu0 %v4743_v27  ;;  %2122 = vmatpush.bf16.msrb.mxu1 %v4744_v38 }
 0x3b0   :  { %2135 = vmatpush.bf16.msrb.mxu2 %v4745_v30  ;;  %2148 = vmatpush.bf16.msrb.mxu3 %v4746_v63 }
 0x3b3   :  { %2110 = vmatpush.bf16.msrb.mxu0 %v4747_v51  ;;  %2123 = vmatpush.bf16.msrb.mxu1 %v4748_v23 }
 0x3b4   :  { %2136 = vmatpush.bf16.msrb.mxu2 %v4749_v37  ;;  %2149 = vmatpush.bf16.msrb.mxu3 %v4750_v5  ;;  %v4761_v5 = vld [vmem:[#allocation35_spill] sm:$0xff] }
 0x3b7   :  { %2111 = vmatpush.bf16.msrb.mxu0 %v4751_v60  ;;  %2124 = vmatpush.bf16.msrb.mxu1 %v4752_v0  ;;  %v4762_v60 = vld [vmem:[#allocation34_spill] sm:$0xff] }
 0x3b8   :  { %2137 = vmatpush.bf16.msrb.mxu2 %v4753_v56  ;;  %2150 = vmatpush.bf16.msrb.mxu3 %v4754_v43  ;;  %v2809_v43 = vld [vmem:[%s4508_s0 + $0x50] sm:$0xff] }
 0x3b9   :  { %v1720_v56 = vunpack.c.l.bf16 %v2809_v43 }
 0x3bb   :  { %2112 = vmatpush.bf16.msrb.mxu0 %v4755_v11  ;;  %2125 = vmatpush.bf16.msrb.mxu1 %v4756_v14  ;;  %v1721_v11 = vunpack.c.h.bf16 %v2809_v43 }
 0x3bc   :  { %2138 = vmatpush.bf16.msrb.mxu2 %v4757_v35  ;;  %2151 = vmatpush.bf16.msrb.mxu3 %v4758_v50 }
 0x3bf   :  { %2113 = vmatpush.bf16.msrb.mxu0 %v4759_v36  ;;  %2126 = vmatpush.bf16.msrb.mxu1 %v4760_v29  ;;  %v2810_v36 = vld [vmem:[%s4508_s0 + $0x58] sm:$0xff] }
 0x3c0   :  { %2139 = vmatpush.bf16.msrb.mxu2 %v4761_v5  ;;  %2152 = vmatpush.bf16.msrb.mxu3 %v4762_v60  ;;  %v1723_v23 = vunpack.c.h.bf16 %v2810_v36 }
 0x3fe   :  { %v1734_v0 = vpop.f32.mrf.mxu0  ;;  %v1747_v14 = vpop.f32.mrf.mxu1 }
 0x3ff   :  { %v1777_v37 = vadd.f32 %v1734_v0, %v1720_v56  ;;  %v1778_v35 = vadd.f32 %v1747_v14, %v1721_v11 }
 0x401   :  { %v2811_v50 = vmul.f32 -1.442695, %v1777_v37  ;;  %v2812_v29 = vmul.f32 -1.442695, %v1778_v35  ;;  %v1722_v37 = vunpack.c.l.bf16 %v2810_v36 }
 0x403   :  { %3063 = vpow2.f32 %v2811_v50 }
 0x404   :  { %3065 = vpow2.f32 %v2812_v29 }
 0x405   :  { %v1760_v60 = vpop.f32.mrf.mxu2  ;;  %v1773_v5 = vpop.f32.mrf.mxu3 }
 0x406   :  { %v1780_v51 = vadd.f32 %v1773_v5, %v1723_v23  ;;  %v1736_v63 = vpop.f32.mrf.mxu0  ;;  %v1749_v30 = vpop.f32.mrf.mxu1  ;;  %v1779_v29 = vadd.f32 %v1760_v60, %v1722_v37 }
 0x408   :  { %v2813_v38 = vmul.f32 -1.442695, %v1780_v51 }
 0x409   :  { %v3064_v43 = vpop.eup %3063 }
 0x40a   :  { %v3066_v27 = vpop.eup %3065  ;;  %v1784_v39 = vadd.f32 1.0, %v3064_v43  ;;  %3067 = vpow2.f32 %v2813_v38 }
 0x40b   :  { %v1803_v0 = vadd.f32 1.0, %v3066_v27  ;;  %v2814_v27 = vld [vmem:[%s4509_s1 + $0x20] sm:$0xff] }
 0x40c   :  { %3069 = vrcp.f32 %v1784_v39  ;;  %v1796_v5 = vand.u32 2147483648, %v1784_v39  ;;  %v1794_v43 = vand.u32 2147483647, %v1784_v39  ;;  %vm1790_vm10 = vweird.f32 %v1784_v39 }
 0x40d   :  { %3071 = vrcp.f32 %v1803_v0  ;;  %v1762_v56 = vpop.f32.mrf.mxu2  ;;  %v1775_v11 = vpop.f32.mrf.mxu3  ;;  %v1815_v38 = vand.u32 2147483648, %v1803_v0  ;;  %v1813_v60 = vand.u32 2147483647, %v1803_v0  ;;  %vm1809_vm11 = vweird.f32 %v1803_v0 }
 0x40e   :  { %vm1795_vm14 = vcmp.eq.f32.partialorder %v1794_v43, 8.507059e+37 }
 0x40f   :  { %v1816_v61 = vor.u32 1.1754944e-38, %v1815_v38  ;;  %vm1814_vm15 = vcmp.eq.f32.partialorder %v1813_v60, 8.507059e+37 }
 0x410   :  { %v3068_v14 = vpop.eup %3067 }
 0x411   :  { %v4360_v35 = vadd.f32 1.0, %v3068_v14  ;;  %v1847_v14 = vunpack.c.l.bf16 %v2814_v27 }
 0x412   :  { %v3070_v50 = vpop.eup %3069 }
 0x413   :  { %v3072_v44 = vpop.eup %3071  ;;  %v1786_v23 = vmul.f32 %v3070_v50, %v1784_v39  ;;  %3073 = vrcp.f32 %v4360_v35  ;;  %vm1791_vm8 = vweird.f32 %v3070_v50  ;;  %vm1829_vm1 = vweird.f32 %v4360_v35 }
 0x414   :  { %v1805_v30 = vmul.f32 %v3072_v44, %v1803_v0  ;;  %3075 = vtanh.f32 %v1779_v29  ;;  %vm1810_vm9 = vweird.f32 %v3072_v44  ;;  %vm1792_vm12 = vmor %vm1790_vm10, %vm1791_vm8 }
 0x415   :  { %v1787_v63 = vsub.f32 1.0, %v1786_v23  ;;  %v1797_v23 = vor.u32 1.1754944e-38, %v1796_v5  ;;  %vm1811_vm13 = vmor %vm1809_vm11, %vm1810_vm9 }
 0x416   :  { %v1806_v51 = vsub.f32 1.0, %v1805_v30 }
 0x417   :  { %v1788_v36 = vmul.f32 %v3070_v50, %v1787_v63  ;;  %v1848_v63 = vunpack.c.h.bf16 %v2814_v27 }
 0x418   :  { %v1807_v56 = vmul.f32 %v3072_v44, %v1806_v51 }
 0x419   :  { %v3074_v11 = vpop.eup %3073  ;;  %v1789_v37 = vadd.f32 %v3070_v50, %v1788_v36 }
 0x41a   :  { %v1808_v30 = vadd.f32 %v3072_v44, %v1807_v56  ;;  %v1825_v29 = vmul.f32 %v3074_v11, %v4360_v35  ;;  %v3076_v31 = vpop.eup %3075  ;;  %vm1830_vm0 = vweird.f32 %v3074_v11 }
 0x41b   :  { %v1793_v18 = vsel %vm1792_vm12, %v3070_v50, %v1789_v37  ;;  %v2815_v50 = vld [vmem:[%s4509_s1 + $0x28] sm:$0xff]  ;;  %vm1831_vm2 = vmor %vm1829_vm1, %vm1830_vm0 }
 0x41c   :  { %v1798_v62 = vsel %vm1795_vm14, %v1797_v23, %v1793_v18  ;;  %v1812_v51 = vsel %vm1811_vm13, %v3072_v44, %v1808_v30  ;;  %v1826_v15 = vsub.f32 1.0, %v1825_v29 }
 0x41d   :  { %v1817_v59 = vsel %vm1814_vm15, %v1816_v61, %v1812_v51  ;;  %v1840_v36 = vmul.f32 %v3076_v31, %v1798_v62  ;;  %v1835_v62 = vand.u32 2147483648, %v4360_v35 }
 0x41e   :  { %v1839_v39 = vmul.f32 %v1817_v59, %v4273_v13  ;;  %v1827_v0 = vmul.f32 %v3074_v11, %v1826_v15  ;;  %v1861_v24 = vpop.f32.mrf.mxu0  ;;  %v1874_v5 = vpop.f32.mrf.mxu1  ;;  %v1850_v13 = vunpack.c.h.bf16 %v2815_v50 }
 0x41f   :  { %v1904_v56 = vadd.f32 %v1861_v24, %v1847_v14  ;;  %v1905_v22 = vadd.f32 %v1874_v5, %v1848_v63  ;;  %v1833_v24 = vand.u32 2147483647, %v4360_v35  ;;  %v1836_v61 = vor.u32 1.1754944e-38, %v1835_v62 }
 0x420   :  { %v4371_v38 = vadd.f32 %v1840_v36, %v1839_v39  ;;  %v1828_v27 = vadd.f32 %v3074_v11, %v1827_v0 }
 0x421   :  { %v2816_v18 = vmul.f32 -1.442695, %v1904_v56  ;;  %v2817_v44 = vmul.f32 -1.442695, %v1905_v22  ;;  %vm1834_vm3 = vcmp.eq.f32.partialorder %v1833_v24, 8.507059e+37 }
 0x422   :  { %3077 = vtanh.f32 %v4371_v38  ;;  %v1832_v31 = vsel %vm1831_vm2, %v3074_v11, %v1828_v27  ;;  %v1849_v11 = vunpack.c.l.bf16 %v2815_v50 }
 0x423   :  { %3079 = vpow2.f32 %v2816_v18  ;;  %v1837_v23 = vsel %vm1834_vm3, %v1836_v61, %v1832_v31 }
 0x424   :  { %3081 = vpow2.f32 %v2817_v44 }
 0x425   :  { %v1887_v59 = vpop.f32.mrf.mxu2  ;;  %v1900_v15 = vpop.f32.mrf.mxu3 }
 0x426   :  { %v1907_v43 = vadd.f32 %v1900_v15, %v1850_v13  ;;  %v1863_v60 = vpop.f32.mrf.mxu0  ;;  %v1876_v22 = vpop.f32.mrf.mxu1  ;;  %v1906_v44 = vadd.f32 %v1887_v59, %v1849_v11  ;;  %v4785_v11 = vld [vmem:[#allocation28_spill] sm:$0xff] }
 0x428   :  { %v3078_v37 = vpop.eup %3077  ;;  %v2818_v14 = vmul.f32 -1.442695, %v1907_v43 }
 0x429   :  { %v3080_v30 = vpop.eup %3079  ;;  %v1843_v29 = vmul.f32 %v3078_v37, %v1837_v23  ;;  %v4776_v23 = vld [vmem:[#allocation18_spill] sm:$0xff] }
 0x42a   :  { %v3082_v63 = vpop.eup %3081  ;;  %v1911_v51 = vadd.f32 1.0, %v3080_v30  ;;  %3083 = vpow2.f32 %v2818_v14  ;;  %v4777_v30 = vld [vmem:[#allocation20_spill] sm:$0xff] }
 0x42b   :  { %v1930_v35 = vadd.f32 1.0, %v3082_v63  ;;  %v1978_v36 = vpack.c.bf16 %v1843_v29, %v1843_v29  ;;  %v4778_v29 = vld [vmem:[#allocation21_spill] sm:$0xff]  ;;  %v4779_v63 = vld [vmem:[#allocation23_spill] sm:$0xff] }
 0x42c   :  { %3085 = vrcp.f32 %v1911_v51  ;;  %v1921_v24 = vand.u32 2147483647, %v1911_v51  ;;  %vm1917_vm6 = vweird.f32 %v1911_v51 }
 0x42d   :  { %3087 = vrcp.f32 %v1930_v35  ;;  %v1889_v39 = vpop.f32.mrf.mxu2  ;;  %v1902_v0 = vpop.f32.mrf.mxu3  ;;  %1987 = vmatmul.bf16.vlgmr.msra.gmra.mxu0 %v1978_v36  ;;  %2000 = vmatmul.bf16.vlgmr.msra.gmra.mxu1 %v1978_v36  ;;  %v1942_v50 = vand.u32 2147483648, %v1930_v35  ;;  %vm1936_vm7 = vweird.f32 %v1930_v35 }
 0x42e   :  { %2013 = vmatmul.bf16.vlgmr.msra.gmra.mxu2 %v1978_v36  ;;  %2026 = vmatmul.bf16.vlgmr.msra.gmra.mxu3 %v1978_v36  ;;  %vm1922_vm10 = vcmp.eq.f32.partialorder %v1921_v24, 8.507059e+37  ;;  %v4782_v36 = vld [vmem:[#allocation25_spill] sm:$0xff]  ;;  %v4783_v39 = vld [vmem:[#allocation27_spill] sm:$0xff]  ;;  %v4784_v0 = vld [vmem:[#allocation26_spill] sm:$0xff] }
 0x42f   :  { %2233 = vmatpush.bf16.msra.mxu0 %v3199_v3  ;;  %2246 = vmatpush.bf16.msra.mxu1 %v3210_v7 }
 0x430   :  { %v3084_v5 = vpop.eup %3083  ;;  %2259 = vmatpush.bf16.msra.mxu2 %v3250_v21  ;;  %2272 = vmatpush.bf16.msra.mxu3 %v3212_v8  ;;  %v1923_v8 = vand.u32 2147483648, %v1911_v51 }
 0x431   :  { %v4381_v56 = vadd.f32 1.0, %v3084_v5  ;;  %v4786_v5 = vld [vmem:[#allocation29_spill] sm:$0xff] }
 0x432   :  { %v3086_v18 = vpop.eup %3085  ;;  %v1924_v59 = vor.u32 1.1754944e-38, %v1923_v8 }
 0x433   :  { %v3088_v27 = vpop.eup %3087  ;;  %v1913_v62 = vmul.f32 %v3086_v18, %v1911_v51  ;;  %3089 = vrcp.f32 %v4381_v56  ;;  %2234 = vmatpush.bf16.msra.mxu0 %v3224_v12  ;;  %2247 = vmatpush.bf16.msra.mxu1 %v3237_v16  ;;  %vm1918_vm4 = vweird.f32 %v3086_v18  ;;  %v1940_v16 = vand.u32 2147483647, %v1930_v35  ;;  %v4780_v51 = vld [vmem:[#allocation22_spill] sm:$0xff] }
 0x434   :  { %v1932_v3 = vmul.f32 %v3088_v27, %v1930_v35  ;;  %2260 = vmatpush.bf16.msra.mxu2 %v3289_v34  ;;  %2273 = vmatpush.bf16.msra.mxu3 %v3239_v17  ;;  %3091 = vtanh.f32 %v1906_v44  ;;  %vm1937_vm5 = vweird.f32 %v3088_v27  ;;  %vm1919_vm8 = vmor %vm1917_vm6, %vm1918_vm4  ;;  %vm1956_vm13 = vweird.f32 %v4381_v56  ;;  %v4781_v35 = vld [vmem:[#allocation24_spill] sm:$0xff] }
 0x435   :  { %v1914_v7 = vsub.f32 1.0, %v1913_v62  ;;  %vm1938_vm9 = vmor %vm1936_vm7, %vm1937_vm5  ;;  %vm1941_vm11 = vcmp.eq.f32.partialorder %v1940_v16, 8.507059e+37  ;;  %v4789_v44 = vld [vmem:[#allocation32_spill] sm:$0xff]  ;;  %v4791_v62 = vld [vmem:[#allocation35_spill] sm:$0xff] }
 0x436   :  { %v1933_v21 = vsub.f32 1.0, %v1932_v3  ;;  %v4792_v3 = vld [vmem:[#allocation34_spill] sm:$0xff]  ;;  %v2820_v16 = vld [vmem:[%s4508_s0 + $0x68] sm:$0xff] }
 0x437   :  { %v1915_v13 = vmul.f32 %v3086_v18, %v1914_v7  ;;  %2235 = vmatpush.bf16.msra.mxu0 %v3272_v28  ;;  %2248 = vmatpush.bf16.msra.mxu1 %v3285_v32  ;;  %v1943_v28 = vor.u32 1.1754944e-38, %v1942_v50  ;;  %v2819_v7 = vld [vmem:[%s4508_s0 + $0x60] sm:$0xff] }
 0x438   :  { %v1934_v12 = vmul.f32 %v3088_v27, %v1933_v21  ;;  %2261 = vmatpush.bf16.msra.mxu2 %v3313_v42  ;;  %2274 = vmatpush.bf16.msra.mxu3 %v3287_v33  ;;  %v1974_v21 = vunpack.c.l.bf16 %v2819_v7  ;;  %v1975_v8 = vunpack.c.h.bf16 %v2819_v7 }
 0x439   :  { %v3090_v17 = vpop.eup %3089  ;;  %v1916_v34 = vadd.f32 %v3086_v18, %v1915_v13 }
 0x43a   :  { %v1935_v15 = vadd.f32 %v3088_v27, %v1934_v12  ;;  %v1952_v31 = vmul.f32 %v3090_v17, %v4381_v56  ;;  %v3092_v32 = vpop.eup %3091  ;;  %vm1957_vm12 = vweird.f32 %v3090_v17 }
 0x43b   :  { %v1920_v61 = vsel %vm1919_vm8, %v3086_v18, %v1916_v34  ;;  %2236 = vmatpush.bf16.msra.mxu0 %v3311_v41  ;;  %2249 = vmatpush.bf16.msra.mxu1 %v3323_v45  ;;  %vm1958_vm14 = vmor %vm1956_vm13, %vm1957_vm12  ;;  %v4788_v18 = vld [vmem:[#allocation30_spill] sm:$0xff] }
 0x43c   :  { %v1925_v42 = vsel %vm1922_vm10, %v1924_v59, %v1920_v61  ;;  %v1939_v33 = vsel %vm1938_vm9, %v3088_v27, %v1935_v15  ;;  %v1953_v43 = vsub.f32 1.0, %v1952_v31  ;;  %2262 = vmatpush.bf16.msra.mxu2 %v3349_v54  ;;  %2275 = vmatpush.bf16.msra.mxu3 %v3325_v46  ;;  %v1962_v46 = vand.u32 2147483648, %v4381_v56  ;;  %v4790_v27 = vld [vmem:[#allocation33_spill] sm:$0xff] }
 0x43d   :  { %v1944_v60 = vsel %vm1941_vm11, %v1943_v28, %v1939_v33  ;;  %v1967_v22 = vmul.f32 %v3092_v32, %v1925_v42  ;;  %v1960_v54 = vand.u32 2147483647, %v4381_v56  ;;  %v4787_v56 = vld [vmem:[#allocation31_spill] sm:$0xff]  ;;  %v1977_v59 = vunpack.c.h.bf16 %v2820_v16 }
 0x43e   :  { %v1966_v37 = vmul.f32 %v1944_v60, %v4302_v4  ;;  %v1954_v14 = vmul.f32 %v3090_v17, %v1953_v43  ;;  %v4775_v4 = vld [vmem:[#allocation19_spill] sm:$0xff] }
 0x43f   :  { %2237 = vmatpush.bf16.msra.mxu0 %v3347_v53  ;;  %2250 = vmatpush.bf16.msra.mxu1 %v3359_v57  ;;  %v1963_v57 = vor.u32 1.1754944e-38, %v1962_v46  ;;  %vm1961_vm15 = vcmp.eq.f32.partialorder %v1960_v54, 8.507059e+37 }
 0x440   :  { %v4400_v41 = vadd.f32 %v1967_v22, %v1966_v37  ;;  %2263 = vmatpush.bf16.msra.mxu2 %v3385_v2  ;;  %2276 = vmatpush.bf16.msra.mxu3 %v3361_v58  ;;  %v1955_v45 = vadd.f32 %v3090_v17, %v1954_v14 }
 0x442   :  { %3093 = vtanh.f32 %v4400_v41  ;;  %v1959_v53 = vsel %vm1958_vm14, %v3090_v17, %v1955_v45  ;;  %v1976_v45 = vunpack.c.l.bf16 %v2820_v16 }
 0x443   :  { %2238 = vmatpush.bf16.msra.mxu0 %v3383_v1  ;;  %2251 = vmatpush.bf16.msra.mxu1 %v3395_v6  ;;  %v1964_v2 = vsel %vm1961_vm15, %v1963_v57, %v1959_v53 }
 0x444   :  { %2264 = vmatpush.bf16.msra.mxu2 %v3421_v20  ;;  %2277 = vmatpush.bf16.msra.mxu3 %v3397_v9  ;;  %v4763_v9 = vld [vmem:[#allocation7_spill] sm:$0xff]  ;;  %v4765_v20 = vld [vmem:[#allocation8_spill] sm:$0xff] }
 0x447   :  { %2239 = vmatpush.bf16.msra.mxu0 %v3419_v19  ;;  %2252 = vmatpush.bf16.msra.mxu1 %v3434_v25  ;;  %v4764_v19 = vld [vmem:[#allocation6_spill] sm:$0xff]  ;;  %v4766_v25 = vld [vmem:[#allocation9_spill] sm:$0xff] }
 0x448   :  { %v3094_v58 = vpop.eup %3093  ;;  %2265 = vmatpush.bf16.msra.mxu2 %v3475_v47  ;;  %2278 = vmatpush.bf16.msra.mxu3 %v3436_v26  ;;  %v4767_v26 = vld [vmem:[#allocation11_spill] sm:$0xff]  ;;  %v4769_v47 = vld [vmem:[#allocation12_spill] sm:$0xff] }
 0x449   :  { %v1970_v1 = vmul.f32 %v3094_v58, %v1964_v2 }
 0x44b   :  { %v2105_v6 = vpack.c.bf16 %v1970_v1, %v1970_v1  ;;  %2240 = vmatpush.bf16.msra.mxu0 %v3467_v40  ;;  %2253 = vmatpush.bf16.msra.mxu1 %v3479_v48  ;;  %v4768_v40 = vld [vmem:[#allocation10_spill] sm:$0xff]  ;;  %v4770_v48 = vld [vmem:[#allocation13_spill] sm:$0xff] }
 0x44c   :  { %2266 = vmatpush.bf16.msra.mxu2 %v3521_v10  ;;  %2279 = vmatpush.bf16.msra.mxu3 %v3481_v49  ;;  %v4771_v49 = vld [vmem:[#allocation15_spill] sm:$0xff]  ;;  %v4774_v10 = vld [vmem:[#allocation17_spill] sm:$0xff] }
 0x44d   :  { %2114 = vmatmul.bf16.vlgmr.msrb.gmra.mxu0 %v2105_v6  ;;  %2127 = vmatmul.bf16.vlgmr.msrb.gmra.mxu1 %v2105_v6 }
 0x44e   :  { %2140 = vmatmul.bf16.vlgmr.msrb.gmra.mxu2 %v2105_v6  ;;  %2153 = vmatmul.bf16.vlgmr.msrb.gmra.mxu3 %v2105_v6 }
 0x44f   :  { %2359 = vmatpush.bf16.msrb.mxu0 %v3489_v52  ;;  %2372 = vmatpush.bf16.msrb.mxu1 %v3491_v55  ;;  %v4772_v52 = vld [vmem:[#allocation14_spill] sm:$0xff]  ;;  %v4773_v55 = vld [vmem:[#allocation16_spill] sm:$0xff] }
 0x450   :  { %2385 = vmatpush.bf16.msrb.mxu2 %v4763_v9  ;;  %2398 = vmatpush.bf16.msrb.mxu3 %v4764_v19 }
 0x453   :  { %2360 = vmatpush.bf16.msrb.mxu0 %v4765_v20  ;;  %2373 = vmatpush.bf16.msrb.mxu1 %v4766_v25  ;;  %v2824_v20 = vld [vmem:[%s4509_s1 + $0x10] sm:$0xff] }
 0x454   :  { %2386 = vmatpush.bf16.msrb.mxu2 %v4767_v26  ;;  %2399 = vmatpush.bf16.msrb.mxu3 %v4768_v40 }
 0x457   :  { %2361 = vmatpush.bf16.msrb.mxu0 %v4769_v47  ;;  %2374 = vmatpush.bf16.msrb.mxu1 %v4770_v48 }
 0x458   :  { %2387 = vmatpush.bf16.msrb.mxu2 %v4771_v49  ;;  %2400 = vmatpush.bf16.msrb.mxu3 %v4772_v52 }
 0x45b   :  { %2362 = vmatpush.bf16.msrb.mxu0 %v4773_v55  ;;  %2375 = vmatpush.bf16.msrb.mxu1 %v4774_v10  ;;  %v2101_v55 = vunpack.c.l.bf16 %v2824_v20 }
 0x45c   :  { %2388 = vmatpush.bf16.msrb.mxu2 %v4775_v4  ;;  %2401 = vmatpush.bf16.msrb.mxu3 %v4776_v23 }
 0x45f   :  { %2363 = vmatpush.bf16.msrb.mxu0 %v4777_v30  ;;  %2376 = vmatpush.bf16.msrb.mxu1 %v4778_v29 }
 0x460   :  { %2389 = vmatpush.bf16.msrb.mxu2 %v4779_v63  ;;  %2402 = vmatpush.bf16.msrb.mxu3 %v4780_v51  ;;  %v2102_v63 = vunpack.c.h.bf16 %v2824_v20 }
 0x463   :  { %2364 = vmatpush.bf16.msrb.mxu0 %v4781_v35  ;;  %2377 = vmatpush.bf16.msrb.mxu1 %v4782_v36 }
 0x464   :  { %2390 = vmatpush.bf16.msrb.mxu2 %v4783_v39  ;;  %2403 = vmatpush.bf16.msrb.mxu3 %v4784_v0 }
 0x467   :  { %2365 = vmatpush.bf16.msrb.mxu0 %v4785_v11  ;;  %2378 = vmatpush.bf16.msrb.mxu1 %v4786_v5 }
 0x468   :  { %2391 = vmatpush.bf16.msrb.mxu2 %v4787_v56  ;;  %2404 = vmatpush.bf16.msrb.mxu3 %v4788_v18 }
 0x46b   :  { %2366 = vmatpush.bf16.msrb.mxu0 %v4789_v44  ;;  %2379 = vmatpush.bf16.msrb.mxu1 %v4790_v27 }
 0x46c   :  { %2392 = vmatpush.bf16.msrb.mxu2 %v4791_v62  ;;  %2405 = vmatpush.bf16.msrb.mxu3 %v4792_v3  ;;  %v2825_v3 = vld [vmem:[%s4509_s1 + $0x18] sm:$0xff] }
 0x4aa   :  { %v1988_v50 = vpop.f32.mrf.mxu0  ;;  %v2001_v13 = vpop.f32.mrf.mxu1 }
 0x4ab   :  { %v2031_v24 = vadd.f32 %v1988_v50, %v1974_v21  ;;  %v2032_v12 = vadd.f32 %v2001_v13, %v1975_v8 }
 0x4ad   :  { %v2821_v17 = vmul.f32 -1.442695, %v2031_v24  ;;  %v2822_v34 = vmul.f32 -1.442695, %v2032_v12 }
 0x4af   :  { %3095 = vpow2.f32 %v2821_v17 }
 0x4b0   :  { %3097 = vpow2.f32 %v2822_v34 }
 0x4b1   :  { %v2014_v15 = vpop.f32.mrf.mxu2  ;;  %v2027_v31 = vpop.f32.mrf.mxu3 }
 0x4b2   :  { %v2034_v28 = vadd.f32 %v2027_v31, %v1977_v59  ;;  %v1990_v61 = vpop.f32.mrf.mxu0  ;;  %v2003_v32 = vpop.f32.mrf.mxu1  ;;  %v2033_v57 = vadd.f32 %v2014_v15, %v1976_v45 }
 0x4b4   :  { %v2823_v42 = vmul.f32 -1.442695, %v2034_v28 }
 0x4b5   :  { %v3096_v33 = vpop.eup %3095 }
 0x4b6   :  { %v3098_v43 = vpop.eup %3097  ;;  %v2038_v60 = vadd.f32 1.0, %v3096_v33  ;;  %3099 = vpow2.f32 %v2823_v42 }
 0x4b7   :  { %v2057_v22 = vadd.f32 1.0, %v3098_v43 }
 0x4b8   :  { %3101 = vrcp.f32 %v2038_v60  ;;  %v2050_v19 = vand.u32 2147483648, %v2038_v60  ;;  %v2048_v40 = vand.u32 2147483647, %v2038_v60  ;;  %vm2044_vm2 = vweird.f32 %v2038_v60 }
 0x4b9   :  { %3103 = vrcp.f32 %v2057_v22  ;;  %v2016_v37 = vpop.f32.mrf.mxu2  ;;  %v2029_v14 = vpop.f32.mrf.mxu3  ;;  %v2069_v25 = vand.u32 2147483648, %v2057_v22  ;;  %v2067_v48 = vand.u32 2147483647, %v2057_v22  ;;  %vm2063_vm3 = vweird.f32 %v2057_v22 }
 0x4ba   :  { %v2051_v10 = vor.u32 1.1754944e-38, %v2050_v19  ;;  %vm2049_vm6 = vcmp.eq.f32.partialorder %v2048_v40, 8.507059e+37 }
 0x4bb   :  { %v2070_v30 = vor.u32 1.1754944e-38, %v2069_v25  ;;  %vm2068_vm7 = vcmp.eq.f32.partialorder %v2067_v48, 8.507059e+37 }
 0x4bc   :  { %v3100_v46 = vpop.eup %3099 }
 0x4bd   :  { %v4458_v54 = vadd.f32 1.0, %v3100_v46  ;;  %v2103_v46 = vunpack.c.l.bf16 %v2825_v3 }
 0x4be   :  { %v3102_v53 = vpop.eup %3101 }
 0x4bf   :  { %v3104_v58 = vpop.eup %3103  ;;  %v2040_v2 = vmul.f32 %v3102_v53, %v2038_v60  ;;  %3105 = vrcp.f32 %v4458_v54  ;;  %vm2045_vm0 = vweird.f32 %v3102_v53  ;;  %v2089_v13 = vand.u32 2147483648, %v4458_v54 }
 0x4c0   :  { %v2059_v1 = vmul.f32 %v3104_v58, %v2057_v22  ;;  %3107 = vtanh.f32 %v2033_v57  ;;  %vm2064_vm1 = vweird.f32 %v3104_v58  ;;  %vm2046_vm4 = vmor %vm2044_vm2, %vm2045_vm0  ;;  %vm2083_vm9 = vweird.f32 %v4458_v54 }
 0x4c1   :  { %v2041_v6 = vsub.f32 1.0, %v2040_v2  ;;  %vm2065_vm5 = vmor %vm2063_vm3, %vm2064_vm1  ;;  %v2087_v24 = vand.u32 2147483647, %v4458_v54  ;;  %v2090_v34 = vor.u32 1.1754944e-38, %v2089_v13 }
 0x4c2   :  { %v2060_v9 = vsub.f32 1.0, %v2059_v1 }
 0x4c3   :  { %v2042_v26 = vmul.f32 %v3102_v53, %v2041_v6  ;;  %vm2088_vm11 = vcmp.eq.f32.partialorder %v2087_v24, 8.507059e+37 }
 0x4c4   :  { %v2061_v47 = vmul.f32 %v3104_v58, %v2060_v9 }
 0x4c5   :  { %v3106_v49 = vpop.eup %3105  ;;  %v2043_v52 = vadd.f32 %v3102_v53, %v2042_v26 }
 0x4c6   :  { %v2062_v4 = vadd.f32 %v3104_v58, %v2061_v47  ;;  %v2079_v23 = vmul.f32 %v3106_v49, %v4458_v54  ;;  %v3108_v51 = vpop.eup %3107  ;;  %vm2084_vm8 = vweird.f32 %v3106_v49 }
 0x4c7   :  { %v2047_v29 = vsel %vm2046_vm4, %v3102_v53, %v2043_v52  ;;  %vm2085_vm10 = vmor %vm2083_vm9, %vm2084_vm8 }
 0x4c8   :  { %v2052_v35 = vsel %vm2049_vm6, %v2051_v10, %v2047_v29  ;;  %v2066_v36 = vsel %vm2065_vm5, %v3104_v58, %v2062_v4  ;;  %v2080_v39 = vsub.f32 1.0, %v2079_v23 }
 0x4c9   :  { %v2071_v0 = vsel %vm2068_vm7, %v2070_v30, %v2066_v36  ;;  %v2094_v11 = vmul.f32 %v3108_v51, %v2052_v35 }
 0x4ca   :  { %v2093_v5 = vmul.f32 %v2071_v0, %v4371_v38  ;;  %v2081_v56 = vmul.f32 %v3106_v49, %v2080_v39  ;;  %v2115_v18 = vpop.f32.mrf.mxu0  ;;  %v2128_v44 = vpop.f32.mrf.mxu1  ;;  %v2104_v38 = vunpack.c.h.bf16 %v2825_v3 }
 0x4cb   :  { %v2158_v27 = vadd.f32 %v2115_v18, %v2101_v55  ;;  %v2159_v62 = vadd.f32 %v2128_v44, %v2102_v63 }
 0x4cc   :  { %v4469_v7 = vadd.f32 %v2094_v11, %v2093_v5  ;;  %v2082_v50 = vadd.f32 %v3106_v49, %v2081_v56 }
 0x4cd   :  { %v2826_v21 = vmul.f32 -1.442695, %v2158_v27  ;;  %v2827_v8 = vmul.f32 -1.442695, %v2159_v62 }
 0x4ce   :  { %3109 = vtanh.f32 %v4469_v7  ;;  %v2086_v17 = vsel %vm2085_vm10, %v3106_v49, %v2082_v50 }
 0x4cf   :  { %3111 = vpow2.f32 %v2826_v21  ;;  %v2091_v32 = vsel %vm2088_vm11, %v2090_v34, %v2086_v17  ;;  %v2830_v34 = vld [vmem:[%s4508_s0 + $0x78] sm:$0xff] }
 0x4d0   :  { %3113 = vpow2.f32 %v2827_v8 }
 0x4d1   :  { %v2141_v12 = vpop.f32.mrf.mxu2  ;;  %v2154_v16 = vpop.f32.mrf.mxu3 }
 0x4d2   :  { %v2161_v59 = vadd.f32 %v2154_v16, %v2104_v38  ;;  %v2117_v15 = vpop.f32.mrf.mxu0  ;;  %v2130_v31 = vpop.f32.mrf.mxu1  ;;  %v2160_v58 = vadd.f32 %v2141_v12, %v2103_v46 }
 0x4d3   :  { %v2231_v31 = vunpack.c.h.bf16 %v2830_v34 }
 0x4d4   :  { %v3110_v28 = vpop.eup %3109  ;;  %v2828_v61 = vmul.f32 -1.442695, %v2161_v59 }
 0x4d5   :  { %v3112_v42 = vpop.eup %3111  ;;  %v2097_v33 = vmul.f32 %v3110_v28, %v2091_v32 }
 0x4d6   :  { %v3114_v43 = vpop.eup %3113  ;;  %v2165_v60 = vadd.f32 1.0, %v3112_v42  ;;  %3115 = vpow2.f32 %v2828_v61 }
 0x4d7   :  { %v2184_v22 = vadd.f32 1.0, %v3114_v43  ;;  %v2232_v37 = vpack.c.bf16 %v2097_v33, %v2097_v33 }
 0x4d8   :  { %3117 = vrcp.f32 %v2165_v60  ;;  %v2177_v20 = vand.u32 2147483648, %v2165_v60  ;;  %v2175_v40 = vand.u32 2147483647, %v2165_v60  ;;  %vm2171_vm14 = vweird.f32 %v2165_v60 }
 0x4d9   :  { %3119 = vrcp.f32 %v2184_v22  ;;  %v2143_v14 = vpop.f32.mrf.mxu2  ;;  %v2156_v45 = vpop.f32.mrf.mxu3  ;;  %2241 = vmatmul.bf16.vlgmr.msra.gmra.mxu0 %v2232_v37  ;;  %2254 = vmatmul.bf16.vlgmr.msra.gmra.mxu1 %v2232_v37  ;;  %v2196_v25 = vand.u32 2147483648, %v2184_v22  ;;  %v2194_v48 = vand.u32 2147483647, %v2184_v22  ;;  %vm2190_vm15 = vweird.f32 %v2184_v22 }
 0x4da   :  { %2267 = vmatmul.bf16.vlgmr.msra.gmra.mxu2 %v2232_v37  ;;  %2280 = vmatmul.bf16.vlgmr.msra.gmra.mxu3 %v2232_v37  ;;  %v2178_v55 = vor.u32 1.1754944e-38, %v2177_v20  ;;  %vm2176_vm2 = vcmp.eq.f32.partialorder %v2175_v40, 8.507059e+37 }
 0x4db   :  { %v2197_v23 = vor.u32 1.1754944e-38, %v2196_v25  ;;  %vm2195_vm3 = vcmp.eq.f32.partialorder %v2194_v48, 8.507059e+37 }
 0x4dc   :  { %v3116_v54 = vpop.eup %3115 }
 0x4dd   :  { %v2204_v53 = vadd.f32 1.0, %v3116_v54  ;;  %v2230_v54 = vunpack.c.l.bf16 %v2830_v34 }
 0x4de   :  { %v3118_v57 = vpop.eup %3117 }
 0x4df   :  { %v3120_v2 = vpop.eup %3119  ;;  %v2167_v1 = vmul.f32 %v3118_v57, %v2165_v60  ;;  %3121 = vrcp.f32 %v2204_v53  ;;  %vm2172_vm12 = vweird.f32 %v3118_v57  ;;  %v2216_v18 = vand.u32 2147483648, %v2204_v53 }
 0x4e0   :  { %v2186_v6 = vmul.f32 %v3120_v2, %v2184_v22  ;;  %3123 = vtanh.f32 %v2160_v58  ;;  %vm2191_vm13 = vweird.f32 %v3120_v2  ;;  %vm2173_vm0 = vmor %vm2171_vm14, %vm2172_vm12  ;;  %vm2210_vm5 = vweird.f32 %v2204_v53 }
 0x4e1   :  { %v2168_v9 = vsub.f32 1.0, %v2167_v1  ;;  %vm2192_vm1 = vmor %vm2190_vm15, %vm2191_vm13  ;;  %v2214_v44 = vand.u32 2147483647, %v2204_v53  ;;  %v2217_v62 = vor.u32 1.1754944e-38, %v2216_v18 }
 0x4e2   :  { %v2187_v19 = vsub.f32 1.0, %v2186_v6 }
 0x4e3   :  { %v2169_v26 = vmul.f32 %v3118_v57, %v2168_v9  ;;  %vm2215_vm7 = vcmp.eq.f32.partialorder %v2214_v44, 8.507059e+37 }
 0x4e4   :  { %v2188_v47 = vmul.f32 %v3120_v2, %v2187_v19 }
 0x4e5   :  { %v3122_v49 = vpop.eup %3121  ;;  %v2170_v52 = vadd.f32 %v3118_v57, %v2169_v26  ;;  %v2352_v26 = vld [vmem:[%s4509_s1] sm:$0xff] }
 0x4e6   :  { %v2189_v10 = vadd.f32 %v3120_v2, %v2188_v47  ;;  %v2206_v4 = vmul.f32 %v3122_v49, %v2204_v53  ;;  %v3124_v29 = vpop.eup %3123  ;;  %vm2211_vm4 = vweird.f32 %v3122_v49 }
 0x4e7   :  { %v2174_v30 = vsel %vm2173_vm0, %v3118_v57, %v2170_v52  ;;  %vm2212_vm6 = vmor %vm2210_vm5, %vm2211_vm4 }
 0x4e8   :  { %v2179_v63 = vsel %vm2176_vm2, %v2178_v55, %v2174_v30  ;;  %v2193_v51 = vsel %vm2192_vm1, %v3120_v2, %v2189_v10  ;;  %v2207_v35 = vsub.f32 1.0, %v2206_v4  ;;  %v2354_v4 = vunpack.c.l.bf16 %v2352_v26 }
 0x4e9   :  { %v2198_v36 = vsel %vm2195_vm3, %v2197_v23, %v2193_v51  ;;  %v2221_v39 = vmul.f32 %v3124_v29, %v2179_v63 }
 0x4ea   :  { %v2220_v0 = vmul.f32 %v2198_v36, %v4400_v41  ;;  %v2208_v11 = vmul.f32 %v3122_v49, %v2207_v35  ;;  %v2829_v41 = vld [vmem:[%s4508_s0 + $0x70] sm:$0xff]  ;;  %v2355_v35 = vunpack.c.h.bf16 %v2352_v26 }
 0x4eb   :  { %v2228_v13 = vunpack.c.l.bf16 %v2829_v41  ;;  %v2229_v38 = vunpack.c.h.bf16 %v2829_v41 }
 0x4ec   :  { %v4476_v5 = vadd.f32 %v2221_v39, %v2220_v0  ;;  %v2209_v56 = vadd.f32 %v3122_v49, %v2208_v11 }
 0x4ee   :  { %3125 = vtanh.f32 %v4476_v5  ;;  %v2213_v27 = vsel %vm2212_vm6, %v3122_v49, %v2209_v56 }
 0x4ef   :  { %v2218_v21 = vsel %vm2215_vm7, %v2217_v62, %v2213_v27 }
 0x4f4   :  { %v3126_v3 = vpop.eup %3125 }
 0x4f5   :  { %v2224_v8 = vmul.f32 %v3126_v3, %v2218_v21 }
 0x4f7   :  { %v2358_v50 = vpack.c.bf16 %v2224_v8, %v2224_v8 }
 0x4f9   :  { %2367 = vmatmul.bf16.vlgmr.msrb.gmra.mxu0 %v2358_v50  ;;  %2380 = vmatmul.bf16.vlgmr.msrb.gmra.mxu1 %v2358_v50 }
 0x4fa   :  { %2393 = vmatmul.bf16.vlgmr.msrb.gmra.mxu2 %v2358_v50  ;;  %2406 = vmatmul.bf16.vlgmr.msrb.gmra.mxu3 %v2358_v50  ;;  %v2353_v50 = vld [vmem:[%s4509_s1 + $0x8] sm:$0xff] }
 0x556   :  { %v2242_v24 = vpop.f32.mrf.mxu0  ;;  %v2255_v12 = vpop.f32.mrf.mxu1 }
 0x557   :  { %v2285_v16 = vadd.f32 %v2242_v24, %v2228_v13  ;;  %v2286_v17 = vadd.f32 %v2255_v12, %v2229_v38 }
 0x559   :  { %v2831_v59 = vmul.f32 -1.442695, %v2285_v16  ;;  %v2832_v15 = vmul.f32 -1.442695, %v2286_v17  ;;  %v2357_v16 = vunpack.c.h.bf16 %v2353_v50 }
 0x55b   :  { %3127 = vpow2.f32 %v2831_v59 }
 0x55c   :  { %3129 = vpow2.f32 %v2832_v15 }
 0x55d   :  { %v2268_v28 = vpop.f32.mrf.mxu2  ;;  %v2281_v61 = vpop.f32.mrf.mxu3 }
 0x55e   :  { %v2288_v32 = vadd.f32 %v2281_v61, %v2231_v31  ;;  %v2244_v42 = vpop.f32.mrf.mxu0  ;;  %v2257_v33 = vpop.f32.mrf.mxu1  ;;  %v2287_v2 = vadd.f32 %v2268_v28, %v2230_v54 }
 0x560   :  { %v2833_v43 = vmul.f32 -1.442695, %v2288_v32 }
 0x561   :  { %v3128_v60 = vpop.eup %3127 }
 0x562   :  { %v3130_v22 = vpop.eup %3129  ;;  %v2292_v37 = vadd.f32 1.0, %v3128_v60  ;;  %3131 = vpow2.f32 %v2833_v43 }
 0x563   :  { %v2311_v14 = vadd.f32 1.0, %v3130_v22 }
 0x564   :  { %3133 = vrcp.f32 %v2292_v37  ;;  %v2304_v25 = vand.u32 2147483648, %v2292_v37  ;;  %v2302_v48 = vand.u32 2147483647, %v2292_v37  ;;  %vm2298_vm10 = vweird.f32 %v2292_v37 }
 0x565   :  { %3135 = vrcp.f32 %v2311_v14  ;;  %v2270_v45 = vpop.f32.mrf.mxu2  ;;  %v2283_v46 = vpop.f32.mrf.mxu3  ;;  %v2323_v40 = vand.u32 2147483648, %v2311_v14  ;;  %v2321_v52 = vand.u32 2147483647, %v2311_v14  ;;  %vm2317_vm11 = vweird.f32 %v2311_v14 }
 0x566   :  { %v2305_v23 = vor.u32 1.1754944e-38, %v2304_v25  ;;  %vm2303_vm14 = vcmp.eq.f32.partialorder %v2302_v48, 8.507059e+37 }
 0x567   :  { %v2324_v63 = vor.u32 1.1754944e-38, %v2323_v40  ;;  %vm2322_vm15 = vcmp.eq.f32.partialorder %v2321_v52, 8.507059e+37 }
 0x568   :  { %v3132_v53 = vpop.eup %3131 }
 0x569   :  { %v4485_v57 = vadd.f32 1.0, %v3132_v53  ;;  %v2356_v53 = vunpack.c.l.bf16 %v2353_v50 }
 0x56a   :  { %v3134_v58 = vpop.eup %3133 }
 0x56b   :  { %v3136_v1 = vpop.eup %3135  ;;  %v2294_v6 = vmul.f32 %v3134_v58, %v2292_v37  ;;  %3137 = vrcp.f32 %v4485_v57  ;;  %vm2299_vm8 = vweird.f32 %v3134_v58  ;;  %v2343_v12 = vand.u32 2147483648, %v4485_v57 }
 0x56c   :  { %v2313_v9 = vmul.f32 %v3136_v1, %v2311_v14  ;;  %3139 = vtanh.f32 %v2287_v2  ;;  %vm2318_vm9 = vweird.f32 %v3136_v1  ;;  %vm2300_vm12 = vmor %vm2298_vm10, %vm2299_vm8  ;;  %vm2337_vm1 = vweird.f32 %v4485_v57 }
 0x56d   :  { %v2295_v19 = vsub.f32 1.0, %v2294_v6  ;;  %vm2319_vm13 = vmor %vm2317_vm11, %vm2318_vm9  ;;  %v2344_v15 = vor.u32 1.1754944e-38, %v2343_v12 }
 0x56e   :  { %v2314_v20 = vsub.f32 1.0, %v2313_v9 }
 0x56f   :  { %v2296_v47 = vmul.f32 %v3134_v58, %v2295_v19 }
 0x570   :  { %v2315_v49 = vmul.f32 %v3136_v1, %v2314_v20 }
 0x571   :  { %v3138_v55 = vpop.eup %3137  ;;  %v2297_v10 = vadd.f32 %v3134_v58, %v2296_v47 }
 0x572   :  { %v2316_v30 = vadd.f32 %v3136_v1, %v2315_v49  ;;  %v2333_v29 = vmul.f32 %v3138_v55, %v4485_v57  ;;  %v3140_v36 = vpop.eup %3139  ;;  %vm2338_vm0 = vweird.f32 %v3138_v55 }
 0x573   :  { %v2301_v51 = vsel %vm2300_vm12, %v3134_v58, %v2297_v10  ;;  %vm2339_vm2 = vmor %vm2337_vm1, %vm2338_vm0 }
 0x574   :  { %v2306_v39 = vsel %vm2303_vm14, %v2305_v23, %v2301_v51  ;;  %v2320_v0 = vsel %vm2319_vm13, %v3136_v1, %v2316_v30  ;;  %v2334_v11 = vsub.f32 1.0, %v2333_v29 }
 0x575   :  { %v2325_v56 = vsel %vm2322_vm15, %v2324_v63, %v2320_v0  ;;  %v2348_v18 = vmul.f32 %v3140_v36, %v2306_v39 }
 0x576   :  { %v2347_v44 = vmul.f32 %v2325_v56, %v4469_v7  ;;  %v2335_v27 = vmul.f32 %v3138_v55, %v2334_v11  ;;  %v2368_v62 = vpop.f32.mrf.mxu0  ;;  %v2381_v3 = vpop.f32.mrf.mxu1  ;;  %v2341_v7 = vand.u32 2147483647, %v4485_v57 }
 0x577   :  { %v2411_v21 = vadd.f32 %v2368_v62, %v2354_v4  ;;  %v2412_v8 = vadd.f32 %v2381_v3, %v2355_v35 }
 0x578   :  { %v2349_v41 = vadd.f32 %v2348_v18, %v2347_v44  ;;  %v2336_v13 = vadd.f32 %v3138_v55, %v2335_v27  ;;  %vm2342_vm3 = vcmp.eq.f32.partialorder %v2341_v7, 8.507059e+37 }
 0x579   :  { %v2834_v38 = vmul.f32 -1.442695, %v2411_v21  ;;  %v2835_v24 = vmul.f32 -1.442695, %v2412_v8 }
 0x57a   :  { %3141 = vtanh.f32 %v2349_v41  ;;  %v2340_v17 = vsel %vm2339_vm2, %v3138_v55, %v2336_v13 }
 0x57b   :  { %3143 = vpow2.f32 %v2834_v38  ;;  %v2345_v42 = vsel %vm2342_vm3, %v2344_v15, %v2340_v17 }
 0x57c   :  { %3145 = vpow2.f32 %v2835_v24 }
 0x57d   :  { %v2394_v34 = vpop.f32.mrf.mxu2  ;;  %v2407_v59 = vpop.f32.mrf.mxu3 }
 0x57e   :  { %v2414_v31 = vadd.f32 %v2407_v59, %v2357_v16  ;;  %v2370_v28 = vpop.f32.mrf.mxu0  ;;  %v2383_v61 = vpop.f32.mrf.mxu1  ;;  %v2413_v1 = vadd.f32 %v2394_v34, %v2356_v53 }
 0x580   :  { %v3142_v32 = vpop.eup %3141  ;;  %v2836_v33 = vmul.f32 -1.442695, %v2414_v31 }
 0x581   :  { %v3144_v43 = vpop.eup %3143  ;;  %v2351_v60 = vmul.f32 %v3142_v32, %v2345_v42 }
 0x582   :  { %v3146_v22 = vpop.eup %3145  ;;  %v2418_v37 = vadd.f32 1.0, %v3144_v43  ;;  %3147 = vpow2.f32 %v2836_v33 }
 0x583   :  { %v2481_v14 = vpack.c.bf16 %v2351_v60, %v2351_v60  ;;  %v2437_v45 = vadd.f32 1.0, %v3146_v22 }
 0x584   :  { %3149 = vrcp.f32 %v2418_v37  ;;  %v2430_v26 = vand.u32 2147483648, %v2418_v37  ;;  %v2428_v48 = vand.u32 2147483647, %v2418_v37  ;;  %vm2424_vm6 = vweird.f32 %v2418_v37 }
 0x585   :  { %2837 = vst [vmem:[%s4510_s4 + $0x4] sm:$0xf] %v2481_v14  ;;  %3151 = vrcp.f32 %v2437_v45  ;;  %v2396_v46 = vpop.f32.mrf.mxu2  ;;  %v2409_v54 = vpop.f32.mrf.mxu3  ;;  %v2449_v40 = vand.u32 2147483648, %v2437_v45  ;;  %v2447_v52 = vand.u32 2147483647, %v2437_v45  ;;  %vm2443_vm7 = vweird.f32 %v2437_v45 }
 0x586   :  { %v2431_v4 = vor.u32 1.1754944e-38, %v2430_v26  ;;  %vm2429_vm10 = vcmp.eq.f32.partialorder %v2428_v48, 8.507059e+37 }
 0x587   :  { %v2450_v29 = vor.u32 1.1754944e-38, %v2449_v40  ;;  %vm2448_vm11 = vcmp.eq.f32.partialorder %v2447_v52, 8.507059e+37 }
 0x588   :  { %v3148_v57 = vpop.eup %3147 }
 0x589   :  { %v2457_v58 = vadd.f32 1.0, %v3148_v57 }
 0x58a   :  { %v3150_v2 = vpop.eup %3149 }
 0x58b   :  { %v3152_v6 = vpop.eup %3151  ;;  %v2420_v9 = vmul.f32 %v3150_v2, %v2418_v37  ;;  %3153 = vrcp.f32 %v2457_v58  ;;  %vm2425_vm4 = vweird.f32 %v3150_v2  ;;  %v2469_v62 = vand.u32 2147483648, %v2457_v58 }
 0x58c   :  { %v2439_v19 = vmul.f32 %v3152_v6, %v2437_v45  ;;  %3155 = vtanh.f32 %v2413_v1  ;;  %vm2444_vm5 = vweird.f32 %v3152_v6  ;;  %vm2426_vm8 = vmor %vm2424_vm6, %vm2425_vm4  ;;  %vm2463_vm13 = vweird.f32 %v2457_v58 }
 0x58d   :  { %v2421_v20 = vsub.f32 1.0, %v2420_v9  ;;  %vm2445_vm9 = vmor %vm2443_vm7, %vm2444_vm5  ;;  %v2467_v3 = vand.u32 2147483647, %v2457_v58  ;;  %v2470_v8 = vor.u32 1.1754944e-38, %v2469_v62 }
 0x58e   :  { %v2440_v25 = vsub.f32 1.0, %v2439_v19 }
 0x58f   :  { %v2422_v47 = vmul.f32 %v3150_v2, %v2421_v20  ;;  %vm2468_vm15 = vcmp.eq.f32.partialorder %v2467_v3, 8.507059e+37 }
 0x590   :  { %v2441_v49 = vmul.f32 %v3152_v6, %v2440_v25 }
 0x591   :  { %v3154_v55 = vpop.eup %3153  ;;  %v2423_v10 = vadd.f32 %v3150_v2, %v2422_v47 }
 0x592   :  { %v2442_v23 = vadd.f32 %v3152_v6, %v2441_v49  ;;  %v2459_v30 = vmul.f32 %v3154_v55, %v2457_v58  ;;  %v3156_v51 = vpop.eup %3155  ;;  %vm2464_vm12 = vweird.f32 %v3154_v55 }
 0x593   :  { %v2427_v63 = vsel %vm2426_vm8, %v3150_v2, %v2423_v10  ;;  %vm2465_vm14 = vmor %vm2463_vm13, %vm2464_vm12 }
 0x594   :  { %v2432_v35 = vsel %vm2429_vm10, %v2431_v4, %v2427_v63  ;;  %v2446_v36 = vsel %vm2445_vm9, %v3152_v6, %v2442_v23  ;;  %v2460_v39 = vsub.f32 1.0, %v2459_v30 }
 0x595   :  { %v2451_v0 = vsel %vm2448_vm11, %v2450_v29, %v2446_v36  ;;  %v2474_v11 = vmul.f32 %v3156_v51, %v2432_v35 }
 0x596   :  { %v2473_v56 = vmul.f32 %v2451_v0, %v4476_v5  ;;  %v2461_v18 = vmul.f32 %v3154_v55, %v2460_v39 }
 0x598   :  { %v2475_v44 = vadd.f32 %v2474_v11, %v2473_v56  ;;  %v2462_v27 = vadd.f32 %v3154_v55, %v2461_v18 }
 0x59a   :  { %3157 = vtanh.f32 %v2475_v44  ;;  %v2466_v21 = vsel %vm2465_vm14, %v3154_v55, %v2462_v27 }
 0x59b   :  { %v2471_v41 = vsel %vm2468_vm15, %v2470_v8, %v2466_v21 }
 0x5a0   :  { %v3158_v50 = vpop.eup %3157 }
 0x5a1   :  { %v2477_v13 = vmul.f32 %v3158_v50, %v2471_v41 }
 0x5a3   :  { %v2484_v38 = vpack.c.bf16 %v2477_v13, %v2477_v13 }
 0x5a5   :  { %2485 = vst [vmem:[%s4511_s5] sm:$0xf] %v2484_v38 }

</bundles_post_ra>
